<compile_context>
chip_gen: v7x
topology: tpu7x:2x2x1
jax: 0.10.0
libtpu: 0.0.40
codegen_flags: <defaults>
</compile_context>

<pallas_src>
import jax
import jax.numpy as jnp
from jax.experimental import pallas as pl
from jax.experimental.pallas import tpu as pltpu

# ------------------------- config (consistent with the module) ------------------------
DIM = 3           # input point dimension
C_DIM = 32        # c_dim (latent feature dim / transformer d_model)
HIDDEN = 32       # hidden_size of the decoder MLP
N_BLOCKS = 2      # n_blocks (ResnetBlockFC layers)
N_LAYERS = 2      # num_attn_layers
N_HEAD = 4        # n_attn_head
D_FF = 64         # transformer feed-forward dim (small stand-in for default 2048)
PLANE_ORDER = ("xz", "xy", "yz")   # order the PyTorch forward() visits the planes
N_PLANES = len(PLANE_ORDER)
PADDING = 0.1
LN_EPS = 1e-5

B = 2             # batch
N = 128           # query points per batch (toy)
R = 16            # plane resolution

# transformer small-param slab: columns of a (P, L, 64, 16) array
#   col: 0=bq 1=bk 2=bv 3=b_out 4=g1 5=be1 6=g2 7=be2 8=b1(D_FF rows) 9=b2
TSM_ROWS, TSM_COLS = 64, 16
# decoder small-param slab: (H, 2 + 3*N_BLOCKS) columns
#   col: 0=fc_p.bias 1=fc_out.bias(row0) then per block (fc_c.bias, fc_0.bias, fc_1.bias)
DSM_COLS = 2 + 3 * N_BLOCKS
PDIM = 8          # point coords padded to 8 rows for a clean K=8 contraction


def _choose_tm(m):
    """Largest tile in {1024,512,256,128} that divides M, preferring >= 2 grid steps."""
    for t in (1024, 512, 256, 128):
        if m % t == 0 and m // t >= 2:
            return t
    for t in (1024, 512, 256, 128):
        if m % t == 0:
            return t
    raise ValueError(f"M={m} must be divisible by 128")


# ----------------------------------- fused kernel -------------------------------------
def _layernorm_cols(x, g, b, inv_e_row):
    """LayerNorm over the feature axis (axis 0) of an (E, T) block.

    Mean/var are (1,E)@(E,T) matmuls -> reduction runs on the MXU, not the VPU/XLU.
    """
    mu = jnp.dot(inv_e_row, x, preferred_element_type=jnp.float32)          # (1, T)
    xc = x - mu
    var = jnp.dot(inv_e_row, xc * xc, preferred_element_type=jnp.float32)   # (1, T)
    return xc * jax.lax.rsqrt(var + LN_EPS) * g + b                          # g,b: (E,1)


def fused_kernel(zc_ref, p_ref,
                 wqkv_ref, wout_ref, wff1_ref, wff2_ref, tsm_ref, hblk_ref,
                 dwp_ref, dwc_ref, dww_ref, dwo_ref, dsm_ref,
                 o_ref):
    """grid = (token_tile i,) all-parallel.  Feature-major layout: blocks are (E, TM).

    Runs the 3 per-plane post-norm nn.TransformerEncoders on the length-2 sequence
    (sampled_z, sampled_c), sums sequence position 0 over planes, then runs the
    LocalDecoder MLP and writes one lane-dense (1, TM) output row.
    """
    E = C_DIM
    H = HIDDEN
    tm = zc_ref.shape[-1]
    hblk = hblk_ref[...]                                  # (E,E) head blocks / sqrt(dh)
    inv_e_row = jnp.full((1, E), 1.0 / E, dtype=jnp.float32)

    c_sum = jnp.zeros((E, tm), jnp.float32)

    # ----------------------- per-plane transformer encoders ---------------------------
    for pidx in range(N_PLANES):
        x0 = zc_ref[pidx, 0].astype(jnp.float32)          # (E, TM) sampled_z (seq pos 0)
        x1 = zc_ref[pidx, 1].astype(jnp.float32)          # (E, TM) sampled_c (seq pos 1)

        for l in range(N_LAYERS):
            wq = wqkv_ref[pidx, l, 0]                     # (E, E) native (out, in)
            wk = wqkv_ref[pidx, l, 1]
            wv = wqkv_ref[pidx, l, 2]
            wo = wout_ref[pidx, l]                        # (E, E)
            w1 = wff1_ref[pidx, l]                        # (D_FF, E)
            w2 = wff2_ref[pidx, l]                        # (E, D_FF)
            sm = tsm_ref[pidx, l]                         # (64, 16) packed small params
            bq, bk, bv = sm[0:E, 0:1], sm[0:E, 1:2], sm[0:E, 2:3]
            b_out = sm[0:E, 3:4]
            g1, be1 = sm[0:E, 4:5], sm[0:E, 5:6]
            g2, be2 = sm[0:E, 6:7], sm[0:E, 7:8]
            b1 = sm[0:D_FF, 8:9]
            b2 = sm[0:E, 9:10]
            last = (l == N_LAYERS - 1)

            q0 = jnp.dot(wq, x0, preferred_element_type=jnp.float32) + bq
            k0 = jnp.dot(wk, x0, preferred_element_type=jnp.float32) + bk
            v0 = jnp.dot(wv, x0, preferred_element_type=jnp.float32) + bv
            k1 = jnp.dot(wk, x1, preferred_element_type=jnp.float32) + bk
            v1 = jnp.dot(wv, x1, preferred_element_type=jnp.float32) + bv

            # Per-head scaled dot products.  Seq len is 2, so attention is elementwise
            # across tokens; hblk @ (q*k) sums within each head and broadcasts the
            # (pre-scaled) score back onto every row of that head.
            s00 = jnp.dot(hblk, q0 * k0, preferred_element_type=jnp.float32)
            s01 = jnp.dot(hblk, q0 * k1, preferred_element_type=jnp.float32)
            m0 = jnp.maximum(s00, s01)
            e00 = jnp.exp(s00 - m0)
            e01 = jnp.exp(s01 - m0)
            inv0 = pl.reciprocal(e00 + e01, approx=True)
            attn0 = (e00 * inv0) * v0 + (e01 * inv0) * v1
            y0 = jnp.dot(wo, attn0, preferred_element_type=jnp.float32) + b_out
            x0 = _layernorm_cols(x0 + y0, g1, be1, inv_e_row)          # post-norm 1
            h0 = jnp.maximum(jnp.dot(w1, x0, preferred_element_type=jnp.float32) + b1, 0.0)
            f0 = jnp.dot(w2, h0, preferred_element_type=jnp.float32) + b2
            x0 = _layernorm_cols(x0 + f0, g2, be2, inv_e_row)          # post-norm 2

            if not last:
                # Sequence position 1 is only needed as k/v input for the next layer;
                # skip its query/out-proj/LN/FFN entirely in the last layer.
                q1 = jnp.dot(wq, x1, preferred_element_type=jnp.float32) + bq
                s10 = jnp.dot(hblk, q1 * k0, preferred_element_type=jnp.float32)
                s11 = jnp.dot(hblk, q1 * k1, preferred_element_type=jnp.float32)
                m1 = jnp.maximum(s10, s11)
                e10 = jnp.exp(s10 - m1)
                e11 = jnp.exp(s11 - m1)
                inv1 = pl.reciprocal(e10 + e11, approx=True)
                attn1 = (e10 * inv1) * v0 + (e11 * inv1) * v1
                y1 = jnp.dot(wo, attn1, preferred_element_type=jnp.float32) + b_out
                x1 = _layernorm_cols(x1 + y1, g1, be1, inv_e_row)
                h1 = jnp.maximum(jnp.dot(w1, x1, preferred_element_type=jnp.float32) + b1, 0.0)
                f1 = jnp.dot(w2, h1, preferred_element_type=jnp.float32) + b2
                x1 = _layernorm_cols(x1 + f1, g2, be2, inv_e_row)

        # forward() keeps only sequence position 0 and sums over planes.
        c_sum = c_sum + x0

    # ------------------------------------ decoder --------------------------------------
    pT = p_ref[...]                                        # (8, TM), rows 3..7 are zero
    dsm = dsm_ref[...]                                     # (H, DSM_COLS)
    bp = dsm[:, 0:1]
    net = jnp.dot(dwp_ref[...], pT, preferred_element_type=jnp.float32) + bp   # fc_p

    for i in range(N_BLOCKS):
        bc = dsm[:, 2 + 3 * i:3 + 3 * i]
        b0 = dsm[:, 3 + 3 * i:4 + 3 * i]
        b1b = dsm[:, 4 + 3 * i:5 + 3 * i]
        # net = net + fc_c[i](c)
        net = net + jnp.dot(dwc_ref[i], c_sum, preferred_element_type=jnp.float32) + bc
        # ResnetBlockFC: x + fc_1(relu(fc_0(relu(x))))   (size_in == size_out)
        hh = jnp.dot(dww_ref[i, 0], jnp.maximum(net, 0.0),
                     preferred_element_type=jnp.float32) + b0
        dx = jnp.dot(dww_ref[i, 1], jnp.maximum(hh, 0.0),
                     preferred_element_type=jnp.float32) + b1b
        net = net + dx

    # fc_out (hidden -> 1), already lane-dense: (1,H) @ (H,TM) -> (1,TM), no transpose.
    bo = dsm[0:1, 1:2]
    out_row = jnp.dot(dwo_ref[...], jnp.maximum(net, 0.0),
                      preferred_element_type=jnp.float32) + bo
    o_ref[...] = out_row.astype(o_ref.dtype)


# ---------------------------------- pallas wrapper -------------------------------------
def run_fused(zc_all, pT, params):
    """zc_all: (P, 2, E, M) bf16 plane-sampled features; pT: (PDIM, M) f32."""
    P, _, E, M = zc_all.shape
    tm = _choose_tm(M)
    grid = (M // tm,)

    zc_spec = pl.BlockSpec((P, 2, E, tm), lambda i: (0, 0, 0, i))
    p_spec = pl.BlockSpec((PDIM, tm), lambda i: (0, i))
    out_spec = pl.BlockSpec((None, 1, tm), lambda i: (i, 0, 0))

    def full(arr):
        # Whole array, constant block index -> DMA'd once, VMEM-resident for all steps.
        return pl.BlockSpec(arr.shape, lambda i, nd=arr.ndim: (0,) * nd)

    w_names = ("w_qkv", "w_out", "w_ff1", "w_ff2", "tsm", "hblk",
               "d_wp", "d_wc", "d_ww", "d_wo", "dsm")
    w_arrays = [params[k] for k in w_names]
    in_specs = [zc_spec, p_spec] + [full(a) for a in w_arrays]

    return pl.pallas_call(
        fused_kernel,
        out_shape=jax.ShapeDtypeStruct((M // tm, 1, tm), jnp.float32),
        grid_spec=pltpu.PrefetchScalarGridSpec(
            num_scalar_prefetch=0,
            grid=grid,
            in_specs=in_specs,
            out_specs=out_spec),
        compiler_params=pltpu.CompilerParams(
            dimension_semantics=("parallel",)),
    )(zc_all, pT, *w_arrays)


# ------------------------------ JAX glue (plane sampling) ------------------------------
def sample_plane_feature(p, c_nchw, plane, padding=PADDING):
    """normalize_coordinate + F.grid_sample(bilinear, border, align_corners=True).

    p: (B, N, 3); c_nchw: (B, C, R, R).  Returns feature-last (B, N, C).
    """
    if plane == "xz":
        xy = jnp.stack([p[..., 0], p[..., 2]], axis=-1)
    elif plane == "xy":
        xy = jnp.stack([p[..., 0], p[..., 1]], axis=-1)
    else:  # 'yz'
        xy = jnp.stack([p[..., 1], p[..., 2]], axis=-1)
    xy = xy / (1 + padding + 10e-6) + 0.5
    xy = jnp.clip(xy, 0.0, 1 - 10e-6)

    _, _, H, W = c_nchw.shape
    # vgrid = 2*xy - 1; align_corners=True => pixel = (v+1)/2*(size-1) = xy*(size-1)
    ix = jnp.clip(xy[..., 0] * (W - 1), 0.0, W - 1)       # grid x -> width axis
    iy = jnp.clip(xy[..., 1] * (H - 1), 0.0, H - 1)       # grid y -> height axis
    ix0 = jnp.floor(ix)
    iy0 = jnp.floor(iy)
    wx = ix - ix0
    wy = iy - iy0
    ix0i = jnp.clip(ix0, 0, W - 1).astype(jnp.int32)
    ix1i = jnp.clip(ix0 + 1, 0, W - 1).astype(jnp.int32)
    iy0i = jnp.clip(iy0, 0, H - 1).astype(jnp.int32)
    iy1i = jnp.clip(iy0 + 1, 0, H - 1).astype(jnp.int32)

    c_nhwc = jnp.transpose(c_nchw, (0, 2, 3, 1))          # (B, H, W, C) feature-last
    gather = jax.vmap(lambda cb, iyb, ixb: cb[iyb, ixb, :])   # (N, C) per batch
    c00 = gather(c_nhwc, iy0i, ix0i)
    c01 = gather(c_nhwc, iy0i, ix1i)
    c10 = gather(c_nhwc, iy1i, ix0i)
    c11 = gather(c_nhwc, iy1i, ix1i)
    w00 = ((1 - wy) * (1 - wx))[..., None]
    w01 = ((1 - wy) * wx)[..., None]
    w10 = (wy * (1 - wx))[..., None]
    w11 = (wy * wx)[..., None]
    return c00 * w00 + c01 * w01 + c10 * w10 + c11 * w11  # (B, N, C)


def local_decoder_multi_attn(p, c_plane, params):
    Bq, Nq, _ = p.shape
    M = Bq * Nq
    zc_list = []
    for plane in PLANE_ORDER:                              # fixed order == weight stacking
        z = sample_plane_feature(p, c_plane[plane], plane).reshape(M, C_DIM).T       # (E,M)
        cc = sample_plane_feature(p, c_plane[plane + "_c"], plane).reshape(M, C_DIM).T
        zc_list.append(jnp.stack([z, cc], axis=0))         # (2, E, M)
    # Feature-major, bf16 HBM stream (the dominant token traffic).
    zc_all = jnp.stack(zc_list, axis=0).astype(jnp.bfloat16)    # (P, 2, E, M)
    pT = jnp.zeros((PDIM, M), jnp.float32).at[0:DIM, :].set(
        jnp.reshape(p, (M, DIM)).astype(jnp.float32).T)          # (8, M), K padded
    out = run_fused(zc_all, pT, params)                    # (M//TM, 1, TM) lane-dense
    return jnp.reshape(out, (Bq, Nq))                      # token order == (b, n)


# ----------------------------------- parameter init ------------------------------------
def init_params(key):
    """Synthetic params, generated directly in the packed / native (out,in) layout."""
    keys = iter(jax.random.split(key, 64))

    def nrm(shape, scale=0.1):
        return (scale * jax.random.normal(next(keys), shape)).astype(jnp.float32)

    P, L, E, H = N_PLANES, N_LAYERS, C_DIM, HIDDEN

    # Transformer weights, native PyTorch (out, in) layout (kernel computes W @ x).
    w_qkv = nrm((P, L, 3, E, E))          # in_proj_weight split into [Wq, Wk, Wv]
    w_out = nrm((P, L, E, E))             # out_proj.weight
    w_ff1 = nrm((P, L, D_FF, E))          # linear1.weight
    w_ff2 = nrm((P, L, E, D_FF))          # linear2.weight

    # Packed small transformer params as columns: (P, L, 64, 16).
    tsm = jnp.zeros((P, L, TSM_ROWS, TSM_COLS), jnp.float32)
    tsm = tsm.at[:, :, 0:E, 0].set(nrm((P, L, E), 0.01))      # q bias
    tsm = tsm.at[:, :, 0:E, 1].set(nrm((P, L, E), 0.01))      # k bias
    tsm = tsm.at[:, :, 0:E, 2].set(nrm((P, L, E), 0.01))      # v bias
    tsm = tsm.at[:, :, 0:E, 3].set(nrm((P, L, E), 0.01))      # out_proj.bias
    tsm = tsm.at[:, :, 0:E, 4].set(1.0)                       # norm1.weight
    tsm = tsm.at[:, :, 0:E, 6].set(1.0)                       # norm2.weight
    tsm = tsm.at[:, :, 0:D_FF, 8].set(nrm((P, L, D_FF), 0.01))  # linear1.bias
    tsm = tsm.at[:, :, 0:E, 9].set(nrm((P, L, E), 0.01))        # linear2.bias
    # (norm1.bias col 5 / norm2.bias col 7 stay zero, matching nn.LayerNorm init.)

    # Head-block matrix with the 1/sqrt(dh) scale pre-folded in (symmetric).
    dh = E // N_HEAD
    head_id = jnp.arange(E) // dh
    hblk = (head_id[:, None] == head_id[None, :]).astype(jnp.float32) / (dh ** 0.5)

    # Decoder weights, native layout; fc_p contraction padded to K=8.
    d_wp = jnp.zeros((H, PDIM), jnp.float32).at[:, 0:DIM].set(nrm((H, DIM)))  # fc_p.weight
    d_wc = nrm((N_BLOCKS, H, E))                  # fc_c[i].weight
    # NOTE: original ResnetBlockFC zero-inits fc_1; small random values here so the
    # synthetic test exercises the full path.
    d_ww = nrm((N_BLOCKS, 2, H, H))               # [blocks[i].fc_0.weight, fc_1.weight]
    d_wo = nrm((1, H))                            # fc_out.weight

    # Packed small decoder params as columns: (H, 2 + 3*N_BLOCKS).
    dsm = jnp.zeros((H, DSM_COLS), jnp.float32)
    dsm = dsm.at[:, 0].set(nrm((H,), 0.01))               # fc_p.bias
    dsm = dsm.at[0, 1].set(nrm((1,), 0.01)[0])            # fc_out.bias (scalar, row 0)
    for i in range(N_BLOCKS):
        dsm = dsm.at[:, 2 + 3 * i].set(nrm((H,), 0.01))   # fc_c[i].bias
        dsm = dsm.at[:, 3 + 3 * i].set(nrm((H,), 0.01))   # blocks[i].fc_0.bias
        dsm = dsm.at[:, 4 + 3 * i].set(nrm((H,), 0.01))   # blocks[i].fc_1.bias

    return dict(w_qkv=w_qkv, w_out=w_out, w_ff1=w_ff1, w_ff2=w_ff2, tsm=tsm,
                hblk=hblk, d_wp=d_wp, d_wc=d_wc, d_ww=d_ww, d_wo=d_wo, dsm=dsm)


# ---------------------------------------- main ------------------------------------------
if __name__ == "__main__":
    key = jax.random.PRNGKey(0)
    kp, kc, kw = jax.random.split(key, 3)

    p = jax.random.uniform(kp, (B, N, DIM), minval=-0.5, maxval=0.5, dtype=jnp.float32)
    plane_keys = jax.random.split(kc, 2 * N_PLANES)
    c_plane = {}
    for i, plane in enumerate(PLANE_ORDER):
        c_plane[plane] = jax.random.normal(plane_keys[2 * i], (B, C_DIM, R, R),
                                           jnp.float32)
        c_plane[plane + "_c"] = jax.random.normal(plane_keys[2 * i + 1],
                                                  (B, C_DIM, R, R), jnp.float32)

    params = init_params(kw)

    out = local_decoder_multi_attn(p, c_plane, params)
    out = jax.block_until_ready(out)
    assert out.shape == (B, N), out.shape
    assert bool(jnp.all(jnp.isfinite(out)))
    print("KERNEL_OK")
</pallas_src>

<mosaic_0001>
module attributes {stable_mosaic.version = 11 : i64} {
  func.func @fused_kernel(%arg0: i32, %arg1: memref<3x2x32x128xbf16, #tpu.memory_space<vmem>>, %arg2: memref<8x128xf32, #tpu.memory_space<vmem>>, %arg3: memref<3x2x3x32x32xf32, #tpu.memory_space<vmem>>, %arg4: memref<3x2x32x32xf32, #tpu.memory_space<vmem>>, %arg5: memref<3x2x64x32xf32, #tpu.memory_space<vmem>>, %arg6: memref<3x2x32x64xf32, #tpu.memory_space<vmem>>, %arg7: memref<3x2x64x16xf32, #tpu.memory_space<vmem>>, %arg8: memref<32x32xf32, #tpu.memory_space<vmem>>, %arg9: memref<32x8xf32, #tpu.memory_space<vmem>>, %arg10: memref<2x32x32xf32, #tpu.memory_space<vmem>>, %arg11: memref<2x2x32x32xf32, #tpu.memory_space<vmem>>, %arg12: memref<1x32xf32, #tpu.memory_space<vmem>>, %arg13: memref<32x8xf32, #tpu.memory_space<vmem>>, %arg14: memref<1x1x128xf32, #tpu.memory_space<vmem>>) attributes {dimension_semantics = [#tpu.dimension_semantics<parallel>], iteration_bounds = array<i64: 2>, scalar_prefetch = 0 : i64, scratch_operands = 0 : i64, tpu.core_type = #tpu.core_type<tc>, window_params = [{transform_indices = @transform_0, window_bounds = array<i64: 3, 2, 32, 128>}, {transform_indices = @transform_1, window_bounds = array<i64: 8, 128>}, {pipeline_mode = #tpu.pipeline_mode<synchronous>, transform_indices = @transform_2, window_bounds = array<i64: 3, 2, 3, 32, 32>}, {pipeline_mode = #tpu.pipeline_mode<synchronous>, transform_indices = @transform_3, window_bounds = array<i64: 3, 2, 32, 32>}, {pipeline_mode = #tpu.pipeline_mode<synchronous>, transform_indices = @transform_4, window_bounds = array<i64: 3, 2, 64, 32>}, {pipeline_mode = #tpu.pipeline_mode<synchronous>, transform_indices = @transform_5, window_bounds = array<i64: 3, 2, 32, 64>}, {pipeline_mode = #tpu.pipeline_mode<synchronous>, transform_indices = @transform_6, window_bounds = array<i64: 3, 2, 64, 16>}, {pipeline_mode = #tpu.pipeline_mode<synchronous>, transform_indices = @transform_7, window_bounds = array<i64: 32, 32>}, {pipeline_mode = #tpu.pipeline_mode<synchronous>, transform_indices = @transform_8, window_bounds = array<i64: 32, 8>}, {pipeline_mode = #tpu.pipeline_mode<synchronous>, transform_indices = @transform_9, window_bounds = array<i64: 2, 32, 32>}, {pipeline_mode = #tpu.pipeline_mode<synchronous>, transform_indices = @transform_10, window_bounds = array<i64: 2, 2, 32, 32>}, {pipeline_mode = #tpu.pipeline_mode<synchronous>, transform_indices = @transform_11, window_bounds = array<i64: 1, 32>}, {pipeline_mode = #tpu.pipeline_mode<synchronous>, transform_indices = @transform_12, window_bounds = array<i64: 32, 8>}, {transform_indices = @transform_13, window_bounds = array<i64: 1, 1, 128>}]} {
    %c0 = arith.constant 0 : index
    %c0_0 = arith.constant 0 : index
    %0 = vector.load %arg8[%c0, %c0_0] : memref<32x32xf32, #tpu.memory_space<vmem>>, vector<32x32xf32>
    %cst = arith.constant 3.125000e-02 : f32
    %1 = vector.broadcast %cst : f32 to vector<1x32xf32>
    %cst_1 = arith.constant 0.000000e+00 : f32
    %2 = vector.broadcast %cst_1 : f32 to vector<32x128xf32>
    %c0_2 = arith.constant 0 : index
    %c0_3 = arith.constant 0 : index
    %c0_4 = arith.constant 0 : index
    %c0_5 = arith.constant 0 : index
    %3 = vector.load %arg1[%c0_2, %c0_3, %c0_4, %c0_5] : memref<3x2x32x128xbf16, #tpu.memory_space<vmem>>, vector<1x1x32x128xbf16>
    %4 = vector.shape_cast %3 : vector<1x1x32x128xbf16> to vector<32x128xbf16>
    %5 = arith.extf %4 : vector<32x128xbf16> to vector<32x128xf32>
    %c0_6 = arith.constant 0 : index
    %c1 = arith.constant 1 : index
    %c0_7 = arith.constant 0 : index
    %c0_8 = arith.constant 0 : index
    %6 = vector.load %arg1[%c0_6, %c1, %c0_7, %c0_8] : memref<3x2x32x128xbf16, #tpu.memory_space<vmem>>, vector<1x1x32x128xbf16>
    %7 = vector.shape_cast %6 : vector<1x1x32x128xbf16> to vector<32x128xbf16>
    %8 = arith.extf %7 : vector<32x128xbf16> to vector<32x128xf32>
    %c0_9 = arith.constant 0 : index
    %c0_10 = arith.constant 0 : index
    %c0_11 = arith.constant 0 : index
    %c0_12 = arith.constant 0 : index
    %c0_13 = arith.constant 0 : index
    %9 = vector.load %arg3[%c0_9, %c0_10, %c0_11, %c0_12, %c0_13] : memref<3x2x3x32x32xf32, #tpu.memory_space<vmem>>, vector<1x1x1x32x32xf32>
    %10 = vector.shape_cast %9 : vector<1x1x1x32x32xf32> to vector<32x32xf32>
    %c0_14 = arith.constant 0 : index
    %c0_15 = arith.constant 0 : index
    %c1_16 = arith.constant 1 : index
    %c0_17 = arith.constant 0 : index
    %c0_18 = arith.constant 0 : index
    %11 = vector.load %arg3[%c0_14, %c0_15, %c1_16, %c0_17, %c0_18] : memref<3x2x3x32x32xf32, #tpu.memory_space<vmem>>, vector<1x1x1x32x32xf32>
    %12 = vector.shape_cast %11 : vector<1x1x1x32x32xf32> to vector<32x32xf32>
    %c0_19 = arith.constant 0 : index
    %c0_20 = arith.constant 0 : index
    %c2 = arith.constant 2 : index
    %c0_21 = arith.constant 0 : index
    %c0_22 = arith.constant 0 : index
    %13 = vector.load %arg3[%c0_19, %c0_20, %c2, %c0_21, %c0_22] : memref<3x2x3x32x32xf32, #tpu.memory_space<vmem>>, vector<1x1x1x32x32xf32>
    %14 = vector.shape_cast %13 : vector<1x1x1x32x32xf32> to vector<32x32xf32>
    %c0_23 = arith.constant 0 : index
    %c0_24 = arith.constant 0 : index
    %c0_25 = arith.constant 0 : index
    %c0_26 = arith.constant 0 : index
    %15 = vector.load %arg4[%c0_23, %c0_24, %c0_25, %c0_26] : memref<3x2x32x32xf32, #tpu.memory_space<vmem>>, vector<1x1x32x32xf32>
    %16 = vector.shape_cast %15 : vector<1x1x32x32xf32> to vector<32x32xf32>
    %c0_27 = arith.constant 0 : index
    %c0_28 = arith.constant 0 : index
    %c0_29 = arith.constant 0 : index
    %c0_30 = arith.constant 0 : index
    %17 = vector.load %arg5[%c0_27, %c0_28, %c0_29, %c0_30] : memref<3x2x64x32xf32, #tpu.memory_space<vmem>>, vector<1x1x64x32xf32>
    %18 = vector.shape_cast %17 : vector<1x1x64x32xf32> to vector<64x32xf32>
    %c0_31 = arith.constant 0 : index
    %c0_32 = arith.constant 0 : index
    %c0_33 = arith.constant 0 : index
    %c0_34 = arith.constant 0 : index
    %19 = vector.load %arg6[%c0_31, %c0_32, %c0_33, %c0_34] : memref<3x2x32x64xf32, #tpu.memory_space<vmem>>, vector<1x1x32x64xf32>
    %20 = vector.shape_cast %19 : vector<1x1x32x64xf32> to vector<32x64xf32>
    %c0_35 = arith.constant 0 : index
    %c0_36 = arith.constant 0 : index
    %c0_37 = arith.constant 0 : index
    %c0_38 = arith.constant 0 : index
    %21 = vector.load %arg7[%c0_35, %c0_36, %c0_37, %c0_38] : memref<3x2x64x16xf32, #tpu.memory_space<vmem>>, vector<1x1x64x16xf32>
    %22 = vector.shape_cast %21 : vector<1x1x64x16xf32> to vector<64x16xf32>
    %23 = vector.extract_strided_slice %22 {offsets = [0, 0], sizes = [32, 1], strides = [1, 1]} : vector<64x16xf32> to vector<32x1xf32>
    %24 = vector.extract_strided_slice %22 {offsets = [0, 1], sizes = [32, 1], strides = [1, 1]} : vector<64x16xf32> to vector<32x1xf32>
    %25 = vector.extract_strided_slice %22 {offsets = [0, 2], sizes = [32, 1], strides = [1, 1]} : vector<64x16xf32> to vector<32x1xf32>
    %26 = vector.extract_strided_slice %22 {offsets = [0, 3], sizes = [32, 1], strides = [1, 1]} : vector<64x16xf32> to vector<32x1xf32>
    %27 = vector.extract_strided_slice %22 {offsets = [0, 4], sizes = [32, 1], strides = [1, 1]} : vector<64x16xf32> to vector<32x1xf32>
    %28 = vector.extract_strided_slice %22 {offsets = [0, 5], sizes = [32, 1], strides = [1, 1]} : vector<64x16xf32> to vector<32x1xf32>
    %29 = vector.extract_strided_slice %22 {offsets = [0, 6], sizes = [32, 1], strides = [1, 1]} : vector<64x16xf32> to vector<32x1xf32>
    %30 = vector.extract_strided_slice %22 {offsets = [0, 7], sizes = [32, 1], strides = [1, 1]} : vector<64x16xf32> to vector<32x1xf32>
    %31 = vector.extract_strided_slice %22 {offsets = [0, 8], sizes = [64, 1], strides = [1, 1]} : vector<64x16xf32> to vector<64x1xf32>
    %32 = vector.extract_strided_slice %22 {offsets = [0, 9], sizes = [32, 1], strides = [1, 1]} : vector<64x16xf32> to vector<32x1xf32>
    %cst_39 = arith.constant dense<0.000000e+00> : vector<32x128xf32>
    %33 = tpu.matmul %10, %5, %cst_39 {dimension_numbers = #tpu.dot_dimension_numbers<[1], [0], [0], [1], [0, 0, 1, 1], [], []>} : vector<32x32xf32>, vector<32x128xf32>, vector<32x128xf32> -> vector<32x128xf32>
    %34 = vector.broadcast %23 : vector<32x1xf32> to vector<32x128xf32>
    %35 = arith.addf %33, %34 : vector<32x128xf32>
    %cst_40 = arith.constant dense<0.000000e+00> : vector<32x128xf32>
    %36 = tpu.matmul %12, %5, %cst_40 {dimension_numbers = #tpu.dot_dimension_numbers<[1], [0], [0], [1], [0, 0, 1, 1], [], []>} : vector<32x32xf32>, vector<32x128xf32>, vector<32x128xf32> -> vector<32x128xf32>
    %37 = vector.broadcast %24 : vector<32x1xf32> to vector<32x128xf32>
    %38 = arith.addf %36, %37 : vector<32x128xf32>
    %cst_41 = arith.constant dense<0.000000e+00> : vector<32x128xf32>
    %39 = tpu.matmul %14, %5, %cst_41 {dimension_numbers = #tpu.dot_dimension_numbers<[1], [0], [0], [1], [0, 0, 1, 1], [], []>} : vector<32x32xf32>, vector<32x128xf32>, vector<32x128xf32> -> vector<32x128xf32>
    %40 = vector.broadcast %25 : vector<32x1xf32> to vector<32x128xf32>
    %41 = arith.addf %39, %40 : vector<32x128xf32>
    %cst_42 = arith.constant dense<0.000000e+00> : vector<32x128xf32>
    %42 = tpu.matmul %12, %8, %cst_42 {dimension_numbers = #tpu.dot_dimension_numbers<[1], [0], [0], [1], [0, 0, 1, 1], [], []>} : vector<32x32xf32>, vector<32x128xf32>, vector<32x128xf32> -> vector<32x128xf32>
    %43 = vector.broadcast %24 : vector<32x1xf32> to vector<32x128xf32>
    %44 = arith.addf %42, %43 : vector<32x128xf32>
    %cst_43 = arith.constant dense<0.000000e+00> : vector<32x128xf32>
    %45 = tpu.matmul %14, %8, %cst_43 {dimension_numbers = #tpu.dot_dimension_numbers<[1], [0], [0], [1], [0, 0, 1, 1], [], []>} : vector<32x32xf32>, vector<32x128xf32>, vector<32x128xf32> -> vector<32x128xf32>
    %46 = vector.broadcast %25 : vector<32x1xf32> to vector<32x128xf32>
    %47 = arith.addf %45, %46 : vector<32x128xf32>
    %48 = arith.mulf %35, %38 : vector<32x128xf32>
    %cst_44 = arith.constant dense<0.000000e+00> : vector<32x128xf32>
    %49 = tpu.matmul %0, %48, %cst_44 {dimension_numbers = #tpu.dot_dimension_numbers<[1], [0], [0], [1], [0, 0, 1, 1], [], []>} : vector<32x32xf32>, vector<32x128xf32>, vector<32x128xf32> -> vector<32x128xf32>
    %50 = arith.mulf %35, %44 : vector<32x128xf32>
    %cst_45 = arith.constant dense<0.000000e+00> : vector<32x128xf32>
    %51 = tpu.matmul %0, %50, %cst_45 {dimension_numbers = #tpu.dot_dimension_numbers<[1], [0], [0], [1], [0, 0, 1, 1], [], []>} : vector<32x32xf32>, vector<32x128xf32>, vector<32x128xf32> -> vector<32x128xf32>
    %52 = arith.maximumf %49, %51 : vector<32x128xf32>
    %53 = arith.subf %49, %52 : vector<32x128xf32>
    %54 = math.exp %53 : vector<32x128xf32>
    %55 = arith.subf %51, %52 : vector<32x128xf32>
    %56 = math.exp %55 : vector<32x128xf32>
    %57 = arith.addf %54, %56 : vector<32x128xf32>
    %58 = tpu.reciprocal %57 {approx = true} : vector<32x128xf32> -> vector<32x128xf32>
    %59 = arith.mulf %54, %58 : vector<32x128xf32>
    %60 = arith.mulf %59, %41 : vector<32x128xf32>
    %61 = arith.mulf %56, %58 : vector<32x128xf32>
    %62 = arith.mulf %61, %47 : vector<32x128xf32>
    %63 = arith.addf %60, %62 : vector<32x128xf32>
    %cst_46 = arith.constant dense<0.000000e+00> : vector<32x128xf32>
    %64 = tpu.matmul %16, %63, %cst_46 {dimension_numbers = #tpu.dot_dimension_numbers<[1], [0], [0], [1], [0, 0, 1, 1], [], []>} : vector<32x32xf32>, vector<32x128xf32>, vector<32x128xf32> -> vector<32x128xf32>
    %65 = vector.broadcast %26 : vector<32x1xf32> to vector<32x128xf32>
    %66 = arith.addf %64, %65 : vector<32x128xf32>
    %67 = arith.addf %5, %66 : vector<32x128xf32>
    %cst_47 = arith.constant dense<0.000000e+00> : vector<1x128xf32>
    %68 = tpu.matmul %1, %67, %cst_47 {dimension_numbers = #tpu.dot_dimension_numbers<[1], [0], [0], [1], [0, 0, 1, 1], [], []>} : vector<1x32xf32>, vector<32x128xf32>, vector<1x128xf32> -> vector<1x128xf32>
    %69 = vector.broadcast %68 : vector<1x128xf32> to vector<32x128xf32>
    %70 = arith.subf %67, %69 : vector<32x128xf32>
    %71 = arith.mulf %70, %70 : vector<32x128xf32>
    %cst_48 = arith.constant dense<0.000000e+00> : vector<1x128xf32>
    %72 = tpu.matmul %1, %71, %cst_48 {dimension_numbers = #tpu.dot_dimension_numbers<[1], [0], [0], [1], [0, 0, 1, 1], [], []>} : vector<1x32xf32>, vector<32x128xf32>, vector<1x128xf32> -> vector<1x128xf32>
    %cst_49 = arith.constant 9.99999974E-6 : f32
    %73 = vector.broadcast %cst_49 : f32 to vector<1x128xf32>
    %74 = arith.addf %72, %73 : vector<1x128xf32>
    %75 = math.rsqrt %74 : vector<1x128xf32>
    %76 = vector.broadcast %75 : vector<1x128xf32> to vector<32x128xf32>
    %77 = arith.mulf %70, %76 : vector<32x128xf32>
    %78 = vector.broadcast %27 : vector<32x1xf32> to vector<32x128xf32>
    %79 = arith.mulf %77, %78 : vector<32x128xf32>
    %80 = vector.broadcast %28 : vector<32x1xf32> to vector<32x128xf32>
    %81 = arith.addf %79, %80 : vector<32x128xf32>
    %cst_50 = arith.constant dense<0.000000e+00> : vector<64x128xf32>
    %82 = tpu.matmul %18, %81, %cst_50 {dimension_numbers = #tpu.dot_dimension_numbers<[1], [0], [0], [1], [0, 0, 1, 1], [], []>} : vector<64x32xf32>, vector<32x128xf32>, vector<64x128xf32> -> vector<64x128xf32>
    %83 = vector.broadcast %31 : vector<64x1xf32> to vector<64x128xf32>
    %84 = arith.addf %82, %83 : vector<64x128xf32>
    %cst_51 = arith.constant 0.000000e+00 : f32
    %85 = vector.broadcast %cst_51 : f32 to vector<64x128xf32>
    %86 = arith.maximumf %84, %85 : vector<64x128xf32>
    %cst_52 = arith.constant dense<0.000000e+00> : vector<32x128xf32>
    %87 = tpu.matmul %20, %86, %cst_52 {dimension_numbers = #tpu.dot_dimension_numbers<[1], [0], [0], [1], [0, 0, 1, 1], [], []>} : vector<32x64xf32>, vector<64x128xf32>, vector<32x128xf32> -> vector<32x128xf32>
    %88 = vector.broadcast %32 : vector<32x1xf32> to vector<32x128xf32>
    %89 = arith.addf %87, %88 : vector<32x128xf32>
    %90 = arith.addf %81, %89 : vector<32x128xf32>
    %cst_53 = arith.constant dense<0.000000e+00> : vector<1x128xf32>
    %91 = tpu.matmul %1, %90, %cst_53 {dimension_numbers = #tpu.dot_dimension_numbers<[1], [0], [0], [1], [0, 0, 1, 1], [], []>} : vector<1x32xf32>, vector<32x128xf32>, vector<1x128xf32> -> vector<1x128xf32>
    %92 = vector.broadcast %91 : vector<1x128xf32> to vector<32x128xf32>
    %93 = arith.subf %90, %92 : vector<32x128xf32>
    %94 = arith.mulf %93, %93 : vector<32x128xf32>
    %cst_54 = arith.constant dense<0.000000e+00> : vector<1x128xf32>
    %95 = tpu.matmul %1, %94, %cst_54 {dimension_numbers = #tpu.dot_dimension_numbers<[1], [0], [0], [1], [0, 0, 1, 1], [], []>} : vector<1x32xf32>, vector<32x128xf32>, vector<1x128xf32> -> vector<1x128xf32>
    %cst_55 = arith.constant 9.99999974E-6 : f32
    %96 = vector.broadcast %cst_55 : f32 to vector<1x128xf32>
    %97 = arith.addf %95, %96 : vector<1x128xf32>
    %98 = math.rsqrt %97 : vector<1x128xf32>
    %99 = vector.broadcast %98 : vector<1x128xf32> to vector<32x128xf32>
    %100 = arith.mulf %93, %99 : vector<32x128xf32>
    %101 = vector.broadcast %29 : vector<32x1xf32> to vector<32x128xf32>
    %102 = arith.mulf %100, %101 : vector<32x128xf32>
    %103 = vector.broadcast %30 : vector<32x1xf32> to vector<32x128xf32>
    %104 = arith.addf %102, %103 : vector<32x128xf32>
    %cst_56 = arith.constant dense<0.000000e+00> : vector<32x128xf32>
    %105 = tpu.matmul %10, %8, %cst_56 {dimension_numbers = #tpu.dot_dimension_numbers<[1], [0], [0], [1], [0, 0, 1, 1], [], []>} : vector<32x32xf32>, vector<32x128xf32>, vector<32x128xf32> -> vector<32x128xf32>
    %106 = vector.broadcast %23 : vector<32x1xf32> to vector<32x128xf32>
    %107 = arith.addf %105, %106 : vector<32x128xf32>
    %108 = arith.mulf %107, %38 : vector<32x128xf32>
    %cst_57 = arith.constant dense<0.000000e+00> : vector<32x128xf32>
    %109 = tpu.matmul %0, %108, %cst_57 {dimension_numbers = #tpu.dot_dimension_numbers<[1], [0], [0], [1], [0, 0, 1, 1], [], []>} : vector<32x32xf32>, vector<32x128xf32>, vector<32x128xf32> -> vector<32x128xf32>
    %110 = arith.mulf %107, %44 : vector<32x128xf32>
    %cst_58 = arith.constant dense<0.000000e+00> : vector<32x128xf32>
    %111 = tpu.matmul %0, %110, %cst_58 {dimension_numbers = #tpu.dot_dimension_numbers<[1], [0], [0], [1], [0, 0, 1, 1], [], []>} : vector<32x32xf32>, vector<32x128xf32>, vector<32x128xf32> -> vector<32x128xf32>
    %112 = arith.maximumf %109, %111 : vector<32x128xf32>
    %113 = arith.subf %109, %112 : vector<32x128xf32>
    %114 = math.exp %113 : vector<32x128xf32>
    %115 = arith.subf %111, %112 : vector<32x128xf32>
    %116 = math.exp %115 : vector<32x128xf32>
    %117 = arith.addf %114, %116 : vector<32x128xf32>
    %118 = tpu.reciprocal %117 {approx = true} : vector<32x128xf32> -> vector<32x128xf32>
    %119 = arith.mulf %114, %118 : vector<32x128xf32>
    %120 = arith.mulf %119, %41 : vector<32x128xf32>
    %121 = arith.mulf %116, %118 : vector<32x128xf32>
    %122 = arith.mulf %121, %47 : vector<32x128xf32>
    %123 = arith.addf %120, %122 : vector<32x128xf32>
    %cst_59 = arith.constant dense<0.000000e+00> : vector<32x128xf32>
    %124 = tpu.matmul %16, %123, %cst_59 {dimension_numbers = #tpu.dot_dimension_numbers<[1], [0], [0], [1], [0, 0, 1, 1], [], []>} : vector<32x32xf32>, vector<32x128xf32>, vector<32x128xf32> -> vector<32x128xf32>
    %125 = vector.broadcast %26 : vector<32x1xf32> to vector<32x128xf32>
    %126 = arith.addf %124, %125 : vector<32x128xf32>
    %127 = arith.addf %8, %126 : vector<32x128xf32>
    %cst_60 = arith.constant dense<0.000000e+00> : vector<1x128xf32>
    %128 = tpu.matmul %1, %127, %cst_60 {dimension_numbers = #tpu.dot_dimension_numbers<[1], [0], [0], [1], [0, 0, 1, 1], [], []>} : vector<1x32xf32>, vector<32x128xf32>, vector<1x128xf32> -> vector<1x128xf32>
    %129 = vector.broadcast %128 : vector<1x128xf32> to vector<32x128xf32>
    %130 = arith.subf %127, %129 : vector<32x128xf32>
    %131 = arith.mulf %130, %130 : vector<32x128xf32>
    %cst_61 = arith.constant dense<0.000000e+00> : vector<1x128xf32>
    %132 = tpu.matmul %1, %131, %cst_61 {dimension_numbers = #tpu.dot_dimension_numbers<[1], [0], [0], [1], [0, 0, 1, 1], [], []>} : vector<1x32xf32>, vector<32x128xf32>, vector<1x128xf32> -> vector<1x128xf32>
    %cst_62 = arith.constant 9.99999974E-6 : f32
    %133 = vector.broadcast %cst_62 : f32 to vector<1x128xf32>
    %134 = arith.addf %132, %133 : vector<1x128xf32>
    %135 = math.rsqrt %134 : vector<1x128xf32>
    %136 = vector.broadcast %135 : vector<1x128xf32> to vector<32x128xf32>
    %137 = arith.mulf %130, %136 : vector<32x128xf32>
    %138 = vector.broadcast %27 : vector<32x1xf32> to vector<32x128xf32>
    %139 = arith.mulf %137, %138 : vector<32x128xf32>
    %140 = vector.broadcast %28 : vector<32x1xf32> to vector<32x128xf32>
    %141 = arith.addf %139, %140 : vector<32x128xf32>
    %cst_63 = arith.constant dense<0.000000e+00> : vector<64x128xf32>
    %142 = tpu.matmul %18, %141, %cst_63 {dimension_numbers = #tpu.dot_dimension_numbers<[1], [0], [0], [1], [0, 0, 1, 1], [], []>} : vector<64x32xf32>, vector<32x128xf32>, vector<64x128xf32> -> vector<64x128xf32>
    %143 = vector.broadcast %31 : vector<64x1xf32> to vector<64x128xf32>
    %144 = arith.addf %142, %143 : vector<64x128xf32>
    %cst_64 = arith.constant 0.000000e+00 : f32
    %145 = vector.broadcast %cst_64 : f32 to vector<64x128xf32>
    %146 = arith.maximumf %144, %145 : vector<64x128xf32>
    %cst_65 = arith.constant dense<0.000000e+00> : vector<32x128xf32>
    %147 = tpu.matmul %20, %146, %cst_65 {dimension_numbers = #tpu.dot_dimension_numbers<[1], [0], [0], [1], [0, 0, 1, 1], [], []>} : vector<32x64xf32>, vector<64x128xf32>, vector<32x128xf32> -> vector<32x128xf32>
    %148 = vector.broadcast %32 : vector<32x1xf32> to vector<32x128xf32>
    %149 = arith.addf %147, %148 : vector<32x128xf32>
    %150 = arith.addf %141, %149 : vector<32x128xf32>
    %cst_66 = arith.constant dense<0.000000e+00> : vector<1x128xf32>
    %151 = tpu.matmul %1, %150, %cst_66 {dimension_numbers = #tpu.dot_dimension_numbers<[1], [0], [0], [1], [0, 0, 1, 1], [], []>} : vector<1x32xf32>, vector<32x128xf32>, vector<1x128xf32> -> vector<1x128xf32>
    %152 = vector.broadcast %151 : vector<1x128xf32> to vector<32x128xf32>
    %153 = arith.subf %150, %152 : vector<32x128xf32>
    %154 = arith.mulf %153, %153 : vector<32x128xf32>
    %cst_67 = arith.constant dense<0.000000e+00> : vector<1x128xf32>
    %155 = tpu.matmul %1, %154, %cst_67 {dimension_numbers = #tpu.dot_dimension_numbers<[1], [0], [0], [1], [0, 0, 1, 1], [], []>} : vector<1x32xf32>, vector<32x128xf32>, vector<1x128xf32> -> vector<1x128xf32>
    %cst_68 = arith.constant 9.99999974E-6 : f32
    %156 = vector.broadcast %cst_68 : f32 to vector<1x128xf32>
    %157 = arith.addf %155, %156 : vector<1x128xf32>
    %158 = math.rsqrt %157 : vector<1x128xf32>
    %159 = vector.broadcast %158 : vector<1x128xf32> to vector<32x128xf32>
    %160 = arith.mulf %153, %159 : vector<32x128xf32>
    %161 = vector.broadcast %29 : vector<32x1xf32> to vector<32x128xf32>
    %162 = arith.mulf %160, %161 : vector<32x128xf32>
    %163 = vector.broadcast %30 : vector<32x1xf32> to vector<32x128xf32>
    %164 = arith.addf %162, %163 : vector<32x128xf32>
    %c0_69 = arith.constant 0 : index
    %c1_70 = arith.constant 1 : index
    %c0_71 = arith.constant 0 : index
    %c0_72 = arith.constant 0 : index
    %c0_73 = arith.constant 0 : index
    %165 = vector.load %arg3[%c0_69, %c1_70, %c0_71, %c0_72, %c0_73] : memref<3x2x3x32x32xf32, #tpu.memory_space<vmem>>, vector<1x1x1x32x32xf32>
    %166 = vector.shape_cast %165 : vector<1x1x1x32x32xf32> to vector<32x32xf32>
    %c0_74 = arith.constant 0 : index
    %c1_75 = arith.constant 1 : index
    %c1_76 = arith.constant 1 : index
    %c0_77 = arith.constant 0 : index
    %c0_78 = arith.constant 0 : index
    %167 = vector.load %arg3[%c0_74, %c1_75, %c1_76, %c0_77, %c0_78] : memref<3x2x3x32x32xf32, #tpu.memory_space<vmem>>, vector<1x1x1x32x32xf32>
    %168 = vector.shape_cast %167 : vector<1x1x1x32x32xf32> to vector<32x32xf32>
    %c0_79 = arith.constant 0 : index
    %c1_80 = arith.constant 1 : index
    %c2_81 = arith.constant 2 : index
    %c0_82 = arith.constant 0 : index
    %c0_83 = arith.constant 0 : index
    %169 = vector.load %arg3[%c0_79, %c1_80, %c2_81, %c0_82, %c0_83] : memref<3x2x3x32x32xf32, #tpu.memory_space<vmem>>, vector<1x1x1x32x32xf32>
    %170 = vector.shape_cast %169 : vector<1x1x1x32x32xf32> to vector<32x32xf32>
    %c0_84 = arith.constant 0 : index
    %c1_85 = arith.constant 1 : index
    %c0_86 = arith.constant 0 : index
    %c0_87 = arith.constant 0 : index
    %171 = vector.load %arg4[%c0_84, %c1_85, %c0_86, %c0_87] : memref<3x2x32x32xf32, #tpu.memory_space<vmem>>, vector<1x1x32x32xf32>
    %172 = vector.shape_cast %171 : vector<1x1x32x32xf32> to vector<32x32xf32>
    %c0_88 = arith.constant 0 : index
    %c1_89 = arith.constant 1 : index
    %c0_90 = arith.constant 0 : index
    %c0_91 = arith.constant 0 : index
    %173 = vector.load %arg5[%c0_88, %c1_89, %c0_90, %c0_91] : memref<3x2x64x32xf32, #tpu.memory_space<vmem>>, vector<1x1x64x32xf32>
    %174 = vector.shape_cast %173 : vector<1x1x64x32xf32> to vector<64x32xf32>
    %c0_92 = arith.constant 0 : index
    %c1_93 = arith.constant 1 : index
    %c0_94 = arith.constant 0 : index
    %c0_95 = arith.constant 0 : index
    %175 = vector.load %arg6[%c0_92, %c1_93, %c0_94, %c0_95] : memref<3x2x32x64xf32, #tpu.memory_space<vmem>>, vector<1x1x32x64xf32>
    %176 = vector.shape_cast %175 : vector<1x1x32x64xf32> to vector<32x64xf32>
    %c0_96 = arith.constant 0 : index
    %c1_97 = arith.constant 1 : index
    %c0_98 = arith.constant 0 : index
    %c0_99 = arith.constant 0 : index
    %177 = vector.load %arg7[%c0_96, %c1_97, %c0_98, %c0_99] : memref<3x2x64x16xf32, #tpu.memory_space<vmem>>, vector<1x1x64x16xf32>
    %178 = vector.shape_cast %177 : vector<1x1x64x16xf32> to vector<64x16xf32>
    %179 = vector.extract_strided_slice %178 {offsets = [0, 0], sizes = [32, 1], strides = [1, 1]} : vector<64x16xf32> to vector<32x1xf32>
    %180 = vector.extract_strided_slice %178 {offsets = [0, 1], sizes = [32, 1], strides = [1, 1]} : vector<64x16xf32> to vector<32x1xf32>
    %181 = vector.extract_strided_slice %178 {offsets = [0, 2], sizes = [32, 1], strides = [1, 1]} : vector<64x16xf32> to vector<32x1xf32>
    %182 = vector.extract_strided_slice %178 {offsets = [0, 3], sizes = [32, 1], strides = [1, 1]} : vector<64x16xf32> to vector<32x1xf32>
    %183 = vector.extract_strided_slice %178 {offsets = [0, 4], sizes = [32, 1], strides = [1, 1]} : vector<64x16xf32> to vector<32x1xf32>
    %184 = vector.extract_strided_slice %178 {offsets = [0, 5], sizes = [32, 1], strides = [1, 1]} : vector<64x16xf32> to vector<32x1xf32>
    %185 = vector.extract_strided_slice %178 {offsets = [0, 6], sizes = [32, 1], strides = [1, 1]} : vector<64x16xf32> to vector<32x1xf32>
    %186 = vector.extract_strided_slice %178 {offsets = [0, 7], sizes = [32, 1], strides = [1, 1]} : vector<64x16xf32> to vector<32x1xf32>
    %187 = vector.extract_strided_slice %178 {offsets = [0, 8], sizes = [64, 1], strides = [1, 1]} : vector<64x16xf32> to vector<64x1xf32>
    %188 = vector.extract_strided_slice %178 {offsets = [0, 9], sizes = [32, 1], strides = [1, 1]} : vector<64x16xf32> to vector<32x1xf32>
    %cst_100 = arith.constant dense<0.000000e+00> : vector<32x128xf32>
    %189 = tpu.matmul %166, %104, %cst_100 {dimension_numbers = #tpu.dot_dimension_numbers<[1], [0], [0], [1], [0, 0, 1, 1], [], []>} : vector<32x32xf32>, vector<32x128xf32>, vector<32x128xf32> -> vector<32x128xf32>
    %190 = vector.broadcast %179 : vector<32x1xf32> to vector<32x128xf32>
    %191 = arith.addf %189, %190 : vector<32x128xf32>
    %cst_101 = arith.constant dense<0.000000e+00> : vector<32x128xf32>
    %192 = tpu.matmul %168, %104, %cst_101 {dimension_numbers = #tpu.dot_dimension_numbers<[1], [0], [0], [1], [0, 0, 1, 1], [], []>} : vector<32x32xf32>, vector<32x128xf32>, vector<32x128xf32> -> vector<32x128xf32>
    %193 = vector.broadcast %180 : vector<32x1xf32> to vector<32x128xf32>
    %194 = arith.addf %192, %193 : vector<32x128xf32>
    %cst_102 = arith.constant dense<0.000000e+00> : vector<32x128xf32>
    %195 = tpu.matmul %170, %104, %cst_102 {dimension_numbers = #tpu.dot_dimension_numbers<[1], [0], [0], [1], [0, 0, 1, 1], [], []>} : vector<32x32xf32>, vector<32x128xf32>, vector<32x128xf32> -> vector<32x128xf32>
    %196 = vector.broadcast %181 : vector<32x1xf32> to vector<32x128xf32>
    %197 = arith.addf %195, %196 : vector<32x128xf32>
    %cst_103 = arith.constant dense<0.000000e+00> : vector<32x128xf32>
    %198 = tpu.matmul %168, %164, %cst_103 {dimension_numbers = #tpu.dot_dimension_numbers<[1], [0], [0], [1], [0, 0, 1, 1], [], []>} : vector<32x32xf32>, vector<32x128xf32>, vector<32x128xf32> -> vector<32x128xf32>
    %199 = vector.broadcast %180 : vector<32x1xf32> to vector<32x128xf32>
    %200 = arith.addf %198, %199 : vector<32x128xf32>
    %cst_104 = arith.constant dense<0.000000e+00> : vector<32x128xf32>
    %201 = tpu.matmul %170, %164, %cst_104 {dimension_numbers = #tpu.dot_dimension_numbers<[1], [0], [0], [1], [0, 0, 1, 1], [], []>} : vector<32x32xf32>, vector<32x128xf32>, vector<32x128xf32> -> vector<32x128xf32>
    %202 = vector.broadcast %181 : vector<32x1xf32> to vector<32x128xf32>
    %203 = arith.addf %201, %202 : vector<32x128xf32>
    %204 = arith.mulf %191, %194 : vector<32x128xf32>
    %cst_105 = arith.constant dense<0.000000e+00> : vector<32x128xf32>
    %205 = tpu.matmul %0, %204, %cst_105 {dimension_numbers = #tpu.dot_dimension_numbers<[1], [0], [0], [1], [0, 0, 1, 1], [], []>} : vector<32x32xf32>, vector<32x128xf32>, vector<32x128xf32> -> vector<32x128xf32>
    %206 = arith.mulf %191, %200 : vector<32x128xf32>
    %cst_106 = arith.constant dense<0.000000e+00> : vector<32x128xf32>
    %207 = tpu.matmul %0, %206, %cst_106 {dimension_numbers = #tpu.dot_dimension_numbers<[1], [0], [0], [1], [0, 0, 1, 1], [], []>} : vector<32x32xf32>, vector<32x128xf32>, vector<32x128xf32> -> vector<32x128xf32>
    %208 = arith.maximumf %205, %207 : vector<32x128xf32>
    %209 = arith.subf %205, %208 : vector<32x128xf32>
    %210 = math.exp %209 : vector<32x128xf32>
    %211 = arith.subf %207, %208 : vector<32x128xf32>
    %212 = math.exp %211 : vector<32x128xf32>
    %213 = arith.addf %210, %212 : vector<32x128xf32>
    %214 = tpu.reciprocal %213 {approx = true} : vector<32x128xf32> -> vector<32x128xf32>
    %215 = arith.mulf %210, %214 : vector<32x128xf32>
    %216 = arith.mulf %215, %197 : vector<32x128xf32>
    %217 = arith.mulf %212, %214 : vector<32x128xf32>
    %218 = arith.mulf %217, %203 : vector<32x128xf32>
    %219 = arith.addf %216, %218 : vector<32x128xf32>
    %cst_107 = arith.constant dense<0.000000e+00> : vector<32x128xf32>
    %220 = tpu.matmul %172, %219, %cst_107 {dimension_numbers = #tpu.dot_dimension_numbers<[1], [0], [0], [1], [0, 0, 1, 1], [], []>} : vector<32x32xf32>, vector<32x128xf32>, vector<32x128xf32> -> vector<32x128xf32>
    %221 = vector.broadcast %182 : vector<32x1xf32> to vector<32x128xf32>
    %222 = arith.addf %220, %221 : vector<32x128xf32>
    %223 = arith.addf %104, %222 : vector<32x128xf32>
    %cst_108 = arith.constant dense<0.000000e+00> : vector<1x128xf32>
    %224 = tpu.matmul %1, %223, %cst_108 {dimension_numbers = #tpu.dot_dimension_numbers<[1], [0], [0], [1], [0, 0, 1, 1], [], []>} : vector<1x32xf32>, vector<32x128xf32>, vector<1x128xf32> -> vector<1x128xf32>
    %225 = vector.broadcast %224 : vector<1x128xf32> to vector<32x128xf32>
    %226 = arith.subf %223, %225 : vector<32x128xf32>
    %227 = arith.mulf %226, %226 : vector<32x128xf32>
    %cst_109 = arith.constant dense<0.000000e+00> : vector<1x128xf32>
    %228 = tpu.matmul %1, %227, %cst_109 {dimension_numbers = #tpu.dot_dimension_numbers<[1], [0], [0], [1], [0, 0, 1, 1], [], []>} : vector<1x32xf32>, vector<32x128xf32>, vector<1x128xf32> -> vector<1x128xf32>
    %cst_110 = arith.constant 9.99999974E-6 : f32
    %229 = vector.broadcast %cst_110 : f32 to vector<1x128xf32>
    %230 = arith.addf %228, %229 : vector<1x128xf32>
    %231 = math.rsqrt %230 : vector<1x128xf32>
    %232 = vector.broadcast %231 : vector<1x128xf32> to vector<32x128xf32>
    %233 = arith.mulf %226, %232 : vector<32x128xf32>
    %234 = vector.broadcast %183 : vector<32x1xf32> to vector<32x128xf32>
    %235 = arith.mulf %233, %234 : vector<32x128xf32>
    %236 = vector.broadcast %184 : vector<32x1xf32> to vector<32x128xf32>
    %237 = arith.addf %235, %236 : vector<32x128xf32>
    %cst_111 = arith.constant dense<0.000000e+00> : vector<64x128xf32>
    %238 = tpu.matmul %174, %237, %cst_111 {dimension_numbers = #tpu.dot_dimension_numbers<[1], [0], [0], [1], [0, 0, 1, 1], [], []>} : vector<64x32xf32>, vector<32x128xf32>, vector<64x128xf32> -> vector<64x128xf32>
    %239 = vector.broadcast %187 : vector<64x1xf32> to vector<64x128xf32>
    %240 = arith.addf %238, %239 : vector<64x128xf32>
    %cst_112 = arith.constant 0.000000e+00 : f32
    %241 = vector.broadcast %cst_112 : f32 to vector<64x128xf32>
    %242 = arith.maximumf %240, %241 : vector<64x128xf32>
    %cst_113 = arith.constant dense<0.000000e+00> : vector<32x128xf32>
    %243 = tpu.matmul %176, %242, %cst_113 {dimension_numbers = #tpu.dot_dimension_numbers<[1], [0], [0], [1], [0, 0, 1, 1], [], []>} : vector<32x64xf32>, vector<64x128xf32>, vector<32x128xf32> -> vector<32x128xf32>
    %244 = vector.broadcast %188 : vector<32x1xf32> to vector<32x128xf32>
    %245 = arith.addf %243, %244 : vector<32x128xf32>
    %246 = arith.addf %237, %245 : vector<32x128xf32>
    %cst_114 = arith.constant dense<0.000000e+00> : vector<1x128xf32>
    %247 = tpu.matmul %1, %246, %cst_114 {dimension_numbers = #tpu.dot_dimension_numbers<[1], [0], [0], [1], [0, 0, 1, 1], [], []>} : vector<1x32xf32>, vector<32x128xf32>, vector<1x128xf32> -> vector<1x128xf32>
    %248 = vector.broadcast %247 : vector<1x128xf32> to vector<32x128xf32>
    %249 = arith.subf %246, %248 : vector<32x128xf32>
    %250 = arith.mulf %249, %249 : vector<32x128xf32>
    %cst_115 = arith.constant dense<0.000000e+00> : vector<1x128xf32>
    %251 = tpu.matmul %1, %250, %cst_115 {dimension_numbers = #tpu.dot_dimension_numbers<[1], [0], [0], [1], [0, 0, 1, 1], [], []>} : vector<1x32xf32>, vector<32x128xf32>, vector<1x128xf32> -> vector<1x128xf32>
    %cst_116 = arith.constant 9.99999974E-6 : f32
    %252 = vector.broadcast %cst_116 : f32 to vector<1x128xf32>
    %253 = arith.addf %251, %252 : vector<1x128xf32>
    %254 = math.rsqrt %253 : vector<1x128xf32>
    %255 = vector.broadcast %254 : vector<1x128xf32> to vector<32x128xf32>
    %256 = arith.mulf %249, %255 : vector<32x128xf32>
    %257 = vector.broadcast %185 : vector<32x1xf32> to vector<32x128xf32>
    %258 = arith.mulf %256, %257 : vector<32x128xf32>
    %259 = vector.broadcast %186 : vector<32x1xf32> to vector<32x128xf32>
    %260 = arith.addf %258, %259 : vector<32x128xf32>
    %261 = arith.addf %2, %260 : vector<32x128xf32>
    %c1_117 = arith.constant 1 : index
    %c0_118 = arith.constant 0 : index
    %c0_119 = arith.constant 0 : index
    %c0_120 = arith.constant 0 : index
    %262 = vector.load %arg1[%c1_117, %c0_118, %c0_119, %c0_120] : memref<3x2x32x128xbf16, #tpu.memory_space<vmem>>, vector<1x1x32x128xbf16>
    %263 = vector.shape_cast %262 : vector<1x1x32x128xbf16> to vector<32x128xbf16>
    %264 = arith.extf %263 : vector<32x128xbf16> to vector<32x128xf32>
    %c1_121 = arith.constant 1 : index
    %c1_122 = arith.constant 1 : index
    %c0_123 = arith.constant 0 : index
    %c0_124 = arith.constant 0 : index
    %265 = vector.load %arg1[%c1_121, %c1_122, %c0_123, %c0_124] : memref<3x2x32x128xbf16, #tpu.memory_space<vmem>>, vector<1x1x32x128xbf16>
    %266 = vector.shape_cast %265 : vector<1x1x32x128xbf16> to vector<32x128xbf16>
    %267 = arith.extf %266 : vector<32x128xbf16> to vector<32x128xf32>
    %c1_125 = arith.constant 1 : index
    %c0_126 = arith.constant 0 : index
    %c0_127 = arith.constant 0 : index
    %c0_128 = arith.constant 0 : index
    %c0_129 = arith.constant 0 : index
    %268 = vector.load %arg3[%c1_125, %c0_126, %c0_127, %c0_128, %c0_129] : memref<3x2x3x32x32xf32, #tpu.memory_space<vmem>>, vector<1x1x1x32x32xf32>
    %269 = vector.shape_cast %268 : vector<1x1x1x32x32xf32> to vector<32x32xf32>
    %c1_130 = arith.constant 1 : index
    %c0_131 = arith.constant 0 : index
    %c1_132 = arith.constant 1 : index
    %c0_133 = arith.constant 0 : index
    %c0_134 = arith.constant 0 : index
    %270 = vector.load %arg3[%c1_130, %c0_131, %c1_132, %c0_133, %c0_134] : memref<3x2x3x32x32xf32, #tpu.memory_space<vmem>>, vector<1x1x1x32x32xf32>
    %271 = vector.shape_cast %270 : vector<1x1x1x32x32xf32> to vector<32x32xf32>
    %c1_135 = arith.constant 1 : index
    %c0_136 = arith.constant 0 : index
    %c2_137 = arith.constant 2 : index
    %c0_138 = arith.constant 0 : index
    %c0_139 = arith.constant 0 : index
    %272 = vector.load %arg3[%c1_135, %c0_136, %c2_137, %c0_138, %c0_139] : memref<3x2x3x32x32xf32, #tpu.memory_space<vmem>>, vector<1x1x1x32x32xf32>
    %273 = vector.shape_cast %272 : vector<1x1x1x32x32xf32> to vector<32x32xf32>
    %c1_140 = arith.constant 1 : index
    %c0_141 = arith.constant 0 : index
    %c0_142 = arith.constant 0 : index
    %c0_143 = arith.constant 0 : index
    %274 = vector.load %arg4[%c1_140, %c0_141, %c0_142, %c0_143] : memref<3x2x32x32xf32, #tpu.memory_space<vmem>>, vector<1x1x32x32xf32>
    %275 = vector.shape_cast %274 : vector<1x1x32x32xf32> to vector<32x32xf32>
    %c1_144 = arith.constant 1 : index
    %c0_145 = arith.constant 0 : index
    %c0_146 = arith.constant 0 : index
    %c0_147 = arith.constant 0 : index
    %276 = vector.load %arg5[%c1_144, %c0_145, %c0_146, %c0_147] : memref<3x2x64x32xf32, #tpu.memory_space<vmem>>, vector<1x1x64x32xf32>
    %277 = vector.shape_cast %276 : vector<1x1x64x32xf32> to vector<64x32xf32>
    %c1_148 = arith.constant 1 : index
    %c0_149 = arith.constant 0 : index
    %c0_150 = arith.constant 0 : index
    %c0_151 = arith.constant 0 : index
    %278 = vector.load %arg6[%c1_148, %c0_149, %c0_150, %c0_151] : memref<3x2x32x64xf32, #tpu.memory_space<vmem>>, vector<1x1x32x64xf32>
    %279 = vector.shape_cast %278 : vector<1x1x32x64xf32> to vector<32x64xf32>
    %c1_152 = arith.constant 1 : index
    %c0_153 = arith.constant 0 : index
    %c0_154 = arith.constant 0 : index
    %c0_155 = arith.constant 0 : index
    %280 = vector.load %arg7[%c1_152, %c0_153, %c0_154, %c0_155] : memref<3x2x64x16xf32, #tpu.memory_space<vmem>>, vector<1x1x64x16xf32>
    %281 = vector.shape_cast %280 : vector<1x1x64x16xf32> to vector<64x16xf32>
    %282 = vector.extract_strided_slice %281 {offsets = [0, 0], sizes = [32, 1], strides = [1, 1]} : vector<64x16xf32> to vector<32x1xf32>
    %283 = vector.extract_strided_slice %281 {offsets = [0, 1], sizes = [32, 1], strides = [1, 1]} : vector<64x16xf32> to vector<32x1xf32>
    %284 = vector.extract_strided_slice %281 {offsets = [0, 2], sizes = [32, 1], strides = [1, 1]} : vector<64x16xf32> to vector<32x1xf32>
    %285 = vector.extract_strided_slice %281 {offsets = [0, 3], sizes = [32, 1], strides = [1, 1]} : vector<64x16xf32> to vector<32x1xf32>
    %286 = vector.extract_strided_slice %281 {offsets = [0, 4], sizes = [32, 1], strides = [1, 1]} : vector<64x16xf32> to vector<32x1xf32>
    %287 = vector.extract_strided_slice %281 {offsets = [0, 5], sizes = [32, 1], strides = [1, 1]} : vector<64x16xf32> to vector<32x1xf32>
    %288 = vector.extract_strided_slice %281 {offsets = [0, 6], sizes = [32, 1], strides = [1, 1]} : vector<64x16xf32> to vector<32x1xf32>
    %289 = vector.extract_strided_slice %281 {offsets = [0, 7], sizes = [32, 1], strides = [1, 1]} : vector<64x16xf32> to vector<32x1xf32>
    %290 = vector.extract_strided_slice %281 {offsets = [0, 8], sizes = [64, 1], strides = [1, 1]} : vector<64x16xf32> to vector<64x1xf32>
    %291 = vector.extract_strided_slice %281 {offsets = [0, 9], sizes = [32, 1], strides = [1, 1]} : vector<64x16xf32> to vector<32x1xf32>
    %cst_156 = arith.constant dense<0.000000e+00> : vector<32x128xf32>
    %292 = tpu.matmul %269, %264, %cst_156 {dimension_numbers = #tpu.dot_dimension_numbers<[1], [0], [0], [1], [0, 0, 1, 1], [], []>} : vector<32x32xf32>, vector<32x128xf32>, vector<32x128xf32> -> vector<32x128xf32>
    %293 = vector.broadcast %282 : vector<32x1xf32> to vector<32x128xf32>
    %294 = arith.addf %292, %293 : vector<32x128xf32>
    %cst_157 = arith.constant dense<0.000000e+00> : vector<32x128xf32>
    %295 = tpu.matmul %271, %264, %cst_157 {dimension_numbers = #tpu.dot_dimension_numbers<[1], [0], [0], [1], [0, 0, 1, 1], [], []>} : vector<32x32xf32>, vector<32x128xf32>, vector<32x128xf32> -> vector<32x128xf32>
    %296 = vector.broadcast %283 : vector<32x1xf32> to vector<32x128xf32>
    %297 = arith.addf %295, %296 : vector<32x128xf32>
    %cst_158 = arith.constant dense<0.000000e+00> : vector<32x128xf32>
    %298 = tpu.matmul %273, %264, %cst_158 {dimension_numbers = #tpu.dot_dimension_numbers<[1], [0], [0], [1], [0, 0, 1, 1], [], []>} : vector<32x32xf32>, vector<32x128xf32>, vector<32x128xf32> -> vector<32x128xf32>
    %299 = vector.broadcast %284 : vector<32x1xf32> to vector<32x128xf32>
    %300 = arith.addf %298, %299 : vector<32x128xf32>
    %cst_159 = arith.constant dense<0.000000e+00> : vector<32x128xf32>
    %301 = tpu.matmul %271, %267, %cst_159 {dimension_numbers = #tpu.dot_dimension_numbers<[1], [0], [0], [1], [0, 0, 1, 1], [], []>} : vector<32x32xf32>, vector<32x128xf32>, vector<32x128xf32> -> vector<32x128xf32>
    %302 = vector.broadcast %283 : vector<32x1xf32> to vector<32x128xf32>
    %303 = arith.addf %301, %302 : vector<32x128xf32>
    %cst_160 = arith.constant dense<0.000000e+00> : vector<32x128xf32>
    %304 = tpu.matmul %273, %267, %cst_160 {dimension_numbers = #tpu.dot_dimension_numbers<[1], [0], [0], [1], [0, 0, 1, 1], [], []>} : vector<32x32xf32>, vector<32x128xf32>, vector<32x128xf32> -> vector<32x128xf32>
    %305 = vector.broadcast %284 : vector<32x1xf32> to vector<32x128xf32>
    %306 = arith.addf %304, %305 : vector<32x128xf32>
    %307 = arith.mulf %294, %297 : vector<32x128xf32>
    %cst_161 = arith.constant dense<0.000000e+00> : vector<32x128xf32>
    %308 = tpu.matmul %0, %307, %cst_161 {dimension_numbers = #tpu.dot_dimension_numbers<[1], [0], [0], [1], [0, 0, 1, 1], [], []>} : vector<32x32xf32>, vector<32x128xf32>, vector<32x128xf32> -> vector<32x128xf32>
    %309 = arith.mulf %294, %303 : vector<32x128xf32>
    %cst_162 = arith.constant dense<0.000000e+00> : vector<32x128xf32>
    %310 = tpu.matmul %0, %309, %cst_162 {dimension_numbers = #tpu.dot_dimension_numbers<[1], [0], [0], [1], [0, 0, 1, 1], [], []>} : vector<32x32xf32>, vector<32x128xf32>, vector<32x128xf32> -> vector<32x128xf32>
    %311 = arith.maximumf %308, %310 : vector<32x128xf32>
    %312 = arith.subf %308, %311 : vector<32x128xf32>
    %313 = math.exp %312 : vector<32x128xf32>
    %314 = arith.subf %310, %311 : vector<32x128xf32>
    %315 = math.exp %314 : vector<32x128xf32>
    %316 = arith.addf %313, %315 : vector<32x128xf32>
    %317 = tpu.reciprocal %316 {approx = true} : vector<32x128xf32> -> vector<32x128xf32>
    %318 = arith.mulf %313, %317 : vector<32x128xf32>
    %319 = arith.mulf %318, %300 : vector<32x128xf32>
    %320 = arith.mulf %315, %317 : vector<32x128xf32>
    %321 = arith.mulf %320, %306 : vector<32x128xf32>
    %322 = arith.addf %319, %321 : vector<32x128xf32>
    %cst_163 = arith.constant dense<0.000000e+00> : vector<32x128xf32>
    %323 = tpu.matmul %275, %322, %cst_163 {dimension_numbers = #tpu.dot_dimension_numbers<[1], [0], [0], [1], [0, 0, 1, 1], [], []>} : vector<32x32xf32>, vector<32x128xf32>, vector<32x128xf32> -> vector<32x128xf32>
    %324 = vector.broadcast %285 : vector<32x1xf32> to vector<32x128xf32>
    %325 = arith.addf %323, %324 : vector<32x128xf32>
    %326 = arith.addf %264, %325 : vector<32x128xf32>
    %cst_164 = arith.constant dense<0.000000e+00> : vector<1x128xf32>
    %327 = tpu.matmul %1, %326, %cst_164 {dimension_numbers = #tpu.dot_dimension_numbers<[1], [0], [0], [1], [0, 0, 1, 1], [], []>} : vector<1x32xf32>, vector<32x128xf32>, vector<1x128xf32> -> vector<1x128xf32>
    %328 = vector.broadcast %327 : vector<1x128xf32> to vector<32x128xf32>
    %329 = arith.subf %326, %328 : vector<32x128xf32>
    %330 = arith.mulf %329, %329 : vector<32x128xf32>
    %cst_165 = arith.constant dense<0.000000e+00> : vector<1x128xf32>
    %331 = tpu.matmul %1, %330, %cst_165 {dimension_numbers = #tpu.dot_dimension_numbers<[1], [0], [0], [1], [0, 0, 1, 1], [], []>} : vector<1x32xf32>, vector<32x128xf32>, vector<1x128xf32> -> vector<1x128xf32>
    %cst_166 = arith.constant 9.99999974E-6 : f32
    %332 = vector.broadcast %cst_166 : f32 to vector<1x128xf32>
    %333 = arith.addf %331, %332 : vector<1x128xf32>
    %334 = math.rsqrt %333 : vector<1x128xf32>
    %335 = vector.broadcast %334 : vector<1x128xf32> to vector<32x128xf32>
    %336 = arith.mulf %329, %335 : vector<32x128xf32>
    %337 = vector.broadcast %286 : vector<32x1xf32> to vector<32x128xf32>
    %338 = arith.mulf %336, %337 : vector<32x128xf32>
    %339 = vector.broadcast %287 : vector<32x1xf32> to vector<32x128xf32>
    %340 = arith.addf %338, %339 : vector<32x128xf32>
    %cst_167 = arith.constant dense<0.000000e+00> : vector<64x128xf32>
    %341 = tpu.matmul %277, %340, %cst_167 {dimension_numbers = #tpu.dot_dimension_numbers<[1], [0], [0], [1], [0, 0, 1, 1], [], []>} : vector<64x32xf32>, vector<32x128xf32>, vector<64x128xf32> -> vector<64x128xf32>
    %342 = vector.broadcast %290 : vector<64x1xf32> to vector<64x128xf32>
    %343 = arith.addf %341, %342 : vector<64x128xf32>
    %cst_168 = arith.constant 0.000000e+00 : f32
    %344 = vector.broadcast %cst_168 : f32 to vector<64x128xf32>
    %345 = arith.maximumf %343, %344 : vector<64x128xf32>
    %cst_169 = arith.constant dense<0.000000e+00> : vector<32x128xf32>
    %346 = tpu.matmul %279, %345, %cst_169 {dimension_numbers = #tpu.dot_dimension_numbers<[1], [0], [0], [1], [0, 0, 1, 1], [], []>} : vector<32x64xf32>, vector<64x128xf32>, vector<32x128xf32> -> vector<32x128xf32>
    %347 = vector.broadcast %291 : vector<32x1xf32> to vector<32x128xf32>
    %348 = arith.addf %346, %347 : vector<32x128xf32>
    %349 = arith.addf %340, %348 : vector<32x128xf32>
    %cst_170 = arith.constant dense<0.000000e+00> : vector<1x128xf32>
    %350 = tpu.matmul %1, %349, %cst_170 {dimension_numbers = #tpu.dot_dimension_numbers<[1], [0], [0], [1], [0, 0, 1, 1], [], []>} : vector<1x32xf32>, vector<32x128xf32>, vector<1x128xf32> -> vector<1x128xf32>
    %351 = vector.broadcast %350 : vector<1x128xf32> to vector<32x128xf32>
    %352 = arith.subf %349, %351 : vector<32x128xf32>
    %353 = arith.mulf %352, %352 : vector<32x128xf32>
    %cst_171 = arith.constant dense<0.000000e+00> : vector<1x128xf32>
    %354 = tpu.matmul %1, %353, %cst_171 {dimension_numbers = #tpu.dot_dimension_numbers<[1], [0], [0], [1], [0, 0, 1, 1], [], []>} : vector<1x32xf32>, vector<32x128xf32>, vector<1x128xf32> -> vector<1x128xf32>
    %cst_172 = arith.constant 9.99999974E-6 : f32
    %355 = vector.broadcast %cst_172 : f32 to vector<1x128xf32>
    %356 = arith.addf %354, %355 : vector<1x128xf32>
    %357 = math.rsqrt %356 : vector<1x128xf32>
    %358 = vector.broadcast %357 : vector<1x128xf32> to vector<32x128xf32>
    %359 = arith.mulf %352, %358 : vector<32x128xf32>
    %360 = vector.broadcast %288 : vector<32x1xf32> to vector<32x128xf32>
    %361 = arith.mulf %359, %360 : vector<32x128xf32>
    %362 = vector.broadcast %289 : vector<32x1xf32> to vector<32x128xf32>
    %363 = arith.addf %361, %362 : vector<32x128xf32>
    %cst_173 = arith.constant dense<0.000000e+00> : vector<32x128xf32>
    %364 = tpu.matmul %269, %267, %cst_173 {dimension_numbers = #tpu.dot_dimension_numbers<[1], [0], [0], [1], [0, 0, 1, 1], [], []>} : vector<32x32xf32>, vector<32x128xf32>, vector<32x128xf32> -> vector<32x128xf32>
    %365 = vector.broadcast %282 : vector<32x1xf32> to vector<32x128xf32>
    %366 = arith.addf %364, %365 : vector<32x128xf32>
    %367 = arith.mulf %366, %297 : vector<32x128xf32>
    %cst_174 = arith.constant dense<0.000000e+00> : vector<32x128xf32>
    %368 = tpu.matmul %0, %367, %cst_174 {dimension_numbers = #tpu.dot_dimension_numbers<[1], [0], [0], [1], [0, 0, 1, 1], [], []>} : vector<32x32xf32>, vector<32x128xf32>, vector<32x128xf32> -> vector<32x128xf32>
    %369 = arith.mulf %366, %303 : vector<32x128xf32>
    %cst_175 = arith.constant dense<0.000000e+00> : vector<32x128xf32>
    %370 = tpu.matmul %0, %369, %cst_175 {dimension_numbers = #tpu.dot_dimension_numbers<[1], [0], [0], [1], [0, 0, 1, 1], [], []>} : vector<32x32xf32>, vector<32x128xf32>, vector<32x128xf32> -> vector<32x128xf32>
    %371 = arith.maximumf %368, %370 : vector<32x128xf32>
    %372 = arith.subf %368, %371 : vector<32x128xf32>
    %373 = math.exp %372 : vector<32x128xf32>
    %374 = arith.subf %370, %371 : vector<32x128xf32>
    %375 = math.exp %374 : vector<32x128xf32>
    %376 = arith.addf %373, %375 : vector<32x128xf32>
    %377 = tpu.reciprocal %376 {approx = true} : vector<32x128xf32> -> vector<32x128xf32>
    %378 = arith.mulf %373, %377 : vector<32x128xf32>
    %379 = arith.mulf %378, %300 : vector<32x128xf32>
    %380 = arith.mulf %375, %377 : vector<32x128xf32>
    %381 = arith.mulf %380, %306 : vector<32x128xf32>
    %382 = arith.addf %379, %381 : vector<32x128xf32>
    %cst_176 = arith.constant dense<0.000000e+00> : vector<32x128xf32>
    %383 = tpu.matmul %275, %382, %cst_176 {dimension_numbers = #tpu.dot_dimension_numbers<[1], [0], [0], [1], [0, 0, 1, 1], [], []>} : vector<32x32xf32>, vector<32x128xf32>, vector<32x128xf32> -> vector<32x128xf32>
    %384 = vector.broadcast %285 : vector<32x1xf32> to vector<32x128xf32>
    %385 = arith.addf %383, %384 : vector<32x128xf32>
    %386 = arith.addf %267, %385 : vector<32x128xf32>
    %cst_177 = arith.constant dense<0.000000e+00> : vector<1x128xf32>
    %387 = tpu.matmul %1, %386, %cst_177 {dimension_numbers = #tpu.dot_dimension_numbers<[1], [0], [0], [1], [0, 0, 1, 1], [], []>} : vector<1x32xf32>, vector<32x128xf32>, vector<1x128xf32> -> vector<1x128xf32>
    %388 = vector.broadcast %387 : vector<1x128xf32> to vector<32x128xf32>
    %389 = arith.subf %386, %388 : vector<32x128xf32>
    %390 = arith.mulf %389, %389 : vector<32x128xf32>
    %cst_178 = arith.constant dense<0.000000e+00> : vector<1x128xf32>
    %391 = tpu.matmul %1, %390, %cst_178 {dimension_numbers = #tpu.dot_dimension_numbers<[1], [0], [0], [1], [0, 0, 1, 1], [], []>} : vector<1x32xf32>, vector<32x128xf32>, vector<1x128xf32> -> vector<1x128xf32>
    %cst_179 = arith.constant 9.99999974E-6 : f32
    %392 = vector.broadcast %cst_179 : f32 to vector<1x128xf32>
    %393 = arith.addf %391, %392 : vector<1x128xf32>
    %394 = math.rsqrt %393 : vector<1x128xf32>
    %395 = vector.broadcast %394 : vector<1x128xf32> to vector<32x128xf32>
    %396 = arith.mulf %389, %395 : vector<32x128xf32>
    %397 = vector.broadcast %286 : vector<32x1xf32> to vector<32x128xf32>
    %398 = arith.mulf %396, %397 : vector<32x128xf32>
    %399 = vector.broadcast %287 : vector<32x1xf32> to vector<32x128xf32>
    %400 = arith.addf %398, %399 : vector<32x128xf32>
    %cst_180 = arith.constant dense<0.000000e+00> : vector<64x128xf32>
    %401 = tpu.matmul %277, %400, %cst_180 {dimension_numbers = #tpu.dot_dimension_numbers<[1], [0], [0], [1], [0, 0, 1, 1], [], []>} : vector<64x32xf32>, vector<32x128xf32>, vector<64x128xf32> -> vector<64x128xf32>
    %402 = vector.broadcast %290 : vector<64x1xf32> to vector<64x128xf32>
    %403 = arith.addf %401, %402 : vector<64x128xf32>
    %cst_181 = arith.constant 0.000000e+00 : f32
    %404 = vector.broadcast %cst_181 : f32 to vector<64x128xf32>
    %405 = arith.maximumf %403, %404 : vector<64x128xf32>
    %cst_182 = arith.constant dense<0.000000e+00> : vector<32x128xf32>
    %406 = tpu.matmul %279, %405, %cst_182 {dimension_numbers = #tpu.dot_dimension_numbers<[1], [0], [0], [1], [0, 0, 1, 1], [], []>} : vector<32x64xf32>, vector<64x128xf32>, vector<32x128xf32> -> vector<32x128xf32>
    %407 = vector.broadcast %291 : vector<32x1xf32> to vector<32x128xf32>
    %408 = arith.addf %406, %407 : vector<32x128xf32>
    %409 = arith.addf %400, %408 : vector<32x128xf32>
    %cst_183 = arith.constant dense<0.000000e+00> : vector<1x128xf32>
    %410 = tpu.matmul %1, %409, %cst_183 {dimension_numbers = #tpu.dot_dimension_numbers<[1], [0], [0], [1], [0, 0, 1, 1], [], []>} : vector<1x32xf32>, vector<32x128xf32>, vector<1x128xf32> -> vector<1x128xf32>
    %411 = vector.broadcast %410 : vector<1x128xf32> to vector<32x128xf32>
    %412 = arith.subf %409, %411 : vector<32x128xf32>
    %413 = arith.mulf %412, %412 : vector<32x128xf32>
    %cst_184 = arith.constant dense<0.000000e+00> : vector<1x128xf32>
    %414 = tpu.matmul %1, %413, %cst_184 {dimension_numbers = #tpu.dot_dimension_numbers<[1], [0], [0], [1], [0, 0, 1, 1], [], []>} : vector<1x32xf32>, vector<32x128xf32>, vector<1x128xf32> -> vector<1x128xf32>
    %cst_185 = arith.constant 9.99999974E-6 : f32
    %415 = vector.broadcast %cst_185 : f32 to vector<1x128xf32>
    %416 = arith.addf %414, %415 : vector<1x128xf32>
    %417 = math.rsqrt %416 : vector<1x128xf32>
    %418 = vector.broadcast %417 : vector<1x128xf32> to vector<32x128xf32>
    %419 = arith.mulf %412, %418 : vector<32x128xf32>
    %420 = vector.broadcast %288 : vector<32x1xf32> to vector<32x128xf32>
    %421 = arith.mulf %419, %420 : vector<32x128xf32>
    %422 = vector.broadcast %289 : vector<32x1xf32> to vector<32x128xf32>
    %423 = arith.addf %421, %422 : vector<32x128xf32>
    %c1_186 = arith.constant 1 : index
    %c1_187 = arith.constant 1 : index
    %c0_188 = arith.constant 0 : index
    %c0_189 = arith.constant 0 : index
    %c0_190 = arith.constant 0 : index
    %424 = vector.load %arg3[%c1_186, %c1_187, %c0_188, %c0_189, %c0_190] : memref<3x2x3x32x32xf32, #tpu.memory_space<vmem>>, vector<1x1x1x32x32xf32>
    %425 = vector.shape_cast %424 : vector<1x1x1x32x32xf32> to vector<32x32xf32>
    %c1_191 = arith.constant 1 : index
    %c1_192 = arith.constant 1 : index
    %c1_193 = arith.constant 1 : index
    %c0_194 = arith.constant 0 : index
    %c0_195 = arith.constant 0 : index
    %426 = vector.load %arg3[%c1_191, %c1_192, %c1_193, %c0_194, %c0_195] : memref<3x2x3x32x32xf32, #tpu.memory_space<vmem>>, vector<1x1x1x32x32xf32>
    %427 = vector.shape_cast %426 : vector<1x1x1x32x32xf32> to vector<32x32xf32>
    %c1_196 = arith.constant 1 : index
    %c1_197 = arith.constant 1 : index
    %c2_198 = arith.constant 2 : index
    %c0_199 = arith.constant 0 : index
    %c0_200 = arith.constant 0 : index
    %428 = vector.load %arg3[%c1_196, %c1_197, %c2_198, %c0_199, %c0_200] : memref<3x2x3x32x32xf32, #tpu.memory_space<vmem>>, vector<1x1x1x32x32xf32>
    %429 = vector.shape_cast %428 : vector<1x1x1x32x32xf32> to vector<32x32xf32>
    %c1_201 = arith.constant 1 : index
    %c1_202 = arith.constant 1 : index
    %c0_203 = arith.constant 0 : index
    %c0_204 = arith.constant 0 : index
    %430 = vector.load %arg4[%c1_201, %c1_202, %c0_203, %c0_204] : memref<3x2x32x32xf32, #tpu.memory_space<vmem>>, vector<1x1x32x32xf32>
    %431 = vector.shape_cast %430 : vector<1x1x32x32xf32> to vector<32x32xf32>
    %c1_205 = arith.constant 1 : index
    %c1_206 = arith.constant 1 : index
    %c0_207 = arith.constant 0 : index
    %c0_208 = arith.constant 0 : index
    %432 = vector.load %arg5[%c1_205, %c1_206, %c0_207, %c0_208] : memref<3x2x64x32xf32, #tpu.memory_space<vmem>>, vector<1x1x64x32xf32>
    %433 = vector.shape_cast %432 : vector<1x1x64x32xf32> to vector<64x32xf32>
    %c1_209 = arith.constant 1 : index
    %c1_210 = arith.constant 1 : index
    %c0_211 = arith.constant 0 : index
    %c0_212 = arith.constant 0 : index
    %434 = vector.load %arg6[%c1_209, %c1_210, %c0_211, %c0_212] : memref<3x2x32x64xf32, #tpu.memory_space<vmem>>, vector<1x1x32x64xf32>
    %435 = vector.shape_cast %434 : vector<1x1x32x64xf32> to vector<32x64xf32>
    %c1_213 = arith.constant 1 : index
    %c1_214 = arith.constant 1 : index
    %c0_215 = arith.constant 0 : index
    %c0_216 = arith.constant 0 : index
    %436 = vector.load %arg7[%c1_213, %c1_214, %c0_215, %c0_216] : memref<3x2x64x16xf32, #tpu.memory_space<vmem>>, vector<1x1x64x16xf32>
    %437 = vector.shape_cast %436 : vector<1x1x64x16xf32> to vector<64x16xf32>
    %438 = vector.extract_strided_slice %437 {offsets = [0, 0], sizes = [32, 1], strides = [1, 1]} : vector<64x16xf32> to vector<32x1xf32>
    %439 = vector.extract_strided_slice %437 {offsets = [0, 1], sizes = [32, 1], strides = [1, 1]} : vector<64x16xf32> to vector<32x1xf32>
    %440 = vector.extract_strided_slice %437 {offsets = [0, 2], sizes = [32, 1], strides = [1, 1]} : vector<64x16xf32> to vector<32x1xf32>
    %441 = vector.extract_strided_slice %437 {offsets = [0, 3], sizes = [32, 1], strides = [1, 1]} : vector<64x16xf32> to vector<32x1xf32>
    %442 = vector.extract_strided_slice %437 {offsets = [0, 4], sizes = [32, 1], strides = [1, 1]} : vector<64x16xf32> to vector<32x1xf32>
    %443 = vector.extract_strided_slice %437 {offsets = [0, 5], sizes = [32, 1], strides = [1, 1]} : vector<64x16xf32> to vector<32x1xf32>
    %444 = vector.extract_strided_slice %437 {offsets = [0, 6], sizes = [32, 1], strides = [1, 1]} : vector<64x16xf32> to vector<32x1xf32>
    %445 = vector.extract_strided_slice %437 {offsets = [0, 7], sizes = [32, 1], strides = [1, 1]} : vector<64x16xf32> to vector<32x1xf32>
    %446 = vector.extract_strided_slice %437 {offsets = [0, 8], sizes = [64, 1], strides = [1, 1]} : vector<64x16xf32> to vector<64x1xf32>
    %447 = vector.extract_strided_slice %437 {offsets = [0, 9], sizes = [32, 1], strides = [1, 1]} : vector<64x16xf32> to vector<32x1xf32>
    %cst_217 = arith.constant dense<0.000000e+00> : vector<32x128xf32>
    %448 = tpu.matmul %425, %363, %cst_217 {dimension_numbers = #tpu.dot_dimension_numbers<[1], [0], [0], [1], [0, 0, 1, 1], [], []>} : vector<32x32xf32>, vector<32x128xf32>, vector<32x128xf32> -> vector<32x128xf32>
    %449 = vector.broadcast %438 : vector<32x1xf32> to vector<32x128xf32>
    %450 = arith.addf %448, %449 : vector<32x128xf32>
    %cst_218 = arith.constant dense<0.000000e+00> : vector<32x128xf32>
    %451 = tpu.matmul %427, %363, %cst_218 {dimension_numbers = #tpu.dot_dimension_numbers<[1], [0], [0], [1], [0, 0, 1, 1], [], []>} : vector<32x32xf32>, vector<32x128xf32>, vector<32x128xf32> -> vector<32x128xf32>
    %452 = vector.broadcast %439 : vector<32x1xf32> to vector<32x128xf32>
    %453 = arith.addf %451, %452 : vector<32x128xf32>
    %cst_219 = arith.constant dense<0.000000e+00> : vector<32x128xf32>
    %454 = tpu.matmul %429, %363, %cst_219 {dimension_numbers = #tpu.dot_dimension_numbers<[1], [0], [0], [1], [0, 0, 1, 1], [], []>} : vector<32x32xf32>, vector<32x128xf32>, vector<32x128xf32> -> vector<32x128xf32>
    %455 = vector.broadcast %440 : vector<32x1xf32> to vector<32x128xf32>
    %456 = arith.addf %454, %455 : vector<32x128xf32>
    %cst_220 = arith.constant dense<0.000000e+00> : vector<32x128xf32>
    %457 = tpu.matmul %427, %423, %cst_220 {dimension_numbers = #tpu.dot_dimension_numbers<[1], [0], [0], [1], [0, 0, 1, 1], [], []>} : vector<32x32xf32>, vector<32x128xf32>, vector<32x128xf32> -> vector<32x128xf32>
    %458 = vector.broadcast %439 : vector<32x1xf32> to vector<32x128xf32>
    %459 = arith.addf %457, %458 : vector<32x128xf32>
    %cst_221 = arith.constant dense<0.000000e+00> : vector<32x128xf32>
    %460 = tpu.matmul %429, %423, %cst_221 {dimension_numbers = #tpu.dot_dimension_numbers<[1], [0], [0], [1], [0, 0, 1, 1], [], []>} : vector<32x32xf32>, vector<32x128xf32>, vector<32x128xf32> -> vector<32x128xf32>
    %461 = vector.broadcast %440 : vector<32x1xf32> to vector<32x128xf32>
    %462 = arith.addf %460, %461 : vector<32x128xf32>
    %463 = arith.mulf %450, %453 : vector<32x128xf32>
    %cst_222 = arith.constant dense<0.000000e+00> : vector<32x128xf32>
    %464 = tpu.matmul %0, %463, %cst_222 {dimension_numbers = #tpu.dot_dimension_numbers<[1], [0], [0], [1], [0, 0, 1, 1], [], []>} : vector<32x32xf32>, vector<32x128xf32>, vector<32x128xf32> -> vector<32x128xf32>
    %465 = arith.mulf %450, %459 : vector<32x128xf32>
    %cst_223 = arith.constant dense<0.000000e+00> : vector<32x128xf32>
    %466 = tpu.matmul %0, %465, %cst_223 {dimension_numbers = #tpu.dot_dimension_numbers<[1], [0], [0], [1], [0, 0, 1, 1], [], []>} : vector<32x32xf32>, vector<32x128xf32>, vector<32x128xf32> -> vector<32x128xf32>
    %467 = arith.maximumf %464, %466 : vector<32x128xf32>
    %468 = arith.subf %464, %467 : vector<32x128xf32>
    %469 = math.exp %468 : vector<32x128xf32>
    %470 = arith.subf %466, %467 : vector<32x128xf32>
    %471 = math.exp %470 : vector<32x128xf32>
    %472 = arith.addf %469, %471 : vector<32x128xf32>
    %473 = tpu.reciprocal %472 {approx = true} : vector<32x128xf32> -> vector<32x128xf32>
    %474 = arith.mulf %469, %473 : vector<32x128xf32>
    %475 = arith.mulf %474, %456 : vector<32x128xf32>
    %476 = arith.mulf %471, %473 : vector<32x128xf32>
    %477 = arith.mulf %476, %462 : vector<32x128xf32>
    %478 = arith.addf %475, %477 : vector<32x128xf32>
    %cst_224 = arith.constant dense<0.000000e+00> : vector<32x128xf32>
    %479 = tpu.matmul %431, %478, %cst_224 {dimension_numbers = #tpu.dot_dimension_numbers<[1], [0], [0], [1], [0, 0, 1, 1], [], []>} : vector<32x32xf32>, vector<32x128xf32>, vector<32x128xf32> -> vector<32x128xf32>
    %480 = vector.broadcast %441 : vector<32x1xf32> to vector<32x128xf32>
    %481 = arith.addf %479, %480 : vector<32x128xf32>
    %482 = arith.addf %363, %481 : vector<32x128xf32>
    %cst_225 = arith.constant dense<0.000000e+00> : vector<1x128xf32>
    %483 = tpu.matmul %1, %482, %cst_225 {dimension_numbers = #tpu.dot_dimension_numbers<[1], [0], [0], [1], [0, 0, 1, 1], [], []>} : vector<1x32xf32>, vector<32x128xf32>, vector<1x128xf32> -> vector<1x128xf32>
    %484 = vector.broadcast %483 : vector<1x128xf32> to vector<32x128xf32>
    %485 = arith.subf %482, %484 : vector<32x128xf32>
    %486 = arith.mulf %485, %485 : vector<32x128xf32>
    %cst_226 = arith.constant dense<0.000000e+00> : vector<1x128xf32>
    %487 = tpu.matmul %1, %486, %cst_226 {dimension_numbers = #tpu.dot_dimension_numbers<[1], [0], [0], [1], [0, 0, 1, 1], [], []>} : vector<1x32xf32>, vector<32x128xf32>, vector<1x128xf32> -> vector<1x128xf32>
    %cst_227 = arith.constant 9.99999974E-6 : f32
    %488 = vector.broadcast %cst_227 : f32 to vector<1x128xf32>
    %489 = arith.addf %487, %488 : vector<1x128xf32>
    %490 = math.rsqrt %489 : vector<1x128xf32>
    %491 = vector.broadcast %490 : vector<1x128xf32> to vector<32x128xf32>
    %492 = arith.mulf %485, %491 : vector<32x128xf32>
    %493 = vector.broadcast %442 : vector<32x1xf32> to vector<32x128xf32>
    %494 = arith.mulf %492, %493 : vector<32x128xf32>
    %495 = vector.broadcast %443 : vector<32x1xf32> to vector<32x128xf32>
    %496 = arith.addf %494, %495 : vector<32x128xf32>
    %cst_228 = arith.constant dense<0.000000e+00> : vector<64x128xf32>
    %497 = tpu.matmul %433, %496, %cst_228 {dimension_numbers = #tpu.dot_dimension_numbers<[1], [0], [0], [1], [0, 0, 1, 1], [], []>} : vector<64x32xf32>, vector<32x128xf32>, vector<64x128xf32> -> vector<64x128xf32>
    %498 = vector.broadcast %446 : vector<64x1xf32> to vector<64x128xf32>
    %499 = arith.addf %497, %498 : vector<64x128xf32>
    %cst_229 = arith.constant 0.000000e+00 : f32
    %500 = vector.broadcast %cst_229 : f32 to vector<64x128xf32>
    %501 = arith.maximumf %499, %500 : vector<64x128xf32>
    %cst_230 = arith.constant dense<0.000000e+00> : vector<32x128xf32>
    %502 = tpu.matmul %435, %501, %cst_230 {dimension_numbers = #tpu.dot_dimension_numbers<[1], [0], [0], [1], [0, 0, 1, 1], [], []>} : vector<32x64xf32>, vector<64x128xf32>, vector<32x128xf32> -> vector<32x128xf32>
    %503 = vector.broadcast %447 : vector<32x1xf32> to vector<32x128xf32>
    %504 = arith.addf %502, %503 : vector<32x128xf32>
    %505 = arith.addf %496, %504 : vector<32x128xf32>
    %cst_231 = arith.constant dense<0.000000e+00> : vector<1x128xf32>
    %506 = tpu.matmul %1, %505, %cst_231 {dimension_numbers = #tpu.dot_dimension_numbers<[1], [0], [0], [1], [0, 0, 1, 1], [], []>} : vector<1x32xf32>, vector<32x128xf32>, vector<1x128xf32> -> vector<1x128xf32>
    %507 = vector.broadcast %506 : vector<1x128xf32> to vector<32x128xf32>
    %508 = arith.subf %505, %507 : vector<32x128xf32>
    %509 = arith.mulf %508, %508 : vector<32x128xf32>
    %cst_232 = arith.constant dense<0.000000e+00> : vector<1x128xf32>
    %510 = tpu.matmul %1, %509, %cst_232 {dimension_numbers = #tpu.dot_dimension_numbers<[1], [0], [0], [1], [0, 0, 1, 1], [], []>} : vector<1x32xf32>, vector<32x128xf32>, vector<1x128xf32> -> vector<1x128xf32>
    %cst_233 = arith.constant 9.99999974E-6 : f32
    %511 = vector.broadcast %cst_233 : f32 to vector<1x128xf32>
    %512 = arith.addf %510, %511 : vector<1x128xf32>
    %513 = math.rsqrt %512 : vector<1x128xf32>
    %514 = vector.broadcast %513 : vector<1x128xf32> to vector<32x128xf32>
    %515 = arith.mulf %508, %514 : vector<32x128xf32>
    %516 = vector.broadcast %444 : vector<32x1xf32> to vector<32x128xf32>
    %517 = arith.mulf %515, %516 : vector<32x128xf32>
    %518 = vector.broadcast %445 : vector<32x1xf32> to vector<32x128xf32>
    %519 = arith.addf %517, %518 : vector<32x128xf32>
    %520 = arith.addf %261, %519 : vector<32x128xf32>
    %c2_234 = arith.constant 2 : index
    %c0_235 = arith.constant 0 : index
    %c0_236 = arith.constant 0 : index
    %c0_237 = arith.constant 0 : index
    %521 = vector.load %arg1[%c2_234, %c0_235, %c0_236, %c0_237] : memref<3x2x32x128xbf16, #tpu.memory_space<vmem>>, vector<1x1x32x128xbf16>
    %522 = vector.shape_cast %521 : vector<1x1x32x128xbf16> to vector<32x128xbf16>
    %523 = arith.extf %522 : vector<32x128xbf16> to vector<32x128xf32>
    %c2_238 = arith.constant 2 : index
    %c1_239 = arith.constant 1 : index
    %c0_240 = arith.constant 0 : index
    %c0_241 = arith.constant 0 : index
    %524 = vector.load %arg1[%c2_238, %c1_239, %c0_240, %c0_241] : memref<3x2x32x128xbf16, #tpu.memory_space<vmem>>, vector<1x1x32x128xbf16>
    %525 = vector.shape_cast %524 : vector<1x1x32x128xbf16> to vector<32x128xbf16>
    %526 = arith.extf %525 : vector<32x128xbf16> to vector<32x128xf32>
    %c2_242 = arith.constant 2 : index
    %c0_243 = arith.constant 0 : index
    %c0_244 = arith.constant 0 : index
    %c0_245 = arith.constant 0 : index
    %c0_246 = arith.constant 0 : index
    %527 = vector.load %arg3[%c2_242, %c0_243, %c0_244, %c0_245, %c0_246] : memref<3x2x3x32x32xf32, #tpu.memory_space<vmem>>, vector<1x1x1x32x32xf32>
    %528 = vector.shape_cast %527 : vector<1x1x1x32x32xf32> to vector<32x32xf32>
    %c2_247 = arith.constant 2 : index
    %c0_248 = arith.constant 0 : index
    %c1_249 = arith.constant 1 : index
    %c0_250 = arith.constant 0 : index
    %c0_251 = arith.constant 0 : index
    %529 = vector.load %arg3[%c2_247, %c0_248, %c1_249, %c0_250, %c0_251] : memref<3x2x3x32x32xf32, #tpu.memory_space<vmem>>, vector<1x1x1x32x32xf32>
    %530 = vector.shape_cast %529 : vector<1x1x1x32x32xf32> to vector<32x32xf32>
    %c2_252 = arith.constant 2 : index
    %c0_253 = arith.constant 0 : index
    %c2_254 = arith.constant 2 : index
    %c0_255 = arith.constant 0 : index
    %c0_256 = arith.constant 0 : index
    %531 = vector.load %arg3[%c2_252, %c0_253, %c2_254, %c0_255, %c0_256] : memref<3x2x3x32x32xf32, #tpu.memory_space<vmem>>, vector<1x1x1x32x32xf32>
    %532 = vector.shape_cast %531 : vector<1x1x1x32x32xf32> to vector<32x32xf32>
    %c2_257 = arith.constant 2 : index
    %c0_258 = arith.constant 0 : index
    %c0_259 = arith.constant 0 : index
    %c0_260 = arith.constant 0 : index
    %533 = vector.load %arg4[%c2_257, %c0_258, %c0_259, %c0_260] : memref<3x2x32x32xf32, #tpu.memory_space<vmem>>, vector<1x1x32x32xf32>
    %534 = vector.shape_cast %533 : vector<1x1x32x32xf32> to vector<32x32xf32>
    %c2_261 = arith.constant 2 : index
    %c0_262 = arith.constant 0 : index
    %c0_263 = arith.constant 0 : index
    %c0_264 = arith.constant 0 : index
    %535 = vector.load %arg5[%c2_261, %c0_262, %c0_263, %c0_264] : memref<3x2x64x32xf32, #tpu.memory_space<vmem>>, vector<1x1x64x32xf32>
    %536 = vector.shape_cast %535 : vector<1x1x64x32xf32> to vector<64x32xf32>
    %c2_265 = arith.constant 2 : index
    %c0_266 = arith.constant 0 : index
    %c0_267 = arith.constant 0 : index
    %c0_268 = arith.constant 0 : index
    %537 = vector.load %arg6[%c2_265, %c0_266, %c0_267, %c0_268] : memref<3x2x32x64xf32, #tpu.memory_space<vmem>>, vector<1x1x32x64xf32>
    %538 = vector.shape_cast %537 : vector<1x1x32x64xf32> to vector<32x64xf32>
    %c2_269 = arith.constant 2 : index
    %c0_270 = arith.constant 0 : index
    %c0_271 = arith.constant 0 : index
    %c0_272 = arith.constant 0 : index
    %539 = vector.load %arg7[%c2_269, %c0_270, %c0_271, %c0_272] : memref<3x2x64x16xf32, #tpu.memory_space<vmem>>, vector<1x1x64x16xf32>
    %540 = vector.shape_cast %539 : vector<1x1x64x16xf32> to vector<64x16xf32>
    %541 = vector.extract_strided_slice %540 {offsets = [0, 0], sizes = [32, 1], strides = [1, 1]} : vector<64x16xf32> to vector<32x1xf32>
    %542 = vector.extract_strided_slice %540 {offsets = [0, 1], sizes = [32, 1], strides = [1, 1]} : vector<64x16xf32> to vector<32x1xf32>
    %543 = vector.extract_strided_slice %540 {offsets = [0, 2], sizes = [32, 1], strides = [1, 1]} : vector<64x16xf32> to vector<32x1xf32>
    %544 = vector.extract_strided_slice %540 {offsets = [0, 3], sizes = [32, 1], strides = [1, 1]} : vector<64x16xf32> to vector<32x1xf32>
    %545 = vector.extract_strided_slice %540 {offsets = [0, 4], sizes = [32, 1], strides = [1, 1]} : vector<64x16xf32> to vector<32x1xf32>
    %546 = vector.extract_strided_slice %540 {offsets = [0, 5], sizes = [32, 1], strides = [1, 1]} : vector<64x16xf32> to vector<32x1xf32>
    %547 = vector.extract_strided_slice %540 {offsets = [0, 6], sizes = [32, 1], strides = [1, 1]} : vector<64x16xf32> to vector<32x1xf32>
    %548 = vector.extract_strided_slice %540 {offsets = [0, 7], sizes = [32, 1], strides = [1, 1]} : vector<64x16xf32> to vector<32x1xf32>
    %549 = vector.extract_strided_slice %540 {offsets = [0, 8], sizes = [64, 1], strides = [1, 1]} : vector<64x16xf32> to vector<64x1xf32>
    %550 = vector.extract_strided_slice %540 {offsets = [0, 9], sizes = [32, 1], strides = [1, 1]} : vector<64x16xf32> to vector<32x1xf32>
    %cst_273 = arith.constant dense<0.000000e+00> : vector<32x128xf32>
    %551 = tpu.matmul %528, %523, %cst_273 {dimension_numbers = #tpu.dot_dimension_numbers<[1], [0], [0], [1], [0, 0, 1, 1], [], []>} : vector<32x32xf32>, vector<32x128xf32>, vector<32x128xf32> -> vector<32x128xf32>
    %552 = vector.broadcast %541 : vector<32x1xf32> to vector<32x128xf32>
    %553 = arith.addf %551, %552 : vector<32x128xf32>
    %cst_274 = arith.constant dense<0.000000e+00> : vector<32x128xf32>
    %554 = tpu.matmul %530, %523, %cst_274 {dimension_numbers = #tpu.dot_dimension_numbers<[1], [0], [0], [1], [0, 0, 1, 1], [], []>} : vector<32x32xf32>, vector<32x128xf32>, vector<32x128xf32> -> vector<32x128xf32>
    %555 = vector.broadcast %542 : vector<32x1xf32> to vector<32x128xf32>
    %556 = arith.addf %554, %555 : vector<32x128xf32>
    %cst_275 = arith.constant dense<0.000000e+00> : vector<32x128xf32>
    %557 = tpu.matmul %532, %523, %cst_275 {dimension_numbers = #tpu.dot_dimension_numbers<[1], [0], [0], [1], [0, 0, 1, 1], [], []>} : vector<32x32xf32>, vector<32x128xf32>, vector<32x128xf32> -> vector<32x128xf32>
    %558 = vector.broadcast %543 : vector<32x1xf32> to vector<32x128xf32>
    %559 = arith.addf %557, %558 : vector<32x128xf32>
    %cst_276 = arith.constant dense<0.000000e+00> : vector<32x128xf32>
    %560 = tpu.matmul %530, %526, %cst_276 {dimension_numbers = #tpu.dot_dimension_numbers<[1], [0], [0], [1], [0, 0, 1, 1], [], []>} : vector<32x32xf32>, vector<32x128xf32>, vector<32x128xf32> -> vector<32x128xf32>
    %561 = vector.broadcast %542 : vector<32x1xf32> to vector<32x128xf32>
    %562 = arith.addf %560, %561 : vector<32x128xf32>
    %cst_277 = arith.constant dense<0.000000e+00> : vector<32x128xf32>
    %563 = tpu.matmul %532, %526, %cst_277 {dimension_numbers = #tpu.dot_dimension_numbers<[1], [0], [0], [1], [0, 0, 1, 1], [], []>} : vector<32x32xf32>, vector<32x128xf32>, vector<32x128xf32> -> vector<32x128xf32>
    %564 = vector.broadcast %543 : vector<32x1xf32> to vector<32x128xf32>
    %565 = arith.addf %563, %564 : vector<32x128xf32>
    %566 = arith.mulf %553, %556 : vector<32x128xf32>
    %cst_278 = arith.constant dense<0.000000e+00> : vector<32x128xf32>
    %567 = tpu.matmul %0, %566, %cst_278 {dimension_numbers = #tpu.dot_dimension_numbers<[1], [0], [0], [1], [0, 0, 1, 1], [], []>} : vector<32x32xf32>, vector<32x128xf32>, vector<32x128xf32> -> vector<32x128xf32>
    %568 = arith.mulf %553, %562 : vector<32x128xf32>
    %cst_279 = arith.constant dense<0.000000e+00> : vector<32x128xf32>
    %569 = tpu.matmul %0, %568, %cst_279 {dimension_numbers = #tpu.dot_dimension_numbers<[1], [0], [0], [1], [0, 0, 1, 1], [], []>} : vector<32x32xf32>, vector<32x128xf32>, vector<32x128xf32> -> vector<32x128xf32>
    %570 = arith.maximumf %567, %569 : vector<32x128xf32>
    %571 = arith.subf %567, %570 : vector<32x128xf32>
    %572 = math.exp %571 : vector<32x128xf32>
    %573 = arith.subf %569, %570 : vector<32x128xf32>
    %574 = math.exp %573 : vector<32x128xf32>
    %575 = arith.addf %572, %574 : vector<32x128xf32>
    %576 = tpu.reciprocal %575 {approx = true} : vector<32x128xf32> -> vector<32x128xf32>
    %577 = arith.mulf %572, %576 : vector<32x128xf32>
    %578 = arith.mulf %577, %559 : vector<32x128xf32>
    %579 = arith.mulf %574, %576 : vector<32x128xf32>
    %580 = arith.mulf %579, %565 : vector<32x128xf32>
    %581 = arith.addf %578, %580 : vector<32x128xf32>
    %cst_280 = arith.constant dense<0.000000e+00> : vector<32x128xf32>
    %582 = tpu.matmul %534, %581, %cst_280 {dimension_numbers = #tpu.dot_dimension_numbers<[1], [0], [0], [1], [0, 0, 1, 1], [], []>} : vector<32x32xf32>, vector<32x128xf32>, vector<32x128xf32> -> vector<32x128xf32>
    %583 = vector.broadcast %544 : vector<32x1xf32> to vector<32x128xf32>
    %584 = arith.addf %582, %583 : vector<32x128xf32>
    %585 = arith.addf %523, %584 : vector<32x128xf32>
    %cst_281 = arith.constant dense<0.000000e+00> : vector<1x128xf32>
    %586 = tpu.matmul %1, %585, %cst_281 {dimension_numbers = #tpu.dot_dimension_numbers<[1], [0], [0], [1], [0, 0, 1, 1], [], []>} : vector<1x32xf32>, vector<32x128xf32>, vector<1x128xf32> -> vector<1x128xf32>
    %587 = vector.broadcast %586 : vector<1x128xf32> to vector<32x128xf32>
    %588 = arith.subf %585, %587 : vector<32x128xf32>
    %589 = arith.mulf %588, %588 : vector<32x128xf32>
    %cst_282 = arith.constant dense<0.000000e+00> : vector<1x128xf32>
    %590 = tpu.matmul %1, %589, %cst_282 {dimension_numbers = #tpu.dot_dimension_numbers<[1], [0], [0], [1], [0, 0, 1, 1], [], []>} : vector<1x32xf32>, vector<32x128xf32>, vector<1x128xf32> -> vector<1x128xf32>
    %cst_283 = arith.constant 9.99999974E-6 : f32
    %591 = vector.broadcast %cst_283 : f32 to vector<1x128xf32>
    %592 = arith.addf %590, %591 : vector<1x128xf32>
    %593 = math.rsqrt %592 : vector<1x128xf32>
    %594 = vector.broadcast %593 : vector<1x128xf32> to vector<32x128xf32>
    %595 = arith.mulf %588, %594 : vector<32x128xf32>
    %596 = vector.broadcast %545 : vector<32x1xf32> to vector<32x128xf32>
    %597 = arith.mulf %595, %596 : vector<32x128xf32>
    %598 = vector.broadcast %546 : vector<32x1xf32> to vector<32x128xf32>
    %599 = arith.addf %597, %598 : vector<32x128xf32>
    %cst_284 = arith.constant dense<0.000000e+00> : vector<64x128xf32>
    %600 = tpu.matmul %536, %599, %cst_284 {dimension_numbers = #tpu.dot_dimension_numbers<[1], [0], [0], [1], [0, 0, 1, 1], [], []>} : vector<64x32xf32>, vector<32x128xf32>, vector<64x128xf32> -> vector<64x128xf32>
    %601 = vector.broadcast %549 : vector<64x1xf32> to vector<64x128xf32>
    %602 = arith.addf %600, %601 : vector<64x128xf32>
    %cst_285 = arith.constant 0.000000e+00 : f32
    %603 = vector.broadcast %cst_285 : f32 to vector<64x128xf32>
    %604 = arith.maximumf %602, %603 : vector<64x128xf32>
    %cst_286 = arith.constant dense<0.000000e+00> : vector<32x128xf32>
    %605 = tpu.matmul %538, %604, %cst_286 {dimension_numbers = #tpu.dot_dimension_numbers<[1], [0], [0], [1], [0, 0, 1, 1], [], []>} : vector<32x64xf32>, vector<64x128xf32>, vector<32x128xf32> -> vector<32x128xf32>
    %606 = vector.broadcast %550 : vector<32x1xf32> to vector<32x128xf32>
    %607 = arith.addf %605, %606 : vector<32x128xf32>
    %608 = arith.addf %599, %607 : vector<32x128xf32>
    %cst_287 = arith.constant dense<0.000000e+00> : vector<1x128xf32>
    %609 = tpu.matmul %1, %608, %cst_287 {dimension_numbers = #tpu.dot_dimension_numbers<[1], [0], [0], [1], [0, 0, 1, 1], [], []>} : vector<1x32xf32>, vector<32x128xf32>, vector<1x128xf32> -> vector<1x128xf32>
    %610 = vector.broadcast %609 : vector<1x128xf32> to vector<32x128xf32>
    %611 = arith.subf %608, %610 : vector<32x128xf32>
    %612 = arith.mulf %611, %611 : vector<32x128xf32>
    %cst_288 = arith.constant dense<0.000000e+00> : vector<1x128xf32>
    %613 = tpu.matmul %1, %612, %cst_288 {dimension_numbers = #tpu.dot_dimension_numbers<[1], [0], [0], [1], [0, 0, 1, 1], [], []>} : vector<1x32xf32>, vector<32x128xf32>, vector<1x128xf32> -> vector<1x128xf32>
    %cst_289 = arith.constant 9.99999974E-6 : f32
    %614 = vector.broadcast %cst_289 : f32 to vector<1x128xf32>
    %615 = arith.addf %613, %614 : vector<1x128xf32>
    %616 = math.rsqrt %615 : vector<1x128xf32>
    %617 = vector.broadcast %616 : vector<1x128xf32> to vector<32x128xf32>
    %618 = arith.mulf %611, %617 : vector<32x128xf32>
    %619 = vector.broadcast %547 : vector<32x1xf32> to vector<32x128xf32>
    %620 = arith.mulf %618, %619 : vector<32x128xf32>
    %621 = vector.broadcast %548 : vector<32x1xf32> to vector<32x128xf32>
    %622 = arith.addf %620, %621 : vector<32x128xf32>
    %cst_290 = arith.constant dense<0.000000e+00> : vector<32x128xf32>
    %623 = tpu.matmul %528, %526, %cst_290 {dimension_numbers = #tpu.dot_dimension_numbers<[1], [0], [0], [1], [0, 0, 1, 1], [], []>} : vector<32x32xf32>, vector<32x128xf32>, vector<32x128xf32> -> vector<32x128xf32>
    %624 = vector.broadcast %541 : vector<32x1xf32> to vector<32x128xf32>
    %625 = arith.addf %623, %624 : vector<32x128xf32>
    %626 = arith.mulf %625, %556 : vector<32x128xf32>
    %cst_291 = arith.constant dense<0.000000e+00> : vector<32x128xf32>
    %627 = tpu.matmul %0, %626, %cst_291 {dimension_numbers = #tpu.dot_dimension_numbers<[1], [0], [0], [1], [0, 0, 1, 1], [], []>} : vector<32x32xf32>, vector<32x128xf32>, vector<32x128xf32> -> vector<32x128xf32>
    %628 = arith.mulf %625, %562 : vector<32x128xf32>
    %cst_292 = arith.constant dense<0.000000e+00> : vector<32x128xf32>
    %629 = tpu.matmul %0, %628, %cst_292 {dimension_numbers = #tpu.dot_dimension_numbers<[1], [0], [0], [1], [0, 0, 1, 1], [], []>} : vector<32x32xf32>, vector<32x128xf32>, vector<32x128xf32> -> vector<32x128xf32>
    %630 = arith.maximumf %627, %629 : vector<32x128xf32>
    %631 = arith.subf %627, %630 : vector<32x128xf32>
    %632 = math.exp %631 : vector<32x128xf32>
    %633 = arith.subf %629, %630 : vector<32x128xf32>
    %634 = math.exp %633 : vector<32x128xf32>
    %635 = arith.addf %632, %634 : vector<32x128xf32>
    %636 = tpu.reciprocal %635 {approx = true} : vector<32x128xf32> -> vector<32x128xf32>
    %637 = arith.mulf %632, %636 : vector<32x128xf32>
    %638 = arith.mulf %637, %559 : vector<32x128xf32>
    %639 = arith.mulf %634, %636 : vector<32x128xf32>
    %640 = arith.mulf %639, %565 : vector<32x128xf32>
    %641 = arith.addf %638, %640 : vector<32x128xf32>
    %cst_293 = arith.constant dense<0.000000e+00> : vector<32x128xf32>
    %642 = tpu.matmul %534, %641, %cst_293 {dimension_numbers = #tpu.dot_dimension_numbers<[1], [0], [0], [1], [0, 0, 1, 1], [], []>} : vector<32x32xf32>, vector<32x128xf32>, vector<32x128xf32> -> vector<32x128xf32>
    %643 = vector.broadcast %544 : vector<32x1xf32> to vector<32x128xf32>
    %644 = arith.addf %642, %643 : vector<32x128xf32>
    %645 = arith.addf %526, %644 : vector<32x128xf32>
    %cst_294 = arith.constant dense<0.000000e+00> : vector<1x128xf32>
    %646 = tpu.matmul %1, %645, %cst_294 {dimension_numbers = #tpu.dot_dimension_numbers<[1], [0], [0], [1], [0, 0, 1, 1], [], []>} : vector<1x32xf32>, vector<32x128xf32>, vector<1x128xf32> -> vector<1x128xf32>
    %647 = vector.broadcast %646 : vector<1x128xf32> to vector<32x128xf32>
    %648 = arith.subf %645, %647 : vector<32x128xf32>
    %649 = arith.mulf %648, %648 : vector<32x128xf32>
    %cst_295 = arith.constant dense<0.000000e+00> : vector<1x128xf32>
    %650 = tpu.matmul %1, %649, %cst_295 {dimension_numbers = #tpu.dot_dimension_numbers<[1], [0], [0], [1], [0, 0, 1, 1], [], []>} : vector<1x32xf32>, vector<32x128xf32>, vector<1x128xf32> -> vector<1x128xf32>
    %cst_296 = arith.constant 9.99999974E-6 : f32
    %651 = vector.broadcast %cst_296 : f32 to vector<1x128xf32>
    %652 = arith.addf %650, %651 : vector<1x128xf32>
    %653 = math.rsqrt %652 : vector<1x128xf32>
    %654 = vector.broadcast %653 : vector<1x128xf32> to vector<32x128xf32>
    %655 = arith.mulf %648, %654 : vector<32x128xf32>
    %656 = vector.broadcast %545 : vector<32x1xf32> to vector<32x128xf32>
    %657 = arith.mulf %655, %656 : vector<32x128xf32>
    %658 = vector.broadcast %546 : vector<32x1xf32> to vector<32x128xf32>
    %659 = arith.addf %657, %658 : vector<32x128xf32>
    %cst_297 = arith.constant dense<0.000000e+00> : vector<64x128xf32>
    %660 = tpu.matmul %536, %659, %cst_297 {dimension_numbers = #tpu.dot_dimension_numbers<[1], [0], [0], [1], [0, 0, 1, 1], [], []>} : vector<64x32xf32>, vector<32x128xf32>, vector<64x128xf32> -> vector<64x128xf32>
    %661 = vector.broadcast %549 : vector<64x1xf32> to vector<64x128xf32>
    %662 = arith.addf %660, %661 : vector<64x128xf32>
    %cst_298 = arith.constant 0.000000e+00 : f32
    %663 = vector.broadcast %cst_298 : f32 to vector<64x128xf32>
    %664 = arith.maximumf %662, %663 : vector<64x128xf32>
    %cst_299 = arith.constant dense<0.000000e+00> : vector<32x128xf32>
    %665 = tpu.matmul %538, %664, %cst_299 {dimension_numbers = #tpu.dot_dimension_numbers<[1], [0], [0], [1], [0, 0, 1, 1], [], []>} : vector<32x64xf32>, vector<64x128xf32>, vector<32x128xf32> -> vector<32x128xf32>
    %666 = vector.broadcast %550 : vector<32x1xf32> to vector<32x128xf32>
    %667 = arith.addf %665, %666 : vector<32x128xf32>
    %668 = arith.addf %659, %667 : vector<32x128xf32>
    %cst_300 = arith.constant dense<0.000000e+00> : vector<1x128xf32>
    %669 = tpu.matmul %1, %668, %cst_300 {dimension_numbers = #tpu.dot_dimension_numbers<[1], [0], [0], [1], [0, 0, 1, 1], [], []>} : vector<1x32xf32>, vector<32x128xf32>, vector<1x128xf32> -> vector<1x128xf32>
    %670 = vector.broadcast %669 : vector<1x128xf32> to vector<32x128xf32>
    %671 = arith.subf %668, %670 : vector<32x128xf32>
    %672 = arith.mulf %671, %671 : vector<32x128xf32>
    %cst_301 = arith.constant dense<0.000000e+00> : vector<1x128xf32>
    %673 = tpu.matmul %1, %672, %cst_301 {dimension_numbers = #tpu.dot_dimension_numbers<[1], [0], [0], [1], [0, 0, 1, 1], [], []>} : vector<1x32xf32>, vector<32x128xf32>, vector<1x128xf32> -> vector<1x128xf32>
    %cst_302 = arith.constant 9.99999974E-6 : f32
    %674 = vector.broadcast %cst_302 : f32 to vector<1x128xf32>
    %675 = arith.addf %673, %674 : vector<1x128xf32>
    %676 = math.rsqrt %675 : vector<1x128xf32>
    %677 = vector.broadcast %676 : vector<1x128xf32> to vector<32x128xf32>
    %678 = arith.mulf %671, %677 : vector<32x128xf32>
    %679 = vector.broadcast %547 : vector<32x1xf32> to vector<32x128xf32>
    %680 = arith.mulf %678, %679 : vector<32x128xf32>
    %681 = vector.broadcast %548 : vector<32x1xf32> to vector<32x128xf32>
    %682 = arith.addf %680, %681 : vector<32x128xf32>
    %c2_303 = arith.constant 2 : index
    %c1_304 = arith.constant 1 : index
    %c0_305 = arith.constant 0 : index
    %c0_306 = arith.constant 0 : index
    %c0_307 = arith.constant 0 : index
    %683 = vector.load %arg3[%c2_303, %c1_304, %c0_305, %c0_306, %c0_307] : memref<3x2x3x32x32xf32, #tpu.memory_space<vmem>>, vector<1x1x1x32x32xf32>
    %684 = vector.shape_cast %683 : vector<1x1x1x32x32xf32> to vector<32x32xf32>
    %c2_308 = arith.constant 2 : index
    %c1_309 = arith.constant 1 : index
    %c1_310 = arith.constant 1 : index
    %c0_311 = arith.constant 0 : index
    %c0_312 = arith.constant 0 : index
    %685 = vector.load %arg3[%c2_308, %c1_309, %c1_310, %c0_311, %c0_312] : memref<3x2x3x32x32xf32, #tpu.memory_space<vmem>>, vector<1x1x1x32x32xf32>
    %686 = vector.shape_cast %685 : vector<1x1x1x32x32xf32> to vector<32x32xf32>
    %c2_313 = arith.constant 2 : index
    %c1_314 = arith.constant 1 : index
    %c2_315 = arith.constant 2 : index
    %c0_316 = arith.constant 0 : index
    %c0_317 = arith.constant 0 : index
    %687 = vector.load %arg3[%c2_313, %c1_314, %c2_315, %c0_316, %c0_317] : memref<3x2x3x32x32xf32, #tpu.memory_space<vmem>>, vector<1x1x1x32x32xf32>
    %688 = vector.shape_cast %687 : vector<1x1x1x32x32xf32> to vector<32x32xf32>
    %c2_318 = arith.constant 2 : index
    %c1_319 = arith.constant 1 : index
    %c0_320 = arith.constant 0 : index
    %c0_321 = arith.constant 0 : index
    %689 = vector.load %arg4[%c2_318, %c1_319, %c0_320, %c0_321] : memref<3x2x32x32xf32, #tpu.memory_space<vmem>>, vector<1x1x32x32xf32>
    %690 = vector.shape_cast %689 : vector<1x1x32x32xf32> to vector<32x32xf32>
    %c2_322 = arith.constant 2 : index
    %c1_323 = arith.constant 1 : index
    %c0_324 = arith.constant 0 : index
    %c0_325 = arith.constant 0 : index
    %691 = vector.load %arg5[%c2_322, %c1_323, %c0_324, %c0_325] : memref<3x2x64x32xf32, #tpu.memory_space<vmem>>, vector<1x1x64x32xf32>
    %692 = vector.shape_cast %691 : vector<1x1x64x32xf32> to vector<64x32xf32>
    %c2_326 = arith.constant 2 : index
    %c1_327 = arith.constant 1 : index
    %c0_328 = arith.constant 0 : index
    %c0_329 = arith.constant 0 : index
    %693 = vector.load %arg6[%c2_326, %c1_327, %c0_328, %c0_329] : memref<3x2x32x64xf32, #tpu.memory_space<vmem>>, vector<1x1x32x64xf32>
    %694 = vector.shape_cast %693 : vector<1x1x32x64xf32> to vector<32x64xf32>
    %c2_330 = arith.constant 2 : index
    %c1_331 = arith.constant 1 : index
    %c0_332 = arith.constant 0 : index
    %c0_333 = arith.constant 0 : index
    %695 = vector.load %arg7[%c2_330, %c1_331, %c0_332, %c0_333] : memref<3x2x64x16xf32, #tpu.memory_space<vmem>>, vector<1x1x64x16xf32>
    %696 = vector.shape_cast %695 : vector<1x1x64x16xf32> to vector<64x16xf32>
    %697 = vector.extract_strided_slice %696 {offsets = [0, 0], sizes = [32, 1], strides = [1, 1]} : vector<64x16xf32> to vector<32x1xf32>
    %698 = vector.extract_strided_slice %696 {offsets = [0, 1], sizes = [32, 1], strides = [1, 1]} : vector<64x16xf32> to vector<32x1xf32>
    %699 = vector.extract_strided_slice %696 {offsets = [0, 2], sizes = [32, 1], strides = [1, 1]} : vector<64x16xf32> to vector<32x1xf32>
    %700 = vector.extract_strided_slice %696 {offsets = [0, 3], sizes = [32, 1], strides = [1, 1]} : vector<64x16xf32> to vector<32x1xf32>
    %701 = vector.extract_strided_slice %696 {offsets = [0, 4], sizes = [32, 1], strides = [1, 1]} : vector<64x16xf32> to vector<32x1xf32>
    %702 = vector.extract_strided_slice %696 {offsets = [0, 5], sizes = [32, 1], strides = [1, 1]} : vector<64x16xf32> to vector<32x1xf32>
    %703 = vector.extract_strided_slice %696 {offsets = [0, 6], sizes = [32, 1], strides = [1, 1]} : vector<64x16xf32> to vector<32x1xf32>
    %704 = vector.extract_strided_slice %696 {offsets = [0, 7], sizes = [32, 1], strides = [1, 1]} : vector<64x16xf32> to vector<32x1xf32>
    %705 = vector.extract_strided_slice %696 {offsets = [0, 8], sizes = [64, 1], strides = [1, 1]} : vector<64x16xf32> to vector<64x1xf32>
    %706 = vector.extract_strided_slice %696 {offsets = [0, 9], sizes = [32, 1], strides = [1, 1]} : vector<64x16xf32> to vector<32x1xf32>
    %cst_334 = arith.constant dense<0.000000e+00> : vector<32x128xf32>
    %707 = tpu.matmul %684, %622, %cst_334 {dimension_numbers = #tpu.dot_dimension_numbers<[1], [0], [0], [1], [0, 0, 1, 1], [], []>} : vector<32x32xf32>, vector<32x128xf32>, vector<32x128xf32> -> vector<32x128xf32>
    %708 = vector.broadcast %697 : vector<32x1xf32> to vector<32x128xf32>
    %709 = arith.addf %707, %708 : vector<32x128xf32>
    %cst_335 = arith.constant dense<0.000000e+00> : vector<32x128xf32>
    %710 = tpu.matmul %686, %622, %cst_335 {dimension_numbers = #tpu.dot_dimension_numbers<[1], [0], [0], [1], [0, 0, 1, 1], [], []>} : vector<32x32xf32>, vector<32x128xf32>, vector<32x128xf32> -> vector<32x128xf32>
    %711 = vector.broadcast %698 : vector<32x1xf32> to vector<32x128xf32>
    %712 = arith.addf %710, %711 : vector<32x128xf32>
    %cst_336 = arith.constant dense<0.000000e+00> : vector<32x128xf32>
    %713 = tpu.matmul %688, %622, %cst_336 {dimension_numbers = #tpu.dot_dimension_numbers<[1], [0], [0], [1], [0, 0, 1, 1], [], []>} : vector<32x32xf32>, vector<32x128xf32>, vector<32x128xf32> -> vector<32x128xf32>
    %714 = vector.broadcast %699 : vector<32x1xf32> to vector<32x128xf32>
    %715 = arith.addf %713, %714 : vector<32x128xf32>
    %cst_337 = arith.constant dense<0.000000e+00> : vector<32x128xf32>
    %716 = tpu.matmul %686, %682, %cst_337 {dimension_numbers = #tpu.dot_dimension_numbers<[1], [0], [0], [1], [0, 0, 1, 1], [], []>} : vector<32x32xf32>, vector<32x128xf32>, vector<32x128xf32> -> vector<32x128xf32>
    %717 = vector.broadcast %698 : vector<32x1xf32> to vector<32x128xf32>
    %718 = arith.addf %716, %717 : vector<32x128xf32>
    %cst_338 = arith.constant dense<0.000000e+00> : vector<32x128xf32>
    %719 = tpu.matmul %688, %682, %cst_338 {dimension_numbers = #tpu.dot_dimension_numbers<[1], [0], [0], [1], [0, 0, 1, 1], [], []>} : vector<32x32xf32>, vector<32x128xf32>, vector<32x128xf32> -> vector<32x128xf32>
    %720 = vector.broadcast %699 : vector<32x1xf32> to vector<32x128xf32>
    %721 = arith.addf %719, %720 : vector<32x128xf32>
    %722 = arith.mulf %709, %712 : vector<32x128xf32>
    %cst_339 = arith.constant dense<0.000000e+00> : vector<32x128xf32>
    %723 = tpu.matmul %0, %722, %cst_339 {dimension_numbers = #tpu.dot_dimension_numbers<[1], [0], [0], [1], [0, 0, 1, 1], [], []>} : vector<32x32xf32>, vector<32x128xf32>, vector<32x128xf32> -> vector<32x128xf32>
    %724 = arith.mulf %709, %718 : vector<32x128xf32>
    %cst_340 = arith.constant dense<0.000000e+00> : vector<32x128xf32>
    %725 = tpu.matmul %0, %724, %cst_340 {dimension_numbers = #tpu.dot_dimension_numbers<[1], [0], [0], [1], [0, 0, 1, 1], [], []>} : vector<32x32xf32>, vector<32x128xf32>, vector<32x128xf32> -> vector<32x128xf32>
    %726 = arith.maximumf %723, %725 : vector<32x128xf32>
    %727 = arith.subf %723, %726 : vector<32x128xf32>
    %728 = math.exp %727 : vector<32x128xf32>
    %729 = arith.subf %725, %726 : vector<32x128xf32>
    %730 = math.exp %729 : vector<32x128xf32>
    %731 = arith.addf %728, %730 : vector<32x128xf32>
    %732 = tpu.reciprocal %731 {approx = true} : vector<32x128xf32> -> vector<32x128xf32>
    %733 = arith.mulf %728, %732 : vector<32x128xf32>
    %734 = arith.mulf %733, %715 : vector<32x128xf32>
    %735 = arith.mulf %730, %732 : vector<32x128xf32>
    %736 = arith.mulf %735, %721 : vector<32x128xf32>
    %737 = arith.addf %734, %736 : vector<32x128xf32>
    %cst_341 = arith.constant dense<0.000000e+00> : vector<32x128xf32>
    %738 = tpu.matmul %690, %737, %cst_341 {dimension_numbers = #tpu.dot_dimension_numbers<[1], [0], [0], [1], [0, 0, 1, 1], [], []>} : vector<32x32xf32>, vector<32x128xf32>, vector<32x128xf32> -> vector<32x128xf32>
    %739 = vector.broadcast %700 : vector<32x1xf32> to vector<32x128xf32>
    %740 = arith.addf %738, %739 : vector<32x128xf32>
    %741 = arith.addf %622, %740 : vector<32x128xf32>
    %cst_342 = arith.constant dense<0.000000e+00> : vector<1x128xf32>
    %742 = tpu.matmul %1, %741, %cst_342 {dimension_numbers = #tpu.dot_dimension_numbers<[1], [0], [0], [1], [0, 0, 1, 1], [], []>} : vector<1x32xf32>, vector<32x128xf32>, vector<1x128xf32> -> vector<1x128xf32>
    %743 = vector.broadcast %742 : vector<1x128xf32> to vector<32x128xf32>
    %744 = arith.subf %741, %743 : vector<32x128xf32>
    %745 = arith.mulf %744, %744 : vector<32x128xf32>
    %cst_343 = arith.constant dense<0.000000e+00> : vector<1x128xf32>
    %746 = tpu.matmul %1, %745, %cst_343 {dimension_numbers = #tpu.dot_dimension_numbers<[1], [0], [0], [1], [0, 0, 1, 1], [], []>} : vector<1x32xf32>, vector<32x128xf32>, vector<1x128xf32> -> vector<1x128xf32>
    %cst_344 = arith.constant 9.99999974E-6 : f32
    %747 = vector.broadcast %cst_344 : f32 to vector<1x128xf32>
    %748 = arith.addf %746, %747 : vector<1x128xf32>
    %749 = math.rsqrt %748 : vector<1x128xf32>
    %750 = vector.broadcast %749 : vector<1x128xf32> to vector<32x128xf32>
    %751 = arith.mulf %744, %750 : vector<32x128xf32>
    %752 = vector.broadcast %701 : vector<32x1xf32> to vector<32x128xf32>
    %753 = arith.mulf %751, %752 : vector<32x128xf32>
    %754 = vector.broadcast %702 : vector<32x1xf32> to vector<32x128xf32>
    %755 = arith.addf %753, %754 : vector<32x128xf32>
    %cst_345 = arith.constant dense<0.000000e+00> : vector<64x128xf32>
    %756 = tpu.matmul %692, %755, %cst_345 {dimension_numbers = #tpu.dot_dimension_numbers<[1], [0], [0], [1], [0, 0, 1, 1], [], []>} : vector<64x32xf32>, vector<32x128xf32>, vector<64x128xf32> -> vector<64x128xf32>
    %757 = vector.broadcast %705 : vector<64x1xf32> to vector<64x128xf32>
    %758 = arith.addf %756, %757 : vector<64x128xf32>
    %cst_346 = arith.constant 0.000000e+00 : f32
    %759 = vector.broadcast %cst_346 : f32 to vector<64x128xf32>
    %760 = arith.maximumf %758, %759 : vector<64x128xf32>
    %cst_347 = arith.constant dense<0.000000e+00> : vector<32x128xf32>
    %761 = tpu.matmul %694, %760, %cst_347 {dimension_numbers = #tpu.dot_dimension_numbers<[1], [0], [0], [1], [0, 0, 1, 1], [], []>} : vector<32x64xf32>, vector<64x128xf32>, vector<32x128xf32> -> vector<32x128xf32>
    %762 = vector.broadcast %706 : vector<32x1xf32> to vector<32x128xf32>
    %763 = arith.addf %761, %762 : vector<32x128xf32>
    %764 = arith.addf %755, %763 : vector<32x128xf32>
    %cst_348 = arith.constant dense<0.000000e+00> : vector<1x128xf32>
    %765 = tpu.matmul %1, %764, %cst_348 {dimension_numbers = #tpu.dot_dimension_numbers<[1], [0], [0], [1], [0, 0, 1, 1], [], []>} : vector<1x32xf32>, vector<32x128xf32>, vector<1x128xf32> -> vector<1x128xf32>
    %766 = vector.broadcast %765 : vector<1x128xf32> to vector<32x128xf32>
    %767 = arith.subf %764, %766 : vector<32x128xf32>
    %768 = arith.mulf %767, %767 : vector<32x128xf32>
    %cst_349 = arith.constant dense<0.000000e+00> : vector<1x128xf32>
    %769 = tpu.matmul %1, %768, %cst_349 {dimension_numbers = #tpu.dot_dimension_numbers<[1], [0], [0], [1], [0, 0, 1, 1], [], []>} : vector<1x32xf32>, vector<32x128xf32>, vector<1x128xf32> -> vector<1x128xf32>
    %cst_350 = arith.constant 9.99999974E-6 : f32
    %770 = vector.broadcast %cst_350 : f32 to vector<1x128xf32>
    %771 = arith.addf %769, %770 : vector<1x128xf32>
    %772 = math.rsqrt %771 : vector<1x128xf32>
    %773 = vector.broadcast %772 : vector<1x128xf32> to vector<32x128xf32>
    %774 = arith.mulf %767, %773 : vector<32x128xf32>
    %775 = vector.broadcast %703 : vector<32x1xf32> to vector<32x128xf32>
    %776 = arith.mulf %774, %775 : vector<32x128xf32>
    %777 = vector.broadcast %704 : vector<32x1xf32> to vector<32x128xf32>
    %778 = arith.addf %776, %777 : vector<32x128xf32>
    %779 = arith.addf %520, %778 : vector<32x128xf32>
    %c0_351 = arith.constant 0 : index
    %c0_352 = arith.constant 0 : index
    %780 = vector.load %arg2[%c0_351, %c0_352] : memref<8x128xf32, #tpu.memory_space<vmem>>, vector<8x128xf32>
    %c0_353 = arith.constant 0 : index
    %c0_354 = arith.constant 0 : index
    %781 = vector.load %arg13[%c0_353, %c0_354] : memref<32x8xf32, #tpu.memory_space<vmem>>, vector<32x8xf32>
    %782 = vector.extract_strided_slice %781 {offsets = [0, 0], sizes = [32, 1], strides = [1, 1]} : vector<32x8xf32> to vector<32x1xf32>
    %c0_355 = arith.constant 0 : index
    %c0_356 = arith.constant 0 : index
    %783 = vector.load %arg9[%c0_355, %c0_356] : memref<32x8xf32, #tpu.memory_space<vmem>>, vector<32x8xf32>
    %cst_357 = arith.constant dense<0.000000e+00> : vector<32x128xf32>
    %784 = tpu.matmul %783, %780, %cst_357 {dimension_numbers = #tpu.dot_dimension_numbers<[1], [0], [0], [1], [0, 0, 1, 1], [], []>} : vector<32x8xf32>, vector<8x128xf32>, vector<32x128xf32> -> vector<32x128xf32>
    %785 = vector.broadcast %782 : vector<32x1xf32> to vector<32x128xf32>
    %786 = arith.addf %784, %785 : vector<32x128xf32>
    %787 = vector.extract_strided_slice %781 {offsets = [0, 2], sizes = [32, 1], strides = [1, 1]} : vector<32x8xf32> to vector<32x1xf32>
    %788 = vector.extract_strided_slice %781 {offsets = [0, 3], sizes = [32, 1], strides = [1, 1]} : vector<32x8xf32> to vector<32x1xf32>
    %789 = vector.extract_strided_slice %781 {offsets = [0, 4], sizes = [32, 1], strides = [1, 1]} : vector<32x8xf32> to vector<32x1xf32>
    %c0_358 = arith.constant 0 : index
    %c0_359 = arith.constant 0 : index
    %c0_360 = arith.constant 0 : index
    %790 = vector.load %arg10[%c0_358, %c0_359, %c0_360] : memref<2x32x32xf32, #tpu.memory_space<vmem>>, vector<1x32x32xf32>
    %791 = vector.shape_cast %790 : vector<1x32x32xf32> to vector<32x32xf32>
    %cst_361 = arith.constant dense<0.000000e+00> : vector<32x128xf32>
    %792 = tpu.matmul %791, %779, %cst_361 {dimension_numbers = #tpu.dot_dimension_numbers<[1], [0], [0], [1], [0, 0, 1, 1], [], []>} : vector<32x32xf32>, vector<32x128xf32>, vector<32x128xf32> -> vector<32x128xf32>
    %793 = arith.addf %786, %792 : vector<32x128xf32>
    %794 = vector.broadcast %787 : vector<32x1xf32> to vector<32x128xf32>
    %795 = arith.addf %793, %794 : vector<32x128xf32>
    %c0_362 = arith.constant 0 : index
    %c0_363 = arith.constant 0 : index
    %c0_364 = arith.constant 0 : index
    %c0_365 = arith.constant 0 : index
    %796 = vector.load %arg11[%c0_362, %c0_363, %c0_364, %c0_365] : memref<2x2x32x32xf32, #tpu.memory_space<vmem>>, vector<1x1x32x32xf32>
    %797 = vector.shape_cast %796 : vector<1x1x32x32xf32> to vector<32x32xf32>
    %cst_366 = arith.constant 0.000000e+00 : f32
    %798 = vector.broadcast %cst_366 : f32 to vector<32x128xf32>
    %799 = arith.maximumf %795, %798 : vector<32x128xf32>
    %cst_367 = arith.constant dense<0.000000e+00> : vector<32x128xf32>
    %800 = tpu.matmul %797, %799, %cst_367 {dimension_numbers = #tpu.dot_dimension_numbers<[1], [0], [0], [1], [0, 0, 1, 1], [], []>} : vector<32x32xf32>, vector<32x128xf32>, vector<32x128xf32> -> vector<32x128xf32>
    %801 = vector.broadcast %788 : vector<32x1xf32> to vector<32x128xf32>
    %802 = arith.addf %800, %801 : vector<32x128xf32>
    %c0_368 = arith.constant 0 : index
    %c1_369 = arith.constant 1 : index
    %c0_370 = arith.constant 0 : index
    %c0_371 = arith.constant 0 : index
    %803 = vector.load %arg11[%c0_368, %c1_369, %c0_370, %c0_371] : memref<2x2x32x32xf32, #tpu.memory_space<vmem>>, vector<1x1x32x32xf32>
    %804 = vector.shape_cast %803 : vector<1x1x32x32xf32> to vector<32x32xf32>
    %cst_372 = arith.constant 0.000000e+00 : f32
    %805 = vector.broadcast %cst_372 : f32 to vector<32x128xf32>
    %806 = arith.maximumf %802, %805 : vector<32x128xf32>
    %cst_373 = arith.constant dense<0.000000e+00> : vector<32x128xf32>
    %807 = tpu.matmul %804, %806, %cst_373 {dimension_numbers = #tpu.dot_dimension_numbers<[1], [0], [0], [1], [0, 0, 1, 1], [], []>} : vector<32x32xf32>, vector<32x128xf32>, vector<32x128xf32> -> vector<32x128xf32>
    %808 = vector.broadcast %789 : vector<32x1xf32> to vector<32x128xf32>
    %809 = arith.addf %807, %808 : vector<32x128xf32>
    %810 = arith.addf %795, %809 : vector<32x128xf32>
    %811 = vector.extract_strided_slice %781 {offsets = [0, 5], sizes = [32, 1], strides = [1, 1]} : vector<32x8xf32> to vector<32x1xf32>
    %812 = vector.extract_strided_slice %781 {offsets = [0, 6], sizes = [32, 1], strides = [1, 1]} : vector<32x8xf32> to vector<32x1xf32>
    %813 = vector.extract_strided_slice %781 {offsets = [0, 7], sizes = [32, 1], strides = [1, 1]} : vector<32x8xf32> to vector<32x1xf32>
    %c1_374 = arith.constant 1 : index
    %c0_375 = arith.constant 0 : index
    %c0_376 = arith.constant 0 : index
    %814 = vector.load %arg10[%c1_374, %c0_375, %c0_376] : memref<2x32x32xf32, #tpu.memory_space<vmem>>, vector<1x32x32xf32>
    %815 = vector.shape_cast %814 : vector<1x32x32xf32> to vector<32x32xf32>
    %cst_377 = arith.constant dense<0.000000e+00> : vector<32x128xf32>
    %816 = tpu.matmul %815, %779, %cst_377 {dimension_numbers = #tpu.dot_dimension_numbers<[1], [0], [0], [1], [0, 0, 1, 1], [], []>} : vector<32x32xf32>, vector<32x128xf32>, vector<32x128xf32> -> vector<32x128xf32>
    %817 = arith.addf %810, %816 : vector<32x128xf32>
    %818 = vector.broadcast %811 : vector<32x1xf32> to vector<32x128xf32>
    %819 = arith.addf %817, %818 : vector<32x128xf32>
    %c1_378 = arith.constant 1 : index
    %c0_379 = arith.constant 0 : index
    %c0_380 = arith.constant 0 : index
    %c0_381 = arith.constant 0 : index
    %820 = vector.load %arg11[%c1_378, %c0_379, %c0_380, %c0_381] : memref<2x2x32x32xf32, #tpu.memory_space<vmem>>, vector<1x1x32x32xf32>
    %821 = vector.shape_cast %820 : vector<1x1x32x32xf32> to vector<32x32xf32>
    %cst_382 = arith.constant 0.000000e+00 : f32
    %822 = vector.broadcast %cst_382 : f32 to vector<32x128xf32>
    %823 = arith.maximumf %819, %822 : vector<32x128xf32>
    %cst_383 = arith.constant dense<0.000000e+00> : vector<32x128xf32>
    %824 = tpu.matmul %821, %823, %cst_383 {dimension_numbers = #tpu.dot_dimension_numbers<[1], [0], [0], [1], [0, 0, 1, 1], [], []>} : vector<32x32xf32>, vector<32x128xf32>, vector<32x128xf32> -> vector<32x128xf32>
    %825 = vector.broadcast %812 : vector<32x1xf32> to vector<32x128xf32>
    %826 = arith.addf %824, %825 : vector<32x128xf32>
    %c1_384 = arith.constant 1 : index
    %c1_385 = arith.constant 1 : index
    %c0_386 = arith.constant 0 : index
    %c0_387 = arith.constant 0 : index
    %827 = vector.load %arg11[%c1_384, %c1_385, %c0_386, %c0_387] : memref<2x2x32x32xf32, #tpu.memory_space<vmem>>, vector<1x1x32x32xf32>
    %828 = vector.shape_cast %827 : vector<1x1x32x32xf32> to vector<32x32xf32>
    %cst_388 = arith.constant 0.000000e+00 : f32
    %829 = vector.broadcast %cst_388 : f32 to vector<32x128xf32>
    %830 = arith.maximumf %826, %829 : vector<32x128xf32>
    %cst_389 = arith.constant dense<0.000000e+00> : vector<32x128xf32>
    %831 = tpu.matmul %828, %830, %cst_389 {dimension_numbers = #tpu.dot_dimension_numbers<[1], [0], [0], [1], [0, 0, 1, 1], [], []>} : vector<32x32xf32>, vector<32x128xf32>, vector<32x128xf32> -> vector<32x128xf32>
    %832 = vector.broadcast %813 : vector<32x1xf32> to vector<32x128xf32>
    %833 = arith.addf %831, %832 : vector<32x128xf32>
    %834 = arith.addf %819, %833 : vector<32x128xf32>
    %835 = vector.extract_strided_slice %781 {offsets = [0, 1], sizes = [1, 1], strides = [1, 1]} : vector<32x8xf32> to vector<1x1xf32>
    %c0_390 = arith.constant 0 : index
    %c0_391 = arith.constant 0 : index
    %836 = vector.load %arg12[%c0_390, %c0_391] : memref<1x32xf32, #tpu.memory_space<vmem>>, vector<1x32xf32>
    %cst_392 = arith.constant 0.000000e+00 : f32
    %837 = vector.broadcast %cst_392 : f32 to vector<32x128xf32>
    %838 = arith.maximumf %834, %837 : vector<32x128xf32>
    %cst_393 = arith.constant dense<0.000000e+00> : vector<1x128xf32>
    %839 = tpu.matmul %836, %838, %cst_393 {dimension_numbers = #tpu.dot_dimension_numbers<[1], [0], [0], [1], [0, 0, 1, 1], [], []>} : vector<1x32xf32>, vector<32x128xf32>, vector<1x128xf32> -> vector<1x128xf32>
    %840 = vector.broadcast %835 : vector<1x1xf32> to vector<1x128xf32>
    %841 = arith.addf %839, %840 : vector<1x128xf32>
    %c0_394 = arith.constant 0 : index
    %c0_395 = arith.constant 0 : index
    %c0_396 = arith.constant 0 : index
    %842 = vector.load %arg14[%c0_394, %c0_395, %c0_396] : memref<1x1x128xf32, #tpu.memory_space<vmem>>, vector<1x1x128xf32>
    %843 = vector.shape_cast %842 : vector<1x1x128xf32> to vector<1x128xf32>
    %844 = vector.shape_cast %841 : vector<1x128xf32> to vector<1x1x128xf32>
    tpu.vector_store %arg14[%c0_394, %c0_395, %c0_396], %844 {strides = array<i32>} : memref<1x1x128xf32, #tpu.memory_space<vmem>>, vector<1x1x128xf32>,
    return
  }
  func.func @transform_0(%arg0: i32) -> (i32, i32, i32, i32) {
    %c0_i32 = arith.constant 0 : i32
    %c0_i32_0 = arith.constant 0 : i32
    %c0_i32_1 = arith.constant 0 : i32
    %c0_i32_2 = arith.constant 0 : i32
    return %c0_i32, %c0_i32_0, %c0_i32_1, %arg0 : i32, i32, i32, i32
  }
  func.func @transform_1(%arg0: i32) -> (i32, i32) {
    %c0_i32 = arith.constant 0 : i32
    %c0_i32_0 = arith.constant 0 : i32
    return %c0_i32, %arg0 : i32, i32
  }
  func.func @transform_2(%arg0: i32) -> (i32, i32, i32, i32, i32) {
    %c0_i32 = arith.constant 0 : i32
    %c0_i32_0 = arith.constant 0 : i32
    %c0_i32_1 = arith.constant 0 : i32
    %c0_i32_2 = arith.constant 0 : i32
    %c0_i32_3 = arith.constant 0 : i32
    %c0_i32_4 = arith.constant 0 : i32
    return %c0_i32, %c0_i32_0, %c0_i32_1, %c0_i32_2, %c0_i32_3 : i32, i32, i32, i32, i32
  }
  func.func @transform_3(%arg0: i32) -> (i32, i32, i32, i32) {
    %c0_i32 = arith.constant 0 : i32
    %c0_i32_0 = arith.constant 0 : i32
    %c0_i32_1 = arith.constant 0 : i32
    %c0_i32_2 = arith.constant 0 : i32
    %c0_i32_3 = arith.constant 0 : i32
    return %c0_i32, %c0_i32_0, %c0_i32_1, %c0_i32_2 : i32, i32, i32, i32
  }
  func.func @transform_4(%arg0: i32) -> (i32, i32, i32, i32) {
    %c0_i32 = arith.constant 0 : i32
    %c0_i32_0 = arith.constant 0 : i32
    %c0_i32_1 = arith.constant 0 : i32
    %c0_i32_2 = arith.constant 0 : i32
    %c0_i32_3 = arith.constant 0 : i32
    return %c0_i32, %c0_i32_0, %c0_i32_1, %c0_i32_2 : i32, i32, i32, i32
  }
  func.func @transform_5(%arg0: i32) -> (i32, i32, i32, i32) {
    %c0_i32 = arith.constant 0 : i32
    %c0_i32_0 = arith.constant 0 : i32
    %c0_i32_1 = arith.constant 0 : i32
    %c0_i32_2 = arith.constant 0 : i32
    %c0_i32_3 = arith.constant 0 : i32
    return %c0_i32, %c0_i32_0, %c0_i32_1, %c0_i32_2 : i32, i32, i32, i32
  }
  func.func @transform_6(%arg0: i32) -> (i32, i32, i32, i32) {
    %c0_i32 = arith.constant 0 : i32
    %c0_i32_0 = arith.constant 0 : i32
    %c0_i32_1 = arith.constant 0 : i32
    %c0_i32_2 = arith.constant 0 : i32
    %c0_i32_3 = arith.constant 0 : i32
    return %c0_i32, %c0_i32_0, %c0_i32_1, %c0_i32_2 : i32, i32, i32, i32
  }
  func.func @transform_7(%arg0: i32) -> (i32, i32) {
    %c0_i32 = arith.constant 0 : i32
    %c0_i32_0 = arith.constant 0 : i32
    %c0_i32_1 = arith.constant 0 : i32
    return %c0_i32, %c0_i32_0 : i32, i32
  }
  func.func @transform_8(%arg0: i32) -> (i32, i32) {
    %c0_i32 = arith.constant 0 : i32
    %c0_i32_0 = arith.constant 0 : i32
    %c0_i32_1 = arith.constant 0 : i32
    return %c0_i32, %c0_i32_0 : i32, i32
  }
  func.func @transform_9(%arg0: i32) -> (i32, i32, i32) {
    %c0_i32 = arith.constant 0 : i32
    %c0_i32_0 = arith.constant 0 : i32
    %c0_i32_1 = arith.constant 0 : i32
    %c0_i32_2 = arith.constant 0 : i32
    return %c0_i32, %c0_i32_0, %c0_i32_1 : i32, i32, i32
  }
  func.func @transform_10(%arg0: i32) -> (i32, i32, i32, i32) {
    %c0_i32 = arith.constant 0 : i32
    %c0_i32_0 = arith.constant 0 : i32
    %c0_i32_1 = arith.constant 0 : i32
    %c0_i32_2 = arith.constant 0 : i32
    %c0_i32_3 = arith.constant 0 : i32
    return %c0_i32, %c0_i32_0, %c0_i32_1, %c0_i32_2 : i32, i32, i32, i32
  }
  func.func @transform_11(%arg0: i32) -> (i32, i32) {
    %c0_i32 = arith.constant 0 : i32
    %c0_i32_0 = arith.constant 0 : i32
    %c0_i32_1 = arith.constant 0 : i32
    return %c0_i32, %c0_i32_0 : i32, i32
  }
  func.func @transform_12(%arg0: i32) -> (i32, i32) {
    %c0_i32 = arith.constant 0 : i32
    %c0_i32_0 = arith.constant 0 : i32
    %c0_i32_1 = arith.constant 0 : i32
    return %c0_i32, %c0_i32_0 : i32, i32
  }
  func.func @transform_13(%arg0: i32) -> (i32, i32, i32) {
    %c0_i32 = arith.constant 0 : i32
    %c0_i32_0 = arith.constant 0 : i32
    %c0_i32_1 = arith.constant 0 : i32
    return %arg0, %c0_i32, %c0_i32_0 : i32, i32, i32
  }
}

</mosaic_0001>

<bundles_post_ra>
// kernel: tpu_custom_call.1
= control target key start
LH: loop header
LB: loop body
LE: loop exit
PB: predicated region body
PF: predicated region fallthrough
CT: control target
= control target key end

     0   :  { %s23336_s0 = inlined_call_operand.vmem [shape: bf16[3,2,32,256], index: 0, kind: input, shape index: {}]   ;;  %s23337_s1 = inlined_call_operand.hbm [shape: f32[8,256], index: 1, kind: input, shape index: {}]   ;;  %s23338_s2 = inlined_call_operand.vmem [shape: f32[3,2,3,32,32], index: 2, kind: input, shape index: {}]   ;;  %s23339_s3 = inlined_call_operand.vmem [shape: f32[3,2,32,32], index: 3, kind: input, shape index: {}]   ;;  %s23340_s4 = inlined_call_operand.vmem [shape: f32[3,2,64,32], index: 4, kind: input, shape index: {}]   ;;  %s23341_s5 = inlined_call_operand.hbm [shape: f32[3,2,32,64], index: 5, kind: input, shape index: {}]   ;;  %s23342_s6 = inlined_call_operand.vmem [shape: f32[3,2,64,16], index: 6, kind: input, shape index: {}]   ;;  %s23343_s7 = inlined_call_operand.hbm [shape: f32[32,32], index: 7, kind: input, shape index: {}]   ;;  %s23344_s8 = inlined_call_operand.vmem [shape: f32[32,8], index: 8, kind: input, shape index: {}]   ;;  %s23345_s9 = inlined_call_operand.vmem [shape: f32[2,32,32], index: 9, kind: input, shape index: {}]   ;;  %s23346_s10 = inlined_call_operand.vmem [shape: f32[2,2,32,32], index: 10, kind: input, shape index: {}]   ;;  %s23347_s11 = inlined_call_operand.vmem [shape: f32[1,32], index: 11, kind: input, shape index: {}]   ;;  %s23348_s12 = inlined_call_operand.vmem [shape: f32[32,8], index: 12, kind: input, shape index: {}]   ;;  %s23349_s13 = inlined_call_operand.hbm [shape: f32[2,1,128], index: 13, kind: output, shape index: {}]  }
   0x1   :  { %23563 = sst [smem:[#allocation110_spill]] %s23346_s10 }
   0x2   :  { %23564 = sst [smem:[#allocation111_spill]] %s23347_s11 }
   0x3   :  { %23565 = sst [smem:[#allocation112_spill]] %s23348_s12 }
   0x4   :  { %23566 = sst [smem:[#allocation113_spill]] %s23349_s13 }
   0x5   :  { %18 = vsyncpa [#allocation4], 0 }
   0x6   :  { %20 = vsyncpa [#allocation4 + $0x1], 0 }
   0x7   :  { %21 = vsyncpa [#allocation7], 0 }
   0x8   :  { %22 = vsyncpa [#allocation5], 0 }
   0x9   :  { %24 = vsyncpa [#allocation5 + $0x1], 0  ;;  %s19325_s25 = smov 0   ;;  %s19327_s26 = smov 0  }
   0xa   :  { %s19329_s27 = smov 0   ;;  %s19331_s28 = smov 0  }
   0xb LB: > { %23567 = sst [smem:[#allocation13_spill]] %s19221_s25  ;;  %s19346_s29 = sadd.s32 4294967295, %s19233_s28   ;;  %s19233_s28 = sphi %s19331_s28, %s24049_s28   ;;  %s19229_s27 = sphi %s19329_s27, %s24053_s27   ;;  %s19225_s26 = sphi %s19327_s26, %s24052_s26   ;;  %s19221_s25 = sphi %s19325_s25, %s24051_s25  }
   0xc   : > { %s14228_s30 = sadd.s32 4294967294, %s19233_s28   ;;  %s19350_s14 = sadd.s32 1, %s19233_s28  }
   0xd   : > { %23568 = sst [smem:[#allocation14_spill]] %s19350_s14  ;;  %s37_s15 = sadd.s32 1, %s19229_s27 }
   0xe   : > { %s34_s16 = ssub.s32 %s19233_s28, %s19350_s14  ;;  %p44_p0 = scmp.ne.s32.totalorder %s19229_s27, %s19225_s26 }
   0xf   : > { %p35_p1 = scmp.eq.s32.totalorder %s34_s16, 0  ;;  %p45_p2 = scmp.eq.s32.totalorder %s19233_s28, 0 }
  0x10   : > { %p76_p3 = scmp.ne.s32.totalorder %s19225_s26, %s19221_s25  ;;  %p23357_p4 = scmp.eq.s32.totalorder %s19346_s29, 0 }
  0x11   : > { %s19362_s17 = scalar_select %p35_p1, %s19229_s27, %s37_s15  }
  0x12   : > { %p19364_p5 = por %p45_p2, %p44_p0  ;;  %p19370_p6 = por %p23357_p4, %p76_p3 }
  0x13   : > { %23569 = sst [smem:[#allocation15_spill]] %s19362_s17  ;;  %p331_p7 = scmp.eq.s32.totalorder %s19346_s29, 1 }
  0x14   : > { %s23570_s18 = scalar_select %p19364_p5, 1, 0 }
  0x15   : > { %s23571_s19 = scalar_select %p19370_p6, 1, 0 }
  0x16   : > { %p337_p8 = scmp.eq.s32.totalorder %s14228_s30, 1  ;;  %p14229_p9 = scmp.ge.s32.totalorder %s19233_s28, 1 }
  0x17   : > { %p344_p10 = scmp.lt.s32.totalorder %s19233_s28, 3  ;;  %p19377_p11 = por %p331_p7, %p44_p0 }
  0x18   : > { %p19381_p12 = por %p337_p8, %p76_p3  ;;  %s19235_s23 = smov [#allocation6]  }
  0x19   : > { %s23572_s20 = scalar_select %p19377_p11, 1, 0 }
  0x1a   : > { %s23574_s21 = scalar_select %p19381_p12, 1, 0 }
  0x1b   : > { %23573 = sst [smem:[#allocation16_spill]] %s23572_s20  ;;  %p19385_p13 = pnand %p14229_p9, %p344_p10 }
  0x1c   : > { %23575 = sst [smem:[#allocation17_spill]] %s23574_s21  ;;  %s365_s24 = sshll.u32 %s19235_s23, 4  ;;  %s366_s24 = int_to_ptr.vmem [resolvable:$true] %s365_s24 }
  0x1d   : > { %s23576_s22 = scalar_select %p19385_p13, 1, 0 }
  0x1e   : > { %p18570_p1 = pneg %p19385_p13  ;;  %s19236_s15 = smov [#allocation8]  }
  0x1f   : > { %s381_s16 = sshll.u32 %s19236_s15, 4  ;;  %s19079_s21 = scalar_lea.hbm %s23341_s5, 3072  ;;  %s19397_s16 = int_to_ptr.vmem [resolvable:$true] %s381_s16 }
  0x20   : > { %p19393_p2 = pnand %p18570_p1, %p23357_p4  ;;  %p19080_p0 = scmp.ne.s32.totalorder %s23341_s5, %s19079_s21 }
  0x21   : > { %p19086_p9 = scmp.lt.u32.totalorder %s19079_s21, %s23341_s5 }
  0x22   : > { %p19081_p3 = pneg %p19393_p2 }
  0x24   : > { %p19082_p7 = pnand %p19081_p3, %p19080_p0 }
  0x26   : > { %p19083_p8 = pneg %p19082_p7 }
  0x28   : > { %p19088_p10 = pnand %p19086_p9, %p19083_p8 }
  0x2a   : > { %19091 = shalt.err (!%p19088_p10)
}
  0x2b   : > { %s19092_s15 = scalar_lea.vmem %s366_s24, 3072  ;;  %p19100_p11 = scmp.lt.s32.totalorder %s366_s24, %s366_s24 }
  0x2c   : > { %p19093_p1 = scmp.ne.s32.totalorder %s366_s24, %s19092_s15  ;;  %p19101_p6 = scmp.lt.s32.totalorder %s19092_s15, %s19092_s15 }
  0x2e   : > { %p19095_p4 = pnand %p19093_p1, %p19081_p3  ;;  %p19102_p13 = por %p19101_p6, %p19100_p11 }
  0x30   : > { %p19096_p12 = pneg %p19095_p4 }
  0x32   : > { %p19103_p5 = pnand %p19102_p13, %p19096_p12 }
  0x34   : > { %19106 = shalt.err (!%p19103_p5)
}
  0x35   : > { %s19237_s13 = smov 128   ;;  %s19238_s25 = smov 8  }
  0x36   : > { %18573 = dma.hbm_to_vmem [thread:$0]  (!%p19393_p2), %s23341_s5, 3072, %s366_s24, [#allocation7], %s19237_s13, %s19237_s13, %s19238_s25  }
  0x37   : > { %s19107_s23 = scalar_lea.hbm %s23343_s7, 512 }
  0x38   : > { %p19108_p4 = scmp.ne.s32.totalorder %s23343_s7, %s19107_s23  ;;  %p19114_p11 = scmp.lt.u32.totalorder %s19107_s23, %s23343_s7 }
  0x3a   : > { %p19110_p5 = pnand %p19108_p4, %p19081_p3 }
  0x3c   : > { %p19111_p6 = pneg %p19110_p5 }
  0x3e   : > { %p19116_p12 = pnand %p19114_p11, %p19111_p6 }
  0x40   : > { %19119 = shalt.err (!%p19116_p12)
}
  0x41   : > { %s19120_s24 = scalar_lea.vmem %s19397_s16, 512  ;;  %p19128_p8 = scmp.lt.s32.totalorder %s19397_s16, %s19397_s16 }
  0x42   : > { %p19121_p13 = scmp.ne.s32.totalorder %s19397_s16, %s19120_s24  ;;  %p19129_p9 = scmp.lt.s32.totalorder %s19120_s24, %s19120_s24 }
  0x44   : > { %p19123_p0 = pnand %p19121_p13, %p19081_p3  ;;  %p19130_p10 = por %p19129_p9, %p19128_p8 }
  0x46   : > { %p19124_p7 = pneg %p19123_p0 }
  0x48   : > { %p19131_p1 = pnand %p19130_p10, %p19124_p7 }
  0x4a   : > { %19134 = shalt.err (!%p19131_p1)
}
  0x4b   : > { %18576 = dma.hbm_to_vmem [thread:$0]  (!%p19393_p2), %s23343_s7, 512, %s19397_s16, [#allocation7], %s19237_s13, %s19237_s13, %s19238_s25  }
  0x4c   : > { %p23364_p4 = scmp.ge.s32.totalorder %s19233_s28, 2 }
  0x4d   : > { %p23578_p3 = scmp.ne.s32.totalorder (!%p23364_p4), %s23570_s18, 0 }
  0x4e   : > { %406 = sbr.rel (%p23364_p4) target bundleno = 131 (0x83), region = 60 }
  0x55   : > { %409 = sbr.rel (!%p23578_p3) target bundleno = 105 (0x69), region = 64  ;;  %s411_s12 = sand.u32 (%p23578_p3), 1, %s19229_s27  }
  0x56   : > { %s14233_s14 = sshll.u32 (%p23578_p3), %s19233_s28, 2  ;;  %s18556_s17 = smul.u32 (%p23578_p3), 96, %s411_s12 }
  0x57   : > { %s19456_s21 = scalar_lea.vmem (%p23578_p3), %s23336_s0, %s14233_s14 }
  0x58   : > { %v431_v0 = vld [vmem:[%s19456_s21] sm:$0xf] (%p23578_p3)  ;;  %v433_v1 = vld [vmem:[%s19456_s21 + $0x8] sm:$0xf] (%p23578_p3)  ;;  %v435_v2 = vld [vmem:[%s19456_s21 + $0x10] sm:$0xf] (%p23578_p3) }
  0x59   : > { %v437_v3 = vld [vmem:[%s19456_s21 + $0x18] sm:$0xf] (%p23578_p3)  ;;  %v439_v4 = vld [vmem:[%s19456_s21 + $0x20] sm:$0xf] (%p23578_p3)  ;;  %s19463_s16 = scalar_lea.vmem (%p23578_p3), [#allocation2], %s18556_s17 }
  0x5a   : > { %432 = vst [vmem:[%s19463_s16] sm:$0xf] (%p23578_p3), %v431_v0  ;;  %434 = vst [vmem:[%s19463_s16 + $0x4] sm:$0xf] (%p23578_p3), %v433_v1  ;;  %v441_v5 = vld [vmem:[%s19456_s21 + $0x28] sm:$0xf] (%p23578_p3) }
  0x5b   : > { %436 = vst [vmem:[%s19463_s16 + $0x8] sm:$0xf] (%p23578_p3), %v435_v2  ;;  %438 = vst [vmem:[%s19463_s16 + $0xc] sm:$0xf] (%p23578_p3), %v437_v3  ;;  %v443_v6 = vld [vmem:[%s19456_s21 + $0x30] sm:$0xf] (%p23578_p3) }
  0x5c   : > { %440 = vst [vmem:[%s19463_s16 + $0x10] sm:$0xf] %v439_v4  ;;  %v445_v7 = vld [vmem:[%s19456_s21 + $0x38] sm:$0xf]  ;;  %442 = vst [vmem:[%s19463_s16 + $0x14] sm:$0xf] %v441_v5 }
  0x5d   : > { %444 = vst [vmem:[%s19463_s16 + $0x18] sm:$0xf] %v443_v6  ;;  %446 = vst [vmem:[%s19463_s16 + $0x1c] sm:$0xf] %v445_v7  ;;  %v447_v8 = vld [vmem:[%s19456_s21 + $0x40] sm:$0xf] }
  0x5e   : > { %v449_v9 = vld [vmem:[%s19456_s21 + $0x48] sm:$0xf]  ;;  %v451_v10 = vld [vmem:[%s19456_s21 + $0x50] sm:$0xf]  ;;  %448 = vst [vmem:[%s19463_s16 + $0x20] sm:$0xf] %v447_v8 }
  0x5f   : > { %450 = vst [vmem:[%s19463_s16 + $0x24] sm:$0xf] %v449_v9  ;;  %452 = vst [vmem:[%s19463_s16 + $0x28] sm:$0xf] %v451_v10  ;;  %v453_v11 = vld [vmem:[%s19456_s21 + $0x58] sm:$0xf] }
  0x60   : > { %v455_v12 = vld [vmem:[%s19456_s21 + $0x60] sm:$0xf]  ;;  %v457_v13 = vld [vmem:[%s19456_s21 + $0x68] sm:$0xf]  ;;  %454 = vst [vmem:[%s19463_s16 + $0x2c] sm:$0xf] %v453_v11 }
  0x61   : > { %456 = vst [vmem:[%s19463_s16 + $0x30] sm:$0xf] %v455_v12  ;;  %458 = vst [vmem:[%s19463_s16 + $0x34] sm:$0xf] %v457_v13  ;;  %v459_v14 = vld [vmem:[%s19456_s21 + $0x70] sm:$0xf] }
  0x62   : > { %v461_v15 = vld [vmem:[%s19456_s21 + $0x78] sm:$0xf]  ;;  %v463_v16 = vld [vmem:[%s19456_s21 + $0x80] sm:$0xf]  ;;  %460 = vst [vmem:[%s19463_s16 + $0x38] sm:$0xf] %v459_v14 }
  0x63   : > { %462 = vst [vmem:[%s19463_s16 + $0x3c] sm:$0xf] %v461_v15  ;;  %464 = vst [vmem:[%s19463_s16 + $0x40] sm:$0xf] %v463_v16  ;;  %v465_v17 = vld [vmem:[%s19456_s21 + $0x88] sm:$0xf] }
  0x64   : > { %v467_v18 = vld [vmem:[%s19456_s21 + $0x90] sm:$0xf]  ;;  %v469_v19 = vld [vmem:[%s19456_s21 + $0x98] sm:$0xf]  ;;  %466 = vst [vmem:[%s19463_s16 + $0x44] sm:$0xf] %v465_v17 }
  0x65   : > { %468 = vst [vmem:[%s19463_s16 + $0x48] sm:$0xf] %v467_v18  ;;  %470 = vst [vmem:[%s19463_s16 + $0x4c] sm:$0xf] %v469_v19  ;;  %v471_v20 = vld [vmem:[%s19456_s21 + $0xa0] sm:$0xf] }
  0x66   : > { %v473_v21 = vld [vmem:[%s19456_s21 + $0xa8] sm:$0xf]  ;;  %v475_v22 = vld [vmem:[%s19456_s21 + $0xb0] sm:$0xf]  ;;  %472 = vst [vmem:[%s19463_s16 + $0x50] sm:$0xf] %v471_v20 }
  0x67   : > { %474 = vst [vmem:[%s19463_s16 + $0x54] sm:$0xf] %v473_v21  ;;  %476 = vst [vmem:[%s19463_s16 + $0x58] sm:$0xf] %v475_v22  ;;  %v477_v23 = vld [vmem:[%s19456_s21 + $0xb8] sm:$0xf] }
  0x68   : > { %478 = vst [vmem:[%s19463_s16 + $0x5c] sm:$0xf] %v477_v23 }
  0x69 PF: > { %s550_s13 = sand.u32 1, %s19229_s27   ;;  %s14235_s25 = sshll.u32 %s19233_s28, 7 }
  0x6a   : > { %s14234_s23 = sshll.u32 %s550_s13, 3  ;;  %s19513_s10 = scalar_lea.hbm %s23337_s1, %s14235_s25 }
  0x6b   : > { %s554_s11 = scalar_lea.vmem [#allocation3], %s14234_s23  ;;  %s551_s14 = scalar_lea.sflag [#allocation4], %s550_s13 }
  0x6c   : > { %s561_s12 = sshll.u32 %s554_s11, 4  ;;  %s19135_s17 = scalar_lea.hbm %s19513_s10, 128  ;;  %s562_s12 = int_to_ptr.vmem [resolvable:$true] %s561_s12 }
  0x6d   : > { %p19136_p2 = scmp.ne.s32.totalorder %s19513_s10, %s19135_s17  ;;  %p23579_p5 = scmp.ne.s32.totalorder %s23570_s18, 0 }
  0x6e   : > { %s19139_s21 = scalar_lea.hbm %s23337_s1, 256  ;;  %p19140_p12 = scmp.lt.u32.totalorder %s19513_s10, %s23337_s1 }
  0x6f   : > { %p19137_p6 = pnand %p19136_p2, %p23579_p5  ;;  %p19141_p13 = scmp.lt.u32.totalorder %s19139_s21, %s19135_s17 }
  0x70   : > { %p19143_p7 = scmp.lt.u32.totalorder %s19135_s17, %s19513_s10 }
  0x71   : > { %p19138_p11 = pneg %p19137_p6  ;;  %p19142_p0 = por %p19141_p13, %p19140_p12 }
  0x73   : > { %p19144_p8 = por %p19143_p7, %p19142_p0 }
  0x75   : > { %p19145_p9 = pnand %p19144_p8, %p19138_p11 }
  0x77   : > { %19148 = shalt.err (!%p19145_p9)
}
  0x78   : > { %s19149_s13 = scalar_lea.vmem %s562_s12, 128  ;;  %s19239_s23 = smov [#allocation3]  }
  0x79   : > { %p19150_p10 = scmp.ne.s32.totalorder %s562_s12, %s19149_s13  ;;  %s19153_s15 = sshll.u32 %s19239_s23, 4  ;;  %s19154_s15 = int_to_ptr.vmem [resolvable:$false] %s19153_s15 }
  0x7a   : > { %s19155_s24 = scalar_lea.vmem %s19154_s15, 256  ;;  %p19156_p2 = scmp.lt.s32.totalorder %s562_s12, %s19154_s15 }
  0x7b   : > { %p19151_p1 = pnand %p19150_p10, %p23579_p5  ;;  %p19157_p6 = scmp.lt.s32.totalorder %s19155_s24, %s19149_s13 }
  0x7d   : > { %p19152_p3 = pneg %p19151_p1  ;;  %p19158_p4 = por %p19157_p6, %p19156_p2 }
  0x7f   : > { %p19159_p12 = pnand %p19158_p4, %p19152_p3 }
  0x81   : > { %19162 = shalt.err (!%p19159_p12)
}
  0x82   : > { %18562 = dma.hbm_to_vmem [thread:$0]  (%p23579_p5), %s19513_s10, 128, %s562_s12, %s551_s14  }
  0x83 PF: > { %p23580_p11 = scmp.ne.s32.totalorder %s23576_s22, 0 }
  0x85   : > { %570 = sbr.rel (%p23580_p11) target bundleno = 18742 (0x4936), region = 109 }
  0x8c   : > { %s19535_s11 = sand.u32 1, %s19225_s26   ;;  %p23581_p4 = scmp.ne.s32.totalorder %s23571_s19, 0 }
  0x8d   : > { %s18557_s17 = smul.u32 96, %s19535_s11  ;;  %s14237_s20 = sshll.u32 %s19535_s11, 3 }
  0x8e   : > { %s580_s21 = scalar_lea.sflag [#allocation4], %s19535_s11  ;;  %s19542_s16 = scalar_lea.vmem [#allocation3], %s14237_s20 }
  0x8f   : > { %s19539_s30 = scalar_lea.vmem [#allocation2], %s18557_s17 }
  0x90   : > { %19208 = dma.done.wait (%p23581_p4), %s580_s21, 128  }
  0x91   : > { %19210 = vsyncadd (%p23581_p4), %s580_s21, 4294967168  ;;  %p23582_p5 = scmp.eq.s32.totalorder %s19346_s29, 0 }
  0x93   : > { %19212 = dma.done.wait (%p23582_p5), [#allocation7], 3584   ;;  %p23583_p13 = pmov %p23582_p5 }
  0x94   : > { %v23371_v24 = vmov 1   ;;  %v23373_v25 = vmov 0   ;;  %v19555_v26 = vld [vmem:[%s19539_s30] sm:$0xff]   ;;  %v19558_v27 = vld [vmem:[%s19539_s30 + $0x8] sm:$0xff]   ;;  %vm716_vm0 = vcmask 261120   ;;  %v19578_v30 = vld [vmem:[%s19539_s30 + $0x10] sm:$0xff]  }
  0x95   : > { %19214 = vsyncadd (%p23583_p13), [#allocation7], 4294963712  ;;  %18637 = vset.pattern.permute.xlu1 %v23371_v24  ;;  %18636 = vset.pattern.permute.xlu0 %v23373_v25  ;;  %v19565_v28 = vld [vmem:[%s23338_s2] sm:$0xff]  ;;  %v19592_v32 = vld [vmem:[%s23338_s2 + $0x8] sm:$0xff]  ;;  %v23367_v47 = vmov 2   ;;  %vm19245_vm1 = vmmov 0  }
  0x96   : > { %17571 = vmatprep.subr.bf16.mxu0 %v19555_v26  ;;  %17579 = vmatprep.subr.bf16.mxu1 %v19555_v26  ;;  %v14244_v29 = vld [vmem:[%s23338_s2 + $0x20] sm:$0xff]  ;;  %v14245_v33 = vld [vmem:[%s23338_s2 + $0x28] sm:$0xff]  ;;  %v19601_v34 = vld [vmem:[%s23338_s2 + $0x10] sm:$0xff]  ;;  %vm1966_vm2 = vcmask 523264   ;;  %vm13185_vm3 = vcmask 64512   ;;  %s24022_s13 = sld [smem:[#allocation112_spill]] }
  0x97   : > { %17573 = vmatpush3.bf16.msra.mxu0 %v19555_v26  ;;  %17581 = vmatpush3.bf16.msra.mxu1 %v19555_v26  ;;  %v19583_v31 = vld [vmem:[%s23342_s6] sm:$0xff]  ;;  %v14246_v35 = vld [vmem:[%s23338_s2 + $0x30] sm:$0xff]  ;;  %v19608_v36 = vld [vmem:[%s19539_s30 + $0x18] sm:$0xff]   ;;  %s24039_s25 = sld [smem:[#allocation110_spill]]  ;;  %s24041_s14 = sld [smem:[#allocation111_spill]] }
  0x98   : > { %17575 = vmatprep.subr.bf16.mxu0 %v19558_v27  ;;  %17583 = vmatprep.subr.bf16.mxu1 %v19558_v27  ;;  %v19616_v37 = vld [vmem:[%s23342_s6 + $0x8] sm:$0xff]  ;;  %v19624_v38 = vld [vmem:[%s23338_s2 + $0x18] sm:$0xff]  ;;  %v19639_v40 = vld [vmem:[%s23342_s6 + $0x10] sm:$0xff]  ;;  %s14857_s23 = sshll.u32 %s19346_s29, 4  ;;  %s636_s15 = scalar_lea.vmem [#allocation9], %s19535_s11 }
  0x99   : > { %15861 = vmatprep.mubr.msk.f32.mxu0 %vm716_vm0, %v19565_v28  ;;  %15875 = vmatprep.mubr.msk.f32.mxu1 %vm716_vm0, %v14244_v29  ;;  %v14247_v39 = vld [vmem:[%s23338_s2 + $0x38] sm:$0xff]  ;;  %v14248_v42 = vld [vmem:[%s23338_s2 + $0x40] sm:$0xff]  ;;  %v14249_v43 = vld [vmem:[%s23338_s2 + $0x48] sm:$0xff]  ;;  %s14125_s24 = sshll.u32 %s636_s15, 4  ;;  %s24043_s21 = sld [smem:[#allocation113_spill]]  ;;  %s23294_s24 = int_to_ptr.vmem [resolvable:$true] %s14125_s24 }
  0x9a   : > { %815 = vperm.xlu1 %18637, %v19583_v31   ;;  %698 = vperm.xlu0 %18636, %v19583_v31   ;;  %v19646_v41 = vld [vmem:[%s23342_s6 + $0x18] sm:$0xff]  ;;  %v14250_v44 = vld [vmem:[%s23338_s2 + $0x50] sm:$0xff]  ;;  %s14113_s19 = scalar_lea.sflag [#allocation5], %s19535_s11  ;;  %s19163_s22 = scalar_lea.vmem %s23294_s24, 16 }
  0x9b   : > { %17577 = vmatpush3.bf16.msra.mxu0 %v19558_v27  ;;  %17585 = vmatpush3.bf16.msra.mxu1 %v19558_v27  ;;  %v14251_v45 = vld [vmem:[%s23338_s2 + $0x58] sm:$0xff]  ;;  %v19685_v46 = vld [vmem:[#allocation8] sm:$0xff]  ;;  %p19164_p0 = scmp.ne.s32.totalorder %s23294_s24, %s19163_s22  ;;  %s19254_s29 = smov [#allocation9]  }
  0x9c   : > { %17595 = vmatprep.subr.bf16.mxu1 %v19578_v30  ;;  %17587 = vmatprep.subr.bf16.mxu0 %v19555_v26  ;;  %v19729_v23 = vld [vmem:[#allocation8 + $0x8] sm:$0xff]  ;;  %s19167_s10 = sshll.u32 %s19254_s29, 4  ;;  %s19168_s10 = int_to_ptr.vmem [resolvable:$false] %s19167_s10 }
  0x9d   : > { %p19170_p10 = scmp.lt.s32.totalorder %s23294_s24, %s19168_s10 }
  0x9e   : > { %15862 = vmatmul.mubr.msk.f32.vlgmr.msra.gmra.mrb[0].mxu0 %vm716_vm0, %v19592_v32  ;;  %15876 = vmatmul.mubr.msk.f32.vlgmr.msra.gmra.mrb[0].mxu1 %vm716_vm0, %v14245_v33 }
  0x9f   : > { %17597 = vmatpush3.bf16.msra.mxu1 %v19578_v30  ;;  %15864 = vmatprep.mubr.msk.f32.mxu0 %vm716_vm0, %v19601_v34  ;;  %s23292_s18 = scalar_lea.hbm %s24043_s21, %s14857_s23 }
  0xa0   : > { %15878 = vmatprep.mubr.msk.f32.mxu1 %vm716_vm0, %v14246_v35  ;;  %17599 = vmatprep.subr.bf16.mxu1 %v19608_v36 }
  0xa1   : > { %819 = vperm.xlu1 %18637, %v19616_v37   ;;  %703 = vperm.xlu0 %18636, %v19616_v37  }
  0xa2   : > { %15865 = vmatmul.mubr.msk.f32.gmra.mrb[2].mxu0 %vm716_vm0, %v19624_v38  ;;  %15879 = vmatmul.mubr.msk.f32.gmra.mrb[2].mxu1 %vm716_vm0, %v14247_v39 }
  0xa3   : > { %17601 = vmatpush3.bf16.msra.mxu1 %v19608_v36  ;;  %15903 = vmatprep.mubr.msk.f32.mxu1 %vm716_vm0, %v14244_v29 }
  0xa4   : > { %17589 = vmatpush3.bf16.msra.mxu0 %v19555_v26  ;;  %15889 = vmatprep.mubr.msk.f32.mxu0 %vm716_vm0, %v14248_v42 }
  0xa5   : > { %18638 = vset.pattern.permute.xlu1 %v23373_v25  ;;  %708 = vperm.xlu0 %18636, %v19639_v40  }
  0xa6   : > { %15904 = vmatmul.mubr.msk.f32.vlgmr.msra.gmra.mrb[4].mxu1 %vm716_vm0, %v14245_v33  ;;  %713 = vperm.xlu1 %18638, %v19646_v41  }
  0xa7   : > { %15906 = vmatprep.mubr.msk.f32.mxu1 %vm716_vm0, %v14246_v35  ;;  %17591 = vmatprep.subr.bf16.mxu0 %v19558_v27  ;;  %v19733_v35 = vld [vmem:[#allocation8 + $0x10] sm:$0xff] }
  0xa8   : > { %17593 = vmatpush3.bf16.msra.mxu0 %v19558_v27 }
  0xa9   : > { %18639 = vset.pattern.permute.xlu0 %v23371_v24  ;;  %17603 = vmatprep.subr.bf16.mxu0 %v19578_v30 }
  0xaa   : > { %15907 = vmatmul.mubr.msk.f32.gmra.mrb[6].mxu1 %vm716_vm0, %v14247_v39  ;;  %18640 = vset.pattern.permute.xlu1 %v23371_v24 }
  0xab   : > { %827 = vperm.xlu1 %18640, %v19646_v41   ;;  %823 = vperm.xlu0 %18639, %v19639_v40  }
  0xac   : > { %15890 = vmatmul.mubr.msk.f32.vlgmr.msra.gmra.mrb[4].mxu0 %vm716_vm0, %v14249_v43  ;;  %15931 = vmatprep.mubr.msk.f32.mxu1 %vm716_vm0, %v19685_v46 }
  0xad   : > { %17605 = vmatpush3.bf16.msra.mxu0 %v19578_v30  ;;  %15892 = vmatprep.mubr.msk.f32.mxu0 %vm716_vm0, %v14250_v44 }
  0xae   : > { %17607 = vmatprep.subr.bf16.mxu0 %v19608_v36 }
  0xaf   : > { %18641 = vset.pattern.permute.xlu1 %v23367_v47  ;;  %18642 = vset.pattern.permute.xlu0 %v23367_v47 }
  0xb0   : > { %15893 = vmatmul.mubr.msk.f32.gmra.mrb[6].mxu0 %vm716_vm0, %v14251_v45  ;;  %928 = vperm.xlu1 %18641, %v19583_v31  }
  0xb1   : > { %17609 = vmatpush3.bf16.msra.mxu0 %v19608_v36  ;;  %15917 = vmatprep.mubr.msk.f32.mxu0 %vm716_vm0, %v14248_v42 }
  0xb2   : > { %932 = vperm.xlu0 %18642, %v19616_v37  }
  0xb4   : > { %15918 = vmatmul.mubr.msk.f32.vlgmr.msra.gmra.mrb[8].mxu0 %vm716_vm0, %v14249_v43  ;;  %936 = vperm.xlu1 %18641, %v19639_v40   ;;  %v19741_v43 = vld [vmem:[#allocation8 + $0x18] sm:$0xff] }
  0xb5   : > { %15920 = vmatprep.mubr.msk.f32.mxu0 %vm716_vm0, %v14250_v44 }
  0xb8   : > { %15921 = vmatmul.mubr.msk.f32.gmra.mrb[10].mxu0 %vm716_vm0, %v14251_v45  ;;  %940 = vperm.xlu1 %18641, %v19646_v41  }
  0xb9   : > { %15945 = vmatprep.mubr.msk.f32.mxu0 %vm716_vm0, %v19685_v46 }
 0x119   : > { %v816_v48 = vpop.permute.xlu1 %815  ;;  %v19697_v49 = vpop.permute.xlu0 %698 }
 0x120   : > { %v820_v50 = vpop.permute.xlu1 %819  ;;  %v19699_v51 = vpop.permute.xlu0 %703 }
 0x124   : > { %v19703_v53 = vpop.permute.xlu0 %708 }
 0x125   : > { %v19701_v52 = vpop.permute.xlu1 %713 }
 0x12a   : > { %v828_v62 = vpop.permute.xlu1 %827  ;;  %v824_v0 = vpop.permute.xlu0 %823 }
 0x171   : > { %v15863_v54 = vpop.f32.mrb[0].mxu0  ;;  %v15877_v55 = vpop.f32.mrb[0].mxu1 }
 0x172   : > { %v801_v56 = vadd.f32 %v15863_v54, %v19699_v51  ;;  %v19706_v57 = vadd.f32 %v15877_v55, %v820_v50  ;;  %v795_v58 = vpop.f32.mrb[1].mxu0  ;;  %v908_v59 = vpop.f32.mrb[1].mxu1 }
 0x173   : > { %v796_v60 = vadd.f32 %v795_v58, %v19697_v49  ;;  %v19709_v61 = vadd.f32 %v908_v59, %v816_v48 }
 0x174   : > { %v1211_v63 = vmul.f32 %v19706_v57, %v801_v56 }
 0x175   : > { %v1210_v1 = vmul.f32 %v19709_v61, %v796_v60  ;;  %v15866_v2 = vpop.f32.mrb[2].mxu0  ;;  %v15880_v3 = vpop.f32.mrb[2].mxu1 }
 0x176   : > { %v811_v4 = vadd.f32 %v15866_v2, %v19701_v52  ;;  %v19714_v5 = vadd.f32 %v15880_v3, %v828_v62  ;;  %v805_v6 = vpop.f32.mrb[3].mxu0  ;;  %v918_v7 = vpop.f32.mrb[3].mxu1 }
 0x177   : > { %v806_v8 = vadd.f32 %v805_v6, %v19703_v53  ;;  %v19717_v9 = vadd.f32 %v918_v7, %v824_v0  ;;  %v17610_v10 = vpack.c.bf16 %v1211_v63, %v1210_v1 }
 0x178   : > { %v1213_v11 = vmul.f32 %v19714_v5, %v811_v4 }
 0x179   : > { %v1212_v12 = vmul.f32 %v19717_v9, %v806_v8  ;;  %v15905_v13 = vpop.f32.mrb[4].mxu1  ;;  %17611 = vmatprep.subr.bf16.mxu1 %v17610_v10 }
 0x17a   : > { %v19721_v14 = vadd.f32 %v15905_v13, %v820_v50  ;;  %v1106_v15 = vpop.f32.mrb[5].mxu1  ;;  %17613 = vmatpush3.bf16.msra.mxu1 %v17610_v10 }
 0x17b   : > { %v19723_v16 = vadd.f32 %v1106_v15, %v816_v48  ;;  %v17614_v17 = vpack.c.bf16 %v1213_v11, %v1212_v12 }
 0x17c   : > { %v1312_v18 = vmul.f32 %v19721_v14, %v801_v56 }
 0x17d   : > { %v1311_v19 = vmul.f32 %v19723_v16, %v796_v60  ;;  %v15908_v20 = vpop.f32.mrb[6].mxu1  ;;  %17615 = vmatprep.subr.bf16.mxu1 %v17614_v17  ;;  %v19770_v60 = vld [vmem:[%s23339_s3] sm:$0xff] }
 0x17e   : > { %v19727_v21 = vadd.f32 %v15908_v20, %v828_v62  ;;  %v1116_v22 = vpop.f32.mrb[7].mxu1  ;;  %17617 = vmatpush3.bf16.msra.mxu1 %v17614_v17  ;;  %v23365_v62 = vmov 3  }
 0x17f   : > { %v19731_v29 = vadd.f32 %v1116_v22, %v824_v0  ;;  %v17618_v33 = vpack.c.bf16 %v1312_v18, %v1311_v19  ;;  %v19751_v45 = vpop.f32.mrb[4].mxu0  ;;  %18644 = vset.pattern.permute.xlu1 %v23365_v62  ;;  %18643 = vset.pattern.permute.xlu0 %v23365_v62 }
 0x180   : > { %v1314_v39 = vmul.f32 %v19727_v21, %v811_v4  ;;  %v19753_v48 = vpop.f32.mrb[5].mxu0  ;;  %1461 = vperm.xlu1 %18644, %v19616_v37   ;;  %1457 = vperm.xlu0 %18643, %v19583_v31  }
 0x181   : > { %v1313_v42 = vmul.f32 %v19731_v29, %v806_v8  ;;  %17619 = vmatprep.subr.bf16.mxu0 %v17618_v33  ;;  %15932 = vmatmul.mubr.msk.f32.vlgmr.msra.gmra.mrb[8].mxu1 %vm716_vm0, %v19729_v23 }
 0x182   : > { %17621 = vmatpush3.bf16.msra.mxu0 %v17618_v33  ;;  %15934 = vmatprep.mubr.msk.f32.mxu1 %vm716_vm0, %v19733_v35 }
 0x183   : > { %v17622_v44 = vpack.c.bf16 %v1314_v39, %v1313_v42  ;;  %v19755_v50 = vpop.f32.mrb[6].mxu0 }
 0x184   : > { %v19757_v54 = vpop.f32.mrb[7].mxu0  ;;  %1465 = vperm.xlu1 %18644, %v19639_v40   ;;  %1469 = vperm.xlu0 %18643, %v19646_v41  }
 0x185   : > { %17623 = vmatprep.subr.bf16.mxu0 %v17622_v44  ;;  %15935 = vmatmul.mubr.msk.f32.gmra.mrb[10].mxu1 %vm716_vm0, %v19741_v43 }
 0x186   : > { %17625 = vmatpush3.bf16.msra.mxu0 %v17622_v44  ;;  %15959 = vmatprep.mubr.msk.f32.mxu1 %vm716_vm0, %v19770_v60 }
 0x187   : > { %v19759_v55 = vpop.f32.mrb[8].mxu0 }
 0x188   : > { %v19761_v56 = vpop.f32.mrb[9].mxu0 }
 0x189   : > { %15946 = vmatmul.mubr.msk.f32.vlgmr.msra.gmra.mrb[12].mxu0 %vm716_vm0, %v19729_v23 }
 0x18a   : > { %15948 = vmatprep.mubr.msk.f32.mxu0 %vm716_vm0, %v19733_v35 }
 0x18b   : > { %v19763_v58 = vpop.f32.mrb[10].mxu0 }
 0x18c   : > { %v19765_v59 = vpop.f32.mrb[11].mxu0 }
 0x18d   : > { %15949 = vmatmul.mubr.msk.f32.gmra.mrb[14].mxu0 %vm716_vm0, %v19741_v43 }
 0x254   : > { %v15933_v63 = vpop.f32.mrb[8].mxu1 }
 0x255   : > { %v1292_v0 = vpop.f32.mrb[9].mxu1 }
 0x258   : > { %v15936_v1 = vpop.f32.mrb[10].mxu1 }
 0x259   : > { %v1302_v2 = vpop.f32.mrb[11].mxu1 }
 0x25c   : > { %v15947_v3 = vpop.f32.mrb[12].mxu0 }
 0x25d   : > { %v1401_v4 = vmax.f32 %v15933_v63, %v15947_v3  ;;  %v1381_v6 = vpop.f32.mrb[13].mxu0 }
 0x25e   : > { %v1400_v7 = vmax.f32 %v1292_v0, %v1381_v6 }
 0x25f   : > { %v1405_v8 = vsub.f32 %v15933_v63, %v1401_v4  ;;  %v1417_v10 = vsub.f32 %v15947_v3, %v1401_v4 }
 0x260   : > { %v1404_v11 = vsub.f32 %v1292_v0, %v1400_v7  ;;  %v1416_v12 = vsub.f32 %v1381_v6, %v1400_v7  ;;  %v15950_v13 = vpop.f32.mrb[14].mxu0 }
 0x261   : > { %v1410_v15 = vmul.f32 1.442695, %v1405_v8  ;;  %v1422_v17 = vmul.f32 1.442695, %v1417_v10  ;;  %v1403_v18 = vmax.f32 %v15936_v1, %v15950_v13  ;;  %v1391_v19 = vpop.f32.mrb[15].mxu0 }
 0x262   : > { %v1408_v20 = vmul.f32 1.442695, %v1404_v11  ;;  %v1420_v22 = vmul.f32 1.442695, %v1416_v12  ;;  %v1402_v33 = vmax.f32 %v1302_v2, %v1391_v19 }
 0x263   : > { %18799 = vpow2.f32 %v1410_v15  ;;  %v1407_v39 = vsub.f32 %v15936_v1, %v1403_v18  ;;  %v1419_v42 = vsub.f32 %v15950_v13, %v1403_v18  ;;  %v929_v1 = vpop.permute.xlu1 %928  ;;  %v933_v18 = vpop.permute.xlu0 %932 }
 0x264   : > { %18801 = vpow2.f32 %v1422_v17  ;;  %v1406_v44 = vsub.f32 %v1302_v2, %v1402_v33  ;;  %v1418_v62 = vsub.f32 %v1391_v19, %v1402_v33  ;;  %v19784_v33 = vadd.f32 %v19759_v55, %v933_v18 }
 0x265   : > { %18803 = vpow2.f32 %v1408_v20  ;;  %v1414_v47 = vmul.f32 1.442695, %v1407_v39  ;;  %v1426_v63 = vmul.f32 1.442695, %v1419_v42  ;;  %v19781_v20 = vadd.f32 %v19751_v45, %v933_v18 }
 0x266   : > { %18805 = vpow2.f32 %v1420_v22  ;;  %v1412_v0 = vmul.f32 1.442695, %v1406_v44  ;;  %v1424_v3 = vmul.f32 1.442695, %v1418_v62 }
 0x267   : > { %18807 = vpow2.f32 %v1414_v47  ;;  %v937_v47 = vpop.permute.xlu1 %936 }
 0x268   : > { %18809 = vpow2.f32 %v1426_v63  ;;  %v19787_v63 = vadd.f32 %v19753_v48, %v929_v1 }
 0x269   : > { %18811 = vpow2.f32 %v1412_v0  ;;  %v19790_v0 = vadd.f32 %v19761_v56, %v929_v1  ;;  %v19800_v56 = vadd.f32 %v19757_v54, %v937_v47 }
 0x26a   : > { %18813 = vpow2.f32 %v1424_v3 }
 0x26b   : > { %v941_v22 = vpop.permute.xlu1 %940 }
 0x26d   : > { %v18800_v4 = vpop.eup %18799 }
 0x26e   : > { %v18802_v6 = vpop.eup %18801 }
 0x26f   : > { %v18804_v7 = vpop.eup %18803  ;;  %v1429_v8 = vadd.f32 %v18802_v6, %v18800_v4 }
 0x270   : > { %v18806_v10 = vpop.eup %18805 }
 0x271   : > { %v18808_v11 = vpop.eup %18807  ;;  %18815 = vrcp.f32 %v1429_v8  ;;  %v1428_v2 = vadd.f32 %v18806_v10, %v18804_v7 }
 0x272   : > { %v18810_v12 = vpop.eup %18809 }
 0x273   : > { %v18812_v13 = vpop.eup %18811  ;;  %18817 = vrcp.f32 %v1428_v2  ;;  %v1431_v15 = vadd.f32 %v18810_v12, %v18808_v11 }
 0x274   : > { %v18814_v17 = vpop.eup %18813 }
 0x275   : > { %18819 = vrcp.f32 %v1431_v15  ;;  %v1430_v62 = vadd.f32 %v18814_v17, %v18812_v13 }
 0x277   : > { %18821 = vrcp.f32 %v1430_v62  ;;  %v19795_v62 = vadd.f32 %v19755_v50, %v941_v22 }
 0x27b   : > { %v18816_v19 = vpop.eup %18815 }
 0x27c   : > { %v1437_v39 = vmul.f32 %v18816_v19, %v18800_v4  ;;  %v1445_v42 = vmul.f32 %v18816_v19, %v18802_v6 }
 0x27d   : > { %v18818_v44 = vpop.eup %18817 }
 0x27e   : > { %v1436_v3 = vmul.f32 %v18818_v44, %v18804_v7  ;;  %v1441_v8 = vmul.f32 %v1437_v39, %v19781_v20  ;;  %v1444_v2 = vmul.f32 %v18818_v44, %v18806_v10  ;;  %v1449_v45 = vmul.f32 %v1445_v42, %v19784_v33 }
 0x27f   : > { %v18820_v15 = vpop.eup %18819  ;;  %v19803_v7 = vadd.f32 %v19763_v58, %v941_v22  ;;  %v19806_v10 = vadd.f32 %v19765_v59, %v937_v47  ;;  %v19815_v59 = vld [vmem:[%s23339_s3 + $0x8] sm:$0xff]  ;;  %v23375_v47 = vmov 0.0  }
 0x280   : > { %v1440_v55 = vmul.f32 %v1436_v3, %v19787_v63  ;;  %v1448_v4 = vmul.f32 %v1444_v2, %v19790_v0  ;;  %v1453_v6 = vadd.f32 %v1449_v45, %v1441_v8  ;;  %v1439_v48 = vmul.f32 %v18820_v15, %v18808_v11  ;;  %15973 = vmatprep.mubr.msk.f32.mxu0 %vm19245_vm1, %v23375_v47  ;;  %v19839_v2 = vpop.permute.xlu0 %1457  ;;  %v19841_v45 = vpop.permute.xlu1 %1461 }
 0x281   : > { %v18822_v18 = vpop.eup %18821  ;;  %v1447_v1 = vmul.f32 %v18820_v15, %v18810_v12  ;;  %v19820_v12 = vld [vmem:[%s23339_s3 + $0x10] sm:$0xff]  ;;  %23585 = vst [vmem:[#allocation19_spill] sm:$0xff] %v19839_v2  ;;  %23586 = vst [vmem:[#allocation20_spill] sm:$0xff] %v19841_v45  ;;  %v14863_v15 = vunpack.c.h.bf16 %v19555_v26 }
 0x282   : > { %v1452_v19 = vadd.f32 %v1448_v4, %v1440_v55  ;;  %v1438_v50 = vmul.f32 %v18822_v18, %v18812_v13  ;;  %v1443_v39 = vmul.f32 %v1439_v48, %v19795_v62  ;;  %v1446_v42 = vmul.f32 %v18822_v18, %v18814_v17  ;;  %v19829_v13 = vld [vmem:[%s23339_s3 + $0x18] sm:$0xff] }
 0x283   : > { %v1451_v44 = vmul.f32 %v1447_v1, %v19803_v7  ;;  %23584 = vst [vmem:[#allocation18_spill] sm:$0xff] %v19829_v13  ;;  %v23383_v17 = vmov 0.0|0.0   ;;  %v14862_v4 = vunpack.c.l.bf16 %v19555_v26 }
 0x284   : > { %v17626_v3 = vpack.c.bf16 %v1453_v6, %v1452_v19  ;;  %v1442_v11 = vmul.f32 %v1438_v50, %v19800_v56  ;;  %v1450_v54 = vmul.f32 %v1446_v42, %v19806_v10  ;;  %17634 = vmatprep.subr.bf16.mxu0 %v23383_v17  ;;  %v14867_v19 = vunpack.c.h.bf16 %v19558_v27  ;;  %v19848_v50 = vpop.permute.xlu0 %1469 }
 0x285   : > { %v1455_v8 = vadd.f32 %v1451_v44, %v1443_v39  ;;  %23587 = vst [vmem:[#allocation21_spill] sm:$0xff] %v19848_v50  ;;  %v14866_v44 = vunpack.c.l.bf16 %v19558_v27  ;;  %v23369_v27 = vmov 4  }
 0x286   : > { %17627 = vmatprep.subr.bf16.mxu1 %v17626_v3  ;;  %v1454_v58 = vadd.f32 %v1450_v54, %v1442_v11  ;;  %18645 = vset.pattern.permute.xlu1 %v23369_v27 }
 0x287   : > { %17629 = vmatpush3.bf16.msra.mxu1 %v17626_v3  ;;  %v19851_v3 = vpop.permute.xlu1 %1465  ;;  %18646 = vset.pattern.permute.xlu0 %v23369_v27 }
 0x288   : > { %v17630_v22 = vpack.c.bf16 %v1455_v8, %v1454_v58  ;;  %23588 = vst [vmem:[#allocation22_spill] sm:$0xff] %v19851_v3  ;;  %1738 = vperm.xlu1 %18645, %v19583_v31   ;;  %1742 = vperm.xlu0 %18646, %v19616_v37  }
 0x28a   : > { %17631 = vmatprep.subr.bf16.mxu1 %v17630_v22 }
 0x28b   : > { %17633 = vmatpush3.bf16.msra.mxu1 %v17630_v22 }
 0x28c   : > { %17640 = vmatprep.subr.bf16.mxu1 %v23383_v17  ;;  %1746 = vperm.xlu0 %18646, %v19639_v40  }
 0x28e   : > { %15960 = vmatmul.mubr.msk.f32.vlgmr.msra.gmra.mrb[12].mxu1 %vm716_vm0, %v19815_v59 }
 0x28f   : > { %15962 = vmatprep.mubr.msk.f32.mxu1 %vm716_vm0, %v19820_v12 }
 0x292   : > { %15963 = vmatmul.mubr.msk.f32.gmra.mrb[14].mxu1 %vm716_vm0, %v19829_v13 }
 0x293   : > { %15984 = vmatprep.mubr.msk.f32.mxu1 %vm19245_vm1, %v23375_v47 }
 0x361   : > { %v15961_v55 = vpop.f32.mrb[12].mxu1 }
 0x362   : > { %v1556_v6 = vadd.f32 %v15961_v55, %v19841_v45  ;;  %v1550_v48 = vpop.f32.mrb[13].mxu1  ;;  %v23381_v55 = vmov 0.03125  }
 0x363   : > { %v1551_v18 = vadd.f32 %v1550_v48, %v19839_v2 }
 0x364   : > { %v1570_v1 = vadd.f32 %v14863_v15, %v1556_v6  ;;  %v1646_v6 = vlaneseq }
 0x365   : > { %v1569_v39 = vadd.f32 %v14862_v4, %v1551_v18  ;;  %v15964_v42 = vpop.f32.mrb[14].mxu1  ;;  %v23377_v4 = vmov 5  }
 0x366   : > { %v1566_v11 = vadd.f32 %v15964_v42, %v19848_v50  ;;  %v1560_v54 = vpop.f32.mrb[15].mxu1  ;;  %18647 = vset.pattern.permute.xlu1 %v23377_v4  ;;  %18649 = vset.pattern.permute.xlu0 %v23377_v4  ;;  %v1647_v48 = vshrl.u32 %v1646_v6, 7 }
 0x367   : > { %v17635_v26 = vpack.c.bf16 %v1570_v1, %v1569_v39  ;;  %v1561_v8 = vadd.f32 %v1560_v54, %v19851_v3  ;;  %1758 = vperm.xlu1 %18647, %v19583_v31   ;;  %1766 = vperm.xlu0 %18649, %v19639_v40  }
 0x368   : > { %v1572_v58 = vadd.f32 %v14867_v19, %v1566_v11  ;;  %v19872_v18 = vsub.s32 0, %v1647_v48 }
 0x369   : > { %v1571_v22 = vadd.f32 %v14866_v44, %v1561_v8  ;;  %17636 = vmatpush3.bf16.msra.mxu0 %v17635_v26 }
 0x36a   : > { %17637 = vmatprep.subr.bf16.mxu0 %v23383_v17 }
 0x36b   : > { %v17638_v15 = vpack.c.bf16 %v1572_v58, %v1571_v22  ;;  %1762 = vperm.xlu1 %18647, %v19616_v37  }
 0x36d   : > { %17639 = vmatpush3.bf16.msra.mxu0 %v17638_v15 }
 0x36f   : > { %18648 = vset.pattern.permute.xlu1 %v23369_v27 }
 0x370   : > { %15974 = vmatmul.mubr.msk.f32.vlgmr.msra.gmra.mrb[16].mxu0 %vm716_vm0, %v23381_v55  ;;  %1750 = vperm.xlu1 %18648, %v19646_v41  }
 0x374   : > { %18650 = vset.pattern.permute.xlu1 %v23377_v4 }
 0x375   : > { %1770 = vperm.xlu1 %18650, %v19646_v41  }
 0x443   : > { %v1642_v19 = vpop.f32.mrb[16].mxu0 }
 0x444   : > { %v1649_v42 = vrot.slane %v1642_v19, %v19872_v18  ;;  %v15975_v44 = vpop.f32.mrb[17].mxu0  ;;  %v19907_v19 = vpop.permute.xlu0 %1742 }
 0x445   : > { %23592 = vst [vmem:[#allocation26_spill] sm:$0xff] %v19907_v19 }
 0x446   : > { %v1650_v11 = vsub.f32 %v1569_v39, %v1649_v42  ;;  %v1651_v54 = vsub.f32 %v1570_v1, %v1649_v42  ;;  %v1652_v26 = vsub.f32 %v1571_v22, %v1649_v42  ;;  %v1653_v8 = vsub.f32 %v1572_v58, %v1649_v42  ;;  %v19881_v39 = vld [vmem:[%s23340_s4] sm:$0xff]  ;;  %v695_v58 = vld [vmem:[%s23342_s6 + $0x38] sm:$0xff]  ;;  %v19903_v22 = vpop.permute.xlu1 %1738 }
 0x447   : > { %23589 = vst [vmem:[#allocation23_spill] sm:$0xff] %v19881_v39  ;;  %15995 = vmatprep.mubr.msk.f32.mxu0 %vm716_vm0, %v19881_v39  ;;  %v23379_v1 = vmov 8   ;;  %23590 = vst [vmem:[#allocation24_spill] sm:$0xff] %v19903_v22 }
 0x448   : > { %v1654_v15 = vmul.f32 %v1650_v11, %v1650_v11  ;;  %v1655_v27 = vmul.f32 %v1651_v54, %v1651_v54  ;;  %v1656_v25 = vmul.f32 %v1652_v26, %v1652_v26  ;;  %v1657_v47 = vmul.f32 %v1653_v8, %v1653_v8  ;;  %18651 = vset.pattern.permute.xlu1 %v23379_v1  ;;  %v19911_v44 = vpop.permute.xlu0 %1746 }
 0x449   : > { %18652 = vset.pattern.permute.xlu0 %v23379_v1  ;;  %1778 = vperm.xlu1 %18651, %v19583_v31   ;;  %23594 = vst [vmem:[#allocation28_spill] sm:$0xff] %v19911_v44 }
 0x44a   : > { %v17641_v24 = vpack.c.bf16 %v1655_v27, %v1654_v15  ;;  %v17644_v4 = vpack.c.bf16 %v1657_v47, %v1656_v25  ;;  %1782 = vperm.xlu0 %18652, %v19616_v37   ;;  %v694_v25 = vld [vmem:[%s23342_s6 + $0x30] sm:$0xff]  ;;  %v693_v47 = vld [vmem:[%s23342_s6 + $0x28] sm:$0xff]  ;;  %v19905_v48 = vpop.permute.xlu1 %1758 }
 0x44b   : > { %23591 = vst [vmem:[#allocation25_spill] sm:$0xff] %v19905_v48 }
 0x44c   : > { %17642 = vmatpush3.bf16.msra.mxu1 %v17641_v24  ;;  %v692_v24 = vld [vmem:[%s23342_s6 + $0x20] sm:$0xff] }
 0x44d   : > { %17643 = vmatprep.subr.bf16.mxu1 %v23383_v17  ;;  %1786 = vperm.xlu1 %18651, %v19639_v40  }
 0x44e   : > { %1795 = vperm.xlu0 %18652, %v692_v24   ;;  %v19909_v42 = vpop.permute.xlu1 %1762 }
 0x44f   : > { %23593 = vst [vmem:[#allocation27_spill] sm:$0xff] %v19909_v42 }
 0x450   : > { %17645 = vmatpush3.bf16.msra.mxu1 %v17644_v4 }
 0x451   : > { %1790 = vperm.xlu1 %18651, %v19646_v41  }
 0x452   : > { %1805 = vperm.xlu0 %18652, %v694_v25   ;;  %v19913_v15 = vpop.permute.xlu1 %1750 }
 0x453   : > { %15985 = vmatmul.mubr.msk.f32.vlgmr.msra.gmra.mrb[16].mxu1 %vm716_vm0, %v23381_v55  ;;  %23595 = vst [vmem:[#allocation29_spill] sm:$0xff] %v19913_v15 }
 0x455   : > { %1800 = vperm.xlu1 %18651, %v693_v47  }
 0x459   : > { %1810 = vperm.xlu1 %18651, %v695_v58  }
 0x526   : > { %v1724_v27 = vpop.f32.mrb[16].mxu1 }
 0x527   : > { %v1725_v4 = vadd.f32 1e-05, %v1724_v27  ;;  %v15986_v6 = vpop.f32.mrb[17].mxu1  ;;  %v19916_v27 = vpop.permute.xlu1 %1770 }
 0x528   : > { %23596 = vst [vmem:[#allocation30_spill] sm:$0xff] %v19916_v27  ;;  %v19918_v6 = vpop.permute.xlu0 %1766 }
 0x529   : > { %18823 = vrsqrt.f32 %v1725_v4  ;;  %23597 = vst [vmem:[#allocation31_spill] sm:$0xff] %v19918_v6 }
 0x533   : > { %v18824_v24 = vpop.eup %18823 }
 0x534   : > { %v1732_v25 = vrot.slane %v18824_v24, %v19872_v18  ;;  %v19963_v24 = vld [vmem:[%s23340_s4 + $0x20] sm:$0xff] }
 0x535   : > { %23602 = vst [vmem:[#allocation35_spill] sm:$0xff] %v19963_v24 }
 0x536   : > { %v1733_v47 = vmul.f32 %v1732_v25, %v1650_v11  ;;  %v1734_v58 = vmul.f32 %v1732_v25, %v1651_v54  ;;  %v1735_v1 = vmul.f32 %v1732_v25, %v1652_v26  ;;  %v1736_v55 = vmul.f32 %v1732_v25, %v1653_v8  ;;  %v19972_v25 = vld [vmem:[%s23340_s4 + $0x28] sm:$0xff] }
 0x537   : > { %23603 = vst [vmem:[#allocation36_spill] sm:$0xff] %v19972_v25 }
 0x538   : > { %v1753_v4 = vmul.f32 %v19903_v22, %v1733_v47  ;;  %v1754_v17 = vmul.f32 %v19907_v19, %v1734_v58  ;;  %v1755_v39 = vmul.f32 %v19911_v44, %v1735_v1  ;;  %v1756_v3 = vmul.f32 %v19913_v15, %v1736_v55  ;;  %v19977_v47 = vld [vmem:[%s23340_s4 + $0x30] sm:$0xff]  ;;  %v19986_v58 = vld [vmem:[%s23340_s4 + $0x38] sm:$0xff] }
 0x539   : > { %v23600_v55 = vmov 0.0|0.0   ;;  %23604 = vst [vmem:[#allocation37_spill] sm:$0xff] %v19977_v47  ;;  %23605 = vst [vmem:[#allocation38_spill] sm:$0xff] %v19986_v58 }
 0x53a   : > { %v19925_v50 = vadd.f32 %v19905_v48, %v1753_v4  ;;  %v19928_v11 = vadd.f32 %v19909_v42, %v1754_v17  ;;  %v19931_v54 = vadd.f32 %v19916_v27, %v1756_v3  ;;  %v19934_v26 = vadd.f32 %v19918_v6, %v1755_v39  ;;  %v19943_v17 = vld [vmem:[%s23340_s4 + $0x8] sm:$0xff]  ;;  %v19948_v3 = vld [vmem:[%s23340_s4 + $0x10] sm:$0xff]  ;;  %v19958_v39 = vld [vmem:[%s23340_s4 + $0x18] sm:$0xff] }
 0x53b   : > { %23598 = vst [vmem:[#allocation32_spill] sm:$0xff] %v19943_v17  ;;  %23599 = vst [vmem:[#allocation33_spill] sm:$0xff] %v19948_v3  ;;  %v23606_v4 = vmov 0.0  }
 0x53c   : > { %v17646_v8 = vpack.c.bf16 %v19928_v11, %v19925_v50  ;;  %v17650_v1 = vpack.c.bf16 %v19931_v54, %v19934_v26  ;;  %23601 = vst [vmem:[#allocation34_spill] sm:$0xff] %v19958_v39 }
 0x53e   : > { %17647 = vmatprep.subr.bf16.mxu0 %v17646_v8 }
 0x53f   : > { %17649 = vmatpush3.bf16.msra.mxu0 %v17646_v8  ;;  %v19992_v8 = vld [vmem:[#allocation6] sm:$0xff] }
 0x540   : > { %17651 = vmatprep.subr.bf16.mxu0 %v17650_v1  ;;  %23607 = vst [vmem:[#allocation39_spill] sm:$0xff] %v19992_v8  ;;  %16023 = vmatprep.mubr.msk.f32.mxu1 %vm1966_vm2, %v19992_v8 }
 0x543   : > { %17653 = vmatpush3.bf16.msra.mxu0 %v17650_v1  ;;  %v23394_v1 = vmov 9  }
 0x544   : > { %17670 = vmatprep.subr.bf16.mxu0 %v23600_v55  ;;  %18654 = vset.pattern.permute.xlu1 %v23394_v1 }
 0x545   : > { %18653 = vset.pattern.permute.xlu0 %v23394_v1  ;;  %1955 = vperm.xlu1 %18654, %v19616_v37  }
 0x546   : > { %15996 = vmatmul.mubr.msk.f32.vlgmr.msra.gmra.mrb[18].mxu0 %vm716_vm0, %v19943_v17  ;;  %1951 = vperm.xlu0 %18653, %v19583_v31  }
 0x547   : > { %15998 = vmatprep.mubr.msk.f32.mxu0 %vm716_vm0, %v19948_v3 }
 0x549   : > { %1959 = vperm.xlu1 %18654, %v19639_v40  }
 0x54a   : > { %15999 = vmatmul.mubr.msk.f32.gmra.mrb[20].mxu0 %vm716_vm0, %v19958_v39  ;;  %1963 = vperm.xlu0 %18653, %v19646_v41  }
 0x54b   : > { %16001 = vmatprep.mubr.msk.f32.mxu0 %vm716_vm0, %v19963_v24 }
 0x54e   : > { %16002 = vmatmul.mubr.msk.f32.gmra.mrb[22].mxu0 %vm716_vm0, %v19972_v25  ;;  %v20006_v25 = vpop.permute.xlu0 %1782 }
 0x54f   : > { %16004 = vmatprep.mubr.msk.f32.mxu0 %vm716_vm0, %v19977_v47 }
 0x552   : > { %16005 = vmatmul.mubr.msk.f32.gmra.mrb[24].mxu0 %vm716_vm0, %v19986_v58  ;;  %v20002_v58 = vpop.permute.xlu1 %1778  ;;  %v20016_v8 = vpop.permute.xlu0 %1795 }
 0x553   : > { %16037 = vmatprep.mubr.msk.f32.mxu0 %vm19245_vm1, %v23606_v4  ;;  %23608 = vst [vmem:[#allocation40_spill] sm:$0xff] %v20002_v58 }
 0x556   : > { %v20004_v47 = vpop.permute.xlu1 %1786 }
 0x55a   : > { %v20008_v24 = vpop.permute.xlu1 %1790 }
 0x55b   : > { %23609 = vst [vmem:[#allocation41_spill] sm:$0xff] %v20008_v24 }
 0x55e   : > { %v20013_v44 = vpop.permute.xlu1 %1800 }
 0x55f   : > { %23610 = vst [vmem:[#allocation42_spill] sm:$0xff] %v20013_v44 }
 0x619   : > { %v15997_v39 = vpop.f32.mrb[18].mxu0 }
 0x61a   : > { %v1909_v3 = vadd.f32 %v15997_v39, %v20006_v25  ;;  %v1903_v1 = vpop.f32.mrb[19].mxu0 }
 0x61b   : > { %v1904_v17 = vadd.f32 %v1903_v1, %v20002_v58 }
 0x61c   : > { %v1943_v27 = vmax.f32 %v1909_v3, 0.0 }
 0x61d   : > { %v1942_v6 = vmax.f32 %v1904_v17, 0.0  ;;  %v16000_v42 = vpop.f32.mrb[20].mxu0 }
 0x61e   : > { %v1919_v48 = vadd.f32 %v16000_v42, %v20008_v24  ;;  %v1913_v15 = vpop.f32.mrb[21].mxu0  ;;  %v20020_v24 = vpop.permute.xlu1 %1810 }
 0x61f   : > { %v17654_v19 = vpack.c.bf16 %v1943_v27, %v1942_v6  ;;  %v1914_v22 = vadd.f32 %v1913_v15, %v20004_v47  ;;  %v20022_v15 = vpop.permute.xlu0 %1805 }
 0x620   : > { %v1945_v2 = vmax.f32 %v1919_v48, 0.0 }
 0x621   : > { %v1944_v45 = vmax.f32 %v1914_v22, 0.0  ;;  %v16003_v13 = vpop.f32.mrb[22].mxu0  ;;  %17655 = vmatprep.subr.bf16.mxu1 %v17654_v19 }
 0x622   : > { %v1929_v39 = vadd.f32 %v16003_v13, %v20013_v44  ;;  %v1923_v1 = vpop.f32.mrb[23].mxu0  ;;  %17657 = vmatpush3.bf16.msra.mxu1 %v17654_v19 }
 0x623   : > { %v17658_v17 = vpack.c.bf16 %v1945_v2, %v1944_v45  ;;  %v1924_v3 = vadd.f32 %v1923_v1, %v20016_v8  ;;  %v20026_v45 = vld [vmem:[#allocation6 + $0x8] sm:$0xff]  ;;  %v20043_v1 = vpop.permute.xlu1 %1955 }
 0x624   : > { %v1947_v42 = vmax.f32 %v1929_v39, 0.0  ;;  %23611 = vst [vmem:[#allocation43_spill] sm:$0xff] %v20026_v45  ;;  %v20028_v39 = vld [vmem:[#allocation6 + $0x10] sm:$0xff]  ;;  %23614 = vst [vmem:[#allocation46_spill] sm:$0xff] %v20043_v1 }
 0x625   : > { %v1946_v58 = vmax.f32 %v1924_v3, 0.0  ;;  %v16006_v27 = vpop.f32.mrb[24].mxu0  ;;  %17659 = vmatprep.subr.bf16.mxu1 %v17658_v17  ;;  %23612 = vst [vmem:[#allocation44_spill] sm:$0xff] %v20028_v39 }
 0x626   : > { %v1939_v48 = vadd.f32 %v16006_v27, %v20020_v24  ;;  %v1933_v22 = vpop.f32.mrb[25].mxu0  ;;  %17661 = vmatpush3.bf16.msra.mxu1 %v17658_v17 }
 0x627   : > { %v17662_v6 = vpack.c.bf16 %v1947_v42, %v1946_v58  ;;  %v1934_v13 = vadd.f32 %v1933_v22, %v20022_v15  ;;  %v20035_v58 = vld [vmem:[#allocation6 + $0x18] sm:$0xff] }
 0x628   : > { %v1949_v44 = vmax.f32 %v1939_v48, 0.0  ;;  %23613 = vst [vmem:[#allocation45_spill] sm:$0xff] %v20035_v58 }
 0x629   : > { %v1948_v19 = vmax.f32 %v1934_v13, 0.0  ;;  %17663 = vmatprep.subr.bf16.mxu1 %v17662_v6 }
 0x62a   : > { %17665 = vmatpush3.bf16.msra.mxu1 %v17662_v6 }
 0x62b   : > { %v17666_v2 = vpack.c.bf16 %v1949_v44, %v1948_v19  ;;  %v20041_v44 = vpop.permute.xlu0 %1951  ;;  %v20051_v19 = vpop.permute.xlu1 %1959 }
 0x62d   : > { %17667 = vmatprep.subr.bf16.mxu1 %v17666_v2 }
 0x62e   : > { %17669 = vmatpush3.bf16.msra.mxu1 %v17666_v2 }
 0x62f   : > { %17676 = vmatprep.subr.bf16.mxu1 %v23600_v55  ;;  %v20048_v22 = vpop.permute.xlu0 %1963 }
 0x631   : > { %16024 = vmatmul.mubr.msk.f32.vlgmr.msra.gmra.mrb[18].mxu1 %vm1966_vm2, %v20026_v45 }
 0x632   : > { %16026 = vmatprep.mubr.msk.f32.mxu1 %vm1966_vm2, %v20028_v39 }
 0x635   : > { %16027 = vmatmul.mubr.msk.f32.gmra.mrb[20].mxu1 %vm1966_vm2, %v20035_v58 }
 0x636   : > { %16048 = vmatprep.mubr.msk.f32.mxu1 %vm19245_vm1, %v23606_v4 }
 0x704   : > { %v16025_v17 = vpop.f32.mrb[18].mxu1 }
 0x705   : > { %v2051_v3 = vadd.f32 %v16025_v17, %v20043_v1  ;;  %v2045_v42 = vpop.f32.mrb[19].mxu1 }
 0x706   : > { %v2046_v27 = vadd.f32 %v2045_v42, %v20041_v44 }
 0x707   : > { %v2065_v48 = vadd.f32 %v2051_v3, %v19928_v11 }
 0x708   : > { %v2064_v6 = vadd.f32 %v2046_v27, %v19925_v50  ;;  %v16028_v13 = vpop.f32.mrb[20].mxu1  ;;  %v23615_v50 = vmov 0.03125  }
 0x709   : > { %v2061_v2 = vadd.f32 %v16028_v13, %v20048_v22  ;;  %v2055_v58 = vpop.f32.mrb[21].mxu1 }
 0x70a   : > { %v17671_v39 = vpack.c.bf16 %v2065_v48, %v2064_v6  ;;  %v2056_v45 = vadd.f32 %v2055_v58, %v20051_v19 }
 0x70b   : > { %v2067_v17 = vadd.f32 %v2061_v2, %v19931_v54 }
 0x70c   : > { %v2066_v1 = vadd.f32 %v2056_v45, %v19934_v26  ;;  %17672 = vmatpush3.bf16.msra.mxu0 %v17671_v39 }
 0x70d   : > { %17673 = vmatprep.subr.bf16.mxu0 %v23600_v55 }
 0x70e   : > { %v17674_v11 = vpack.c.bf16 %v2067_v17, %v2066_v1 }
 0x710   : > { %17675 = vmatpush3.bf16.msra.mxu0 %v17674_v11 }
 0x711   : > { %17683 = vmatprep.subr.bf16.mxu0 %v19578_v30 }
 0x713   : > { %16038 = vmatmul.mubr.msk.f32.vlgmr.msra.gmra.mrb[26].mxu0 %vm716_vm0, %v23615_v50 }
 0x714   : > { %17685 = vmatpush3.bf16.msra.mxu0 %v19578_v30  ;;  %16059 = vmatprep.mubr.msk.f32.mxu0 %vm716_vm0, %v19565_v28  ;;  %v23416_v30 = vmov 6   ;;  %v23418_v28 = vmov 7  }
 0x715   : > { %17687 = vmatprep.subr.bf16.mxu0 %v19608_v36  ;;  %18655 = vset.pattern.permute.xlu1 %v23416_v30 }
 0x716   : > { %18656 = vset.pattern.permute.xlu0 %v23416_v30  ;;  %2230 = vperm.xlu1 %18655, %v19583_v31  }
 0x717   : > { %2234 = vperm.xlu0 %18656, %v19616_v37  }
 0x718   : > { %17689 = vmatpush3.bf16.msra.mxu0 %v19608_v36 }
 0x71a   : > { %18657 = vset.pattern.permute.xlu1 %v23418_v28 }
 0x71b   : > { %16060 = vmatmul.mubr.msk.f32.vlgmr.msra.gmra.mrb[28].mxu0 %vm716_vm0, %v19592_v32  ;;  %2238 = vperm.xlu0 %18656, %v19639_v40   ;;  %v23616_v32 = vmov 0  }
 0x71c   : > { %16062 = vmatprep.mubr.msk.f32.mxu0 %vm716_vm0, %v19601_v34  ;;  %2250 = vperm.xlu1 %18657, %v19583_v31  }
 0x71f   : > { %16063 = vmatmul.mubr.msk.f32.gmra.mrb[30].mxu0 %vm716_vm0, %v19624_v38  ;;  %18659 = vset.pattern.permute.xlu0 %v23418_v28 }
 0x720   : > { %16087 = vmatprep.mubr.msk.f32.mxu0 %vm716_vm0, %v19685_v46  ;;  %2254 = vperm.xlu1 %18657, %v19616_v37  }
 0x721   : > { %2258 = vperm.xlu0 %18659, %v19639_v40  }
 0x724   : > { %18658 = vset.pattern.permute.xlu1 %v23416_v30 }
 0x725   : > { %18662 = vset.pattern.permute.xlu0 %v23616_v32  ;;  %2242 = vperm.xlu1 %18658, %v19646_v41  }
 0x729   : > { %18660 = vset.pattern.permute.xlu1 %v23418_v28 }
 0x72a   : > { %2262 = vperm.xlu1 %18660, %v19646_v41  }
 0x72e   : > { %18661 = vset.pattern.permute.xlu1 %v23616_v32 }
 0x7e6   : > { %v2134_v34 = vpop.f32.mrb[26].mxu0 }
 0x7e7   : > { %v2141_v31 = vrot.slane %v2134_v34, %v19872_v18  ;;  %v16039_v36 = vpop.f32.mrb[27].mxu0 }
 0x7e9   : > { %v20091_v38 = vsub.f32 %v2064_v6, %v2141_v31  ;;  %v20093_v37 = vsub.f32 %v2065_v48, %v2141_v31  ;;  %v20095_v40 = vsub.f32 %v2066_v1, %v2141_v31  ;;  %v20097_v54 = vsub.f32 %v2067_v17, %v2141_v31 }
 0x7eb   : > { %v2146_v26 = vmul.f32 %v20091_v38, %v20091_v38  ;;  %v2147_v41 = vmul.f32 %v20093_v37, %v20093_v37  ;;  %v2148_v39 = vmul.f32 %v20095_v40, %v20095_v40  ;;  %v2149_v58 = vmul.f32 %v20097_v54, %v20097_v54 }
 0x7ed   : > { %v17677_v45 = vpack.c.bf16 %v2147_v41, %v2146_v26  ;;  %v17680_v13 = vpack.c.bf16 %v2149_v58, %v2148_v39 }
 0x7ee   : > { %v16061_v3 = vpop.f32.mrb[28].mxu0 }
 0x7ef   : > { %v2341_v42 = vadd.f32 %v16061_v3, %v19699_v51  ;;  %17678 = vmatpush3.bf16.msra.mxu1 %v17677_v45  ;;  %v2335_v1 = vpop.f32.mrb[29].mxu0 }
 0x7f0   : > { %v2336_v27 = vadd.f32 %v2335_v1, %v19697_v49  ;;  %17679 = vmatprep.subr.bf16.mxu1 %v23600_v55 }
 0x7f1   : > { %v2355_v48 = vmul.f32 %v2341_v42, %v19706_v57  ;;  %v2444_v6 = vmul.f32 %v2341_v42, %v19721_v14 }
 0x7f2   : > { %v2354_v2 = vmul.f32 %v2336_v27, %v19709_v61  ;;  %v2443_v17 = vmul.f32 %v2336_v27, %v19723_v16  ;;  %v16064_v11 = vpop.f32.mrb[30].mxu0 }
 0x7f3   : > { %v2351_v34 = vadd.f32 %v16064_v11, %v19701_v52  ;;  %17681 = vmatpush3.bf16.msra.mxu1 %v17680_v13  ;;  %v2345_v51 = vpop.f32.mrb[31].mxu0 }
 0x7f4   : > { %v2346_v31 = vadd.f32 %v2345_v51, %v19703_v53  ;;  %v17690_v36 = vpack.c.bf16 %v2355_v48, %v2354_v2  ;;  %v17698_v49 = vpack.c.bf16 %v2444_v6, %v2443_v17 }
 0x7f5   : > { %v2357_v26 = vmul.f32 %v2351_v34, %v19714_v5  ;;  %v2446_v57 = vmul.f32 %v2351_v34, %v19727_v21 }
 0x7f6   : > { %v2356_v14 = vmul.f32 %v2346_v31, %v19717_v9  ;;  %v2445_v41 = vmul.f32 %v2346_v31, %v19731_v29  ;;  %16049 = vmatmul.mubr.msk.f32.vlgmr.msra.gmra.mrb[22].mxu1 %vm716_vm0, %v23615_v50  ;;  %17691 = vmatprep.subr.bf16.mxu1 %v17690_v36 }
 0x7f7   : > { %17699 = vmatprep.subr.bf16.mxu0 %v17698_v49  ;;  %17693 = vmatpush3.bf16.msra.mxu1 %v17690_v36 }
 0x7f8   : > { %17701 = vmatpush3.bf16.msra.mxu0 %v17698_v49  ;;  %v17694_v52 = vpack.c.bf16 %v2357_v26, %v2356_v14  ;;  %v17702_v61 = vpack.c.bf16 %v2446_v57, %v2445_v41  ;;  %16073 = vmatprep.mubr.msk.f32.mxu1 %vm716_vm0, %v19685_v46 }
 0x7fa   : > { %17695 = vmatprep.subr.bf16.mxu1 %v17694_v52  ;;  %17703 = vmatprep.subr.bf16.mxu0 %v17702_v61 }
 0x7fb   : > { %17697 = vmatpush3.bf16.msra.mxu1 %v17694_v52 }
 0x7fc   : > { %17705 = vmatpush3.bf16.msra.mxu0 %v17702_v61 }
 0x7fd   : > { %17714 = vmatprep.subr.bf16.mxu0 %v23600_v55 }
 0x7fe   : > { %16074 = vmatmul.mubr.msk.f32.vlgmr.msra.gmra.mrb[24].mxu1 %vm716_vm0, %v19729_v23 }
 0x7ff   : > { %16088 = vmatmul.mubr.msk.f32.vlgmr.msra.gmra.mrb[32].mxu0 %vm716_vm0, %v19729_v23  ;;  %16076 = vmatprep.mubr.msk.f32.mxu1 %vm716_vm0, %v19733_v35 }
 0x800   : > { %16090 = vmatprep.mubr.msk.f32.mxu0 %vm716_vm0, %v19733_v35 }
 0x802   : > { %16077 = vmatmul.mubr.msk.f32.gmra.mrb[26].mxu1 %vm716_vm0, %v19741_v43 }
 0x803   : > { %16091 = vmatmul.mubr.msk.f32.gmra.mrb[34].mxu0 %vm716_vm0, %v19741_v43  ;;  %16101 = vmatprep.mubr.msk.f32.mxu1 %vm716_vm0, %v19770_v60 }
 0x804   : > { %16115 = vmatprep.mubr.msk.f32.mxu0 %vm19245_vm1, %v23606_v4 }
 0x8c9   : > { %v20141_v46 = vpop.f32.mrb[22].mxu1 }
 0x8ca   : > { %v16050_v53 = vpop.f32.mrb[23].mxu1 }
 0x8d1   : > { %v16075_v5 = vpop.f32.mrb[24].mxu1 }
 0x8d2   : > { %v16089_v9 = vpop.f32.mrb[32].mxu0  ;;  %v2424_v16 = vpop.f32.mrb[25].mxu1 }
 0x8d3   : > { %v2533_v21 = vmax.f32 %v16075_v5, %v16089_v9  ;;  %v2513_v23 = vpop.f32.mrb[33].mxu0 }
 0x8d4   : > { %v2532_v29 = vmax.f32 %v2424_v16, %v2513_v23 }
 0x8d5   : > { %v2537_v35 = vsub.f32 %v16075_v5, %v2533_v21  ;;  %v2549_v45 = vsub.f32 %v16089_v9, %v2533_v21  ;;  %v16078_v39 = vpop.f32.mrb[26].mxu1 }
 0x8d6   : > { %v2536_v58 = vsub.f32 %v2424_v16, %v2532_v29  ;;  %v2548_v43 = vsub.f32 %v2513_v23, %v2532_v29  ;;  %v16092_v3 = vpop.f32.mrb[34].mxu0  ;;  %v2434_v42 = vpop.f32.mrb[27].mxu1 }
 0x8d7   : > { %v2542_v60 = vmul.f32 1.442695, %v2537_v35  ;;  %v2554_v1 = vmul.f32 1.442695, %v2549_v45  ;;  %v2535_v27 = vmax.f32 %v16078_v39, %v16092_v3  ;;  %v2523_v48 = vpop.f32.mrb[35].mxu0 }
 0x8d8   : > { %v2540_v6 = vmul.f32 1.442695, %v2536_v58  ;;  %v2552_v13 = vmul.f32 1.442695, %v2548_v43  ;;  %v2534_v2 = vmax.f32 %v2434_v42, %v2523_v48 }
 0x8d9   : > { %18825 = vpow2.f32 %v2542_v60  ;;  %v2539_v17 = vsub.f32 %v16078_v39, %v2535_v27  ;;  %v2551_v11 = vsub.f32 %v16092_v3, %v2535_v27 }
 0x8da   : > { %18827 = vpow2.f32 %v2554_v1  ;;  %v2538_v34 = vsub.f32 %v2434_v42, %v2534_v2  ;;  %v2550_v51 = vsub.f32 %v2523_v48, %v2534_v2 }
 0x8db   : > { %18829 = vpow2.f32 %v2540_v6  ;;  %v2546_v31 = vmul.f32 1.442695, %v2539_v17  ;;  %v2558_v36 = vmul.f32 1.442695, %v2551_v11 }
 0x8dc   : > { %18831 = vpow2.f32 %v2552_v13  ;;  %v2544_v49 = vmul.f32 1.442695, %v2538_v34  ;;  %v2556_v26 = vmul.f32 1.442695, %v2550_v51 }
 0x8dd   : > { %18833 = vpow2.f32 %v2546_v31 }
 0x8de   : > { %18835 = vpow2.f32 %v2558_v36 }
 0x8df   : > { %18837 = vpow2.f32 %v2544_v49 }
 0x8e0   : > { %18839 = vpow2.f32 %v2556_v26 }
 0x8e3   : > { %v18826_v57 = vpop.eup %18825 }
 0x8e4   : > { %v18828_v14 = vpop.eup %18827 }
 0x8e5   : > { %v18830_v41 = vpop.eup %18829  ;;  %v2561_v52 = vadd.f32 %v18828_v14, %v18826_v57 }
 0x8e6   : > { %v18832_v61 = vpop.eup %18831 }
 0x8e7   : > { %v18834_v53 = vpop.eup %18833  ;;  %18841 = vrcp.f32 %v2561_v52  ;;  %v2560_v5 = vadd.f32 %v18832_v61, %v18830_v41 }
 0x8e8   : > { %v18836_v9 = vpop.eup %18835 }
 0x8e9   : > { %v18838_v16 = vpop.eup %18837  ;;  %18843 = vrcp.f32 %v2560_v5  ;;  %v2563_v21 = vadd.f32 %v18836_v9, %v18834_v53 }
 0x8ea   : > { %v18840_v23 = vpop.eup %18839 }
 0x8eb   : > { %18845 = vrcp.f32 %v2563_v21  ;;  %v2562_v29 = vadd.f32 %v18840_v23, %v18838_v16 }
 0x8ed   : > { %18847 = vrcp.f32 %v2562_v29 }
 0x8f1   : > { %v18842_v35 = vpop.eup %18841 }
 0x8f2   : > { %v2569_v45 = vmul.f32 %v18842_v35, %v18826_v57  ;;  %v2577_v39 = vmul.f32 %v18842_v35, %v18828_v14  ;;  %v23618_v14 = vld [vmem:[#allocation20_spill] sm:$0xff] }
 0x8f3   : > { %v18844_v58 = vpop.eup %18843 }
 0x8f4   : > { %v2568_v43 = vmul.f32 %v18844_v58, %v18830_v41  ;;  %v2573_v3 = vmul.f32 %v2569_v45, %v19781_v20  ;;  %v2576_v42 = vmul.f32 %v18844_v58, %v18832_v61  ;;  %v2581_v60 = vmul.f32 %v2577_v39, %v19784_v33  ;;  %v23619_v61 = vld [vmem:[#allocation19_spill] sm:$0xff]  ;;  %v23621_v39 = vld [vmem:[#allocation22_spill] sm:$0xff] }
 0x8f5   : > { %v18846_v1 = vpop.eup %18845 }
 0x8f6   : > { %v2572_v27 = vmul.f32 %v2568_v43, %v19787_v63  ;;  %v2580_v48 = vmul.f32 %v2576_v42, %v19790_v0  ;;  %v2585_v6 = vadd.f32 %v2581_v60, %v2573_v3  ;;  %v2571_v13 = vmul.f32 %v18846_v1, %v18834_v53  ;;  %v23622_v60 = vld [vmem:[#allocation23_spill] sm:$0xff] }
 0x8f7   : > { %v18848_v2 = vpop.eup %18847  ;;  %v2579_v17 = vmul.f32 %v18846_v1, %v18836_v9 }
 0x8f8   : > { %v2584_v11 = vadd.f32 %v2580_v48, %v2572_v27  ;;  %v2570_v34 = vmul.f32 %v18848_v2, %v18838_v16  ;;  %v2575_v51 = vmul.f32 %v2571_v13, %v19795_v62  ;;  %v2578_v31 = vmul.f32 %v18848_v2, %v18840_v23  ;;  %v23617_v62 = vld [vmem:[#allocation18_spill] sm:$0xff]  ;;  %v23620_v23 = vld [vmem:[#allocation21_spill] sm:$0xff] }
 0x8f9   : > { %v2583_v36 = vmul.f32 %v2579_v17, %v19803_v7 }
 0x8fa   : > { %v17706_v20 = vpack.c.bf16 %v2585_v6, %v2584_v11  ;;  %v2574_v33 = vmul.f32 %v2570_v34, %v19800_v56  ;;  %v2582_v49 = vmul.f32 %v2578_v31, %v19806_v10  ;;  %v19051_v56 = vld [vmem:[%s19539_s30 + $0x10] sm:$0xff]  }
 0x8fb   : > { %v2587_v63 = vadd.f32 %v2583_v36, %v2575_v51  ;;  %v14871_v7 = vunpack.c.h.bf16 %v19051_v56  ;;  %v14870_v57 = vunpack.c.l.bf16 %v19051_v56 }
 0x8fc   : > { %17707 = vmatprep.subr.bf16.mxu1 %v17706_v20  ;;  %v2586_v0 = vadd.f32 %v2582_v49, %v2574_v33  ;;  %v23623_v33 = vld [vmem:[#allocation39_spill] sm:$0xff] }
 0x8fd   : > { %17709 = vmatpush3.bf16.msra.mxu1 %v17706_v20 }
 0x8fe   : > { %v17710_v26 = vpack.c.bf16 %v2587_v63, %v2586_v0 }
 0x900   : > { %17711 = vmatprep.subr.bf16.mxu1 %v17710_v26 }
 0x901   : > { %17713 = vmatpush3.bf16.msra.mxu1 %v17710_v26 }
 0x902   : > { %17720 = vmatprep.subr.bf16.mxu1 %v23600_v55 }
 0x904   : > { %16102 = vmatmul.mubr.msk.f32.vlgmr.msra.gmra.mrb[28].mxu1 %vm716_vm0, %v19815_v59  ;;  %v19052_v59 = vld [vmem:[%s19539_s30 + $0x18] sm:$0xff]  }
 0x905   : > { %16104 = vmatprep.mubr.msk.f32.mxu1 %vm716_vm0, %v19820_v12  ;;  %v14875_v9 = vunpack.c.h.bf16 %v19052_v59  ;;  %v14874_v21 = vunpack.c.l.bf16 %v19052_v59  ;;  %v23627_v59 = vld [vmem:[#allocation29_spill] sm:$0xff] }
 0x908   : > { %16105 = vmatmul.mubr.msk.f32.gmra.mrb[30].mxu1 %vm716_vm0, %v23617_v62 }
 0x909   : > { %16126 = vmatprep.mubr.msk.f32.mxu1 %vm19245_vm1, %v23606_v4 }
 0x9d7   : > { %v16103_v10 = vpop.f32.mrb[28].mxu1 }
 0x9d8   : > { %v2660_v41 = vadd.f32 %v16103_v10, %v23618_v14  ;;  %v2654_v52 = vpop.f32.mrb[29].mxu1  ;;  %v23624_v14 = vld [vmem:[#allocation24_spill] sm:$0xff] }
 0x9d9   : > { %v2655_v53 = vadd.f32 %v2654_v52, %v23619_v61  ;;  %v23625_v52 = vld [vmem:[#allocation26_spill] sm:$0xff] }
 0x9da   : > { %v2674_v5 = vadd.f32 %v14871_v7, %v2660_v41 }
 0x9db   : > { %v2673_v16 = vadd.f32 %v14870_v57, %v2655_v53  ;;  %v16106_v12 = vpop.f32.mrb[30].mxu1  ;;  %v23626_v53 = vld [vmem:[#allocation28_spill] sm:$0xff] }
 0x9dc   : > { %v2670_v29 = vadd.f32 %v16106_v12, %v23620_v23  ;;  %v2664_v35 = vpop.f32.mrb[31].mxu1 }
 0x9dd   : > { %v17715_v45 = vpack.c.bf16 %v2674_v5, %v2673_v16  ;;  %v2665_v58 = vadd.f32 %v2664_v35, %v23621_v39 }
 0x9de   : > { %v2676_v43 = vadd.f32 %v14875_v9, %v2670_v29  ;;  %v23630_v29 = vld [vmem:[#allocation31_spill] sm:$0xff] }
 0x9df   : > { %v2675_v3 = vadd.f32 %v14874_v21, %v2665_v58  ;;  %17716 = vmatpush3.bf16.msra.mxu0 %v17715_v45  ;;  %v23629_v21 = vld [vmem:[#allocation27_spill] sm:$0xff]  ;;  %v23631_v45 = vld [vmem:[#allocation30_spill] sm:$0xff] }
 0x9e0   : > { %17717 = vmatprep.subr.bf16.mxu0 %v23600_v55 }
 0x9e1   : > { %v17718_v42 = vpack.c.bf16 %v2676_v43, %v2675_v3 }
 0x9e3   : > { %17719 = vmatpush3.bf16.msra.mxu0 %v17718_v42  ;;  %v23633_v42 = vld [vmem:[#allocation33_spill] sm:$0xff] }
 0x9e6   : > { %16116 = vmatmul.mubr.msk.f32.vlgmr.msra.gmra.mrb[36].mxu0 %vm716_vm0, %v23615_v50 }
 0x9e7   : > { %16137 = vmatprep.mubr.msk.f32.mxu0 %vm716_vm0, %v23622_v60  ;;  %v23634_v60 = vld [vmem:[#allocation34_spill] sm:$0xff] }
 0xab9   : > { %v2743_v1 = vpop.f32.mrb[36].mxu0 }
 0xaba   : > { %v2750_v27 = vrot.slane %v2743_v1, %v19872_v18  ;;  %v16117_v48 = vpop.f32.mrb[37].mxu0  ;;  %v23635_v1 = vld [vmem:[#allocation35_spill] sm:$0xff] }
 0xabb   : > { %v23637_v48 = vld [vmem:[#allocation37_spill] sm:$0xff] }
 0xabc   : > { %v2751_v6 = vsub.f32 %v2673_v16, %v2750_v27  ;;  %v2752_v13 = vsub.f32 %v2674_v5, %v2750_v27  ;;  %v2753_v2 = vsub.f32 %v2675_v3, %v2750_v27  ;;  %v2754_v17 = vsub.f32 %v2676_v43, %v2750_v27  ;;  %v23628_v16 = vld [vmem:[#allocation25_spill] sm:$0xff]  ;;  %v23632_v3 = vld [vmem:[#allocation32_spill] sm:$0xff] }
 0xabd   : > { %v23636_v27 = vld [vmem:[#allocation36_spill] sm:$0xff] }
 0xabe   : > { %v2755_v11 = vmul.f32 %v2751_v6, %v2751_v6  ;;  %v2756_v34 = vmul.f32 %v2752_v13, %v2752_v13  ;;  %v2757_v31 = vmul.f32 %v2753_v2, %v2753_v2  ;;  %v2758_v36 = vmul.f32 %v2754_v17, %v2754_v17 }
 0xac0   : > { %v17721_v51 = vpack.c.bf16 %v2756_v34, %v2755_v11  ;;  %v17724_v20 = vpack.c.bf16 %v2758_v36, %v2757_v31  ;;  %v23639_v11 = vld [vmem:[#allocation40_spill] sm:$0xff] }
 0xac2   : > { %17722 = vmatpush3.bf16.msra.mxu1 %v17721_v51 }
 0xac3   : > { %17723 = vmatprep.subr.bf16.mxu1 %v23600_v55 }
 0xac6   : > { %17725 = vmatpush3.bf16.msra.mxu1 %v17724_v20  ;;  %v23640_v20 = vld [vmem:[#allocation41_spill] sm:$0xff] }
 0xac9   : > { %16127 = vmatmul.mubr.msk.f32.vlgmr.msra.gmra.mrb[32].mxu1 %vm716_vm0, %v23615_v50 }
 0xaca   : > { %16165 = vmatprep.mubr.msk.f32.mxu1 %vm1966_vm2, %v23623_v33 }
 0xb9c   : > { %v2825_v49 = vpop.f32.mrb[32].mxu1 }
 0xb9d   : > { %v2826_v63 = vadd.f32 1e-05, %v2825_v49  ;;  %v16128_v0 = vpop.f32.mrb[33].mxu1 }
 0xb9f   : > { %18849 = vrsqrt.f32 %v2826_v63 }
 0xba9   : > { %v18850_v26 = vpop.eup %18849 }
 0xbaa   : > { %v2833_v62 = vrot.slane %v18850_v26, %v19872_v18 }
 0xbac   : > { %v2834_v56 = vmul.f32 %v2833_v62, %v2751_v6  ;;  %v2835_v7 = vmul.f32 %v2833_v62, %v2752_v13  ;;  %v2836_v10 = vmul.f32 %v2833_v62, %v2753_v2  ;;  %v2837_v57 = vmul.f32 %v2833_v62, %v2754_v17  ;;  %v23638_v6 = vld [vmem:[#allocation38_spill] sm:$0xff] }
 0xbae   : > { %v2838_v41 = vmul.f32 %v2834_v56, %v23624_v14  ;;  %v2839_v61 = vmul.f32 %v2835_v7, %v23625_v52  ;;  %v2840_v5 = vmul.f32 %v2836_v10, %v23626_v53  ;;  %v2841_v9 = vmul.f32 %v2837_v57, %v23627_v59  ;;  %v23641_v7 = vld [vmem:[#allocation42_spill] sm:$0xff] }
 0xbb0   : > { %v20183_v12 = vadd.f32 %v2838_v41, %v23628_v16  ;;  %v20186_v23 = vadd.f32 %v2839_v61, %v23629_v21  ;;  %v20189_v35 = vadd.f32 %v2840_v5, %v23630_v29  ;;  %v20192_v39 = vadd.f32 %v2841_v9, %v23631_v45  ;;  %v23643_v29 = vld [vmem:[#allocation44_spill] sm:$0xff]  ;;  %v20233_v45 = vpop.permute.xlu1 %2230 }
 0xbb2   : > { %v17726_v58 = vpack.c.bf16 %v20186_v23, %v20183_v12  ;;  %v17730_v43 = vpack.c.bf16 %v20192_v39, %v20189_v35 }
 0xbb4   : > { %17727 = vmatprep.subr.bf16.mxu0 %v17726_v58 }
 0xbb5   : > { %17729 = vmatpush3.bf16.msra.mxu0 %v17726_v58  ;;  %v20235_v58 = vpop.permute.xlu1 %2250 }
 0xbb6   : > { %17731 = vmatprep.subr.bf16.mxu0 %v17730_v43 }
 0xbb9   : > { %17733 = vmatpush3.bf16.msra.mxu0 %v17730_v43 }
 0xbba   : > { %17750 = vmatprep.subr.bf16.mxu0 %v23600_v55 }
 0xbbc   : > { %16138 = vmatmul.mubr.msk.f32.vlgmr.msra.gmra.mrb[38].mxu0 %vm716_vm0, %v23632_v3 }
 0xbbd   : > { %16140 = vmatprep.mubr.msk.f32.mxu0 %vm716_vm0, %v23633_v42  ;;  %v20238_v42 = vpop.permute.xlu1 %2254 }
 0xbc0   : > { %16141 = vmatmul.mubr.msk.f32.gmra.mrb[40].mxu0 %vm716_vm0, %v23634_v60  ;;  %v20240_v60 = vpop.permute.xlu0 %2234 }
 0xbc1   : > { %16143 = vmatprep.mubr.msk.f32.mxu0 %vm716_vm0, %v23635_v1 }
 0xbc4   : > { %16144 = vmatmul.mubr.msk.f32.gmra.mrb[42].mxu0 %vm716_vm0, %v23636_v27 }
 0xbc5   : > { %16146 = vmatprep.mubr.msk.f32.mxu0 %vm716_vm0, %v23637_v48 }
 0xbc8   : > { %16147 = vmatmul.mubr.msk.f32.gmra.mrb[44].mxu0 %vm716_vm0, %v23638_v6  ;;  %v23645_v6 = vld [vmem:[#allocation46_spill] sm:$0xff] }
 0xbc9   : > { %16179 = vmatprep.mubr.msk.f32.mxu0 %vm19245_vm1, %v23606_v4 }
 0xc8f   : > { %v16139_v13 = vpop.f32.mrb[38].mxu0 }
 0xc90   : > { %v2918_v2 = vadd.f32 %v16139_v13, %v20006_v25  ;;  %v2912_v17 = vpop.f32.mrb[39].mxu0 }
 0xc91   : > { %v2913_v34 = vadd.f32 %v2912_v17, %v23639_v11  ;;  %v20246_v17 = vpop.permute.xlu1 %2242  ;;  %v20248_v11 = vpop.permute.xlu0 %2238 }
 0xc92   : > { %v2952_v51 = vmax.f32 %v2918_v2, 0.0 }
 0xc93   : > { %v2951_v31 = vmax.f32 %v2913_v34, 0.0  ;;  %v16142_v36 = vpop.f32.mrb[40].mxu0 }
 0xc94   : > { %v2928_v33 = vadd.f32 %v16142_v36, %v23640_v20  ;;  %v2922_v49 = vpop.f32.mrb[41].mxu0 }
 0xc95   : > { %v17734_v63 = vpack.c.bf16 %v2952_v51, %v2951_v31  ;;  %v2923_v0 = vadd.f32 %v2922_v49, %v20004_v47 }
 0xc96   : > { %v2954_v26 = vmax.f32 %v2928_v33, 0.0 }
 0xc97   : > { %v2953_v62 = vmax.f32 %v2923_v0, 0.0  ;;  %v16145_v56 = vpop.f32.mrb[42].mxu0  ;;  %17735 = vmatprep.subr.bf16.mxu1 %v17734_v63 }
 0xc98   : > { %v2938_v10 = vadd.f32 %v16145_v56, %v23641_v7  ;;  %v2932_v57 = vpop.f32.mrb[43].mxu0  ;;  %17737 = vmatpush3.bf16.msra.mxu1 %v17734_v63 }
 0xc99   : > { %v17738_v25 = vpack.c.bf16 %v2954_v26, %v2953_v62  ;;  %v2933_v14 = vadd.f32 %v2932_v57, %v20016_v8  ;;  %v23642_v8 = vld [vmem:[#allocation43_spill] sm:$0xff]  ;;  %v20269_v62 = vpop.permute.xlu0 %2258  ;;  %v14333_v57 = vld [vmem:[%s23338_s2 + $0x68] sm:$0xff] }
 0xc9a   : > { %v2956_v41 = vmax.f32 %v2938_v10, 0.0 }
 0xc9b   : > { %v2955_v52 = vmax.f32 %v2933_v14, 0.0  ;;  %v16148_v61 = vpop.f32.mrb[44].mxu0  ;;  %17739 = vmatprep.subr.bf16.mxu1 %v17738_v25 }
 0xc9c   : > { %v2948_v53 = vadd.f32 %v16148_v61, %v20020_v24  ;;  %v2942_v5 = vpop.f32.mrb[45].mxu0  ;;  %17741 = vmatpush3.bf16.msra.mxu1 %v17738_v25  ;;  %v23644_v24 = vld [vmem:[#allocation45_spill] sm:$0xff] }
 0xc9d   : > { %v17742_v47 = vpack.c.bf16 %v2956_v41, %v2955_v52  ;;  %v2943_v59 = vadd.f32 %v2942_v5, %v20022_v15  ;;  %v2217_v15 = vadd.f32 1e-05, %v20141_v46 }
 0xc9e   : > { %v2958_v9 = vmax.f32 %v2948_v53, 0.0 }
 0xc9f   : > { %v2957_v16 = vmax.f32 %v2943_v59, 0.0  ;;  %17743 = vmatprep.subr.bf16.mxu1 %v17742_v47  ;;  %18851 = vrsqrt.f32 %v2217_v15  ;;  %v14334_v15 = vld [vmem:[%s23338_s2 + $0x70] sm:$0xff] }
 0xca0   : > { %17745 = vmatpush3.bf16.msra.mxu1 %v17742_v47 }
 0xca1   : > { %v17746_v21 = vpack.c.bf16 %v2958_v9, %v2957_v16 }
 0xca3   : > { %17747 = vmatprep.subr.bf16.mxu1 %v17746_v21 }
 0xca4   : > { %17749 = vmatpush3.bf16.msra.mxu1 %v17746_v21 }
 0xca5   : > { %17756 = vmatprep.subr.bf16.mxu1 %v23600_v55 }
 0xca7   : > { %16166 = vmatmul.mubr.msk.f32.vlgmr.msra.gmra.mrb[34].mxu1 %vm1966_vm2, %v23642_v8 }
 0xca8   : > { %16168 = vmatprep.mubr.msk.f32.mxu1 %vm1966_vm2, %v23643_v29  ;;  %v14336_v29 = vld [vmem:[%s23338_s2 + $0x80] sm:$0xff] }
 0xca9   : > { %v18852_v43 = vpop.eup %18851 }
 0xcaa   : > { %v2224_v3 = vrot.slane %v18852_v43, %v19872_v18  ;;  %v14335_v43 = vld [vmem:[%s23338_s2 + $0x78] sm:$0xff] }
 0xcab   : > { %16169 = vmatmul.mubr.msk.f32.gmra.mrb[36].mxu1 %vm1966_vm2, %v23644_v24  ;;  %v20319_v24 = vld [vmem:[%s23338_s2 + $0x88] sm:$0xff] }
 0xcac   : > { %16190 = vmatprep.mubr.msk.f32.mxu1 %vm19245_vm1, %v23606_v4  ;;  %v2225_v1 = vmul.f32 %v2224_v3, %v20091_v38  ;;  %v2226_v27 = vmul.f32 %v2224_v3, %v20093_v37  ;;  %v2228_v31 = vmul.f32 %v2224_v3, %v20097_v54  ;;  %v2227_v38 = vmul.f32 %v2224_v3, %v20095_v40  ;;  %v20332_v3 = vld [vmem:[%s23338_s2 + $0xa0] sm:$0xff] }
 0xcae   : > { %v2245_v2 = vmul.f32 %v20233_v45, %v2225_v1  ;;  %v2246_v51 = vmul.f32 %v20240_v60, %v2226_v27  ;;  %v2248_v54 = vmul.f32 %v20246_v17, %v2228_v31  ;;  %v2247_v40 = vmul.f32 %v20248_v11, %v2227_v38  ;;  %v20342_v1 = vld [vmem:[%s23338_s2 + $0x90] sm:$0xff]  ;;  %v20347_v27 = vld [vmem:[%s23338_s2 + $0xa8] sm:$0xff] }
 0xcaf   : > { %v23647_v31 = vmov 2   ;;  %v23648_v38 = vmov 3  }
 0xcb0   : > { %v20258_v63 = vadd.f32 %v20235_v58, %v2245_v2  ;;  %v20262_v26 = vadd.f32 %v20238_v42, %v2246_v51  ;;  %v20279_v10 = vadd.f32 %v20269_v62, %v2247_v40  ;;  %v23646_v2 = vmov 1   ;;  %v20389_v51 = vld [vmem:[%s23342_s6 + $0x58] sm:$0xff] }
 0xd7a   : > { %v16167_v48 = vpop.f32.mrb[34].mxu1 }
 0xd7b   : > { %v3031_v13 = vadd.f32 %v16167_v48, %v23645_v6  ;;  %v3025_v46 = vpop.f32.mrb[35].mxu1  ;;  %v20356_v48 = vld [vmem:[%s23338_s2 + $0x98] sm:$0xff]  ;;  %v20364_v6 = vld [vmem:[%s23342_s6 + $0x40] sm:$0xff] }
 0xd7c   : > { %v3026_v34 = vadd.f32 %v3025_v46, %v20041_v44  ;;  %3262 = vperm.xlu1 %18661, %v20364_v6   ;;  %v20376_v46 = vld [vmem:[%s23342_s6 + $0x50] sm:$0xff] }
 0xd7d   : > { %v3045_v37 = vadd.f32 %v3031_v13, %v20186_v23  ;;  %v20369_v13 = vld [vmem:[%s23342_s6 + $0x48] sm:$0xff] }
 0xd7e   : > { %v3044_v36 = vadd.f32 %v3026_v34, %v20183_v12  ;;  %v16170_v20 = vpop.f32.mrb[36].mxu1  ;;  %v20267_v12 = vpop.permute.xlu1 %2262  ;;  %3267 = vperm.xlu0 %18662, %v20369_v13  }
 0xd7f   : > { %v3041_v33 = vadd.f32 %v16170_v20, %v20048_v22  ;;  %v3035_v49 = vpop.f32.mrb[37].mxu1  ;;  %v20276_v7 = vadd.f32 %v20267_v12, %v2248_v54  ;;  %v23651_v20 = vmov 8  }
 0xd80   : > { %v17751_v0 = vpack.c.bf16 %v3045_v37, %v3044_v36  ;;  %v3036_v44 = vadd.f32 %v3035_v49, %v20051_v19  ;;  %v17762_v19 = vpack.c.bf16 %v20262_v26, %v20258_v63  ;;  %18663 = vset.pattern.permute.xlu1 %v23646_v2 }
 0xd81   : > { %v3047_v23 = vadd.f32 %v3041_v33, %v20192_v39  ;;  %v14332_v39 = vld [vmem:[%s23338_s2 + $0x60] sm:$0xff]  ;;  %3378 = vperm.xlu1 %18663, %v20364_v6  }
 0xd82   : > { %v3046_v22 = vadd.f32 %v3036_v44, %v20189_v35  ;;  %17752 = vmatpush3.bf16.msra.mxu0 %v17751_v0  ;;  %v17766_v35 = vpack.c.bf16 %v20276_v7, %v20279_v10  ;;  %3272 = vperm.xlu0 %18662, %v20376_v46  }
 0xd83   : > { %17753 = vmatprep.subr.bf16.mxu0 %v23600_v55 }
 0xd84   : > { %v17754_v56 = vpack.c.bf16 %v3047_v23, %v3046_v22 }
 0xd85   : > { %3382 = vperm.xlu1 %18663, %v20369_v13  }
 0xd86   : > { %17755 = vmatpush3.bf16.msra.mxu0 %v17754_v56  ;;  %18665 = vset.pattern.permute.xlu0 %v23646_v2 }
 0xd87   : > { %17763 = vmatprep.subr.bf16.mxu0 %v17762_v19  ;;  %3386 = vperm.xlu0 %18665, %v20376_v46  }
 0xd89   : > { %16180 = vmatmul.mubr.msk.f32.vlgmr.msra.gmra.mrb[46].mxu0 %vm716_vm0, %v23615_v50  ;;  %18664 = vset.pattern.permute.xlu1 %v23616_v32 }
 0xd8a   : > { %17765 = vmatpush3.bf16.msra.mxu0 %v17762_v19  ;;  %16201 = vmatprep.mubr.msk.f32.mxu0 %vm716_vm0, %v14332_v39 }
 0xd8b   : > { %17767 = vmatprep.subr.bf16.mxu0 %v17766_v35  ;;  %18668 = vset.pattern.permute.xlu0 %v23647_v31 }
 0xd8c   : > { %3277 = vperm.xlu1 %18664, %v20389_v51   ;;  %3495 = vperm.xlu0 %18668, %v20369_v13  }
 0xd8e   : > { %17769 = vmatpush3.bf16.msra.mxu0 %v17766_v35 }
 0xd8f   : > { %17779 = vmatprep.subr.bf16.mxu0 %v17762_v19 }
 0xd90   : > { %18666 = vset.pattern.permute.xlu1 %v23646_v2  ;;  %18669 = vset.pattern.permute.xlu0 %v23648_v38 }
 0xd91   : > { %16202 = vmatmul.mubr.msk.f32.vlgmr.msra.gmra.mrb[48].mxu0 %vm716_vm0, %v14333_v57  ;;  %3390 = vperm.xlu1 %18666, %v20389_v51  }
 0xd92   : > { %17781 = vmatpush3.bf16.msra.mxu0 %v17762_v19  ;;  %16204 = vmatprep.mubr.msk.f32.mxu0 %vm716_vm0, %v14334_v15 }
 0xd93   : > { %17783 = vmatprep.subr.bf16.mxu0 %v17766_v35  ;;  %4008 = vperm.xlu0 %18669, %v20364_v6  }
 0xd95   : > { %16205 = vmatmul.mubr.msk.f32.gmra.mrb[50].mxu0 %vm716_vm0, %v14335_v43  ;;  %18667 = vset.pattern.permute.xlu1 %v23647_v31 }
 0xd96   : > { %17785 = vmatpush3.bf16.msra.mxu0 %v17766_v35  ;;  %16229 = vmatprep.mubr.msk.f32.mxu0 %vm716_vm0, %v20332_v3 }
 0xd97   : > { %4020 = vperm.xlu0 %18669, %v20389_v51   ;;  %3491 = vperm.xlu1 %18667, %v20364_v6  }
 0xd99   : > { %16230 = vmatmul.mubr.msk.f32.vlgmr.msra.gmra.mrb[52].mxu0 %vm716_vm0, %v20347_v27 }
 0xd9b   : > { %3499 = vperm.xlu1 %18667, %v20376_v46  }
 0xd9f   : > { %3503 = vperm.xlu1 %18667, %v20389_v51  }
 0xda3   : > { %18670 = vset.pattern.permute.xlu1 %v23648_v38 }
 0xda4   : > { %4012 = vperm.xlu1 %18670, %v20369_v13  }
 0xda8   : > { %4016 = vperm.xlu1 %18670, %v20376_v46  }
 0xe5c   : > { %v3114_v25 = vpop.f32.mrb[46].mxu0 }
 0xe5d   : > { %v3121_v14 = vrot.slane %v3114_v25, %v19872_v18  ;;  %v16181_v41 = vpop.f32.mrb[47].mxu0 }
 0xe5f   : > { %v20294_v52 = vsub.f32 %v3044_v36, %v3121_v14  ;;  %v20296_v61 = vsub.f32 %v3045_v37, %v3121_v14  ;;  %v20298_v53 = vsub.f32 %v3046_v22, %v3121_v14  ;;  %v20300_v5 = vsub.f32 %v3047_v23, %v3121_v14 }
 0xe60   : > { %v23649_v37 = vmov 4   ;;  %v23650_v36 = vmov 5  }
 0xe61   : > { %v3126_v47 = vmul.f32 %v20294_v52, %v20294_v52  ;;  %v3127_v59 = vmul.f32 %v20296_v61, %v20296_v61  ;;  %v3128_v16 = vmul.f32 %v20298_v53, %v20298_v53  ;;  %v3129_v21 = vmul.f32 %v20300_v5, %v20300_v5  ;;  %18672 = vset.pattern.permute.xlu0 %v23649_v37 }
 0xe62   : > { %4290 = vperm.xlu0 %18672, %v20369_v13   ;;  %18671 = vset.pattern.permute.xlu1 %v23649_v37 }
 0xe63   : > { %v17757_v9 = vpack.c.bf16 %v3127_v59, %v3126_v47  ;;  %v17760_v8 = vpack.c.bf16 %v3129_v21, %v3128_v16  ;;  %4286 = vperm.xlu1 %18671, %v20364_v6  }
 0xe64   : > { %v20380_v34 = vpop.f32.mrb[48].mxu0 }
 0xe65   : > { %17758 = vmatpush3.bf16.msra.mxu1 %v17757_v9  ;;  %v3358_v33 = vpop.f32.mrb[49].mxu0 }
 0xe66   : > { %17759 = vmatprep.subr.bf16.mxu1 %v23600_v55  ;;  %4294 = vperm.xlu0 %18672, %v20376_v46  }
 0xe67   : > { %18673 = vset.pattern.permute.xlu1 %v23650_v36 }
 0xe68   : > { %4306 = vperm.xlu1 %18673, %v20364_v6  }
 0xe69   : > { %17761 = vmatpush3.bf16.msra.mxu1 %v17760_v8 }
 0xe6a   : > { %17771 = vmatprep.subr.bf16.mxu1 %v17762_v19  ;;  %18675 = vset.pattern.permute.xlu0 %v23650_v36 }
 0xe6b   : > { %4314 = vperm.xlu0 %18675, %v20376_v46  }
 0xe6c   : > { %16191 = vmatmul.mubr.msk.f32.vlgmr.msra.gmra.mrb[38].mxu1 %vm716_vm0, %v23615_v50  ;;  %4310 = vperm.xlu1 %18673, %v20369_v13  }
 0xe6d   : > { %17773 = vmatpush3.bf16.msra.mxu1 %v17762_v19  ;;  %16215 = vmatprep.mubr.msk.f32.mxu1 %vm716_vm0, %v14336_v29 }
 0xe6e   : > { %17775 = vmatprep.subr.bf16.mxu1 %v17766_v35 }
 0xe6f   : > { %18678 = vset.pattern.permute.xlu0 %v23651_v20 }
 0xe70   : > { %4330 = vperm.xlu0 %18678, %v20369_v13   ;;  %18674 = vset.pattern.permute.xlu1 %v23649_v37 }
 0xe71   : > { %17777 = vmatpush3.bf16.msra.mxu1 %v17766_v35  ;;  %4298 = vperm.xlu1 %18674, %v20389_v51  }
 0xe74   : > { %16216 = vmatmul.mubr.msk.f32.vlgmr.msra.gmra.mrb[40].mxu1 %vm716_vm0, %v20319_v24 }
 0xe75   : > { %16218 = vmatprep.mubr.msk.f32.mxu1 %vm716_vm0, %v20342_v1  ;;  %18676 = vset.pattern.permute.xlu1 %v23650_v36 }
 0xe76   : > { %4318 = vperm.xlu1 %18676, %v20389_v51  }
 0xe78   : > { %16219 = vmatmul.mubr.msk.f32.gmra.mrb[42].mxu1 %vm716_vm0, %v20356_v48 }
 0xe79   : > { %16243 = vmatprep.mubr.msk.f32.mxu1 %vm716_vm0, %v14336_v29 }
 0xe7a   : > { %18677 = vset.pattern.permute.xlu1 %v23651_v20 }
 0xe7b   : > { %4326 = vperm.xlu1 %18677, %v20364_v6  }
 0xe7f   : > { %4334 = vperm.xlu1 %18677, %v20376_v46  }
 0xe83   : > { %4338 = vperm.xlu1 %18677, %v20389_v51  }
 0xf3f   : > { %v3196_v49 = vpop.f32.mrb[38].mxu1 }
 0xf40   : > { %v3197_v0 = vadd.f32 1e-05, %v3196_v49  ;;  %v16192_v44 = vpop.f32.mrb[39].mxu1 }
 0xf42   : > { %18853 = vrsqrt.f32 %v3197_v0 }
 0xf4c   : > { %v18854_v54 = vpop.eup %18853 }
 0xf4d   : > { %v3204_v40 = vrot.slane %v18854_v54, %v19872_v18 }
 0xf4f   : > { %v3205_v23 = vmul.f32 %v3204_v40, %v20294_v52  ;;  %v3206_v22 = vmul.f32 %v3204_v40, %v20296_v61  ;;  %v3207_v56 = vmul.f32 %v3204_v40, %v20298_v53  ;;  %v3208_v19 = vmul.f32 %v3204_v40, %v20300_v5  ;;  %v16206_v5 = vpop.f32.mrb[50].mxu0 }
 0xf50   : > { %v3368_v16 = vpop.f32.mrb[51].mxu0 }
 0xf51   : > { %v3209_v39 = vmul.f32 %v3205_v23, %v20233_v45  ;;  %v3210_v35 = vmul.f32 %v3206_v22, %v20240_v60  ;;  %v3211_v57 = vmul.f32 %v3207_v56, %v20248_v11  ;;  %v3212_v25 = vmul.f32 %v3208_v19, %v20246_v17  ;;  %v19053_v45 = vld [vmem:[#allocation8] sm:$0xff]  ;;  %v3268_v60 = vpop.permute.xlu0 %3267  ;;  %v14343_v19 = vld [vmem:[%s23338_s2 + $0xb8] sm:$0xff] }
 0xf52   : > { %v3364_v11 = vadd.f32 %v20380_v34, %v3268_v60  ;;  %v14342_v56 = vld [vmem:[%s23338_s2 + $0xb0] sm:$0xff] }
 0xf53   : > { %v3213_v14 = vadd.f32 %v3209_v39, %v20235_v58  ;;  %v3214_v41 = vadd.f32 %v3210_v35, %v20238_v42  ;;  %v3215_v52 = vadd.f32 %v3211_v57, %v20269_v62  ;;  %v3216_v61 = vadd.f32 %v3212_v25, %v20267_v12  ;;  %v3263_v58 = vpop.permute.xlu1 %3262  ;;  %v16217_v12 = vpop.f32.mrb[40].mxu1  ;;  %16232 = vmatprep.mubr.msk.f32.mxu0 %vm716_vm0, %v14342_v56  ;;  %v19054_v39 = vld [vmem:[#allocation8 + $0x8] sm:$0xff]  ;;  %v19055_v35 = vld [vmem:[#allocation8 + $0x10] sm:$0xff]  ;;  %v19056_v57 = vld [vmem:[#allocation8 + $0x18] sm:$0xff] }
 0xf54   : > { %v3359_v62 = vadd.f32 %v3358_v33, %v3263_v58  ;;  %v3471_v9 = vpop.f32.mrb[41].mxu1  ;;  %16233 = vmatmul.mubr.msk.f32.gmra.mrb[54].mxu0 %vm716_vm0, %v14343_v19  ;;  %v20466_v25 = vpop.f32.mrb[52].mxu0 }
 0xf55   : > { %v17786_v47 = vpack.c.bf16 %v3214_v41, %v3213_v14  ;;  %v17790_v53 = vpack.c.bf16 %v3216_v61, %v3215_v52  ;;  %v16220_v0 = vpop.f32.mrb[42].mxu1  ;;  %16257 = vmatprep.mubr.msk.f32.mxu0 %vm716_vm0, %v20332_v3  ;;  %v20468_v3 = vpop.f32.mrb[53].mxu0 }
 0xf56   : > { %v3481_v54 = vpop.f32.mrb[43].mxu1 }
 0xf57   : > { %17787 = vmatprep.subr.bf16.mxu1 %v17786_v47  ;;  %17795 = vmatprep.subr.bf16.mxu0 %v17786_v47  ;;  %v3379_v42 = vpop.permute.xlu1 %3378 }
 0xf58   : > { %17789 = vmatpush3.bf16.msra.mxu1 %v17786_v47  ;;  %17797 = vmatpush3.bf16.msra.mxu0 %v17786_v47  ;;  %v3472_v21 = vadd.f32 %v3471_v9, %v3379_v42 }
 0xf59   : > { %17791 = vmatprep.subr.bf16.mxu1 %v17790_v53  ;;  %17799 = vmatprep.subr.bf16.mxu0 %v17790_v53 }
 0xf5a   : > { %v3773_v15 = vmul.f32 %v3472_v21, %v3359_v62 }
 0xf5b   : > { %v3383_v17 = vpop.permute.xlu1 %3382 }
 0xf5c   : > { %17793 = vmatpush3.bf16.msra.mxu1 %v17790_v53  ;;  %17801 = vmatpush3.bf16.msra.mxu0 %v17790_v53  ;;  %v3477_v59 = vadd.f32 %v16217_v12, %v3383_v17 }
 0xf5e   : > { %v3774_v29 = vmul.f32 %v3477_v59, %v3364_v11 }
 0xf5f   : > { %16244 = vmatmul.mubr.msk.f32.vlgmr.msra.gmra.mrb[44].mxu1 %vm716_vm0, %v20319_v24  ;;  %v3278_v8 = vpop.permute.xlu1 %3277  ;;  %v3273_v24 = vpop.permute.xlu0 %3272  ;;  %16258 = vmatmul.mubr.msk.f32.vlgmr.msra.gmra.mrb[56].mxu0 %vm716_vm0, %v20347_v27 }
 0xf60   : > { %16246 = vmatprep.mubr.msk.f32.mxu1 %vm716_vm0, %v20342_v1  ;;  %v17802_v43 = vpack.c.bf16 %v3774_v29, %v3773_v15  ;;  %v3374_v49 = vadd.f32 %v16206_v5, %v3278_v8  ;;  %v3369_v44 = vadd.f32 %v3368_v16, %v3273_v24  ;;  %16260 = vmatprep.mubr.msk.f32.mxu0 %vm716_vm0, %v14342_v56 }
 0xf62   : > { %17803 = vmatprep.subr.bf16.mxu1 %v17802_v43 }
 0xf63   : > { %16247 = vmatmul.mubr.msk.f32.gmra.mrb[46].mxu1 %vm716_vm0, %v20356_v48  ;;  %v3391_v1 = vpop.permute.xlu1 %3390  ;;  %v3387_v48 = vpop.permute.xlu0 %3386  ;;  %16261 = vmatmul.mubr.msk.f32.gmra.mrb[58].mxu0 %vm716_vm0, %v14343_v19 }
 0xf64   : > { %16271 = vmatprep.mubr.msk.f32.mxu1 %vm716_vm0, %v19053_v45  ;;  %17805 = vmatpush3.bf16.msra.mxu1 %v17802_v43  ;;  %v3487_v34 = vadd.f32 %v16220_v0, %v3391_v1  ;;  %v3482_v33 = vadd.f32 %v3481_v54, %v3387_v48  ;;  %v14344_v43 = vld [vmem:[%s23339_s3 + $0x20] sm:$0xff] }
 0xf65   : > { %16285 = vmatprep.mubr.msk.f32.mxu0 %vm716_vm0, %v19053_v45 }
 0xf66   : > { %v3776_v40 = vmul.f32 %v3487_v34, %v3374_v49  ;;  %v3775_v23 = vmul.f32 %v3482_v33, %v3369_v44 }
 0xf68   : > { %v17806_v22 = vpack.c.bf16 %v3776_v40, %v3775_v23 }
 0xf6a   : > { %17807 = vmatprep.subr.bf16.mxu1 %v17806_v22 }
 0xf6b   : > { %17809 = vmatpush3.bf16.msra.mxu1 %v17806_v22 }
 0xf6e   : > { %16272 = vmatmul.mubr.msk.f32.vlgmr.msra.gmra.mrb[48].mxu1 %vm716_vm0, %v19054_v39 }
 0xf6f   : > { %16274 = vmatprep.mubr.msk.f32.mxu1 %vm716_vm0, %v19055_v35 }
 0xf72   : > { %16275 = vmatmul.mubr.msk.f32.gmra.mrb[50].mxu1 %vm716_vm0, %v19056_v57 }
 0xf73   : > { %16299 = vmatprep.mubr.msk.f32.mxu1 %vm716_vm0, %v14344_v43 }
0x1032   : > { %v16245_v14 = vpop.f32.mrb[44].mxu1 }
0x1033   : > { %v3675_v41 = vadd.f32 %v16245_v14, %v3383_v17  ;;  %v3669_v52 = vpop.f32.mrb[45].mxu1 }
0x1034   : > { %v3670_v27 = vadd.f32 %v3669_v52, %v3379_v42  ;;  %v20476_v42 = vpop.f32.mrb[54].mxu0 }
0x1035   : > { %v3863_v61 = vmul.f32 %v3675_v41, %v3364_v11  ;;  %v20478_v17 = vpop.f32.mrb[55].mxu0 }
0x1036   : > { %v3862_v47 = vmul.f32 %v3670_v27, %v3359_v62  ;;  %v16248_v53 = vpop.f32.mrb[46].mxu1  ;;  %v20480_v62 = vpop.f32.mrb[56].mxu0 }
0x1037   : > { %v3685_v58 = vadd.f32 %v16248_v53, %v3391_v1  ;;  %v3679_v60 = vpop.f32.mrb[47].mxu1  ;;  %v20482_v21 = vpop.f32.mrb[57].mxu0 }
0x1038   : > { %v3680_v12 = vadd.f32 %v3679_v60, %v3387_v48  ;;  %v17810_v5 = vpack.c.bf16 %v3863_v61, %v3862_v47  ;;  %v20484_v8 = vpop.f32.mrb[58].mxu0 }
0x1039   : > { %v3865_v59 = vmul.f32 %v3685_v58, %v3374_v49  ;;  %v20486_v29 = vpop.f32.mrb[59].mxu0 }
0x103a   : > { %v3864_v9 = vmul.f32 %v3680_v12, %v3369_v44  ;;  %17811 = vmatprep.subr.bf16.mxu0 %v17810_v5 }
0x103b   : > { %17813 = vmatpush3.bf16.msra.mxu0 %v17810_v5 }
0x103c   : > { %v17814_v45 = vpack.c.bf16 %v3865_v59, %v3864_v9 }
0x103e   : > { %17815 = vmatprep.subr.bf16.mxu0 %v17814_v45 }
0x103f   : > { %17817 = vmatpush3.bf16.msra.mxu0 %v17814_v45  ;;  %v3492_v45 = vpop.permute.xlu1 %3491 }
0x1040   : > { %17826 = vmatprep.subr.bf16.mxu0 %v23600_v55 }
0x1041   : > { %v16273_v11 = vpop.f32.mrb[48].mxu1 }
0x1042   : > { %16286 = vmatmul.mubr.msk.f32.vlgmr.msra.gmra.mrb[60].mxu0 %vm716_vm0, %v19054_v39  ;;  %v3843_v16 = vpop.f32.mrb[49].mxu1 }
0x1043   : > { %16288 = vmatprep.mubr.msk.f32.mxu0 %vm716_vm0, %v19055_v35 }
0x1045   : > { %v16276_v24 = vpop.f32.mrb[50].mxu1 }
0x1046   : > { %16289 = vmatmul.mubr.msk.f32.gmra.mrb[62].mxu0 %vm716_vm0, %v19056_v57  ;;  %v3853_v15 = vpop.f32.mrb[51].mxu1 }
0x1047   : > { %16313 = vmatprep.mubr.msk.f32.mxu0 %vm19245_vm1, %v23606_v4 }
0x1115   : > { %v16287_v1 = vpop.f32.mrb[60].mxu0 }
0x1116   : > { %v3952_v48 = vmax.f32 %v16273_v11, %v16287_v1  ;;  %v3932_v49 = vpop.f32.mrb[61].mxu0 }
0x1117   : > { %v3951_v0 = vmax.f32 %v3843_v16, %v3932_v49 }
0x1118   : > { %v3956_v44 = vsub.f32 %v16273_v11, %v3952_v48  ;;  %v3968_v34 = vsub.f32 %v16287_v1, %v3952_v48 }
0x1119   : > { %v3955_v54 = vsub.f32 %v3843_v16, %v3951_v0  ;;  %v3967_v33 = vsub.f32 %v3932_v49, %v3951_v0  ;;  %v16290_v40 = vpop.f32.mrb[62].mxu0  ;;  %v3500_v49 = vpop.permute.xlu1 %3499 }
0x111a   : > { %v3961_v23 = vmul.f32 1.442695, %v3956_v44  ;;  %v3973_v22 = vmul.f32 1.442695, %v3968_v34  ;;  %v3954_v56 = vmax.f32 %v16276_v24, %v16290_v40  ;;  %v3942_v19 = vpop.f32.mrb[63].mxu0  ;;  %v3496_v0 = vpop.permute.xlu0 %3495 }
0x111b   : > { %v3959_v39 = vmul.f32 1.442695, %v3955_v54  ;;  %v3971_v35 = vmul.f32 1.442695, %v3967_v33  ;;  %v3953_v57 = vmax.f32 %v3853_v15, %v3942_v19  ;;  %v3590_v34 = vadd.f32 %v20466_v25, %v3496_v0 }
0x111c   : > { %18855 = vpow2.f32 %v3961_v23  ;;  %v3958_v14 = vsub.f32 %v16276_v24, %v3954_v56  ;;  %v3970_v41 = vsub.f32 %v16290_v40, %v3954_v56  ;;  %v3760_v33 = vadd.f32 %v20480_v62, %v3496_v0 }
0x111d   : > { %18857 = vpow2.f32 %v3973_v22  ;;  %v3957_v52 = vsub.f32 %v3853_v15, %v3953_v57  ;;  %v3969_v27 = vsub.f32 %v3942_v19, %v3953_v57  ;;  %v3504_v54 = vpop.permute.xlu1 %3503  ;;  %v3585_v56 = vadd.f32 %v20468_v3, %v3492_v45 }
0x111e   : > { %18859 = vpow2.f32 %v3959_v39  ;;  %v3965_v61 = vmul.f32 1.442695, %v3958_v14  ;;  %v3977_v47 = vmul.f32 1.442695, %v3970_v41  ;;  %v3755_v19 = vadd.f32 %v20482_v21, %v3492_v45 }
0x111f   : > { %18861 = vpow2.f32 %v3971_v35  ;;  %v3963_v53 = vmul.f32 1.442695, %v3957_v52  ;;  %v3975_v58 = vmul.f32 1.442695, %v3969_v27  ;;  %v3600_v52 = vadd.f32 %v20476_v42, %v3504_v54 }
0x1120   : > { %18863 = vpow2.f32 %v3965_v61  ;;  %v3595_v62 = vadd.f32 %v20478_v17, %v3500_v49  ;;  %v3765_v3 = vadd.f32 %v20486_v29, %v3500_v49  ;;  %v14345_v17 = vld [vmem:[%s23339_s3 + $0x28] sm:$0xff]  ;;  %v14347_v29 = vld [vmem:[%s23339_s3 + $0x38] sm:$0xff] }
0x1121   : > { %18865 = vpow2.f32 %v3977_v47 }
0x1122   : > { %18867 = vpow2.f32 %v3963_v53 }
0x1123   : > { %18869 = vpow2.f32 %v3975_v58  ;;  %v3770_v58 = vadd.f32 %v20484_v8, %v3504_v54  ;;  %v14346_v8 = vld [vmem:[%s23339_s3 + $0x30] sm:$0xff] }
0x1126   : > { %v18856_v60 = vpop.eup %18855 }
0x1127   : > { %v18858_v12 = vpop.eup %18857 }
0x1128   : > { %v18860_v5 = vpop.eup %18859  ;;  %v3980_v59 = vadd.f32 %v18858_v12, %v18856_v60 }
0x1129   : > { %v18862_v9 = vpop.eup %18861 }
0x112a   : > { %v18864_v11 = vpop.eup %18863  ;;  %18871 = vrcp.f32 %v3980_v59  ;;  %v3979_v16 = vadd.f32 %v18862_v9, %v18860_v5 }
0x112b   : > { %v18866_v24 = vpop.eup %18865 }
0x112c   : > { %v18868_v15 = vpop.eup %18867  ;;  %18873 = vrcp.f32 %v3979_v16  ;;  %v3982_v43 = vadd.f32 %v18866_v24, %v18864_v11 }
0x112d   : > { %v18870_v1 = vpop.eup %18869 }
0x112e   : > { %18875 = vrcp.f32 %v3982_v43  ;;  %v3981_v48 = vadd.f32 %v18870_v1, %v18868_v15 }
0x1130   : > { %18877 = vrcp.f32 %v3981_v48 }
0x1134   : > { %v18872_v44 = vpop.eup %18871 }
0x1135   : > { %v3988_v40 = vmul.f32 %v18872_v44, %v18856_v60  ;;  %v3996_v23 = vmul.f32 %v18872_v44, %v18858_v12 }
0x1136   : > { %v18874_v22 = vpop.eup %18873 }
0x1137   : > { %v3987_v39 = vmul.f32 %v18874_v22, %v18860_v5  ;;  %v3992_v35 = vmul.f32 %v3988_v40, %v3590_v34  ;;  %v3995_v57 = vmul.f32 %v18874_v22, %v18862_v9  ;;  %v4000_v14 = vmul.f32 %v3996_v23, %v3760_v33 }
0x1138   : > { %v18876_v41 = vpop.eup %18875 }
0x1139   : > { %v3991_v27 = vmul.f32 %v3987_v39, %v3585_v56  ;;  %v3999_v61 = vmul.f32 %v3995_v57, %v3755_v19  ;;  %v4004_v25 = vadd.f32 %v4000_v14, %v3992_v35  ;;  %v3990_v47 = vmul.f32 %v18876_v41, %v18864_v11 }
0x113a   : > { %v18878_v53 = vpop.eup %18877  ;;  %v3998_v60 = vmul.f32 %v18876_v41, %v18866_v24  ;;  %v4009_v24 = vpop.permute.xlu0 %4008 }
0x113b   : > { %v4003_v21 = vadd.f32 %v3999_v61, %v3991_v27  ;;  %v3989_v12 = vmul.f32 %v18878_v53, %v18868_v15  ;;  %v3994_v5 = vmul.f32 %v3990_v47, %v3600_v52  ;;  %v3997_v59 = vmul.f32 %v18878_v53, %v18870_v1  ;;  %v4013_v15 = vpop.permute.xlu1 %4012 }
0x113c   : > { %v4002_v9 = vmul.f32 %v3998_v60, %v3770_v58  ;;  %v14361_v60 = vld [vmem:[%s23342_s6 + $0x68] sm:$0xff] }
0x113d   : > { %v17818_v45 = vpack.c.bf16 %v4004_v25, %v4003_v21  ;;  %v3993_v16 = vmul.f32 %v3989_v12, %v3595_v62  ;;  %v4001_v42 = vmul.f32 %v3997_v59, %v3765_v3  ;;  %v14348_v3 = vld [vmem:[%s23340_s4 + $0x40] sm:$0xff]  ;;  %4348 = vperm.xlu1 %18677, %v14361_v60   ;;  %v14363_v12 = vld [vmem:[%s23342_s6 + $0x78] sm:$0xff]  ;;  %v23652_v59 = vmov 9  }
0x113e   : > { %v4006_v43 = vadd.f32 %v4002_v9, %v3994_v5  ;;  %v4021_v54 = vpop.permute.xlu0 %4020  ;;  %v14360_v21 = vld [vmem:[%s23342_s6 + $0x60] sm:$0xff]  ;;  %v14362_v5 = vld [vmem:[%s23342_s6 + $0x70] sm:$0xff] }
0x113f   : > { %17819 = vmatprep.subr.bf16.mxu1 %v17818_v45  ;;  %v4005_v48 = vadd.f32 %v4001_v42, %v3993_v16  ;;  %v4017_v23 = vpop.permute.xlu1 %4016  ;;  %4343 = vperm.xlu0 %18678, %v14360_v21  }
0x1140   : > { %17821 = vmatpush3.bf16.msra.mxu1 %v17818_v45 }
0x1141   : > { %v17822_v11 = vpack.c.bf16 %v4006_v43, %v4005_v48  ;;  %4358 = vperm.xlu1 %18677, %v14363_v12  }
0x1142   : > { %v4291_v48 = vpop.permute.xlu0 %4290 }
0x1143   : > { %17823 = vmatprep.subr.bf16.mxu1 %v17822_v11  ;;  %4353 = vperm.xlu0 %18678, %v14362_v5   ;;  %v4287_v9 = vpop.permute.xlu1 %4286 }
0x1144   : > { %17825 = vmatpush3.bf16.msra.mxu1 %v17822_v11 }
0x1145   : > { %17832 = vmatprep.subr.bf16.mxu1 %v23600_v55  ;;  %18680 = vset.pattern.permute.xlu1 %v23652_v59 }
0x1146   : > { %4503 = vperm.xlu1 %18680, %v20369_v13  }
0x1147   : > { %16300 = vmatmul.mubr.msk.f32.vlgmr.msra.gmra.mrb[52].mxu1 %vm716_vm0, %v14345_v17  ;;  %18679 = vset.pattern.permute.xlu0 %v23652_v59  ;;  %v4307_v43 = vpop.permute.xlu1 %4306  ;;  %v4295_v17 = vpop.permute.xlu0 %4294 }
0x1148   : > { %16302 = vmatprep.mubr.msk.f32.mxu1 %vm716_vm0, %v14346_v8  ;;  %4499 = vperm.xlu0 %18679, %v20364_v6  }
0x114a   : > { %4507 = vperm.xlu1 %18680, %v20376_v46  }
0x114b   : > { %16303 = vmatmul.mubr.msk.f32.gmra.mrb[54].mxu1 %vm716_vm0, %v14347_v29  ;;  %v4311_v11 = vpop.permute.xlu1 %4310 }
0x114c   : > { %16324 = vmatprep.mubr.msk.f32.mxu1 %vm19245_vm1, %v23606_v4  ;;  %4511 = vperm.xlu0 %18679, %v20389_v51  }
0x114e   : > { %18681 = vset.pattern.permute.xlu1 %v23616_v32 }
0x114f   : > { %v4299_v13 = vpop.permute.xlu1 %4298 }
0x1150   : > { %18682 = vset.pattern.permute.xlu0 %v23616_v32 }
0x121a   : > { %v16301_v1 = vpop.f32.mrb[52].mxu1 }
0x121b   : > { %v4107_v49 = vadd.f32 %v16301_v1, %v4013_v15  ;;  %v4101_v0 = vpop.f32.mrb[53].mxu1  ;;  %v4319_v15 = vpop.permute.xlu1 %4318 }
0x121c   : > { %v4102_v44 = vadd.f32 %v4101_v0, %v4009_v24  ;;  %v4315_v1 = vpop.permute.xlu0 %4314 }
0x121d   : > { %v4121_v34 = vadd.f32 %v4107_v49, %v20262_v26 }
0x121e   : > { %v4120_v33 = vadd.f32 %v4102_v44, %v20258_v63  ;;  %v16304_v40 = vpop.f32.mrb[54].mxu1 }
0x121f   : > { %v4117_v22 = vadd.f32 %v16304_v40, %v4021_v54  ;;  %v4111_v56 = vpop.f32.mrb[55].mxu1 }
0x1220   : > { %v17827_v19 = vpack.c.bf16 %v4121_v34, %v4120_v33  ;;  %v4112_v39 = vadd.f32 %v4111_v56, %v4017_v23 }
0x1221   : > { %v4123_v35 = vadd.f32 %v4117_v22, %v20276_v7 }
0x1222   : > { %v4122_v57 = vadd.f32 %v4112_v39, %v20279_v10  ;;  %17828 = vmatpush3.bf16.msra.mxu0 %v17827_v19  ;;  %v14349_v19 = vld [vmem:[%s23340_s4 + $0x48] sm:$0xff]  ;;  %v14350_v39 = vld [vmem:[%s23340_s4 + $0x50] sm:$0xff] }
0x1223   : > { %17829 = vmatprep.subr.bf16.mxu0 %v23600_v55 }
0x1224   : > { %v17830_v14 = vpack.c.bf16 %v4123_v35, %v4122_v57 }
0x1226   : > { %17831 = vmatpush3.bf16.msra.mxu0 %v17830_v14  ;;  %v14353_v14 = vld [vmem:[%s23340_s4 + $0x68] sm:$0xff] }
0x1229   : > { %16314 = vmatmul.mubr.msk.f32.vlgmr.msra.gmra.mrb[64].mxu0 %vm716_vm0, %v23615_v50 }
0x122a   : > { %16335 = vmatprep.mubr.msk.f32.mxu0 %vm716_vm0, %v14348_v3 }
0x12fc   : > { %v4190_v26 = vpop.f32.mrb[64].mxu0 }
0x12fd   : > { %v4197_v63 = vrot.slane %v4190_v26, %v19872_v18  ;;  %v16315_v41 = vpop.f32.mrb[65].mxu0  ;;  %v14354_v26 = vld [vmem:[%s23340_s4 + $0x70] sm:$0xff] }
0x12fe   : > { %v3247_v41 = vld [vmem:[#allocation6 + $0x20] sm:$0xff] }
0x12ff   : > { %v4198_v52 = vsub.f32 %v4120_v33, %v4197_v63  ;;  %v4199_v27 = vsub.f32 %v4121_v34, %v4197_v63  ;;  %v4200_v61 = vsub.f32 %v4122_v57, %v4197_v63  ;;  %v4201_v25 = vsub.f32 %v4123_v35, %v4197_v63  ;;  %v14351_v35 = vld [vmem:[%s23340_s4 + $0x58] sm:$0xff]  ;;  %v14352_v57 = vld [vmem:[%s23340_s4 + $0x60] sm:$0xff] }
0x1300   : > { %v14355_v63 = vld [vmem:[%s23340_s4 + $0x78] sm:$0xff] }
0x1301   : > { %v4202_v47 = vmul.f32 %v4198_v52, %v4198_v52  ;;  %v4203_v7 = vmul.f32 %v4199_v27, %v4199_v27  ;;  %v4204_v10 = vmul.f32 %v4200_v61, %v4200_v61  ;;  %v4205_v62 = vmul.f32 %v4201_v25, %v4201_v25 }
0x1303   : > { %v17833_v53 = vpack.c.bf16 %v4203_v7, %v4202_v47  ;;  %v17836_v58 = vpack.c.bf16 %v4205_v62, %v4204_v10  ;;  %v14449_v47 = vld [vmem:[%s23342_s6 + $0xa8] sm:$0xff]  ;;  %v14451_v7 = vld [vmem:[%s23342_s6 + $0xb8] sm:$0xff]  ;;  %v4331_v62 = vpop.permute.xlu0 %4330 }
0x1305   : > { %17834 = vmatpush3.bf16.msra.mxu1 %v17833_v53  ;;  %v4327_v53 = vpop.permute.xlu1 %4326 }
0x1306   : > { %17835 = vmatprep.subr.bf16.mxu1 %v23600_v55 }
0x1309   : > { %17837 = vmatpush3.bf16.msra.mxu1 %v17836_v58  ;;  %v4335_v10 = vpop.permute.xlu1 %4334 }
0x130c   : > { %16325 = vmatmul.mubr.msk.f32.vlgmr.msra.gmra.mrb[56].mxu1 %vm716_vm0, %v23615_v50 }
0x130d   : > { %16363 = vmatprep.mubr.msk.f32.mxu1 %vm1966_vm2, %v3247_v41  ;;  %v4339_v58 = vpop.permute.xlu1 %4338  ;;  %v3250_v41 = vld [vmem:[#allocation6 + $0x38] sm:$0xff] }
0x13df   : > { %v4272_v45 = vpop.f32.mrb[56].mxu1 }
0x13e0   : > { %v4273_v16 = vadd.f32 1e-05, %v4272_v45  ;;  %v16326_v42 = vpop.f32.mrb[57].mxu1 }
0x13e2   : > { %18879 = vrsqrt.f32 %v4273_v16 }
0x13ec   : > { %v18880_v8 = vpop.eup %18879 }
0x13ed   : > { %v4280_v6 = vrot.slane %v18880_v8, %v19872_v18 }
0x13ef   : > { %v4281_v46 = vmul.f32 %v4280_v6, %v4198_v52  ;;  %v4282_v29 = vmul.f32 %v4280_v6, %v4199_v27  ;;  %v4283_v51 = vmul.f32 %v4280_v6, %v4200_v61  ;;  %v4284_v24 = vmul.f32 %v4280_v6, %v4201_v25  ;;  %v20598_v52 = vld [vmem:[%s23342_s6 + $0x80] sm:$0xff]  ;;  %v20603_v27 = vld [vmem:[%s23342_s6 + $0x88] sm:$0xff]  ;;  %v20610_v61 = vld [vmem:[%s23342_s6 + $0x90] sm:$0xff] }
0x13f0   : > { %4883 = vperm.xlu1 %18681, %v20598_v52   ;;  %4888 = vperm.xlu0 %18682, %v20603_v27   ;;  %v20621_v25 = vld [vmem:[%s23342_s6 + $0x98] sm:$0xff] }
0x13f1   : > { %v4301_v49 = vmul.f32 %v4287_v9, %v4281_v46  ;;  %v4302_v0 = vmul.f32 %v4291_v48, %v4282_v29  ;;  %v4303_v44 = vmul.f32 %v4295_v17, %v4283_v51  ;;  %v4304_v34 = vmul.f32 %v4299_v13, %v4284_v24  ;;  %v4344_v17 = vpop.permute.xlu0 %4343 }
0x13f3   : > { %v20551_v54 = vadd.f32 %v4307_v43, %v4301_v49  ;;  %v20553_v33 = vadd.f32 %v4311_v11, %v4302_v0  ;;  %v20555_v40 = vadd.f32 %v4319_v15, %v4304_v34  ;;  %v20557_v23 = vadd.f32 %v4315_v1, %v4303_v44  ;;  %v4349_v43 = vpop.permute.xlu1 %4348 }
0x13f4   : > { %18683 = vset.pattern.permute.xlu1 %v23646_v2  ;;  %4893 = vperm.xlu0 %18682, %v20610_v61  }
0x13f5   : > { %v17838_v22 = vpack.c.bf16 %v20553_v33, %v20551_v54  ;;  %v17842_v56 = vpack.c.bf16 %v20555_v40, %v20557_v23  ;;  %4999 = vperm.xlu1 %18683, %v20598_v52   ;;  %v4354_v44 = vpop.permute.xlu0 %4353 }
0x13f7   : > { %17839 = vmatprep.subr.bf16.mxu0 %v17838_v22  ;;  %v4359_v1 = vpop.permute.xlu1 %4358 }
0x13f8   : > { %17841 = vmatpush3.bf16.msra.mxu0 %v17838_v22  ;;  %18685 = vset.pattern.permute.xlu0 %v23646_v2 }
0x13f9   : > { %17843 = vmatprep.subr.bf16.mxu0 %v17842_v56  ;;  %5003 = vperm.xlu1 %18683, %v20603_v27  }
0x13fa   : > { %5007 = vperm.xlu0 %18685, %v20610_v61  }
0x13fc   : > { %17845 = vmatpush3.bf16.msra.mxu0 %v17842_v56 }
0x13fd   : > { %17862 = vmatprep.subr.bf16.mxu0 %v23600_v55  ;;  %18684 = vset.pattern.permute.xlu1 %v23616_v32 }
0x13fe   : > { %18688 = vset.pattern.permute.xlu0 %v23647_v31  ;;  %4898 = vperm.xlu1 %18684, %v20621_v25  }
0x13ff   : > { %16336 = vmatmul.mubr.msk.f32.vlgmr.msra.gmra.mrb[66].mxu0 %vm716_vm0, %v14349_v19  ;;  %5116 = vperm.xlu0 %18688, %v20603_v27  }
0x1400   : > { %16338 = vmatprep.mubr.msk.f32.mxu0 %vm716_vm0, %v14350_v39 }
0x1402   : > { %18686 = vset.pattern.permute.xlu1 %v23646_v2 }
0x1403   : > { %16339 = vmatmul.mubr.msk.f32.gmra.mrb[68].mxu0 %vm716_vm0, %v14351_v35  ;;  %18689 = vset.pattern.permute.xlu0 %v23648_v38 }
0x1404   : > { %16341 = vmatprep.mubr.msk.f32.mxu0 %vm716_vm0, %v14352_v57  ;;  %5011 = vperm.xlu1 %18686, %v20621_v25  }
0x1405   : > { %5629 = vperm.xlu0 %18689, %v20598_v52  }
0x1407   : > { %16342 = vmatmul.mubr.msk.f32.gmra.mrb[70].mxu0 %vm716_vm0, %v14353_v14  ;;  %v3248_v14 = vld [vmem:[#allocation6 + $0x28] sm:$0xff] }
0x1408   : > { %16344 = vmatprep.mubr.msk.f32.mxu0 %vm716_vm0, %v14354_v26  ;;  %18687 = vset.pattern.permute.xlu1 %v23647_v31  ;;  %v3249_v26 = vld [vmem:[#allocation6 + $0x30] sm:$0xff] }
0x1409   : > { %5641 = vperm.xlu0 %18689, %v20621_v25   ;;  %5112 = vperm.xlu1 %18687, %v20598_v52  }
0x140b   : > { %16345 = vmatmul.mubr.msk.f32.gmra.mrb[72].mxu0 %vm716_vm0, %v14355_v63  ;;  %v20680_v63 = vld [vmem:[%s23342_s6 + $0xc0] sm:$0xff] }
0x140c   : > { %16377 = vmatprep.mubr.msk.f32.mxu0 %vm19245_vm1, %v23606_v4 }
0x140d   : > { %18692 = vset.pattern.permute.xlu0 %v23649_v37  ;;  %5120 = vperm.xlu1 %18687, %v20610_v61  }
0x140e   : > { %5911 = vperm.xlu0 %18692, %v20603_v27  }
0x1411   : > { %5124 = vperm.xlu1 %18687, %v20621_v25  }
0x1412   : > { %5915 = vperm.xlu0 %18692, %v20610_v61  }
0x1415   : > { %18690 = vset.pattern.permute.xlu1 %v23648_v38 }
0x1416   : > { %18695 = vset.pattern.permute.xlu0 %v23650_v36  ;;  %5633 = vperm.xlu1 %18690, %v20603_v27  }
0x1417   : > { %5935 = vperm.xlu0 %18695, %v20610_v61  }
0x141a   : > { %5637 = vperm.xlu1 %18690, %v20610_v61  }
0x141b   : > { %18698 = vset.pattern.permute.xlu0 %v23651_v20 }
0x141c   : > { %5951 = vperm.xlu0 %18698, %v20603_v27  }
0x141e   : > { %18691 = vset.pattern.permute.xlu1 %v23649_v37 }
0x141f   : > { %5907 = vperm.xlu1 %18691, %v20598_v52  }
0x1423   : > { %18693 = vset.pattern.permute.xlu1 %v23650_v36 }
0x1424   : > { %5927 = vperm.xlu1 %18693, %v20598_v52  }
0x1428   : > { %5931 = vperm.xlu1 %18693, %v20603_v27  }
0x142c   : > { %18694 = vset.pattern.permute.xlu1 %v23649_v37 }
0x142d   : > { %5919 = vperm.xlu1 %18694, %v20621_v25  }
0x1431   : > { %18696 = vset.pattern.permute.xlu1 %v23650_v36 }
0x1432   : > { %5939 = vperm.xlu1 %18696, %v20621_v25  }
0x1436   : > { %18697 = vset.pattern.permute.xlu1 %v23651_v20 }
0x1437   : > { %5947 = vperm.xlu1 %18697, %v20598_v52  }
0x143b   : > { %5955 = vperm.xlu1 %18697, %v20610_v61  }
0x143f   : > { %5959 = vperm.xlu1 %18697, %v20621_v25  }
0x1443   : > { %5969 = vperm.xlu1 %18697, %v14449_v47   ;;  %v20695_v47 = vld [vmem:[%s23342_s6 + $0xc8] sm:$0xff] }
0x1447   : > { %5979 = vperm.xlu1 %18697, %v14451_v7   ;;  %v20701_v7 = vld [vmem:[%s23342_s6 + $0xd8] sm:$0xff] }
0x144b   : > { %18700 = vset.pattern.permute.xlu1 %v23652_v59 }
0x144c   : > { %6124 = vperm.xlu1 %18700, %v20603_v27  }
0x1450   : > { %6128 = vperm.xlu1 %18700, %v20610_v61  }
0x1454   : > { %18701 = vset.pattern.permute.xlu1 %v23416_v30 }
0x1455   : > { %6398 = vperm.xlu1 %18701, %v20598_v52  }
0x1459   : > { %18703 = vset.pattern.permute.xlu1 %v23418_v28 }
0x145a   : > { %6418 = vperm.xlu1 %18703, %v20598_v52  }
0x145e   : > { %6422 = vperm.xlu1 %18703, %v20603_v27  }
0x1462   : > { %18704 = vset.pattern.permute.xlu1 %v23416_v30 }
0x1463   : > { %6410 = vperm.xlu1 %18704, %v20621_v25  }
0x1467   : > { %18706 = vset.pattern.permute.xlu1 %v23418_v28 }
0x1468   : > { %6430 = vperm.xlu1 %18706, %v20621_v25  }
0x146c   : > { %18707 = vset.pattern.permute.xlu1 %v23616_v32 }
0x146d   : > { %7430 = vperm.xlu1 %18707, %v20680_v63  }
0x1471   : > { %18709 = vset.pattern.permute.xlu1 %v23646_v2 }
0x1472   : > { %7546 = vperm.xlu1 %18709, %v20680_v63  }
0x1476   : > { %7550 = vperm.xlu1 %18709, %v20695_v47  }
0x147a   : > { %18710 = vset.pattern.permute.xlu1 %v23616_v32 }
0x147b   : > { %7445 = vperm.xlu1 %18710, %v20701_v7  }
0x147f   : > { %18712 = vset.pattern.permute.xlu1 %v23646_v2 }
0x1480   : > { %7558 = vperm.xlu1 %18712, %v20701_v7  }
0x1484   : > { %18713 = vset.pattern.permute.xlu1 %v23647_v31 }
0x1485   : > { %7659 = vperm.xlu1 %18713, %v20680_v63  }
0x14d2   : > { %v16337_v3 = vpop.f32.mrb[66].mxu0 }
0x14d3   : > { %v4457_v60 = vadd.f32 %v16337_v3, %v4331_v62  ;;  %v4451_v21 = vpop.f32.mrb[67].mxu0  ;;  %v14448_v3 = vld [vmem:[%s23342_s6 + $0xa0] sm:$0xff] }
0x14d4   : > { %v4452_v12 = vadd.f32 %v4451_v21, %v4327_v53  ;;  %v20709_v53 = vpop.permute.xlu1 %4503  ;;  %5964 = vperm.xlu0 %18698, %v14448_v3  }
0x14d5   : > { %v4491_v5 = vmax.f32 %v4457_v60, 0.0  ;;  %v14450_v60 = vld [vmem:[%s23342_s6 + $0xb0] sm:$0xff] }
0x14d6   : > { %v4490_v9 = vmax.f32 %v4452_v12, 0.0  ;;  %v16340_v45 = vpop.f32.mrb[68].mxu0 }
0x14d7   : > { %v4467_v16 = vadd.f32 %v16340_v45, %v4339_v58  ;;  %v4461_v42 = vpop.f32.mrb[69].mxu0 }
0x14d8   : > { %v17846_v48 = vpack.c.bf16 %v4491_v5, %v4490_v9  ;;  %v4462_v11 = vadd.f32 %v4461_v42, %v4335_v10  ;;  %v20714_v10 = vld [vmem:[%s23342_s6 + $0xd0] sm:$0xff]  ;;  %v20718_v62 = vpop.permute.xlu1 %4507  ;;  %5974 = vperm.xlu0 %18698, %v14450_v60  }
0x14d9   : > { %v4493_v13 = vmax.f32 %v4467_v16, 0.0  ;;  %7667 = vperm.xlu1 %18713, %v20714_v10  }
0x14da   : > { %v4492_v8 = vmax.f32 %v4462_v11, 0.0  ;;  %v16343_v6 = vpop.f32.mrb[70].mxu0  ;;  %17847 = vmatprep.subr.bf16.mxu1 %v17846_v48 }
0x14db   : > { %v4477_v46 = vadd.f32 %v16343_v6, %v4349_v43  ;;  %v4471_v29 = vpop.f32.mrb[71].mxu0  ;;  %17849 = vmatpush3.bf16.msra.mxu1 %v17846_v48  ;;  %v14563_v48 = vld [vmem:[%s23342_s6 + $0xf8] sm:$0xff] }
0x14dc   : > { %v17850_v51 = vpack.c.bf16 %v4493_v13, %v4492_v8  ;;  %v4472_v24 = vadd.f32 %v4471_v29, %v4344_v17  ;;  %v20722_v58 = vpop.permute.xlu1 %4883  ;;  %18699 = vset.pattern.permute.xlu0 %v23652_v59  ;;  %v20802_v8 = vld [vmem:[%s23342_s6 + $0x100] sm:$0xff]  ;;  %v20818_v29 = vld [vmem:[%s23342_s6 + $0x108] sm:$0xff] }
0x14dd   : > { %v4495_v15 = vmax.f32 %v4477_v46, 0.0  ;;  %7671 = vperm.xlu1 %18713, %v20701_v7   ;;  %23653 = vst [vmem:[#allocation18_spill] sm:$0xff] %v20722_v58  ;;  %6120 = vperm.xlu0 %18699, %v20598_v52  }
0x14de   : > { %v4494_v49 = vmax.f32 %v4472_v24, 0.0  ;;  %v16346_v0 = vpop.f32.mrb[72].mxu0  ;;  %17851 = vmatprep.subr.bf16.mxu1 %v17850_v51  ;;  %v20828_v24 = vld [vmem:[%s23342_s6 + $0x118] sm:$0xff] }
0x14df   : > { %v4487_v34 = vadd.f32 %v16346_v0, %v4359_v1  ;;  %v4481_v22 = vpop.f32.mrb[73].mxu0  ;;  %17853 = vmatpush3.bf16.msra.mxu1 %v17850_v51 }
0x14e0   : > { %v17854_v56 = vpack.c.bf16 %v4495_v15, %v4494_v49  ;;  %v4482_v19 = vadd.f32 %v4481_v22, %v4354_v44  ;;  %v20731_v21 = vpop.permute.xlu1 %4999  ;;  %v14560_v15 = vld [vmem:[%s23342_s6 + $0xe0] sm:$0xff]  ;;  %v14562_v49 = vld [vmem:[%s23342_s6 + $0xf0] sm:$0xff] }
0x14e1   : > { %v4497_v39 = vmax.f32 %v4487_v34, 0.0  ;;  %18716 = vset.pattern.permute.xlu1 %v23648_v38  ;;  %6132 = vperm.xlu0 %18699, %v20621_v25   ;;  %v20851_v44 = vld [vmem:[%s23342_s6 + $0x110] sm:$0xff] }
0x14e2   : > { %v4496_v35 = vmax.f32 %v4482_v19, 0.0  ;;  %17855 = vmatprep.subr.bf16.mxu1 %v17854_v56  ;;  %8180 = vperm.xlu1 %18716, %v20695_v47  }
0x14e3   : > { %17857 = vmatpush3.bf16.msra.mxu1 %v17854_v56 }
0x14e4   : > { %v17858_v57 = vpack.c.bf16 %v4497_v39, %v4496_v35  ;;  %v20734_v12 = vpop.permute.xlu1 %5003  ;;  %v4500_v39 = vpop.permute.xlu0 %4499 }
0x14e5   : > { %18702 = vset.pattern.permute.xlu0 %v23416_v30 }
0x14e6   : > { %17859 = vmatprep.subr.bf16.mxu1 %v17858_v57  ;;  %8184 = vperm.xlu1 %18716, %v20714_v10  }
0x14e7   : > { %17861 = vmatpush3.bf16.msra.mxu1 %v17858_v57  ;;  %6402 = vperm.xlu0 %18702, %v20603_v27  }
0x14e8   : > { %17868 = vmatprep.subr.bf16.mxu1 %v23600_v55  ;;  %v20739_v5 = vpop.permute.xlu1 %4898  ;;  %v4512_v60 = vpop.permute.xlu0 %4511 }
0x14e9   : > { %23654 = vst [vmem:[#allocation20_spill] sm:$0xff] %v20739_v5 }
0x14ea   : > { %16364 = vmatmul.mubr.msk.f32.vlgmr.msra.gmra.mrb[58].mxu1 %vm1966_vm2, %v3248_v14  ;;  %18717 = vset.pattern.permute.xlu1 %v23649_v37 }
0x14eb   : > { %16366 = vmatprep.mubr.msk.f32.mxu1 %vm1966_vm2, %v3249_v26  ;;  %8454 = vperm.xlu1 %18717, %v20680_v63  }
0x14ec   : > { %v20744_v9 = vpop.permute.xlu1 %5011  ;;  %6406 = vperm.xlu0 %18702, %v20610_v61  }
0x14ee   : > { %16367 = vmatmul.mubr.msk.f32.gmra.mrb[60].mxu1 %vm1966_vm2, %v3250_v41 }
0x14ef   : > { %16388 = vmatprep.mubr.msk.f32.mxu1 %vm19245_vm1, %v23606_v4  ;;  %18719 = vset.pattern.permute.xlu1 %v23650_v36 }
0x14f0   : > { %8474 = vperm.xlu1 %18719, %v20680_v63   ;;  %v20748_v45 = vpop.permute.xlu1 %5112  ;;  %18705 = vset.pattern.permute.xlu0 %v23418_v28 }
0x14f1   : > { %6426 = vperm.xlu0 %18705, %v20610_v61   ;;  %v14561_v61 = vld [vmem:[%s23342_s6 + $0xe8] sm:$0xff] }
0x14f4   : > { %8478 = vperm.xlu1 %18719, %v20695_v47   ;;  %v20753_v52 = vpop.permute.xlu1 %5120 }
0x14f5   : > { %18708 = vset.pattern.permute.xlu0 %v23616_v32 }
0x14f6   : > { %7435 = vperm.xlu0 %18708, %v20695_v47  }
0x14f8   : > { %18720 = vset.pattern.permute.xlu1 %v23649_v37  ;;  %v20758_v25 = vpop.permute.xlu1 %5124 }
0x14f9   : > { %8466 = vperm.xlu1 %18720, %v20701_v7  }
0x14fa   : > { %7440 = vperm.xlu0 %18708, %v20714_v10  }
0x14fc   : > { %v20763_v27 = vpop.permute.xlu1 %5633 }
0x14fd   : > { %18722 = vset.pattern.permute.xlu1 %v23650_v36 }
0x14fe   : > { %8486 = vperm.xlu1 %18722, %v20701_v7   ;;  %18711 = vset.pattern.permute.xlu0 %v23646_v2 }
0x14ff   : > { %7554 = vperm.xlu0 %18711, %v20714_v10  }
0x1500   : > { %v20768_v16 = vpop.permute.xlu1 %5637 }
0x1502   : > { %18723 = vset.pattern.permute.xlu1 %v23651_v20 }
0x1503   : > { %8494 = vperm.xlu1 %18723, %v20680_v63   ;;  %18714 = vset.pattern.permute.xlu0 %v23647_v31 }
0x1504   : > { %v20772_v42 = vpop.permute.xlu1 %5907  ;;  %7663 = vperm.xlu0 %18714, %v20695_v47  }
0x1507   : > { %8502 = vperm.xlu1 %18723, %v20714_v10  }
0x1508   : > { %v20780_v43 = vpop.permute.xlu1 %5927  ;;  %18715 = vset.pattern.permute.xlu0 %v23648_v38 }
0x1509   : > { %8176 = vperm.xlu0 %18715, %v20680_v63  }
0x150b   : > { %8506 = vperm.xlu1 %18723, %v20701_v7  }
0x150c   : > { %v20786_v11 = vpop.permute.xlu1 %5931 }
0x150d   : > { %8188 = vperm.xlu0 %18715, %v20701_v7  }
0x150f   : > { %8516 = vperm.xlu1 %18723, %v14561_v61  }
0x1510   : > { %v20789_v17 = vpop.permute.xlu1 %5919 }
0x1511   : > { %18718 = vset.pattern.permute.xlu0 %v23649_v37 }
0x1512   : > { %8458 = vperm.xlu0 %18718, %v20695_v47  }
0x1513   : > { %8526 = vperm.xlu1 %18723, %v14563_v48  }
0x1514   : > { %v20795_v13 = vpop.permute.xlu1 %5939 }
0x1516   : > { %8462 = vperm.xlu0 %18718, %v20714_v10  }
0x1517   : > { %18726 = vset.pattern.permute.xlu1 %v23652_v59 }
0x1518   : > { %8671 = vperm.xlu1 %18726, %v20695_v47   ;;  %v20804_v6 = vpop.permute.xlu1 %5947 }
0x1519   : > { %23655 = vst [vmem:[#allocation19_spill] sm:$0xff] %v20804_v6 }
0x151a   : > { %18721 = vset.pattern.permute.xlu0 %v23650_v36 }
0x151b   : > { %8482 = vperm.xlu0 %18721, %v20714_v10  }
0x151c   : > { %8675 = vperm.xlu1 %18726, %v20714_v10   ;;  %v20810_v46 = vpop.permute.xlu1 %5955 }
0x151d   : > { %23656 = vst [vmem:[#allocation21_spill] sm:$0xff] %v20810_v46 }
0x151f   : > { %18724 = vset.pattern.permute.xlu0 %v23651_v20 }
0x1520   : > { %18727 = vset.pattern.permute.xlu1 %v23616_v32  ;;  %v20823_v51 = vpop.permute.xlu1 %5959  ;;  %8498 = vperm.xlu0 %18724, %v20695_v47  }
0x1521   : > { %9051 = vperm.xlu1 %18727, %v20802_v8  }
0x1524   : > { %v20837_v1 = vpop.permute.xlu1 %5969  ;;  %8511 = vperm.xlu0 %18724, %v14560_v15  }
0x1525   : > { %18729 = vset.pattern.permute.xlu1 %v23646_v2  ;;  %23657 = vst [vmem:[#allocation22_spill] sm:$0xff] %v20837_v1 }
0x1526   : > { %9167 = vperm.xlu1 %18729, %v20802_v8  }
0x1528   : > { %v20844_v0 = vpop.permute.xlu1 %5979  ;;  %8521 = vperm.xlu0 %18724, %v14562_v49  }
0x1529   : > { %23658 = vst [vmem:[#allocation23_spill] sm:$0xff] %v20844_v0 }
0x152a   : > { %9171 = vperm.xlu1 %18729, %v20818_v29  }
0x152c   : > { %18725 = vset.pattern.permute.xlu0 %v23652_v59  ;;  %v20855_v34 = vpop.permute.xlu1 %6124 }
0x152d   : > { %8667 = vperm.xlu0 %18725, %v20680_v63   ;;  %23659 = vst [vmem:[#allocation39_spill] sm:$0xff] %v20855_v34 }
0x152e   : > { %18730 = vset.pattern.permute.xlu1 %v23616_v32 }
0x152f   : > { %9066 = vperm.xlu1 %18730, %v20828_v24  }
0x1530   : > { %v20860_v22 = vpop.permute.xlu1 %6128 }
0x1531   : > { %8679 = vperm.xlu0 %18725, %v20701_v7   ;;  %23660 = vst [vmem:[#allocation24_spill] sm:$0xff] %v20860_v22 }
0x1533   : > { %18732 = vset.pattern.permute.xlu1 %v23646_v2 }
0x1534   : > { %9179 = vperm.xlu1 %18732, %v20828_v24   ;;  %v20866_v56 = vpop.permute.xlu1 %6398 }
0x1535   : > { %18728 = vset.pattern.permute.xlu0 %v23616_v32  ;;  %23661 = vst [vmem:[#allocation26_spill] sm:$0xff] %v20866_v56 }
0x1536   : > { %9056 = vperm.xlu0 %18728, %v20818_v29  }
0x1538   : > { %18733 = vset.pattern.permute.xlu1 %v23647_v31  ;;  %v20873_v19 = vpop.permute.xlu1 %6418 }
0x1539   : > { %9280 = vperm.xlu1 %18733, %v20802_v8   ;;  %23662 = vst [vmem:[#allocation28_spill] sm:$0xff] %v20873_v19 }
0x153a   : > { %9061 = vperm.xlu0 %18728, %v20851_v44  }
0x153c   : > { %v20881_v26 = vpop.permute.xlu1 %6422 }
0x153d   : > { %9288 = vperm.xlu1 %18733, %v20851_v44   ;;  %23663 = vst [vmem:[#allocation29_spill] sm:$0xff] %v20881_v26 }
0x153e   : > { %18731 = vset.pattern.permute.xlu0 %v23646_v2 }
0x153f   : > { %9175 = vperm.xlu0 %18731, %v20851_v44  }
0x1541   : > { %9292 = vperm.xlu1 %18733, %v20828_v24  }
0x1543   : > { %18734 = vset.pattern.permute.xlu0 %v23647_v31 }
0x1544   : > { %9284 = vperm.xlu0 %18734, %v20818_v29  }
0x1545   : > { %18736 = vset.pattern.permute.xlu1 %v23648_v38 }
0x1546   : > { %9801 = vperm.xlu1 %18736, %v20818_v29  }
0x1548   : > { %18735 = vset.pattern.permute.xlu0 %v23648_v38 }
0x1549   : > { %9797 = vperm.xlu0 %18735, %v20802_v8  }
0x154a   : > { %9805 = vperm.xlu1 %18736, %v20851_v44  }
0x154d   : > { %9809 = vperm.xlu0 %18735, %v20828_v24  }
0x154e   : > { %18737 = vset.pattern.permute.xlu1 %v23649_v37 }
0x154f   : > { %10075 = vperm.xlu1 %18737, %v20802_v8  }
0x1551   : > { %18738 = vset.pattern.permute.xlu0 %v23649_v37 }
0x1552   : > { %10079 = vperm.xlu0 %18738, %v20818_v29  }
0x1553   : > { %18739 = vset.pattern.permute.xlu1 %v23650_v36 }
0x1554   : > { %10095 = vperm.xlu1 %18739, %v20802_v8  }
0x1556   : > { %10083 = vperm.xlu0 %18738, %v20851_v44  }
0x1558   : > { %10099 = vperm.xlu1 %18739, %v20818_v29  }
0x155a   : > { %18741 = vset.pattern.permute.xlu0 %v23650_v36 }
0x155b   : > { %10103 = vperm.xlu0 %18741, %v20851_v44  }
0x155c   : > { %18740 = vset.pattern.permute.xlu1 %v23649_v37 }
0x155d   : > { %10087 = vperm.xlu1 %18740, %v20828_v24  }
0x155f   : > { %18744 = vset.pattern.permute.xlu0 %v23651_v20 }
0x1560   : > { %10119 = vperm.xlu0 %18744, %v20818_v29  }
0x1561   : > { %18742 = vset.pattern.permute.xlu1 %v23650_v36 }
0x1562   : > { %10107 = vperm.xlu1 %18742, %v20828_v24  }
0x1566   : > { %18743 = vset.pattern.permute.xlu1 %v23651_v20 }
0x1567   : > { %10115 = vperm.xlu1 %18743, %v20802_v8  }
0x156b   : > { %10123 = vperm.xlu1 %18743, %v20851_v44  }
0x156f   : > { %10127 = vperm.xlu1 %18743, %v20828_v24  }
0x15bd   : > { %v16365_v35 = vpop.f32.mrb[58].mxu1 }
0x15be   : > { %v4598_v57 = vadd.f32 %v16365_v35, %v20709_v53  ;;  %v4592_v14 = vpop.f32.mrb[59].mxu1  ;;  %v20898_v35 = vpop.permute.xlu1 %6410 }
0x15bf   : > { %v4593_v41 = vadd.f32 %v4592_v14, %v4500_v39  ;;  %23664 = vst [vmem:[#allocation25_spill] sm:$0xff] %v20898_v35  ;;  %v14648_v14 = vld [vmem:[%s23342_s6 + $0x120] sm:$0xff]  ;;  %v23692_v35 = vmov 7  }
0x15c0   : > { %v20884_v3 = vadd.f32 %v4598_v57, %v20553_v33  ;;  %10132 = vperm.xlu0 %18744, %v14648_v14  }
0x15c1   : > { %v20888_v61 = vadd.f32 %v4593_v41, %v20551_v54  ;;  %v16368_v48 = vpop.f32.mrb[60].mxu1  ;;  %v14649_v41 = vld [vmem:[%s23342_s6 + $0x128] sm:$0xff] }
0x15c2   : > { %v4608_v15 = vadd.f32 %v16368_v48, %v4512_v60  ;;  %v4602_v53 = vpop.f32.mrb[61].mxu1  ;;  %10137 = vperm.xlu1 %18743, %v14649_v41   ;;  %v14651_v48 = vld [vmem:[%s23342_s6 + $0x138] sm:$0xff]  ;;  %v20968_v41 = vld [vmem:[%s23342_s6 + $0x140] sm:$0xff] }
0x15c3   : > { %v17863_v49 = vpack.c.bf16 %v20884_v3, %v20888_v61  ;;  %v4603_v39 = vadd.f32 %v4602_v53, %v20718_v62 }
0x15c4   : > { %v20896_v33 = vadd.f32 %v4608_v15, %v20555_v40  ;;  %v20910_v40 = vpop.permute.xlu1 %6430 }
0x15c5   : > { %v20901_v54 = vadd.f32 %v4603_v39, %v20557_v23  ;;  %17864 = vmatpush3.bf16.msra.mxu0 %v17863_v49  ;;  %23665 = vst [vmem:[#allocation27_spill] sm:$0xff] %v20910_v40  ;;  %v21078_v40 = vld [vmem:[%s23338_s2 + $0xd8] sm:$0xff] }
0x15c6   : > { %17865 = vmatprep.subr.bf16.mxu0 %v23600_v55  ;;  %10147 = vperm.xlu1 %18743, %v14651_v48   ;;  %23691 = vst [vmem:[#allocation55_spill] sm:$0xff] %v21078_v40 }
0x15c7   : > { %v17866_v57 = vpack.c.bf16 %v20896_v33, %v20901_v54 }
0x15c8   : > { %v20919_v23 = vpop.permute.xlu1 %7430 }
0x15c9   : > { %17867 = vmatpush3.bf16.msra.mxu0 %v17866_v57  ;;  %23666 = vst [vmem:[#allocation31_spill] sm:$0xff] %v20919_v23  ;;  %v21066_v23 = vld [vmem:[%s19539_s30 + $0x30] sm:$0xff]  }
0x15ca   : > { %18746 = vset.pattern.permute.xlu1 %v23652_v59  ;;  %23689 = vst [vmem:[#allocation53_spill] sm:$0xff] %v21066_v23 }
0x15cb   : > { %10292 = vperm.xlu1 %18746, %v20818_v29  }
0x15cc   : > { %16378 = vmatmul.mubr.msk.f32.vlgmr.msra.gmra.mrb[74].mxu0 %vm716_vm0, %v23615_v50  ;;  %v20925_v62 = vpop.permute.xlu1 %7546 }
0x15cd   : > { %23667 = vst [vmem:[#allocation30_spill] sm:$0xff] %v20925_v62  ;;  %v23687_v62 = vmov 6  }
0x15cf   : > { %10296 = vperm.xlu1 %18746, %v20851_v44  }
0x15d0   : > { %v20936_v60 = vpop.permute.xlu1 %7550 }
0x15d1   : > { %23668 = vst [vmem:[#allocation32_spill] sm:$0xff] %v20936_v60 }
0x15d3   : > { %18747 = vset.pattern.permute.xlu1 %v23416_v30 }
0x15d4   : > { %v20941_v15 = vpop.permute.xlu1 %7445  ;;  %10566 = vperm.xlu1 %18747, %v20802_v8  }
0x15d5   : > { %23669 = vst [vmem:[#allocation33_spill] sm:$0xff] %v20941_v15 }
0x15d8   : > { %v20945_v53 = vpop.permute.xlu1 %7558  ;;  %18749 = vset.pattern.permute.xlu1 %v23418_v28 }
0x15d9   : > { %23670 = vst [vmem:[#allocation34_spill] sm:$0xff] %v20945_v53  ;;  %10586 = vperm.xlu1 %18749, %v20802_v8  }
0x15dc   : > { %v20948_v49 = vpop.permute.xlu1 %7659 }
0x15dd   : > { %23671 = vst [vmem:[#allocation35_spill] sm:$0xff] %v20948_v49  ;;  %10590 = vperm.xlu1 %18749, %v20818_v29   ;;  %v21017_v49 = vld [vmem:[%s19539_s30 + $0x20] sm:$0xff]  }
0x15de   : > { %17875 = vmatprep.subr.bf16.mxu0 %v21017_v49 }
0x15df   : > { %17877 = vmatpush3.bf16.msra.mxu0 %v21017_v49 }
0x15e0   : > { %v20953_v39 = vpop.permute.xlu1 %7667 }
0x15e1   : > { %23672 = vst [vmem:[#allocation36_spill] sm:$0xff] %v20953_v39  ;;  %18750 = vset.pattern.permute.xlu1 %v23416_v30 }
0x15e2   : > { %10578 = vperm.xlu1 %18750, %v20828_v24  }
0x15e4   : > { %v20957_v57 = vpop.permute.xlu1 %7671 }
0x15e5   : > { %23673 = vst [vmem:[#allocation37_spill] sm:$0xff] %v20957_v57  ;;  %v21009_v57 = vpop.permute.xlu0 %4888 }
0x15e6   : > { %18752 = vset.pattern.permute.xlu1 %v23418_v28  ;;  %v20981_v28 = vld [vmem:[%s23342_s6 + $0x148] sm:$0xff]  ;;  %23680 = vst [vmem:[#allocation45_spill] sm:$0xff] %v21009_v57 }
0x15e7   : > { %10598 = vperm.xlu1 %18752, %v20828_v24  }
0x15e8   : > { %v20961_v14 = vpop.permute.xlu1 %8180 }
0x15e9   : > { %23674 = vst [vmem:[#allocation38_spill] sm:$0xff] %v20961_v14  ;;  %v21021_v53 = vpop.permute.xlu0 %4893 }
0x15ea   : > { %23682 = vst [vmem:[#allocation47_spill] sm:$0xff] %v21021_v53 }
0x15eb   : > { %18753 = vset.pattern.permute.xlu1 %v23616_v32 }
0x15ec   : > { %v20970_v48 = vpop.permute.xlu1 %8184  ;;  %11598 = vperm.xlu1 %18753, %v20968_v41  }
0x15ed   : > { %23675 = vst [vmem:[#allocation40_spill] sm:$0xff] %v20970_v48  ;;  %v20989_v48 = vld [vmem:[%s23342_s6 + $0x158] sm:$0xff] }
0x15f0   : > { %18755 = vset.pattern.permute.xlu1 %v23646_v2  ;;  %v20975_v30 = vpop.permute.xlu1 %8454 }
0x15f1   : > { %23676 = vst [vmem:[#allocation41_spill] sm:$0xff] %v20975_v30  ;;  %11714 = vperm.xlu1 %18755, %v20968_v41  }
0x15f4   : > { %v20984_v14 = vpop.permute.xlu1 %8474 }
0x15f5   : > { %11718 = vperm.xlu1 %18755, %v20981_v28   ;;  %23677 = vst [vmem:[#allocation42_spill] sm:$0xff] %v20984_v14  ;;  %v21004_v14 = vld [vmem:[%s23342_s6 + $0x150] sm:$0xff] }
0x15f8   : > { %v20993_v30 = vpop.permute.xlu1 %8478 }
0x15f9   : > { %18756 = vset.pattern.permute.xlu1 %v23616_v32  ;;  %23678 = vst [vmem:[#allocation43_spill] sm:$0xff] %v20993_v30  ;;  %v14650_v30 = vld [vmem:[%s23342_s6 + $0x130] sm:$0xff] }
0x15fa   : > { %11613 = vperm.xlu1 %18756, %v20989_v48   ;;  %10142 = vperm.xlu0 %18744, %v14650_v30   ;;  %v21028_v30 = vld [vmem:[%s19539_s30 + $0x28] sm:$0xff]  }
0x15fb   : > { %17879 = vmatprep.subr.bf16.mxu0 %v21028_v30 }
0x15fc   : > { %v20997_v39 = vpop.permute.xlu1 %8466  ;;  %17881 = vmatpush3.bf16.msra.mxu0 %v21028_v30 }
0x15fd   : > { %23679 = vst [vmem:[#allocation44_spill] sm:$0xff] %v20997_v39  ;;  %17891 = vmatprep.subr.bf16.mxu0 %v21017_v49 }
0x15fe   : > { %18758 = vset.pattern.permute.xlu1 %v23646_v2  ;;  %18745 = vset.pattern.permute.xlu0 %v23652_v59 }
0x15ff   : > { %11726 = vperm.xlu1 %18758, %v20989_v48   ;;  %10288 = vperm.xlu0 %18745, %v20802_v8   ;;  %v21037_v8 = vld [vmem:[%s23338_s2 + $0xc0] sm:$0xff] }
0x1600   : > { %v21012_v39 = vpop.permute.xlu1 %8486  ;;  %23684 = vst [vmem:[#allocation49_spill] sm:$0xff] %v21037_v8  ;;  %16399 = vmatprep.mubr.msk.f32.mxu0 %vm716_vm0, %v21037_v8 }
0x1601   : > { %23681 = vst [vmem:[#allocation46_spill] sm:$0xff] %v21012_v39  ;;  %v21039_v39 = vpop.permute.xlu0 %5007 }
0x1603   : > { %18759 = vset.pattern.permute.xlu1 %v23647_v31  ;;  %10300 = vperm.xlu0 %18745, %v20828_v24  }
0x1604   : > { %11827 = vperm.xlu1 %18759, %v20968_v41   ;;  %v21024_v15 = vpop.permute.xlu1 %8494 }
0x1605   : > { %23683 = vst [vmem:[#allocation48_spill] sm:$0xff] %v21024_v15  ;;  %v21046_v15 = vld [vmem:[%s23338_s2 + $0xc8] sm:$0xff]  ;;  %v21059_v60 = vpop.permute.xlu0 %5116 }
0x1606   : > { %23685 = vst [vmem:[#allocation50_spill] sm:$0xff] %v21046_v15  ;;  %16400 = vmatmul.mubr.msk.f32.vlgmr.msra.gmra.mrb[76].mxu0 %vm716_vm0, %v21046_v15 }
0x1607   : > { %18748 = vset.pattern.permute.xlu0 %v23687_v62  ;;  %17893 = vmatpush3.bf16.msra.mxu0 %v21017_v49 }
0x1608   : > { %11835 = vperm.xlu1 %18759, %v21004_v14   ;;  %v21049_v24 = vpop.permute.xlu1 %8502  ;;  %10570 = vperm.xlu0 %18748, %v20818_v29   ;;  %v21073_v29 = vld [vmem:[%s23338_s2 + $0xd0] sm:$0xff] }
0x1609   : > { %23686 = vst [vmem:[#allocation51_spill] sm:$0xff] %v21049_v24  ;;  %17895 = vmatprep.subr.bf16.mxu0 %v21028_v30  ;;  %23690 = vst [vmem:[#allocation54_spill] sm:$0xff] %v21073_v29  ;;  %16402 = vmatprep.mubr.msk.f32.mxu0 %vm716_vm0, %v21073_v29 }
0x160a   : > { %16403 = vmatmul.mubr.msk.f32.gmra.mrb[78].mxu0 %vm716_vm0, %v21078_v40 }
0x160b   : > { %17897 = vmatpush3.bf16.msra.mxu0 %v21028_v30 }
0x160c   : > { %11839 = vperm.xlu1 %18759, %v20989_v48   ;;  %10574 = vperm.xlu0 %18748, %v20851_v44   ;;  %v21063_v24 = vpop.permute.xlu1 %8506 }
0x160d   : > { %23688 = vst [vmem:[#allocation52_spill] sm:$0xff] %v21063_v24  ;;  %17907 = vmatprep.subr.bf16.mxu0 %v21066_v23  ;;  %v21085_v24 = vpop.permute.xlu0 %5629 }
0x1610   : > { %18762 = vset.pattern.permute.xlu1 %v23648_v38  ;;  %18751 = vset.pattern.permute.xlu0 %v23692_v35  ;;  %v21090_v26 = vpop.permute.xlu1 %8516 }
0x1611   : > { %12348 = vperm.xlu1 %18762, %v20981_v28   ;;  %10594 = vperm.xlu0 %18751, %v20851_v44   ;;  %23693 = vst [vmem:[#allocation56_spill] sm:$0xff] %v21090_v26  ;;  %v21095_v19 = vpop.permute.xlu0 %5641 }
0x1614   : > { %v21097_v56 = vpop.permute.xlu1 %8526 }
0x1615   : > { %12352 = vperm.xlu1 %18762, %v21004_v14   ;;  %18754 = vset.pattern.permute.xlu0 %v23616_v32  ;;  %23694 = vst [vmem:[#allocation57_spill] sm:$0xff] %v21097_v56  ;;  %v21102_v44 = vpop.permute.xlu0 %5911 }
0x1616   : > { %11603 = vperm.xlu0 %18754, %v20981_v28  }
0x1618   : > { %v21105_v26 = vpop.permute.xlu1 %8671 }
0x1619   : > { %18763 = vset.pattern.permute.xlu1 %v23649_v37  ;;  %23695 = vst [vmem:[#allocation58_spill] sm:$0xff] %v21105_v26  ;;  %v21111_v56 = vpop.permute.xlu0 %5915 }
0x161a   : > { %12622 = vperm.xlu1 %18763, %v20968_v41   ;;  %11608 = vperm.xlu0 %18754, %v21004_v14  }
0x161c   : > { %v21115_v40 = vpop.permute.xlu1 %8675 }
0x161d   : > { %23696 = vst [vmem:[#allocation59_spill] sm:$0xff] %v21115_v40 }
0x161e   : > { %18765 = vset.pattern.permute.xlu1 %v23650_v36  ;;  %18757 = vset.pattern.permute.xlu0 %v23646_v2  ;;  %v21120_v2 = vpop.permute.xlu0 %5935 }
0x161f   : > { %12642 = vperm.xlu1 %18765, %v20968_v41   ;;  %11722 = vperm.xlu0 %18757, %v21004_v14  }
0x1620   : > { %v21123_v26 = vpop.permute.xlu1 %9051 }
0x1621   : > { %23697 = vst [vmem:[#allocation60_spill] sm:$0xff] %v21123_v26 }
0x1622   : > { %v21130_v40 = vpop.permute.xlu0 %5951 }
0x1623   : > { %12646 = vperm.xlu1 %18765, %v20981_v28   ;;  %18760 = vset.pattern.permute.xlu0 %v23647_v31  ;;  %v14761_v31 = vld [vmem:[%s23342_s6 + $0x168] sm:$0xff] }
0x1624   : > { %11831 = vperm.xlu0 %18760, %v20981_v28   ;;  %v21132_v29 = vpop.permute.xlu1 %9167 }
0x1625   : > { %23698 = vst [vmem:[#allocation61_spill] sm:$0xff] %v21132_v29  ;;  %v14760_v29 = vld [vmem:[%s23342_s6 + $0x160] sm:$0xff] }
0x1626   : > { %v21139_v26 = vpop.permute.xlu0 %5964 }
0x1627   : > { %18766 = vset.pattern.permute.xlu1 %v23649_v37  ;;  %23699 = vst [vmem:[#allocation62_spill] sm:$0xff] %v21139_v26 }
0x1628   : > { %12634 = vperm.xlu1 %18766, %v20989_v48   ;;  %18761 = vset.pattern.permute.xlu0 %v23648_v38  ;;  %v14763_v38 = vld [vmem:[%s23342_s6 + $0x178] sm:$0xff]  ;;  %v21141_v15 = vpop.permute.xlu1 %9171 }
0x1629   : > { %12344 = vperm.xlu0 %18761, %v20968_v41   ;;  %23700 = vst [vmem:[#allocation63_spill] sm:$0xff] %v21141_v15 }
0x162c   : > { %18768 = vset.pattern.permute.xlu1 %v23650_v36 }
0x162d   : > { %12654 = vperm.xlu1 %18768, %v20989_v48   ;;  %12356 = vperm.xlu0 %18761, %v20989_v48  }
0x1631   : > { %18769 = vset.pattern.permute.xlu1 %v23651_v20  ;;  %18764 = vset.pattern.permute.xlu0 %v23649_v37  ;;  %v21150_v37 = vpop.permute.xlu1 %9066 }
0x1632   : > { %12662 = vperm.xlu1 %18769, %v20968_v41   ;;  %12626 = vperm.xlu0 %18764, %v20981_v28   ;;  %23702 = vst [vmem:[#allocation65_spill] sm:$0xff] %v21150_v37 }
0x1635   : > { %v21164_v37 = vpop.permute.xlu1 %9179 }
0x1636   : > { %12670 = vperm.xlu1 %18769, %v21004_v14   ;;  %12630 = vperm.xlu0 %18764, %v21004_v14   ;;  %23704 = vst [vmem:[#allocation67_spill] sm:$0xff] %v21164_v37  ;;  %v19058_v37 = vld [vmem:[%s23342_s6 + $0x48] sm:$0xff] }
0x1639   : > { %v21172_v8 = vpop.permute.xlu1 %9280 }
0x163a   : > { %12674 = vperm.xlu1 %18769, %v20989_v48   ;;  %18767 = vset.pattern.permute.xlu0 %v23650_v36  ;;  %v19057_v36 = vld [vmem:[%s23342_s6 + $0x40] sm:$0xff]  ;;  %23706 = vst [vmem:[#allocation69_spill] sm:$0xff] %v21172_v8 }
0x163b   : > { %12650 = vperm.xlu0 %18767, %v21004_v14  }
0x163e   : > { %12684 = vperm.xlu1 %18769, %v14761_v31   ;;  %v21147_v31 = vpop.permute.xlu0 %5974 }
0x163f   : > { %23701 = vst [vmem:[#allocation64_spill] sm:$0xff] %v21147_v31  ;;  %18770 = vset.pattern.permute.xlu0 %v23651_v20  ;;  %v14762_v20 = vld [vmem:[%s23342_s6 + $0x170] sm:$0xff] }
0x1640   : > { %12666 = vperm.xlu0 %18770, %v20981_v28  }
0x1642   : > { %12694 = vperm.xlu1 %18769, %v14763_v38   ;;  %v21156_v38 = vpop.permute.xlu0 %6120 }
0x1643   : > { %23703 = vst [vmem:[#allocation66_spill] sm:$0xff] %v21156_v38 }
0x1644   : > { %12679 = vperm.xlu0 %18770, %v14760_v29   ;;  %v21180_v29 = vpop.permute.xlu1 %9288 }
0x1645   : > { %23708 = vst [vmem:[#allocation71_spill] sm:$0xff] %v21180_v29 }
0x1646   : > { %18772 = vset.pattern.permute.xlu1 %v23652_v59  ;;  %v21170_v15 = vpop.permute.xlu0 %6132 }
0x1647   : > { %12839 = vperm.xlu1 %18772, %v20981_v28   ;;  %23705 = vst [vmem:[#allocation68_spill] sm:$0xff] %v21170_v15 }
0x1648   : > { %12689 = vperm.xlu0 %18770, %v14762_v20  }
0x164a   : > { %v21176_v22 = vpop.permute.xlu0 %6402 }
0x164b   : > { %12843 = vperm.xlu1 %18772, %v21004_v14   ;;  %23707 = vst [vmem:[#allocation70_spill] sm:$0xff] %v21176_v22 }
0x164c   : > { %18771 = vset.pattern.permute.xlu0 %v23652_v59  ;;  %v21189_v59 = vpop.permute.xlu1 %9292 }
0x164d   : > { %12835 = vperm.xlu0 %18771, %v20968_v41   ;;  %23710 = vst [vmem:[#allocation73_spill] sm:$0xff] %v21189_v59 }
0x164e   : > { %v21187_v20 = vpop.permute.xlu0 %6406 }
0x164f   : > { %18773 = vset.pattern.permute.xlu1 %v23687_v62  ;;  %23709 = vst [vmem:[#allocation72_spill] sm:$0xff] %v21187_v20 }
0x1650   : > { %4777 = vperm.xlu1 %18773, %v19057_v36   ;;  %v21196_v8 = vpop.permute.xlu1 %9801 }
0x1651   : > { %12847 = vperm.xlu0 %18771, %v20989_v48   ;;  %23712 = vst [vmem:[#allocation75_spill] sm:$0xff] %v21196_v8 }
0x1652   : > { %v21194_v29 = vpop.permute.xlu0 %6426 }
0x1653   : > { %23711 = vst [vmem:[#allocation74_spill] sm:$0xff] %v21194_v29 }
0x1654   : > { %8945 = vperm.xlu1 %18773, %v20680_v63   ;;  %v21208_v20 = vpop.permute.xlu1 %9805 }
0x1655   : > { %18774 = vset.pattern.permute.xlu0 %v23692_v35  ;;  %23714 = vst [vmem:[#allocation77_spill] sm:$0xff] %v21208_v20 }
0x1656   : > { %4797 = vperm.xlu0 %18774, %v19057_v36   ;;  %v21203_v59 = vpop.permute.xlu0 %7435  ;;  %v19060_v36 = vld [vmem:[%s23342_s6 + $0x58] sm:$0xff] }
0x1657   : > { %23713 = vst [vmem:[#allocation76_spill] sm:$0xff] %v21203_v59 }
0x1658   : > { %8949 = vperm.xlu1 %18773, %v20695_v47   ;;  %v21213_v8 = vpop.permute.xlu1 %10075 }
0x1659   : > { %23716 = vst [vmem:[#allocation79_spill] sm:$0xff] %v21213_v8 }
0x165a   : > { %8969 = vperm.xlu0 %18774, %v20695_v47   ;;  %v21211_v47 = vpop.permute.xlu0 %7440 }
0x165b   : > { %23715 = vst [vmem:[#allocation78_spill] sm:$0xff] %v21211_v47 }
0x165c   : > { %18775 = vset.pattern.permute.xlu1 %v23692_v35  ;;  %v21221_v59 = vpop.permute.xlu1 %10095 }
0x165d   : > { %4801 = vperm.xlu1 %18775, %v19058_v37   ;;  %23718 = vst [vmem:[#allocation81_spill] sm:$0xff] %v21221_v59 }
0x165e   : > { %13133 = vperm.xlu0 %18774, %v20968_v41  }
0x1660   : > { %v21227_v8 = vpop.permute.xlu1 %10099 }
0x1661   : > { %8965 = vperm.xlu1 %18775, %v20680_v63   ;;  %v19059_v63 = vld [vmem:[%s23342_s6 + $0x50] sm:$0xff]  ;;  %23720 = vst [vmem:[#allocation83_spill] sm:$0xff] %v21227_v8 }
0x1662   : > { %4809 = vperm.xlu0 %18774, %v19060_v36  }
0x1664   : > { %v21248_v8 = vpop.permute.xlu1 %10087 }
0x1665   : > { %18776 = vset.pattern.permute.xlu1 %v23687_v62  ;;  %23726 = vst [vmem:[#allocation89_spill] sm:$0xff] %v21248_v8 }
0x1666   : > { %13113 = vperm.xlu1 %18776, %v20968_v41   ;;  %8977 = vperm.xlu0 %18774, %v20701_v7   ;;  %v21219_v41 = vpop.permute.xlu0 %7554 }
0x1667   : > { %23717 = vst [vmem:[#allocation80_spill] sm:$0xff] %v21219_v41 }
0x166a   : > { %4785 = vperm.xlu1 %18776, %v19059_v63   ;;  %18778 = vset.pattern.permute.xlu0 %v23687_v62 }
0x166b   : > { %4781 = vperm.xlu0 %18778, %v19058_v37  }
0x166e   : > { %4789 = vperm.xlu1 %18776, %v19060_v36   ;;  %v21225_v36 = vpop.permute.xlu0 %7663 }
0x166f   : > { %13117 = vperm.xlu0 %18778, %v20981_v28   ;;  %23719 = vst [vmem:[#allocation82_spill] sm:$0xff] %v21225_v36 }
0x1672   : > { %8957 = vperm.xlu1 %18776, %v20701_v7   ;;  %v21233_v59 = vpop.permute.xlu0 %8176 }
0x1673   : > { %8953 = vperm.xlu0 %18778, %v20714_v10   ;;  %23721 = vst [vmem:[#allocation84_spill] sm:$0xff] %v21233_v59 }
0x1676   : > { %18777 = vset.pattern.permute.xlu1 %v23692_v35 }
0x1677   : > { %13137 = vperm.xlu1 %18777, %v20981_v28   ;;  %13125 = vperm.xlu0 %18778, %v20989_v48  }
0x167b   : > { %4805 = vperm.xlu1 %18777, %v19059_v63   ;;  %18781 = vset.pattern.permute.xlu0 %v23616_v32 }
0x167f   : > { %8973 = vperm.xlu1 %18777, %v20714_v10  }
0x1683   : > { %18779 = vset.pattern.permute.xlu1 %v23687_v62 }
0x1684   : > { %13121 = vperm.xlu1 %18779, %v21004_v14  }
0x1688   : > { %18780 = vset.pattern.permute.xlu1 %v23692_v35 }
0x1689   : > { %13141 = vperm.xlu1 %18780, %v21004_v14   ;;  %v14424_v14 = vld [vmem:[%s23338_s2 + $0xe0] sm:$0xff] }
0x169f   : > { %v4681_v7 = vpop.f32.mrb[74].mxu0 }
0x16a0   : > { %v4688_v37 = vrot.slane %v4681_v7, %v19872_v18  ;;  %v16379_v20 = vpop.f32.mrb[75].mxu0  ;;  %v21261_v7 = vpop.permute.xlu1 %10107  ;;  %13145 = vperm.xlu1 %18780, %v20989_v48   ;;  %v14425_v48 = vld [vmem:[%s23338_s2 + $0xe8] sm:$0xff] }
0x16a1   : > { %23727 = vst [vmem:[#allocation90_spill] sm:$0xff] %v21261_v7  ;;  %v14428_v7 = vld [vmem:[%s23338_s2 + $0x100] sm:$0xff] }
0x16a2   : > { %v21237_v28 = vsub.f32 %v20888_v61, %v4688_v37  ;;  %v21240_v63 = vsub.f32 %v20884_v3, %v4688_v37  ;;  %v21243_v10 = vsub.f32 %v20901_v54, %v4688_v37  ;;  %v21246_v62 = vsub.f32 %v20896_v33, %v4688_v37  ;;  %16427 = vmatprep.mubr.msk.f32.mxu0 %vm716_vm0, %v14428_v7 }
0x16a4   : > { %23722 = vst [vmem:[#allocation85_spill] sm:$0xff] %v21237_v28  ;;  %23723 = vst [vmem:[#allocation86_spill] sm:$0xff] %v21240_v63  ;;  %v4693_v20 = vmul.f32 %v21237_v28, %v21237_v28  ;;  %v4694_v61 = vmul.f32 %v21240_v63, %v21240_v63  ;;  %v4695_v54 = vmul.f32 %v21243_v10, %v21243_v10  ;;  %18782 = vset.pattern.permute.xlu1 %v23616_v32 }
0x16a5   : > { %23724 = vst [vmem:[#allocation87_spill] sm:$0xff] %v21243_v10  ;;  %23725 = vst [vmem:[#allocation88_spill] sm:$0xff] %v21246_v62  ;;  %v4696_v33 = vmul.f32 %v21246_v62, %v21246_v62 }
0x16a6   : > { %v17869_v3 = vpack.c.bf16 %v4694_v61, %v4693_v20  ;;  %v14426_v20 = vld [vmem:[%s23338_s2 + $0xf0] sm:$0xff]  ;;  %v21284_v61 = vld [vmem:[%s19539_s30 + $0x38] sm:$0xff]  }
0x16a7   : > { %v17872_v37 = vpack.c.bf16 %v4696_v33, %v4695_v54  ;;  %23728 = vst [vmem:[#allocation91_spill] sm:$0xff] %v21284_v61  ;;  %v21299_v54 = vld [vmem:[#allocation8] sm:$0xff] }
0x16a8   : > { %17870 = vmatpush3.bf16.msra.mxu1 %v17869_v3  ;;  %v14427_v3 = vld [vmem:[%s23338_s2 + $0xf8] sm:$0xff]  ;;  %23729 = vst [vmem:[#allocation92_spill] sm:$0xff] %v21299_v54 }
0x16a9   : > { %17871 = vmatprep.subr.bf16.mxu1 %v23600_v55 }
0x16ac   : > { %17873 = vmatpush3.bf16.msra.mxu1 %v17872_v37 }
0x16ad   : > { %17883 = vmatprep.subr.bf16.mxu1 %v21017_v49 }
0x16af   : > { %16389 = vmatmul.mubr.msk.f32.vlgmr.msra.gmra.mrb[62].mxu1 %vm716_vm0, %v23615_v50 }
0x16b0   : > { %17885 = vmatpush3.bf16.msra.mxu1 %v21017_v49  ;;  %16413 = vmatprep.mubr.msk.f32.mxu1 %vm716_vm0, %v14424_v14 }
0x16b1   : > { %17887 = vmatprep.subr.bf16.mxu1 %v21028_v30 }
0x16b4   : > { %17889 = vmatpush3.bf16.msra.mxu1 %v21028_v30 }
0x16b5   : > { %17899 = vmatprep.subr.bf16.mxu1 %v21066_v23 }
0x16b7   : > { %16414 = vmatmul.mubr.msk.f32.vlgmr.msra.gmra.mrb[64].mxu1 %vm716_vm0, %v14425_v48 }
0x16b8   : > { %17901 = vmatpush3.bf16.msra.mxu1 %v21066_v23  ;;  %16416 = vmatprep.mubr.msk.f32.mxu1 %vm716_vm0, %v14426_v20 }
0x16b9   : > { %17903 = vmatprep.subr.bf16.mxu1 %v21284_v61 }
0x16bb   : > { %16417 = vmatmul.mubr.msk.f32.gmra.mrb[66].mxu1 %vm716_vm0, %v14427_v3 }
0x16bc   : > { %17905 = vmatpush3.bf16.msra.mxu1 %v21284_v61  ;;  %16441 = vmatprep.mubr.msk.f32.mxu1 %vm716_vm0, %v14424_v14  ;;  %v14429_v14 = vld [vmem:[%s23338_s2 + $0x108] sm:$0xff] }
0x16bd   : > { %16428 = vmatmul.mubr.msk.f32.vlgmr.msra.gmra.mrb[80].mxu0 %vm716_vm0, %v14429_v14 }
0x16be   : > { %17909 = vmatpush3.bf16.msra.mxu0 %v21066_v23 }
0x16bf   : > { %16442 = vmatmul.mubr.msk.f32.vlgmr.msra.gmra.mrb[68].mxu1 %vm716_vm0, %v14425_v48  ;;  %v14430_v48 = vld [vmem:[%s23338_s2 + $0x110] sm:$0xff]  ;;  %17911 = vmatprep.subr.bf16.mxu0 %v21284_v61 }
0x16c0   : > { %16444 = vmatprep.mubr.msk.f32.mxu1 %vm716_vm0, %v14426_v20  ;;  %16430 = vmatprep.mubr.msk.f32.mxu0 %vm716_vm0, %v14430_v48  ;;  %v14431_v20 = vld [vmem:[%s23338_s2 + $0x118] sm:$0xff] }
0x16c1   : > { %16431 = vmatmul.mubr.msk.f32.gmra.mrb[82].mxu0 %vm716_vm0, %v14431_v20 }
0x16c2   : > { %17913 = vmatpush3.bf16.msra.mxu0 %v21284_v61  ;;  %16455 = vmatprep.mubr.msk.f32.mxu0 %vm716_vm0, %v14428_v7 }
0x16c3   : > { %16445 = vmatmul.mubr.msk.f32.gmra.mrb[70].mxu1 %vm716_vm0, %v14427_v3 }
0x16c4   : > { %16469 = vmatprep.mubr.msk.f32.mxu1 %vm716_vm0, %v21299_v54 }
0x16c5   : > { %16456 = vmatmul.mubr.msk.f32.vlgmr.msra.gmra.mrb[84].mxu0 %vm716_vm0, %v14429_v14 }
0x16c6   : > { %16458 = vmatprep.mubr.msk.f32.mxu0 %vm716_vm0, %v14430_v48 }
0x16c9   : > { %16459 = vmatmul.mubr.msk.f32.gmra.mrb[86].mxu0 %vm716_vm0, %v14431_v20 }
0x16ca   : > { %16483 = vmatprep.mubr.msk.f32.mxu0 %vm716_vm0, %v21299_v54 }
0x16d9   : > { %v16401_v33 = vpop.f32.mrb[76].mxu0 }
0x16da   : > { %v4979_v37 = vpop.f32.mrb[77].mxu0  ;;  %v4985_v28 = vadd.f32 %v16401_v33, %v21009_v57 }
0x16db   : > { %v4980_v7 = vadd.f32 %v4979_v37, %v20722_v58 }
0x16dd   : > { %v16404_v35 = vpop.f32.mrb[78].mxu0 }
0x16de   : > { %v4989_v32 = vpop.f32.mrb[79].mxu0  ;;  %v4995_v20 = vadd.f32 %v16404_v35, %v20739_v5 }
0x1782   : > { %v21328_v3 = vpop.f32.mrb[62].mxu1 }
0x1783   : > { %23730 = vst [vmem:[#allocation93_spill] sm:$0xff] %v21328_v3  ;;  %v16390_v8 = vpop.f32.mrb[63].mxu1 }
0x1784   : > { %v4990_v8 = vadd.f32 %v4989_v32, %v21021_v53 }
0x178a   : > { %v16415_v63 = vpop.f32.mrb[64].mxu1 }
0x178b   : > { %v21332_v10 = vadd.f32 %v16415_v63, %v20734_v12  ;;  %v5092_v62 = vpop.f32.mrb[65].mxu1 }
0x178c   : > { %v21336_v14 = vadd.f32 %v5092_v62, %v20731_v21 }
0x178d   : > { %23731 = vst [vmem:[#allocation94_spill] sm:$0xff] %v21332_v10  ;;  %v5395_v48 = vmul.f32 %v21332_v10, %v4985_v28 }
0x178e   : > { %23732 = vst [vmem:[#allocation95_spill] sm:$0xff] %v21336_v14  ;;  %v5394_v59 = vmul.f32 %v21336_v14, %v4980_v7  ;;  %v16418_v3 = vpop.f32.mrb[66].mxu1 }
0x178f   : > { %v21343_v33 = vadd.f32 %v16418_v3, %v20744_v9  ;;  %v5102_v63 = vpop.f32.mrb[67].mxu1 }
0x1790   : > { %v21346_v36 = vadd.f32 %v5102_v63, %v21039_v39  ;;  %v17914_v37 = vpack.c.bf16 %v5395_v48, %v5394_v59 }
0x1791   : > { %23733 = vst [vmem:[#allocation96_spill] sm:$0xff] %v21343_v33  ;;  %v5397_v62 = vmul.f32 %v21343_v33, %v4995_v20 }
0x1792   : > { %23734 = vst [vmem:[#allocation97_spill] sm:$0xff] %v21346_v36  ;;  %v5396_v41 = vmul.f32 %v21346_v36, %v4990_v8  ;;  %v16443_v47 = vpop.f32.mrb[68].mxu1  ;;  %17915 = vmatprep.subr.bf16.mxu1 %v17914_v37 }
0x1793   : > { %v21351_v35 = vadd.f32 %v16443_v47, %v20734_v12  ;;  %v5290_v29 = vpop.f32.mrb[69].mxu1  ;;  %17917 = vmatpush3.bf16.msra.mxu1 %v17914_v37 }
0x1794   : > { %v21354_v32 = vadd.f32 %v5290_v29, %v20731_v21  ;;  %v17918_v22 = vpack.c.bf16 %v5397_v62, %v5396_v41  ;;  %v21366_v29 = vld [vmem:[#allocation8 + $0x8] sm:$0xff]  ;;  %v21370_v41 = vld [vmem:[#allocation8 + $0x10] sm:$0xff] }
0x1795   : > { %23735 = vst [vmem:[#allocation98_spill] sm:$0xff] %v21351_v35  ;;  %v5484_v3 = vmul.f32 %v21351_v35, %v4985_v28  ;;  %23739 = vst [vmem:[#allocation102_spill] sm:$0xff] %v21366_v29 }
0x1796   : > { %23736 = vst [vmem:[#allocation99_spill] sm:$0xff] %v21354_v32  ;;  %v5483_v63 = vmul.f32 %v21354_v32, %v4980_v7  ;;  %v16446_v59 = vpop.f32.mrb[70].mxu1  ;;  %17919 = vmatprep.subr.bf16.mxu1 %v17918_v22  ;;  %23740 = vst [vmem:[#allocation103_spill] sm:$0xff] %v21370_v41 }
0x1797   : > { %v21359_v48 = vadd.f32 %v16446_v59, %v20744_v9  ;;  %v5300_v36 = vpop.f32.mrb[71].mxu1  ;;  %17921 = vmatpush3.bf16.msra.mxu1 %v17918_v22  ;;  %v21374_v22 = vld [vmem:[#allocation8 + $0x18] sm:$0xff] }
0x1798   : > { %v21362_v33 = vadd.f32 %v5300_v36, %v21039_v39  ;;  %v17922_v12 = vpack.c.bf16 %v5484_v3, %v5483_v63  ;;  %23741 = vst [vmem:[#allocation104_spill] sm:$0xff] %v21374_v22  ;;  %v21387_v39 = vpop.f32.mrb[80].mxu0  ;;  %v21404_v3 = vld [vmem:[%s23339_s3 + $0x40] sm:$0xff] }
0x1799   : > { %23737 = vst [vmem:[#allocation100_spill] sm:$0xff] %v21359_v48  ;;  %v5486_v47 = vmul.f32 %v21359_v48, %v4995_v20  ;;  %v21389_v36 = vpop.f32.mrb[81].mxu0  ;;  %23742 = vst [vmem:[#allocation105_spill] sm:$0xff] %v21404_v3 }
0x179a   : > { %23738 = vst [vmem:[#allocation101_spill] sm:$0xff] %v21362_v33  ;;  %v5485_v21 = vmul.f32 %v21362_v33, %v4990_v8  ;;  %17923 = vmatprep.subr.bf16.mxu0 %v17922_v12  ;;  %16470 = vmatmul.mubr.msk.f32.vlgmr.msra.gmra.mrb[72].mxu1 %vm716_vm0, %v21366_v29  ;;  %v21391_v28 = vpop.f32.mrb[82].mxu0 }
0x179b   : > { %17925 = vmatpush3.bf16.msra.mxu0 %v17922_v12  ;;  %16472 = vmatprep.mubr.msk.f32.mxu1 %vm716_vm0, %v21370_v41  ;;  %v21393_v7 = vpop.f32.mrb[83].mxu0 }
0x179c   : > { %v17926_v9 = vpack.c.bf16 %v5486_v47, %v5485_v21  ;;  %v16457_v20 = vpop.f32.mrb[84].mxu0 }
0x179d   : > { %v21395_v8 = vpop.f32.mrb[85].mxu0 }
0x179e   : > { %17927 = vmatprep.subr.bf16.mxu0 %v17926_v9  ;;  %16473 = vmatmul.mubr.msk.f32.gmra.mrb[74].mxu1 %vm716_vm0, %v21374_v22  ;;  %v21397_v37 = vpop.f32.mrb[86].mxu0 }
0x179f   : > { %17929 = vmatpush3.bf16.msra.mxu0 %v17926_v9  ;;  %v21399_v62 = vpop.f32.mrb[87].mxu0  ;;  %16497 = vmatprep.mubr.msk.f32.mxu1 %vm716_vm0, %v21404_v3 }
0x17a0   : > { %17938 = vmatprep.subr.bf16.mxu0 %v23600_v55 }
0x17a2   : > { %16484 = vmatmul.mubr.msk.f32.vlgmr.msra.gmra.mrb[88].mxu0 %vm716_vm0, %v21366_v29 }
0x17a3   : > { %16486 = vmatprep.mubr.msk.f32.mxu0 %vm716_vm0, %v21370_v41 }
0x17a6   : > { %16487 = vmatmul.mubr.msk.f32.gmra.mrb[90].mxu0 %vm716_vm0, %v21374_v22 }
0x17a7   : > { %16511 = vmatprep.mubr.msk.f32.mxu0 %vm19245_vm1, %v23606_v4 }
0x186d   : > { %v16471_v63 = vpop.f32.mrb[72].mxu1 }
0x186e   : > { %v5464_v59 = vpop.f32.mrb[73].mxu1 }
0x1871   : > { %v16474_v12 = vpop.f32.mrb[74].mxu1 }
0x1872   : > { %v5474_v47 = vpop.f32.mrb[75].mxu1 }
0x1875   : > { %v16485_v21 = vpop.f32.mrb[88].mxu0 }
0x1876   : > { %v5573_v9 = vmax.f32 %v16471_v63, %v16485_v21  ;;  %v5553_v22 = vpop.f32.mrb[89].mxu0 }
0x1877   : > { %v5572_v41 = vmax.f32 %v5464_v59, %v5553_v22 }
0x1878   : > { %v5577_v29 = vsub.f32 %v16471_v63, %v5573_v9  ;;  %v5589_v33 = vsub.f32 %v16485_v21, %v5573_v9 }
0x1879   : > { %v5576_v48 = vsub.f32 %v5464_v59, %v5572_v41  ;;  %v5588_v53 = vsub.f32 %v5553_v22, %v5572_v41  ;;  %v16488_v5 = vpop.f32.mrb[90].mxu0 }
0x187a   : > { %v5582_v32 = vmul.f32 1.442695, %v5577_v29  ;;  %v5594_v14 = vmul.f32 1.442695, %v5589_v33  ;;  %v5575_v35 = vmax.f32 %v16474_v12, %v16488_v5  ;;  %v5563_v10 = vpop.f32.mrb[91].mxu0 }
0x187b   : > { %v5580_v58 = vmul.f32 1.442695, %v5576_v48  ;;  %v5592_v57 = vmul.f32 1.442695, %v5588_v53  ;;  %v5574_v3 = vmax.f32 %v5474_v47, %v5563_v10 }
0x187c   : > { %18881 = vpow2.f32 %v5582_v32  ;;  %v5579_v54 = vsub.f32 %v16474_v12, %v5575_v35  ;;  %v5591_v61 = vsub.f32 %v16488_v5, %v5575_v35  ;;  %v21417_v12 = vadd.f32 %v21389_v36, %v20748_v45 }
0x187d   : > { %18883 = vpow2.f32 %v5594_v14  ;;  %v5578_v23 = vsub.f32 %v5474_v47, %v5574_v3  ;;  %v5590_v15 = vsub.f32 %v5563_v10, %v5574_v3  ;;  %v21421_v47 = vadd.f32 %v21395_v8, %v20748_v45 }
0x187e   : > { %18885 = vpow2.f32 %v5580_v58  ;;  %v5586_v38 = vmul.f32 1.442695, %v5579_v54  ;;  %v5598_v63 = vmul.f32 1.442695, %v5591_v61  ;;  %v21433_v45 = vadd.f32 %v21393_v7, %v20753_v52 }
0x187f   : > { %18887 = vpow2.f32 %v5592_v57  ;;  %v5584_v59 = vmul.f32 1.442695, %v5578_v23  ;;  %v5596_v41 = vmul.f32 1.442695, %v5590_v15  ;;  %v21410_v57 = vadd.f32 %v21387_v39, %v21059_v60 }
0x1880   : > { %18889 = vpow2.f32 %v5586_v38  ;;  %v21413_v38 = vadd.f32 %v16457_v20, %v21059_v60  ;;  %v21427_v60 = vadd.f32 %v21391_v28, %v20758_v25  ;;  %v21437_v8 = vadd.f32 %v21397_v37, %v20758_v25 }
0x1881   : > { %18891 = vpow2.f32 %v5598_v63 }
0x1882   : > { %18893 = vpow2.f32 %v5584_v59 }
0x1883   : > { %18895 = vpow2.f32 %v5596_v41 }
0x1886   : > { %v18882_v33 = vpop.eup %18881 }
0x1887   : > { %v18884_v48 = vpop.eup %18883 }
0x1888   : > { %v18886_v53 = vpop.eup %18885  ;;  %v5601_v29 = vadd.f32 %v18884_v48, %v18882_v33 }
0x1889   : > { %v18888_v32 = vpop.eup %18887 }
0x188a   : > { %v18890_v22 = vpop.eup %18889  ;;  %18897 = vrcp.f32 %v5601_v29  ;;  %v5600_v5 = vadd.f32 %v18888_v32, %v18886_v53 }
0x188b   : > { %v18892_v14 = vpop.eup %18891 }
0x188c   : > { %v18894_v10 = vpop.eup %18893  ;;  %18899 = vrcp.f32 %v5600_v5  ;;  %v5603_v58 = vadd.f32 %v18892_v14, %v18890_v22 }
0x188d   : > { %v18896_v61 = vpop.eup %18895 }
0x188e   : > { %18901 = vrcp.f32 %v5603_v58  ;;  %v5602_v23 = vadd.f32 %v18896_v61, %v18894_v10 }
0x1890   : > { %18903 = vrcp.f32 %v5602_v23 }
0x1894   : > { %v18898_v15 = vpop.eup %18897 }
0x1895   : > { %v5609_v54 = vmul.f32 %v18898_v15, %v18882_v33  ;;  %v5617_v35 = vmul.f32 %v18898_v15, %v18884_v48 }
0x1896   : > { %v18900_v3 = vpop.eup %18899 }
0x1897   : > { %v5608_v21 = vmul.f32 %v18900_v3, %v18886_v53  ;;  %v5613_v9 = vmul.f32 %v5609_v54, %v21410_v57  ;;  %v5616_v63 = vmul.f32 %v18900_v3, %v18888_v32  ;;  %v5621_v39 = vmul.f32 %v5617_v35, %v21413_v38 }
0x1898   : > { %v18902_v59 = vpop.eup %18901  ;;  %v21441_v53 = vadd.f32 %v21399_v62, %v20753_v52  ;;  %v21450_v52 = vld [vmem:[%s23339_s3 + $0x48] sm:$0xff]  ;;  %v21455_v62 = vld [vmem:[%s23339_s3 + $0x50] sm:$0xff]  ;;  %v14878_v35 = vunpack.c.l.bf16 %v21017_v49 }
0x1899   : > { %v5612_v20 = vmul.f32 %v5608_v21, %v21417_v12  ;;  %v5620_v36 = vmul.f32 %v5616_v63, %v21421_v47  ;;  %v5625_v41 = vadd.f32 %v5621_v39, %v5613_v9  ;;  %v5611_v33 = vmul.f32 %v18902_v59, %v18890_v22 }
0x189a   : > { %v18904_v48 = vpop.eup %18903  ;;  %v5619_v28 = vmul.f32 %v18902_v59, %v18892_v14  ;;  %v21465_v14 = vld [vmem:[%s23339_s3 + $0x58] sm:$0xff]  ;;  %v14883_v39 = vunpack.c.h.bf16 %v21028_v30 }
0x189b   : > { %v5624_v29 = vadd.f32 %v5620_v36, %v5612_v20  ;;  %v5610_v32 = vmul.f32 %v18904_v48, %v18894_v10  ;;  %v5615_v5 = vmul.f32 %v5611_v33, %v21427_v60  ;;  %v5618_v58 = vmul.f32 %v18904_v48, %v18896_v61 }
0x189c   : > { %v5623_v22 = vmul.f32 %v5619_v28, %v21437_v8  ;;  %v14879_v10 = vunpack.c.h.bf16 %v21017_v49  ;;  %v14882_v36 = vunpack.c.l.bf16 %v21028_v30 }
0x189d   : > { %v17930_v23 = vpack.c.bf16 %v5625_v41, %v5624_v29  ;;  %v5614_v7 = vmul.f32 %v5610_v32, %v21433_v45  ;;  %v5622_v15 = vmul.f32 %v5618_v58, %v21441_v53 }
0x189e   : > { %v5627_v54 = vadd.f32 %v5623_v22, %v5615_v5 }
0x189f   : > { %17931 = vmatprep.subr.bf16.mxu1 %v17930_v23  ;;  %v5626_v25 = vadd.f32 %v5622_v15, %v5614_v7 }
0x18a0   : > { %17933 = vmatpush3.bf16.msra.mxu1 %v17930_v23 }
0x18a1   : > { %v17934_v37 = vpack.c.bf16 %v5627_v54, %v5626_v25 }
0x18a3   : > { %17935 = vmatprep.subr.bf16.mxu1 %v17934_v37 }
0x18a4   : > { %17937 = vmatpush3.bf16.msra.mxu1 %v17934_v37 }
0x18a5   : > { %17944 = vmatprep.subr.bf16.mxu1 %v23600_v55 }
0x18a7   : > { %16498 = vmatmul.mubr.msk.f32.vlgmr.msra.gmra.mrb[76].mxu1 %vm716_vm0, %v21450_v52 }
0x18a8   : > { %16500 = vmatprep.mubr.msk.f32.mxu1 %vm716_vm0, %v21455_v62 }
0x18ab   : > { %16501 = vmatmul.mubr.msk.f32.gmra.mrb[78].mxu1 %vm716_vm0, %v21465_v14 }
0x18ac   : > { %16522 = vmatprep.mubr.msk.f32.mxu1 %vm19245_vm1, %v23606_v4 }
0x197a   : > { %v16499_v61 = vpop.f32.mrb[76].mxu1 }
0x197b   : > { %v5728_v3 = vadd.f32 %v16499_v61, %v20763_v27  ;;  %v5722_v21 = vpop.f32.mrb[77].mxu1 }
0x197c   : > { %v5723_v9 = vadd.f32 %v5722_v21, %v21085_v24 }
0x197d   : > { %v5742_v63 = vadd.f32 %v14879_v10, %v5728_v3  ;;  %v21489_v3 = vld [vmem:[%s23340_s4 + $0x80] sm:$0xff] }
0x197e   : > { %v5741_v59 = vadd.f32 %v14878_v35, %v5723_v9  ;;  %v16502_v20 = vpop.f32.mrb[78].mxu1 }
0x197f   : > { %v5738_v41 = vadd.f32 %v16502_v20, %v21095_v19  ;;  %v5732_v33 = vpop.f32.mrb[79].mxu1 }
0x1980   : > { %v17939_v48 = vpack.c.bf16 %v5742_v63, %v5741_v59  ;;  %v5733_v28 = vadd.f32 %v5732_v33, %v20768_v16 }
0x1981   : > { %v5744_v29 = vadd.f32 %v14883_v39, %v5738_v41 }
0x1982   : > { %v5743_v49 = vadd.f32 %v14882_v36, %v5733_v28  ;;  %17940 = vmatpush3.bf16.msra.mxu0 %v17939_v48 }
0x1983   : > { %17941 = vmatprep.subr.bf16.mxu0 %v23600_v55 }
0x1984   : > { %v17942_v32 = vpack.c.bf16 %v5744_v29, %v5743_v49 }
0x1986   : > { %17943 = vmatpush3.bf16.msra.mxu0 %v17942_v32 }
0x1989   : > { %16512 = vmatmul.mubr.msk.f32.vlgmr.msra.gmra.mrb[92].mxu0 %vm716_vm0, %v23615_v50 }
0x198a   : > { %16533 = vmatprep.mubr.msk.f32.mxu0 %vm716_vm0, %v21489_v3 }
0x1a5c   : > { %v5811_v5 = vpop.f32.mrb[92].mxu0 }
0x1a5d   : > { %v5818_v58 = vrot.slane %v5811_v5, %v19872_v18  ;;  %v16513_v30 = vpop.f32.mrb[93].mxu0 }
0x1a5f   : > { %v5819_v22 = vsub.f32 %v5741_v59, %v5818_v58  ;;  %v5820_v23 = vsub.f32 %v5742_v63, %v5818_v58  ;;  %v5821_v7 = vsub.f32 %v5743_v49, %v5818_v58  ;;  %v5822_v15 = vsub.f32 %v5744_v29, %v5818_v58 }
0x1a61   : > { %v5823_v54 = vmul.f32 %v5819_v22, %v5819_v22  ;;  %v5824_v25 = vmul.f32 %v5820_v23, %v5820_v23  ;;  %v5825_v10 = vmul.f32 %v5821_v7, %v5821_v7  ;;  %v5826_v61 = vmul.f32 %v5822_v15, %v5822_v15 }
0x1a63   : > { %v17945_v37 = vpack.c.bf16 %v5824_v25, %v5823_v54  ;;  %v17948_v35 = vpack.c.bf16 %v5826_v61, %v5825_v10  ;;  %v21532_v54 = vld [vmem:[%s23340_s4 + $0x98] sm:$0xff]  ;;  %v21537_v25 = vld [vmem:[%s23340_s4 + $0xa0] sm:$0xff]  ;;  %v21551_v10 = vld [vmem:[%s23340_s4 + $0xb0] sm:$0xff] }
0x1a64   : > { %v21560_v61 = vld [vmem:[%s23340_s4 + $0xb8] sm:$0xff] }
0x1a65   : > { %17946 = vmatpush3.bf16.msra.mxu1 %v17945_v37  ;;  %v21546_v37 = vld [vmem:[%s23340_s4 + $0xa8] sm:$0xff]  ;;  %23743 = vst [vmem:[#allocation106_spill] sm:$0xff] %v21560_v61 }
0x1a66   : > { %17947 = vmatprep.subr.bf16.mxu1 %v23600_v55 }
0x1a69   : > { %17949 = vmatpush3.bf16.msra.mxu1 %v17948_v35  ;;  %v21566_v35 = vld [vmem:[#allocation6 + $0x40] sm:$0xff] }
0x1a6c   : > { %16523 = vmatmul.mubr.msk.f32.vlgmr.msra.gmra.mrb[80].mxu1 %vm716_vm0, %v23615_v50 }
0x1a6d   : > { %16561 = vmatprep.mubr.msk.f32.mxu1 %vm1966_vm2, %v21566_v35 }
0x1b3f   : > { %v5893_v21 = vpop.f32.mrb[80].mxu1 }
0x1b40   : > { %v5894_v9 = vadd.f32 1e-05, %v5893_v21  ;;  %v16524_v63 = vpop.f32.mrb[81].mxu1 }
0x1b42   : > { %18905 = vrsqrt.f32 %v5894_v9 }
0x1b4c   : > { %v18906_v39 = vpop.eup %18905 }
0x1b4d   : > { %v5901_v59 = vrot.slane %v18906_v39, %v19872_v18 }
0x1b4f   : > { %v5902_v20 = vmul.f32 %v5901_v59, %v5819_v22  ;;  %v5903_v36 = vmul.f32 %v5901_v59, %v5820_v23  ;;  %v5904_v41 = vmul.f32 %v5901_v59, %v5821_v7  ;;  %v5905_v33 = vmul.f32 %v5901_v59, %v5822_v15  ;;  %v21517_v7 = vld [vmem:[%s23340_s4 + $0x88] sm:$0xff]  ;;  %v21522_v15 = vld [vmem:[%s23340_s4 + $0x90] sm:$0xff] }
0x1b51   : > { %v5922_v48 = vmul.f32 %v20772_v42, %v5902_v20  ;;  %v5923_v28 = vmul.f32 %v21102_v44, %v5903_v36  ;;  %v5924_v29 = vmul.f32 %v21111_v56, %v5904_v41  ;;  %v5925_v49 = vmul.f32 %v20789_v17, %v5905_v33 }
0x1b53   : > { %v21499_v32 = vadd.f32 %v20780_v43, %v5922_v48  ;;  %v21502_v5 = vadd.f32 %v20786_v11, %v5923_v28  ;;  %v21505_v58 = vadd.f32 %v21120_v2, %v5924_v29  ;;  %v21508_v30 = vadd.f32 %v20795_v13, %v5925_v49 }
0x1b55   : > { %v17950_v22 = vpack.c.bf16 %v21502_v5, %v21499_v32  ;;  %v17954_v23 = vpack.c.bf16 %v21508_v30, %v21505_v58 }
0x1b57   : > { %17951 = vmatprep.subr.bf16.mxu0 %v17950_v22 }
0x1b58   : > { %17953 = vmatpush3.bf16.msra.mxu0 %v17950_v22 }
0x1b59   : > { %17955 = vmatprep.subr.bf16.mxu0 %v17954_v23 }
0x1b5c   : > { %17957 = vmatpush3.bf16.msra.mxu0 %v17954_v23 }
0x1b5d   : > { %17974 = vmatprep.subr.bf16.mxu0 %v23600_v55 }
0x1b5f   : > { %16534 = vmatmul.mubr.msk.f32.vlgmr.msra.gmra.mrb[94].mxu0 %vm716_vm0, %v21517_v7 }
0x1b60   : > { %16536 = vmatprep.mubr.msk.f32.mxu0 %vm716_vm0, %v21522_v15 }
0x1b63   : > { %16537 = vmatmul.mubr.msk.f32.gmra.mrb[96].mxu0 %vm716_vm0, %v21532_v54 }
0x1b64   : > { %16539 = vmatprep.mubr.msk.f32.mxu0 %vm716_vm0, %v21537_v25 }
0x1b67   : > { %16540 = vmatmul.mubr.msk.f32.gmra.mrb[98].mxu0 %vm716_vm0, %v21546_v37 }
0x1b68   : > { %16542 = vmatprep.mubr.msk.f32.mxu0 %vm716_vm0, %v21551_v10 }
0x1b6b   : > { %16543 = vmatmul.mubr.msk.f32.gmra.mrb[100].mxu0 %vm716_vm0, %v21560_v61 }
0x1b6c   : > { %16575 = vmatprep.mubr.msk.f32.mxu0 %vm19245_vm1, %v23606_v4 }
0x1c32   : > { %v16535_v21 = vpop.f32.mrb[94].mxu0 }
0x1c33   : > { %v6078_v9 = vadd.f32 %v16535_v21, %v21130_v40  ;;  %v6072_v63 = vpop.f32.mrb[95].mxu0 }
0x1c34   : > { %v6073_v39 = vadd.f32 %v6072_v63, %v20804_v6 }
0x1c35   : > { %v6112_v59 = vmax.f32 %v6078_v9, 0.0 }
0x1c36   : > { %v6111_v20 = vmax.f32 %v6073_v39, 0.0  ;;  %v16538_v36 = vpop.f32.mrb[96].mxu0 }
0x1c37   : > { %v6088_v41 = vadd.f32 %v16538_v36, %v20823_v51  ;;  %v6082_v33 = vpop.f32.mrb[97].mxu0 }
0x1c38   : > { %v17958_v48 = vpack.c.bf16 %v6112_v59, %v6111_v20  ;;  %v6083_v28 = vadd.f32 %v6082_v33, %v20810_v46  ;;  %v23771_v46 = vld [vmem:[#allocation97_spill] sm:$0xff] }
0x1c39   : > { %v6114_v29 = vmax.f32 %v6088_v41, 0.0 }
0x1c3a   : > { %v6113_v49 = vmax.f32 %v6083_v28, 0.0  ;;  %v16541_v22 = vpop.f32.mrb[98].mxu0  ;;  %17959 = vmatprep.subr.bf16.mxu1 %v17958_v48 }
0x1c3b   : > { %v6098_v23 = vadd.f32 %v16541_v22, %v20837_v1  ;;  %v6092_v61 = vpop.f32.mrb[99].mxu0  ;;  %17961 = vmatpush3.bf16.msra.mxu1 %v17958_v48  ;;  %v21578_v48 = vld [vmem:[#allocation6 + $0x48] sm:$0xff]  ;;  %v23770_v1 = vld [vmem:[#allocation100_spill] sm:$0xff] }
0x1c3c   : > { %v17962_v21 = vpack.c.bf16 %v6114_v29, %v6113_v49  ;;  %v6093_v63 = vadd.f32 %v6092_v61, %v21139_v26  ;;  %23744 = vst [vmem:[#allocation107_spill] sm:$0xff] %v21578_v48  ;;  %v21580_v61 = vld [vmem:[#allocation6 + $0x50] sm:$0xff] }
0x1c3d   : > { %v6116_v9 = vmax.f32 %v6098_v23, 0.0  ;;  %23745 = vst [vmem:[#allocation108_spill] sm:$0xff] %v21580_v61 }
0x1c3e   : > { %v6115_v39 = vmax.f32 %v6093_v63, 0.0  ;;  %v16544_v6 = vpop.f32.mrb[100].mxu0  ;;  %17963 = vmatprep.subr.bf16.mxu1 %v17962_v21 }
0x1c3f   : > { %v6108_v36 = vadd.f32 %v16544_v6, %v20844_v0  ;;  %v6102_v59 = vpop.f32.mrb[101].mxu0  ;;  %17965 = vmatpush3.bf16.msra.mxu1 %v17962_v21  ;;  %v21587_v6 = vld [vmem:[#allocation6 + $0x58] sm:$0xff]  ;;  %v23747_v21 = vld [vmem:[#allocation66_spill] sm:$0xff] }
0x1c40   : > { %v17966_v20 = vpack.c.bf16 %v6116_v9, %v6115_v39  ;;  %v6103_v41 = vadd.f32 %v6102_v59, %v21147_v31  ;;  %23746 = vst [vmem:[#allocation109_spill] sm:$0xff] %v21587_v6  ;;  %v23748_v59 = vld [vmem:[#allocation68_spill] sm:$0xff] }
0x1c41   : > { %v6118_v33 = vmax.f32 %v6108_v36, 0.0 }
0x1c42   : > { %v6117_v28 = vmax.f32 %v6103_v41, 0.0  ;;  %17967 = vmatprep.subr.bf16.mxu1 %v17966_v20 }
0x1c43   : > { %17969 = vmatpush3.bf16.msra.mxu1 %v17966_v20 }
0x1c44   : > { %v17970_v22 = vpack.c.bf16 %v6118_v33, %v6117_v28  ;;  %v23749_v28 = vld [vmem:[#allocation24_spill] sm:$0xff] }
0x1c46   : > { %17971 = vmatprep.subr.bf16.mxu1 %v17970_v22 }
0x1c47   : > { %17973 = vmatpush3.bf16.msra.mxu1 %v17970_v22 }
0x1c48   : > { %17980 = vmatprep.subr.bf16.mxu1 %v23600_v55 }
0x1c4a   : > { %16562 = vmatmul.mubr.msk.f32.vlgmr.msra.gmra.mrb[82].mxu1 %vm1966_vm2, %v21578_v48 }
0x1c4b   : > { %16564 = vmatprep.mubr.msk.f32.mxu1 %vm1966_vm2, %v21580_v61 }
0x1c4e   : > { %16565 = vmatmul.mubr.msk.f32.gmra.mrb[84].mxu1 %vm1966_vm2, %v21587_v6 }
0x1c4f   : > { %16586 = vmatprep.mubr.msk.f32.mxu1 %vm19245_vm1, %v23606_v4 }
0x1d1d   : > { %v16563_v29 = vpop.f32.mrb[82].mxu1 }
0x1d1e   : > { %v6219_v49 = vadd.f32 %v16563_v29, %v20855_v34  ;;  %v6213_v23 = vpop.f32.mrb[83].mxu1 }
0x1d1f   : > { %v6214_v63 = vadd.f32 %v6213_v23, %v23747_v21  ;;  %v23750_v23 = vld [vmem:[#allocation53_spill] sm:$0xff]  ;;  %v23764_v21 = vld [vmem:[#allocation98_spill] sm:$0xff] }
0x1d20   : > { %v6233_v9 = vadd.f32 %v6219_v49, %v21502_v5  ;;  %v23752_v5 = vld [vmem:[#allocation91_spill] sm:$0xff] }
0x1d21   : > { %v6232_v39 = vadd.f32 %v6214_v63, %v21499_v32  ;;  %v16566_v36 = vpop.f32.mrb[84].mxu1  ;;  %v23751_v32 = vld [vmem:[#allocation49_spill] sm:$0xff]  ;;  %v23755_v49 = vld [vmem:[#allocation55_spill] sm:$0xff]  ;;  %v23756_v63 = vld [vmem:[#allocation92_spill] sm:$0xff] }
0x1d22   : > { %v6229_v20 = vadd.f32 %v16566_v36, %v23748_v59  ;;  %v6223_v41 = vpop.f32.mrb[85].mxu1 }
0x1d23   : > { %v17975_v33 = vpack.c.bf16 %v6233_v9, %v6232_v39  ;;  %v6224_v22 = vadd.f32 %v6223_v41, %v23749_v28  ;;  %v23763_v28 = vld [vmem:[#allocation94_spill] sm:$0xff] }
0x1d24   : > { %v6235_v6 = vadd.f32 %v6229_v20, %v21508_v30  ;;  %v23754_v30 = vld [vmem:[#allocation54_spill] sm:$0xff] }
0x1d25   : > { %v6234_v61 = vadd.f32 %v6224_v22, %v21505_v58  ;;  %17976 = vmatpush3.bf16.msra.mxu0 %v17975_v33  ;;  %v23753_v58 = vld [vmem:[#allocation50_spill] sm:$0xff] }
0x1d26   : > { %17977 = vmatprep.subr.bf16.mxu0 %v23600_v55 }
0x1d27   : > { %v17978_v29 = vpack.c.bf16 %v6235_v6, %v6234_v61 }
0x1d29   : > { %17979 = vmatpush3.bf16.msra.mxu0 %v17978_v29 }
0x1d2a   : > { %17987 = vmatprep.subr.bf16.mxu0 %v23750_v23 }
0x1d2c   : > { %16576 = vmatmul.mubr.msk.f32.vlgmr.msra.gmra.mrb[102].mxu0 %vm716_vm0, %v23615_v50 }
0x1d2d   : > { %17989 = vmatpush3.bf16.msra.mxu0 %v23750_v23  ;;  %16597 = vmatprep.mubr.msk.f32.mxu0 %vm716_vm0, %v23751_v32 }
0x1d2e   : > { %17991 = vmatprep.subr.bf16.mxu0 %v23752_v5 }
0x1d31   : > { %17993 = vmatpush3.bf16.msra.mxu0 %v23752_v5 }
0x1d34   : > { %16598 = vmatmul.mubr.msk.f32.vlgmr.msra.gmra.mrb[104].mxu0 %vm716_vm0, %v23753_v58 }
0x1d35   : > { %16600 = vmatprep.mubr.msk.f32.mxu0 %vm716_vm0, %v23754_v30 }
0x1d38   : > { %16601 = vmatmul.mubr.msk.f32.gmra.mrb[106].mxu0 %vm716_vm0, %v23755_v49 }
0x1d39   : > { %16625 = vmatprep.mubr.msk.f32.mxu0 %vm716_vm0, %v23756_v63 }
0x1dff   : > { %v6302_v36 = vpop.f32.mrb[102].mxu0 }
0x1e00   : > { %v6309_v20 = vrot.slane %v6302_v36, %v19872_v18  ;;  %v16577_v41 = vpop.f32.mrb[103].mxu0 }
0x1e02   : > { %v21619_v33 = vsub.f32 %v6232_v39, %v6309_v20  ;;  %v21621_v22 = vsub.f32 %v6233_v9, %v6309_v20  ;;  %v21623_v29 = vsub.f32 %v6234_v61, %v6309_v20  ;;  %v21625_v23 = vsub.f32 %v6235_v6, %v6309_v20  ;;  %v23761_v9 = vld [vmem:[#allocation45_spill] sm:$0xff]  ;;  %v23762_v6 = vld [vmem:[#allocation18_spill] sm:$0xff] }
0x1e04   : > { %23757 = vst [vmem:[#allocation53_spill] sm:$0xff] %v21619_v33  ;;  %23758 = vst [vmem:[#allocation49_spill] sm:$0xff] %v21621_v22  ;;  %v6314_v32 = vmul.f32 %v21619_v33, %v21619_v33  ;;  %v6315_v58 = vmul.f32 %v21621_v22, %v21621_v22  ;;  %v6316_v49 = vmul.f32 %v21623_v29, %v21623_v29 }
0x1e05   : > { %23759 = vst [vmem:[#allocation91_spill] sm:$0xff] %v21623_v29  ;;  %23760 = vst [vmem:[#allocation50_spill] sm:$0xff] %v21625_v23  ;;  %v6317_v39 = vmul.f32 %v21625_v23, %v21625_v23  ;;  %v23766_v29 = vld [vmem:[#allocation99_spill] sm:$0xff]  ;;  %v23767_v23 = vld [vmem:[#allocation20_spill] sm:$0xff] }
0x1e06   : > { %v17981_v30 = vpack.c.bf16 %v6315_v58, %v6314_v32  ;;  %v23765_v58 = vld [vmem:[#allocation95_spill] sm:$0xff] }
0x1e07   : > { %v16599_v36 = vpop.f32.mrb[104].mxu0  ;;  %v17984_v32 = vpack.c.bf16 %v6317_v39, %v6316_v49  ;;  %v23772_v49 = vld [vmem:[#allocation101_spill] sm:$0xff] }
0x1e08   : > { %v6509_v41 = vadd.f32 %v16599_v36, %v23761_v9  ;;  %17982 = vmatpush3.bf16.msra.mxu1 %v17981_v30  ;;  %v6503_v61 = vpop.f32.mrb[105].mxu0  ;;  %v23768_v30 = vld [vmem:[#allocation47_spill] sm:$0xff] }
0x1e09   : > { %v6504_v20 = vadd.f32 %v6503_v61, %v23762_v6  ;;  %17983 = vmatprep.subr.bf16.mxu1 %v23600_v55  ;;  %v23769_v6 = vld [vmem:[#allocation96_spill] sm:$0xff] }
0x1e0a   : > { %v6523_v59 = vmul.f32 %v6509_v41, %v23763_v28  ;;  %v6612_v34 = vmul.f32 %v6509_v41, %v23764_v21 }
0x1e0b   : > { %v6522_v22 = vmul.f32 %v6504_v20, %v23765_v58  ;;  %v6611_v33 = vmul.f32 %v6504_v20, %v23766_v29  ;;  %v16602_v48 = vpop.f32.mrb[106].mxu0 }
0x1e0c   : > { %v6519_v31 = vadd.f32 %v16602_v48, %v23767_v23  ;;  %17985 = vmatpush3.bf16.msra.mxu1 %v17984_v32  ;;  %v6513_v36 = vpop.f32.mrb[107].mxu0 }
0x1e0d   : > { %v6514_v9 = vadd.f32 %v6513_v36, %v23768_v30  ;;  %v17994_v0 = vpack.c.bf16 %v6523_v59, %v6522_v22  ;;  %v18002_v61 = vpack.c.bf16 %v6612_v34, %v6611_v33  ;;  %v23776_v34 = vld [vmem:[#allocation105_spill] sm:$0xff] }
0x1e0e   : > { %v6525_v26 = vmul.f32 %v6519_v31, %v23769_v6  ;;  %v6614_v28 = vmul.f32 %v6519_v31, %v23770_v1  ;;  %v23774_v1 = vld [vmem:[#allocation103_spill] sm:$0xff] }
0x1e0f   : > { %v6524_v21 = vmul.f32 %v6514_v9, %v23771_v46  ;;  %v6613_v39 = vmul.f32 %v6514_v9, %v23772_v49  ;;  %16587 = vmatmul.mubr.msk.f32.vlgmr.msra.gmra.mrb[86].mxu1 %vm716_vm0, %v23615_v50  ;;  %17995 = vmatprep.subr.bf16.mxu1 %v17994_v0  ;;  %v23773_v46 = vld [vmem:[#allocation102_spill] sm:$0xff] }
0x1e10   : > { %18003 = vmatprep.subr.bf16.mxu0 %v18002_v61  ;;  %17997 = vmatpush3.bf16.msra.mxu1 %v17994_v0  ;;  %v23775_v0 = vld [vmem:[#allocation104_spill] sm:$0xff] }
0x1e11   : > { %18005 = vmatpush3.bf16.msra.mxu0 %v18002_v61  ;;  %v17998_v48 = vpack.c.bf16 %v6525_v26, %v6524_v21  ;;  %v18006_v29 = vpack.c.bf16 %v6614_v28, %v6613_v39  ;;  %16611 = vmatprep.mubr.msk.f32.mxu1 %vm716_vm0, %v23756_v63 }
0x1e13   : > { %17999 = vmatprep.subr.bf16.mxu1 %v17998_v48  ;;  %18007 = vmatprep.subr.bf16.mxu0 %v18006_v29 }
0x1e14   : > { %18001 = vmatpush3.bf16.msra.mxu1 %v17998_v48 }
0x1e15   : > { %18009 = vmatpush3.bf16.msra.mxu0 %v18006_v29 }
0x1e16   : > { %18018 = vmatprep.subr.bf16.mxu0 %v23600_v55 }
0x1e17   : > { %16612 = vmatmul.mubr.msk.f32.vlgmr.msra.gmra.mrb[88].mxu1 %vm716_vm0, %v23773_v46 }
0x1e18   : > { %16626 = vmatmul.mubr.msk.f32.vlgmr.msra.gmra.mrb[108].mxu0 %vm716_vm0, %v23773_v46  ;;  %16614 = vmatprep.mubr.msk.f32.mxu1 %vm716_vm0, %v23774_v1 }
0x1e19   : > { %16628 = vmatprep.mubr.msk.f32.mxu0 %vm716_vm0, %v23774_v1 }
0x1e1b   : > { %16615 = vmatmul.mubr.msk.f32.gmra.mrb[90].mxu1 %vm716_vm0, %v23775_v0 }
0x1e1c   : > { %16629 = vmatmul.mubr.msk.f32.gmra.mrb[110].mxu0 %vm716_vm0, %v23775_v0  ;;  %16639 = vmatprep.mubr.msk.f32.mxu1 %vm716_vm0, %v23776_v34 }
0x1e1d   : > { %16653 = vmatprep.mubr.msk.f32.mxu0 %vm19245_vm1, %v23606_v4 }
0x1ee2   : > { %v21669_v26 = vpop.f32.mrb[86].mxu1 }
0x1ee3   : > { %v16588_v31 = vpop.f32.mrb[87].mxu1 }
0x1eea   : > { %v16613_v59 = vpop.f32.mrb[88].mxu1 }
0x1eeb   : > { %v16627_v63 = vpop.f32.mrb[108].mxu0  ;;  %v6592_v33 = vpop.f32.mrb[89].mxu1 }
0x1eec   : > { %v6701_v22 = vmax.f32 %v16613_v59, %v16627_v63  ;;  %v6681_v23 = vpop.f32.mrb[109].mxu0 }
0x1eed   : > { %v6700_v41 = vmax.f32 %v6592_v33, %v6681_v23 }
0x1eee   : > { %v6705_v20 = vsub.f32 %v16613_v59, %v6701_v22  ;;  %v6717_v32 = vsub.f32 %v16627_v63, %v6701_v22  ;;  %v16616_v58 = vpop.f32.mrb[90].mxu1 }
0x1eef   : > { %v6704_v36 = vsub.f32 %v6592_v33, %v6700_v41  ;;  %v6716_v30 = vsub.f32 %v6681_v23, %v6700_v41  ;;  %v16630_v9 = vpop.f32.mrb[110].mxu0  ;;  %v6602_v61 = vpop.f32.mrb[91].mxu1 }
0x1ef0   : > { %v6710_v6 = vmul.f32 1.442695, %v6705_v20  ;;  %v6722_v28 = vmul.f32 1.442695, %v6717_v32  ;;  %v6703_v21 = vmax.f32 %v16616_v58, %v16630_v9  ;;  %v6691_v49 = vpop.f32.mrb[111].mxu0 }
0x1ef1   : > { %v6708_v39 = vmul.f32 1.442695, %v6704_v36  ;;  %v6702_v48 = vmax.f32 %v6602_v61, %v6691_v49  ;;  %v6720_v29 = vmul.f32 1.442695, %v6716_v30 }
0x1ef2   : > { %18907 = vpow2.f32 %v6710_v6  ;;  %v6707_v46 = vsub.f32 %v16616_v58, %v6703_v21  ;;  %v6719_v1 = vsub.f32 %v16630_v9, %v6703_v21 }
0x1ef3   : > { %v6706_v0 = vsub.f32 %v6602_v61, %v6702_v48  ;;  %18909 = vpow2.f32 %v6722_v28  ;;  %v6718_v34 = vsub.f32 %v6691_v49, %v6702_v48 }
0x1ef4   : > { %18911 = vpow2.f32 %v6708_v39  ;;  %v6714_v31 = vmul.f32 1.442695, %v6707_v46  ;;  %v6726_v59 = vmul.f32 1.442695, %v6719_v1 }
0x1ef5   : > { %v6712_v63 = vmul.f32 1.442695, %v6706_v0  ;;  %18913 = vpow2.f32 %v6720_v29  ;;  %v6724_v33 = vmul.f32 1.442695, %v6718_v34 }
0x1ef6   : > { %18915 = vpow2.f32 %v6714_v31 }
0x1ef7   : > { %18917 = vpow2.f32 %v6726_v59 }
0x1ef8   : > { %18919 = vpow2.f32 %v6712_v63 }
0x1ef9   : > { %18921 = vpow2.f32 %v6724_v33 }
0x1efc   : > { %v18908_v22 = vpop.eup %18907 }
0x1efd   : > { %v18910_v23 = vpop.eup %18909 }
0x1efe   : > { %v18912_v41 = vpop.eup %18911  ;;  %v6729_v20 = vadd.f32 %v18910_v23, %v18908_v22 }
0x1eff   : > { %v18914_v32 = vpop.eup %18913 }
0x1f00   : > { %v18916_v58 = vpop.eup %18915  ;;  %18923 = vrcp.f32 %v6729_v20  ;;  %v6728_v36 = vadd.f32 %v18914_v32, %v18912_v41 }
0x1f01   : > { %v18918_v30 = vpop.eup %18917 }
0x1f02   : > { %v18920_v9 = vpop.eup %18919  ;;  %18925 = vrcp.f32 %v6728_v36  ;;  %v6731_v61 = vadd.f32 %v18918_v30, %v18916_v58 }
0x1f03   : > { %v18922_v6 = vpop.eup %18921 }
0x1f04   : > { %18927 = vrcp.f32 %v6731_v61  ;;  %v6730_v28 = vadd.f32 %v18922_v6, %v18920_v9 }
0x1f06   : > { %18929 = vrcp.f32 %v6730_v28 }
0x1f0a   : > { %v18924_v21 = vpop.eup %18923 }
0x1f0b   : > { %v6737_v49 = vmul.f32 %v18924_v21, %v18908_v22  ;;  %v6745_v39 = vmul.f32 %v18924_v21, %v18910_v23 }
0x1f0c   : > { %v18926_v48 = vpop.eup %18925 }
0x1f0d   : > { %v6736_v29 = vmul.f32 %v18926_v48, %v18912_v41  ;;  %v6741_v46 = vmul.f32 %v6737_v49, %v21410_v57  ;;  %v6744_v1 = vmul.f32 %v18926_v48, %v18914_v32  ;;  %v6749_v0 = vmul.f32 %v6745_v39, %v21413_v38 }
0x1f0e   : > { %v18928_v34 = vpop.eup %18927  ;;  %v14890_v39 = vunpack.c.l.bf16 %v23752_v5 }
0x1f0f   : > { %v6740_v31 = vmul.f32 %v6736_v29, %v21417_v12  ;;  %v6748_v59 = vmul.f32 %v6744_v1, %v21421_v47  ;;  %v6753_v63 = vadd.f32 %v6749_v0, %v6741_v46  ;;  %v6739_v33 = vmul.f32 %v18928_v34, %v18916_v58 }
0x1f10   : > { %v18930_v20 = vpop.eup %18929  ;;  %v6747_v36 = vmul.f32 %v18928_v34, %v18918_v30 }
0x1f11   : > { %v6752_v61 = vadd.f32 %v6748_v59, %v6740_v31  ;;  %v6738_v28 = vmul.f32 %v18930_v20, %v18920_v9  ;;  %v6743_v22 = vmul.f32 %v6739_v33, %v21427_v60  ;;  %v6746_v23 = vmul.f32 %v18930_v20, %v18922_v6  ;;  %v19065_v60 = vld [vmem:[%s19539_s30 + $0x30] sm:$0xff]  }
0x1f12   : > { %v6751_v41 = vmul.f32 %v6747_v36, %v21437_v8 }
0x1f13   : > { %v18010_v57 = vpack.c.bf16 %v6753_v63, %v6752_v61  ;;  %v6742_v38 = vmul.f32 %v6738_v28, %v21433_v45  ;;  %v6750_v32 = vmul.f32 %v6746_v23, %v21441_v53  ;;  %v14887_v45 = vunpack.c.h.bf16 %v19065_v60 }
0x1f14   : > { %v6755_v12 = vadd.f32 %v6751_v41, %v6743_v22  ;;  %v14886_v53 = vunpack.c.l.bf16 %v19065_v60 }
0x1f15   : > { %18011 = vmatprep.subr.bf16.mxu1 %v18010_v57  ;;  %v6754_v47 = vadd.f32 %v6750_v32, %v6742_v38 }
0x1f16   : > { %18013 = vmatpush3.bf16.msra.mxu1 %v18010_v57 }
0x1f17   : > { %v18014_v58 = vpack.c.bf16 %v6755_v12, %v6754_v47 }
0x1f19   : > { %18015 = vmatprep.subr.bf16.mxu1 %v18014_v58 }
0x1f1a   : > { %18017 = vmatpush3.bf16.msra.mxu1 %v18014_v58 }
0x1f1b   : > { %18024 = vmatprep.subr.bf16.mxu1 %v23600_v55 }
0x1f1d   : > { %16640 = vmatmul.mubr.msk.f32.vlgmr.msra.gmra.mrb[92].mxu1 %vm716_vm0, %v21450_v52  ;;  %v14891_v52 = vunpack.c.h.bf16 %v23752_v5 }
0x1f1e   : > { %16642 = vmatprep.mubr.msk.f32.mxu1 %vm716_vm0, %v21455_v62 }
0x1f21   : > { %16643 = vmatmul.mubr.msk.f32.gmra.mrb[94].mxu1 %vm716_vm0, %v21465_v14 }
0x1f22   : > { %16664 = vmatprep.mubr.msk.f32.mxu1 %vm19245_vm1, %v23606_v4 }
0x1ff0   : > { %v16641_v8 = vpop.f32.mrb[92].mxu1 }
0x1ff1   : > { %v6828_v30 = vadd.f32 %v16641_v8, %v20763_v27  ;;  %v6822_v9 = vpop.f32.mrb[93].mxu1 }
0x1ff2   : > { %v6823_v6 = vadd.f32 %v6822_v9, %v21085_v24 }
0x1ff3   : > { %v6842_v21 = vadd.f32 %v14887_v45, %v6828_v30 }
0x1ff4   : > { %v6841_v49 = vadd.f32 %v14886_v53, %v6823_v6  ;;  %v16644_v62 = vpop.f32.mrb[94].mxu1 }
0x1ff5   : > { %v6838_v14 = vadd.f32 %v16644_v62, %v21095_v19  ;;  %v6832_v48 = vpop.f32.mrb[95].mxu1 }
0x1ff6   : > { %v18019_v29 = vpack.c.bf16 %v6842_v21, %v6841_v49  ;;  %v6833_v46 = vadd.f32 %v6832_v48, %v20768_v16 }
0x1ff7   : > { %v6844_v1 = vadd.f32 %v14891_v52, %v6838_v14 }
0x1ff8   : > { %v6843_v0 = vadd.f32 %v14890_v39, %v6833_v46  ;;  %18020 = vmatpush3.bf16.msra.mxu0 %v18019_v29  ;;  %v23780_v39 = vld [vmem:[#allocation22_spill] sm:$0xff] }
0x1ff9   : > { %18021 = vmatprep.subr.bf16.mxu0 %v23600_v55  ;;  %v23781_v29 = vld [vmem:[#allocation62_spill] sm:$0xff] }
0x1ffa   : > { %v18022_v27 = vpack.c.bf16 %v6844_v1, %v6843_v0 }
0x1ffc   : > { %18023 = vmatpush3.bf16.msra.mxu0 %v18022_v27 }
0x1fff   : > { %16654 = vmatmul.mubr.msk.f32.vlgmr.msra.gmra.mrb[112].mxu0 %vm716_vm0, %v23615_v50 }
0x2000   : > { %16675 = vmatprep.mubr.msk.f32.mxu0 %vm716_vm0, %v21489_v3 }
0x20d2   : > { %v6911_v24 = vpop.f32.mrb[112].mxu0 }
0x20d3   : > { %v6918_v19 = vrot.slane %v6911_v24, %v19872_v18  ;;  %v16655_v5 = vpop.f32.mrb[113].mxu0 }
0x20d5   : > { %v6919_v34 = vsub.f32 %v6841_v49, %v6918_v19  ;;  %v6920_v31 = vsub.f32 %v6842_v21, %v6918_v19  ;;  %v6921_v16 = vsub.f32 %v6843_v0, %v6918_v19  ;;  %v6922_v59 = vsub.f32 %v6844_v1, %v6918_v19 }
0x20d7   : > { %v6923_v63 = vmul.f32 %v6919_v34, %v6919_v34  ;;  %v6924_v33 = vmul.f32 %v6920_v31, %v6920_v31  ;;  %v6925_v36 = vmul.f32 %v6921_v16, %v6921_v16  ;;  %v6926_v61 = vmul.f32 %v6922_v59, %v6922_v59 }
0x20d9   : > { %v18025_v20 = vpack.c.bf16 %v6924_v33, %v6923_v63  ;;  %v18028_v28 = vpack.c.bf16 %v6926_v61, %v6925_v36  ;;  %v23784_v33 = vld [vmem:[#allocation107_spill] sm:$0xff]  ;;  %v23786_v36 = vld [vmem:[#allocation109_spill] sm:$0xff]  ;;  %v6385_v61 = vadd.f32 1e-05, %v21669_v26 }
0x20db   : > { %18026 = vmatpush3.bf16.msra.mxu1 %v18025_v20  ;;  %v23785_v20 = vld [vmem:[#allocation108_spill] sm:$0xff] }
0x20dc   : > { %18027 = vmatprep.subr.bf16.mxu1 %v23600_v55 }
0x20df   : > { %18029 = vmatpush3.bf16.msra.mxu1 %v18028_v28 }
0x20e2   : > { %16665 = vmatmul.mubr.msk.f32.vlgmr.msra.gmra.mrb[96].mxu1 %vm716_vm0, %v23615_v50 }
0x20e3   : > { %16703 = vmatprep.mubr.msk.f32.mxu1 %vm1966_vm2, %v21566_v35 }
0x21b5   : > { %v6993_v3 = vpop.f32.mrb[96].mxu1 }
0x21b6   : > { %v6994_v22 = vadd.f32 1e-05, %v6993_v3  ;;  %v16666_v23 = vpop.f32.mrb[97].mxu1 }
0x21b8   : > { %18931 = vrsqrt.f32 %v6994_v22  ;;  %v23787_v22 = vld [vmem:[#allocation53_spill] sm:$0xff] }
0x21b9   : > { %18933 = vrsqrt.f32 %v6385_v61 }
0x21c2   : > { %v18932_v41 = vpop.eup %18931 }
0x21c3   : > { %v7001_v57 = vrot.slane %v18932_v41, %v19872_v18  ;;  %v18934_v28 = vpop.eup %18933  ;;  %v23788_v41 = vld [vmem:[#allocation49_spill] sm:$0xff] }
0x21c4   : > { %v6392_v3 = vrot.slane %v18934_v28, %v19872_v18 }
0x21c5   : > { %v7002_v38 = vmul.f32 %v7001_v57, %v6919_v34  ;;  %v7003_v32 = vmul.f32 %v7001_v57, %v6920_v31  ;;  %v7004_v12 = vmul.f32 %v7001_v57, %v6921_v16  ;;  %v7005_v47 = vmul.f32 %v7001_v57, %v6922_v59  ;;  %v23783_v34 = vld [vmem:[#allocation64_spill] sm:$0xff] }
0x21c6   : > { %v6393_v23 = vmul.f32 %v6392_v3, %v23787_v22  ;;  %v6394_v57 = vmul.f32 %v6392_v3, %v23788_v41  ;;  %v14537_v22 = vld [vmem:[%s23338_s2 + $0x148] sm:$0xff]  ;;  %v14535_v41 = vld [vmem:[%s23338_s2 + $0x138] sm:$0xff] }
0x21c7   : > { %v7006_v58 = vmul.f32 %v7002_v38, %v20772_v42  ;;  %v7007_v60 = vmul.f32 %v7003_v32, %v21102_v44  ;;  %v7008_v45 = vmul.f32 %v7004_v12, %v21111_v56  ;;  %v7009_v8 = vmul.f32 %v7005_v47, %v20789_v17  ;;  %v23789_v32 = vld [vmem:[#allocation39_spill] sm:$0xff] }
0x21c9   : > { %v21712_v35 = vadd.f32 %v7006_v58, %v20780_v43  ;;  %v21715_v53 = vadd.f32 %v7007_v60, %v20786_v11  ;;  %v21718_v30 = vadd.f32 %v7008_v45, %v21120_v2  ;;  %v21721_v9 = vadd.f32 %v7009_v8, %v20795_v13  ;;  %v23777_v2 = vld [vmem:[#allocation106_spill] sm:$0xff]  ;;  %v23778_v13 = vld [vmem:[#allocation19_spill] sm:$0xff] }
0x21ca   : > { %v23790_v58 = vld [vmem:[#allocation66_spill] sm:$0xff] }
0x21cb   : > { %v18030_v42 = vpack.c.bf16 %v21715_v53, %v21712_v35  ;;  %v18034_v56 = vpack.c.bf16 %v21721_v9, %v21718_v30  ;;  %v23791_v45 = vld [vmem:[#allocation26_spill] sm:$0xff] }
0x21cc   : > { %v6413_v8 = vmul.f32 %v23791_v45, %v6393_v23  ;;  %v14534_v23 = vld [vmem:[%s23338_s2 + $0x130] sm:$0xff] }
0x21cd   : > { %18031 = vmatprep.subr.bf16.mxu0 %v18030_v42 }
0x21ce   : > { %18033 = vmatpush3.bf16.msra.mxu0 %v18030_v42  ;;  %v23792_v42 = vld [vmem:[#allocation91_spill] sm:$0xff] }
0x21cf   : > { %18035 = vmatprep.subr.bf16.mxu0 %v18034_v56 }
0x21d2   : > { %18037 = vmatpush3.bf16.msra.mxu0 %v18034_v56  ;;  %v6395_v56 = vmul.f32 %v6392_v3, %v23792_v42 }
0x21d3   : > { %18054 = vmatprep.subr.bf16.mxu0 %v23600_v55 }
0x21d5   : > { %16676 = vmatmul.mubr.msk.f32.vlgmr.msra.gmra.mrb[114].mxu0 %vm716_vm0, %v21517_v7 }
0x21d6   : > { %16678 = vmatprep.mubr.msk.f32.mxu0 %vm716_vm0, %v21522_v15 }
0x21d9   : > { %16679 = vmatmul.mubr.msk.f32.gmra.mrb[116].mxu0 %vm716_vm0, %v21532_v54 }
0x21da   : > { %16681 = vmatprep.mubr.msk.f32.mxu0 %vm716_vm0, %v21537_v25 }
0x21dd   : > { %16682 = vmatmul.mubr.msk.f32.gmra.mrb[118].mxu0 %vm716_vm0, %v21546_v37 }
0x21de   : > { %16684 = vmatprep.mubr.msk.f32.mxu0 %vm716_vm0, %v21551_v10  ;;  %v23779_v10 = vld [vmem:[#allocation21_spill] sm:$0xff] }
0x21e1   : > { %16685 = vmatmul.mubr.msk.f32.gmra.mrb[120].mxu0 %vm716_vm0, %v23777_v2  ;;  %v23793_v2 = vld [vmem:[#allocation50_spill] sm:$0xff] }
0x21e2   : > { %16717 = vmatprep.mubr.msk.f32.mxu0 %vm19245_vm1, %v23606_v4  ;;  %v6396_v26 = vmul.f32 %v6392_v3, %v23793_v2  ;;  %v14536_v3 = vld [vmem:[%s23338_s2 + $0x140] sm:$0xff] }
0x22a8   : > { %v16677_v43 = vpop.f32.mrb[114].mxu0 }
0x22a9   : > { %v7086_v11 = vadd.f32 %v16677_v43, %v21130_v40  ;;  %v7080_v17 = vpop.f32.mrb[115].mxu0 }
0x22aa   : > { %v7081_v44 = vadd.f32 %v7080_v17, %v23778_v13 }
0x22ab   : > { %v7120_v7 = vmax.f32 %v7086_v11, 0.0  ;;  %v23794_v11 = vld [vmem:[#allocation70_spill] sm:$0xff] }
0x22ac   : > { %v7119_v15 = vmax.f32 %v7081_v44, 0.0  ;;  %v16680_v54 = vpop.f32.mrb[116].mxu0  ;;  %v6414_v17 = vmul.f32 %v23794_v11, %v6394_v57  ;;  %v21827_v57 = vld [vmem:[%s23338_s2 + $0x160] sm:$0xff] }
0x22ad   : > { %v7096_v25 = vadd.f32 %v16680_v54, %v20823_v51  ;;  %v7090_v37 = vpop.f32.mrb[117].mxu0  ;;  %v23782_v51 = vld [vmem:[#allocation23_spill] sm:$0xff] }
0x22ae   : > { %v18038_v6 = vpack.c.bf16 %v7120_v7, %v7119_v15  ;;  %v7091_v21 = vadd.f32 %v7090_v37, %v23779_v10  ;;  %v23795_v7 = vld [vmem:[#allocation68_spill] sm:$0xff] }
0x22af   : > { %v7122_v52 = vmax.f32 %v7096_v25, 0.0  ;;  %v23796_v37 = vld [vmem:[#allocation24_spill] sm:$0xff] }
0x22b0   : > { %v7121_v49 = vmax.f32 %v7091_v21, 0.0  ;;  %v16683_v62 = vpop.f32.mrb[118].mxu0  ;;  %18039 = vmatprep.subr.bf16.mxu1 %v18038_v6  ;;  %v23797_v10 = vld [vmem:[#allocation28_spill] sm:$0xff] }
0x22b1   : > { %v7106_v14 = vadd.f32 %v16683_v62, %v23780_v39  ;;  %v7100_v48 = vpop.f32.mrb[119].mxu0  ;;  %18041 = vmatpush3.bf16.msra.mxu1 %v18038_v6  ;;  %v21776_v21 = vadd.f32 %v23797_v10, %v6413_v8 }
0x22b2   : > { %v18042_v40 = vpack.c.bf16 %v7122_v52, %v7121_v49  ;;  %v7101_v46 = vadd.f32 %v7100_v48, %v23781_v29  ;;  %v23798_v49 = vld [vmem:[#allocation29_spill] sm:$0xff] }
0x22b3   : > { %v7124_v1 = vmax.f32 %v7106_v14, 0.0  ;;  %v21780_v62 = vadd.f32 %v23798_v49, %v6414_v17  ;;  %v23800_v14 = vld [vmem:[#allocation25_spill] sm:$0xff] }
0x22b4   : > { %v7123_v0 = vmax.f32 %v7101_v46, 0.0  ;;  %v16686_v27 = vpop.f32.mrb[120].mxu0  ;;  %18043 = vmatprep.subr.bf16.mxu1 %v18042_v40  ;;  %v6416_v48 = vmul.f32 %v23800_v14, %v6396_v26  ;;  %v23801_v46 = vld [vmem:[#allocation74_spill] sm:$0xff] }
0x22b5   : > { %v7116_v24 = vadd.f32 %v16686_v27, %v23782_v51  ;;  %v7110_v19 = vpop.f32.mrb[121].mxu0  ;;  %18045 = vmatpush3.bf16.msra.mxu1 %v18042_v40  ;;  %v18066_v29 = vpack.c.bf16 %v21780_v62, %v21776_v21  ;;  %v14532_v27 = vld [vmem:[%s23338_s2 + $0x120] sm:$0xff]  ;;  %v14533_v51 = vld [vmem:[%s23338_s2 + $0x128] sm:$0xff] }
0x22b6   : > { %v18046_v5 = vpack.c.bf16 %v7124_v1, %v7123_v0  ;;  %v7111_v31 = vadd.f32 %v7110_v19, %v23783_v34 }
0x22b7   : > { %v7126_v16 = vmax.f32 %v7116_v24, 0.0 }
0x22b8   : > { %v7125_v59 = vmax.f32 %v7111_v31, 0.0  ;;  %18047 = vmatprep.subr.bf16.mxu1 %v18046_v5 }
0x22b9   : > { %18049 = vmatpush3.bf16.msra.mxu1 %v18046_v5 }
0x22ba   : > { %v18050_v63 = vpack.c.bf16 %v7126_v16, %v7125_v59 }
0x22bc   : > { %18051 = vmatprep.subr.bf16.mxu1 %v18050_v63 }
0x22bd   : > { %18053 = vmatpush3.bf16.msra.mxu1 %v18050_v63 }
0x22be   : > { %18060 = vmatprep.subr.bf16.mxu1 %v23600_v55 }
0x22c0   : > { %16704 = vmatmul.mubr.msk.f32.vlgmr.msra.gmra.mrb[98].mxu1 %vm1966_vm2, %v23784_v33 }
0x22c1   : > { %16706 = vmatprep.mubr.msk.f32.mxu1 %vm1966_vm2, %v23785_v20 }
0x22c4   : > { %16707 = vmatmul.mubr.msk.f32.gmra.mrb[100].mxu1 %vm1966_vm2, %v23786_v36 }
0x22c5   : > { %16728 = vmatprep.mubr.msk.f32.mxu1 %vm19245_vm1, %v23606_v4 }
0x2393   : > { %v16705_v38 = vpop.f32.mrb[98].mxu1 }
0x2394   : > { %v7199_v12 = vadd.f32 %v16705_v38, %v23789_v32  ;;  %v7193_v47 = vpop.f32.mrb[99].mxu1  ;;  %v14538_v38 = vld [vmem:[%s23338_s2 + $0x150] sm:$0xff]  ;;  %v21839_v32 = vld [vmem:[%s23338_s2 + $0x168] sm:$0xff] }
0x2395   : > { %v7194_v60 = vadd.f32 %v7193_v47, %v23790_v58 }
0x2396   : > { %v7213_v43 = vadd.f32 %v7199_v12, %v21715_v53  ;;  %v23799_v53 = vld [vmem:[#allocation72_spill] sm:$0xff]  ;;  %v14539_v12 = vld [vmem:[%s23338_s2 + $0x158] sm:$0xff] }
0x2397   : > { %v7212_v13 = vadd.f32 %v7194_v60, %v21712_v35  ;;  %v16708_v44 = vpop.f32.mrb[100].mxu1  ;;  %v6415_v39 = vmul.f32 %v23799_v53, %v6395_v56 }
0x2398   : > { %v7209_v15 = vadd.f32 %v16708_v44, %v23795_v7  ;;  %v7203_v54 = vpop.f32.mrb[101].mxu1 }
0x2399   : > { %v18055_v25 = vpack.c.bf16 %v7213_v43, %v7212_v13  ;;  %v7204_v6 = vadd.f32 %v7203_v54, %v23796_v37  ;;  %v21789_v1 = vadd.f32 %v23801_v46, %v6415_v39 }
0x239a   : > { %v7215_v52 = vadd.f32 %v7209_v15, %v21721_v9  ;;  %v23802_v9 = vld [vmem:[#allocation27_spill] sm:$0xff] }
0x239b   : > { %v7214_v35 = vadd.f32 %v7204_v6, %v21718_v30  ;;  %18056 = vmatpush3.bf16.msra.mxu0 %v18055_v25  ;;  %v21792_v0 = vadd.f32 %v23802_v9, %v6416_v48 }
0x239c   : > { %18057 = vmatprep.subr.bf16.mxu0 %v23600_v55 }
0x239d   : > { %v18058_v40 = vpack.c.bf16 %v7215_v52, %v7214_v35  ;;  %v18070_v30 = vpack.c.bf16 %v21792_v0, %v21789_v1 }
0x239f   : > { %18059 = vmatpush3.bf16.msra.mxu0 %v18058_v40  ;;  %v23805_v40 = vld [vmem:[#allocation32_spill] sm:$0xff] }
0x23a0   : > { %18067 = vmatprep.subr.bf16.mxu0 %v18066_v29 }
0x23a2   : > { %16718 = vmatmul.mubr.msk.f32.vlgmr.msra.gmra.mrb[122].mxu0 %vm716_vm0, %v23615_v50 }
0x23a3   : > { %18069 = vmatpush3.bf16.msra.mxu0 %v18066_v29  ;;  %16739 = vmatprep.mubr.msk.f32.mxu0 %vm716_vm0, %v14532_v27  ;;  %v23806_v27 = vld [vmem:[#allocation30_spill] sm:$0xff] }
0x23a4   : > { %18071 = vmatprep.subr.bf16.mxu0 %v18070_v30 }
0x23a7   : > { %18073 = vmatpush3.bf16.msra.mxu0 %v18070_v30 }
0x23a8   : > { %18083 = vmatprep.subr.bf16.mxu0 %v18066_v29 }
0x23aa   : > { %16740 = vmatmul.mubr.msk.f32.vlgmr.msra.gmra.mrb[124].mxu0 %vm716_vm0, %v14533_v51 }
0x23ab   : > { %18085 = vmatpush3.bf16.msra.mxu0 %v18066_v29  ;;  %16742 = vmatprep.mubr.msk.f32.mxu0 %vm716_vm0, %v14534_v23  ;;  %v14542_v23 = vld [vmem:[%s23338_s2 + $0x170] sm:$0xff] }
0x23ac   : > { %18087 = vmatprep.subr.bf16.mxu0 %v18070_v30 }
0x23ae   : > { %16743 = vmatmul.mubr.msk.f32.gmra.mrb[126].mxu0 %vm716_vm0, %v14535_v41  ;;  %v14543_v41 = vld [vmem:[%s23338_s2 + $0x178] sm:$0xff] }
0x23af   : > { %18089 = vmatpush3.bf16.msra.mxu0 %v18070_v30  ;;  %16767 = vmatprep.mubr.msk.f32.mxu0 %vm716_vm0, %v21827_v57 }
0x23b2   : > { %16768 = vmatmul.mubr.msk.f32.vlgmr.msra.gmra.mrb[128].mxu0 %vm716_vm0, %v21839_v32 }
0x23b3   : > { %16770 = vmatprep.mubr.msk.f32.mxu0 %vm716_vm0, %v14542_v23 }
0x23b6   : > { %16771 = vmatmul.mubr.msk.f32.gmra.mrb[130].mxu0 %vm716_vm0, %v14543_v41 }
0x23b7   : > { %16795 = vmatprep.mubr.msk.f32.mxu0 %vm716_vm0, %v21827_v57 }
0x2475   : > { %v7282_v24 = vpop.f32.mrb[122].mxu0 }
0x2476   : > { %v7289_v19 = vrot.slane %v7282_v24, %v19872_v18  ;;  %v16719_v5 = vpop.f32.mrb[123].mxu0 }
0x2477   : > { %v23807_v5 = vld [vmem:[#allocation33_spill] sm:$0xff] }
0x2478   : > { %v7290_v34 = vsub.f32 %v7212_v13, %v7289_v19  ;;  %v7291_v31 = vsub.f32 %v7213_v43, %v7289_v19  ;;  %v7292_v16 = vsub.f32 %v7214_v35, %v7289_v19  ;;  %v7293_v59 = vsub.f32 %v7215_v52, %v7289_v19 }
0x247a   : > { %v7294_v63 = vmul.f32 %v7290_v34, %v7290_v34  ;;  %v7295_v33 = vmul.f32 %v7291_v31, %v7291_v31  ;;  %v7296_v36 = vmul.f32 %v7292_v16, %v7292_v16  ;;  %v7297_v61 = vmul.f32 %v7293_v59, %v7293_v59 }
0x247c   : > { %v18061_v20 = vpack.c.bf16 %v7295_v33, %v7294_v63  ;;  %v18064_v28 = vpack.c.bf16 %v7297_v61, %v7296_v36  ;;  %v23809_v63 = vld [vmem:[#allocation34_spill] sm:$0xff]  ;;  %v23810_v36 = vld [vmem:[#allocation80_spill] sm:$0xff] }
0x247d   : > { %v16741_v47 = vpop.f32.mrb[124].mxu0 }
0x247e   : > { %18062 = vmatpush3.bf16.msra.mxu1 %v18061_v20  ;;  %v7526_v58 = vpop.f32.mrb[125].mxu0 }
0x247f   : > { %18063 = vmatprep.subr.bf16.mxu1 %v23600_v55 }
0x2481   : > { %v16744_v35 = vpop.f32.mrb[126].mxu0 }
0x2482   : > { %18065 = vmatpush3.bf16.msra.mxu1 %v18064_v28 }
0x2483   : > { %18075 = vmatprep.subr.bf16.mxu1 %v18066_v29 }
0x2485   : > { %16729 = vmatmul.mubr.msk.f32.vlgmr.msra.gmra.mrb[102].mxu1 %vm716_vm0, %v23615_v50 }
0x2486   : > { %18077 = vmatpush3.bf16.msra.mxu1 %v18066_v29  ;;  %16753 = vmatprep.mubr.msk.f32.mxu1 %vm716_vm0, %v14536_v3 }
0x2487   : > { %18079 = vmatprep.subr.bf16.mxu1 %v18070_v30 }
0x248a   : > { %18081 = vmatpush3.bf16.msra.mxu1 %v18070_v30 }
0x248d   : > { %16754 = vmatmul.mubr.msk.f32.vlgmr.msra.gmra.mrb[104].mxu1 %vm716_vm0, %v14537_v22 }
0x248e   : > { %16756 = vmatprep.mubr.msk.f32.mxu1 %vm716_vm0, %v14538_v38 }
0x2491   : > { %16757 = vmatmul.mubr.msk.f32.gmra.mrb[106].mxu1 %vm716_vm0, %v14539_v12 }
0x2492   : > { %16781 = vmatprep.mubr.msk.f32.mxu1 %vm716_vm0, %v14536_v3 }
0x2558   : > { %v7364_v60 = vpop.f32.mrb[102].mxu1 }
0x2559   : > { %v7365_v8 = vadd.f32 1e-05, %v7364_v60  ;;  %v16730_v42 = vpop.f32.mrb[103].mxu1 }
0x255b   : > { %18935 = vrsqrt.f32 %v7365_v8 }
0x2565   : > { %v18936_v56 = vpop.eup %18935 }
0x2566   : > { %v7372_v2 = vrot.slane %v18936_v56, %v19872_v18 }
0x2568   : > { %v7373_v26 = vmul.f32 %v7372_v2, %v7290_v34  ;;  %v7374_v43 = vmul.f32 %v7372_v2, %v7291_v31  ;;  %v7375_v17 = vmul.f32 %v7372_v2, %v7292_v16  ;;  %v7376_v13 = vmul.f32 %v7372_v2, %v7293_v59  ;;  %v23808_v16 = vld [vmem:[#allocation78_spill] sm:$0xff] }
0x2569   : > { %v7542_v34 = vadd.f32 %v16744_v35, %v23807_v5 }
0x256a   : > { %v7377_v44 = vmul.f32 %v7373_v26, %v23791_v45  ;;  %v7378_v7 = vmul.f32 %v7374_v43, %v23794_v11  ;;  %v7379_v15 = vmul.f32 %v7375_v17, %v23799_v53  ;;  %v7380_v54 = vmul.f32 %v7376_v13, %v23800_v14  ;;  %v21861_v45 = vld [vmem:[#allocation8] sm:$0xff]  ;;  %v23803_v11 = vld [vmem:[#allocation76_spill] sm:$0xff]  ;;  %v23804_v53 = vld [vmem:[#allocation31_spill] sm:$0xff] }
0x256b   : > { %v7527_v14 = vadd.f32 %v7526_v58, %v23804_v53 }
0x256c   : > { %v7381_v25 = vadd.f32 %v7377_v44, %v23797_v10  ;;  %v7382_v37 = vadd.f32 %v7378_v7, %v23798_v49  ;;  %v7383_v6 = vadd.f32 %v7379_v15, %v23801_v46  ;;  %v7384_v52 = vadd.f32 %v7380_v54, %v23802_v9  ;;  %v16755_v49 = vpop.f32.mrb[104].mxu1  ;;  %v7536_v9 = vpop.f32.mrb[127].mxu0 }
0x256d   : > { %v7532_v10 = vadd.f32 %v16741_v47, %v23803_v11  ;;  %v7645_v29 = vadd.f32 %v16755_v49, %v23805_v40  ;;  %v7639_v46 = vpop.f32.mrb[105].mxu1  ;;  %v7537_v59 = vadd.f32 %v7536_v9, %v23808_v16  ;;  %v19069_v47 = vld [vmem:[#allocation8 + $0x18] sm:$0xff]  ;;  %v21892_v57 = vpop.f32.mrb[128].mxu0 }
0x256e   : > { %v18090_v39 = vpack.c.bf16 %v7382_v37, %v7381_v25  ;;  %v18094_v48 = vpack.c.bf16 %v7384_v52, %v7383_v6  ;;  %v7640_v30 = vadd.f32 %v7639_v46, %v23806_v27  ;;  %v16758_v31 = vpop.f32.mrb[106].mxu1  ;;  %v21894_v58 = vpop.f32.mrb[129].mxu0 }
0x256f   : > { %v7942_v51 = vmul.f32 %v7645_v29, %v7532_v10  ;;  %v7655_v33 = vadd.f32 %v16758_v31, %v23809_v63  ;;  %v7649_v20 = vpop.f32.mrb[107].mxu1  ;;  %v21906_v25 = vpop.f32.mrb[130].mxu0 }
0x2570   : > { %18091 = vmatprep.subr.bf16.mxu1 %v18090_v39  ;;  %18099 = vmatprep.subr.bf16.mxu0 %v18090_v39  ;;  %v7941_v24 = vmul.f32 %v7640_v30, %v7527_v14  ;;  %v7650_v61 = vadd.f32 %v7649_v20, %v23810_v36  ;;  %v21908_v37 = vpop.f32.mrb[131].mxu0 }
0x2571   : > { %18093 = vmatpush3.bf16.msra.mxu1 %v18090_v39  ;;  %18101 = vmatpush3.bf16.msra.mxu0 %v18090_v39  ;;  %v7944_v28 = vmul.f32 %v7655_v33, %v7542_v34 }
0x2572   : > { %18095 = vmatprep.subr.bf16.mxu1 %v18094_v48  ;;  %18103 = vmatprep.subr.bf16.mxu0 %v18094_v48  ;;  %v18106_v19 = vpack.c.bf16 %v7942_v51, %v7941_v24  ;;  %v7943_v3 = vmul.f32 %v7650_v61, %v7537_v59 }
0x2575   : > { %18097 = vmatpush3.bf16.msra.mxu1 %v18094_v48  ;;  %18105 = vmatpush3.bf16.msra.mxu0 %v18094_v48 }
0x2576   : > { %18107 = vmatprep.subr.bf16.mxu1 %v18106_v19 }
0x2578   : > { %16782 = vmatmul.mubr.msk.f32.vlgmr.msra.gmra.mrb[108].mxu1 %vm716_vm0, %v14537_v22  ;;  %v18110_v22 = vpack.c.bf16 %v7944_v28, %v7943_v3  ;;  %16796 = vmatmul.mubr.msk.f32.vlgmr.msra.gmra.mrb[132].mxu0 %vm716_vm0, %v21839_v32 }
0x2579   : > { %16784 = vmatprep.mubr.msk.f32.mxu1 %vm716_vm0, %v14538_v38  ;;  %18109 = vmatpush3.bf16.msra.mxu1 %v18106_v19  ;;  %v19067_v38 = vld [vmem:[#allocation8 + $0x8] sm:$0xff] }
0x257a   : > { %18111 = vmatprep.subr.bf16.mxu1 %v18110_v22  ;;  %16798 = vmatprep.mubr.msk.f32.mxu0 %vm716_vm0, %v14542_v23 }
0x257c   : > { %16785 = vmatmul.mubr.msk.f32.gmra.mrb[110].mxu1 %vm716_vm0, %v14539_v12  ;;  %v19068_v12 = vld [vmem:[#allocation8 + $0x10] sm:$0xff]  ;;  %16799 = vmatmul.mubr.msk.f32.gmra.mrb[134].mxu0 %vm716_vm0, %v14543_v41 }
0x257d   : > { %16809 = vmatprep.mubr.msk.f32.mxu1 %vm716_vm0, %v21861_v45  ;;  %18113 = vmatpush3.bf16.msra.mxu1 %v18110_v22 }
0x257e   : > { %16823 = vmatprep.mubr.msk.f32.mxu0 %vm716_vm0, %v21861_v45 }
0x2580   : > { %16810 = vmatmul.mubr.msk.f32.vlgmr.msra.gmra.mrb[112].mxu1 %vm716_vm0, %v19067_v38 }
0x2581   : > { %16812 = vmatprep.mubr.msk.f32.mxu1 %vm716_vm0, %v19068_v12 }
0x2584   : > { %16813 = vmatmul.mubr.msk.f32.gmra.mrb[114].mxu1 %vm716_vm0, %v19069_v47 }
0x264b   : > { %v16783_v60 = vpop.f32.mrb[108].mxu1  ;;  %v16797_v52 = vpop.f32.mrb[132].mxu0 }
0x264c   : > { %v7843_v32 = vadd.f32 %v16783_v60, %v23805_v40  ;;  %v7837_v8 = vpop.f32.mrb[109].mxu1  ;;  %v7922_v48 = vpop.f32.mrb[133].mxu0 }
0x264d   : > { %v7838_v42 = vadd.f32 %v7837_v8, %v23806_v27 }
0x264e   : > { %v8031_v56 = vmul.f32 %v7843_v32, %v7532_v10 }
0x264f   : > { %v8030_v2 = vmul.f32 %v7838_v42, %v7527_v14  ;;  %v16786_v26 = vpop.f32.mrb[110].mxu1  ;;  %v21910_v11 = vpop.f32.mrb[134].mxu0  ;;  %v14544_v14 = vld [vmem:[%s23339_s3 + $0x60] sm:$0xff] }
0x2650   : > { %v7853_v43 = vadd.f32 %v16786_v26, %v23809_v63  ;;  %v7847_v17 = vpop.f32.mrb[111].mxu1  ;;  %v21912_v10 = vpop.f32.mrb[135].mxu0  ;;  %16837 = vmatprep.mubr.msk.f32.mxu1 %vm716_vm0, %v14544_v14 }
0x2651   : > { %v7848_v13 = vadd.f32 %v7847_v17, %v23810_v36  ;;  %v18114_v44 = vpack.c.bf16 %v8031_v56, %v8030_v2 }
0x2652   : > { %v8033_v7 = vmul.f32 %v7853_v43, %v7542_v34 }
0x2653   : > { %v8032_v15 = vmul.f32 %v7848_v13, %v7537_v59  ;;  %18115 = vmatprep.subr.bf16.mxu0 %v18114_v44  ;;  %v16811_v6 = vpop.f32.mrb[112].mxu1  ;;  %v23811_v13 = vld [vmem:[#allocation82_spill] sm:$0xff] }
0x2654   : > { %18117 = vmatpush3.bf16.msra.mxu0 %v18114_v44  ;;  %v8011_v39 = vpop.f32.mrb[113].mxu1  ;;  %v7758_v44 = vadd.f32 %v21892_v57, %v23811_v13 }
0x2655   : > { %v18118_v54 = vpack.c.bf16 %v8033_v7, %v8032_v15  ;;  %v7928_v7 = vadd.f32 %v16797_v52, %v23811_v13 }
0x2657   : > { %18119 = vmatprep.subr.bf16.mxu0 %v18118_v54  ;;  %v16814_v49 = vpop.f32.mrb[114].mxu1 }
0x2658   : > { %18121 = vmatpush3.bf16.msra.mxu0 %v18118_v54  ;;  %v8021_v53 = vpop.f32.mrb[115].mxu1 }
0x2659   : > { %18130 = vmatprep.subr.bf16.mxu0 %v23600_v55 }
0x265b   : > { %16824 = vmatmul.mubr.msk.f32.vlgmr.msra.gmra.mrb[136].mxu0 %vm716_vm0, %v19067_v38 }
0x265c   : > { %16826 = vmatprep.mubr.msk.f32.mxu0 %vm716_vm0, %v19068_v12 }
0x265f   : > { %16827 = vmatmul.mubr.msk.f32.gmra.mrb[138].mxu0 %vm716_vm0, %v19069_v47 }
0x2660   : > { %16851 = vmatprep.mubr.msk.f32.mxu0 %vm19245_vm1, %v23606_v4 }
0x272e   : > { %v16825_v35 = vpop.f32.mrb[136].mxu0 }
0x272f   : > { %v8120_v40 = vmax.f32 %v16811_v6, %v16825_v35  ;;  %v8100_v29 = vpop.f32.mrb[137].mxu0 }
0x2730   : > { %v8119_v46 = vmax.f32 %v8011_v39, %v8100_v29 }
0x2731   : > { %v8124_v9 = vsub.f32 %v16811_v6, %v8120_v40  ;;  %v8136_v27 = vsub.f32 %v16825_v35, %v8120_v40 }
0x2732   : > { %v8123_v30 = vsub.f32 %v8011_v39, %v8119_v46  ;;  %v8135_v51 = vsub.f32 %v8100_v29, %v8119_v46  ;;  %v16828_v24 = vpop.f32.mrb[138].mxu0  ;;  %v23812_v39 = vld [vmem:[#allocation35_spill] sm:$0xff] }
0x2733   : > { %v8129_v19 = vmul.f32 1.442695, %v8124_v9  ;;  %v8141_v5 = vmul.f32 1.442695, %v8136_v27  ;;  %v8122_v34 = vmax.f32 %v16814_v49, %v16828_v24  ;;  %v8110_v31 = vpop.f32.mrb[139].mxu0  ;;  %v23813_v9 = vld [vmem:[#allocation37_spill] sm:$0xff] }
0x2734   : > { %v8127_v16 = vmul.f32 1.442695, %v8123_v30  ;;  %v8139_v59 = vmul.f32 1.442695, %v8135_v51  ;;  %v8121_v63 = vmax.f32 %v8021_v53, %v8110_v31  ;;  %v7768_v27 = vadd.f32 %v21906_v25, %v23813_v9 }
0x2735   : > { %18937 = vpow2.f32 %v8129_v19  ;;  %v8126_v33 = vsub.f32 %v16814_v49, %v8122_v34  ;;  %v8138_v20 = vsub.f32 %v16828_v24, %v8122_v34  ;;  %v7753_v49 = vadd.f32 %v21894_v58, %v23812_v39  ;;  %v23814_v19 = vld [vmem:[#allocation36_spill] sm:$0xff] }
0x2736   : > { %18939 = vpow2.f32 %v8141_v5  ;;  %v8125_v36 = vsub.f32 %v8021_v53, %v8121_v63  ;;  %v8137_v61 = vsub.f32 %v8110_v31, %v8121_v63  ;;  %v7923_v53 = vadd.f32 %v7922_v48, %v23812_v39 }
0x2737   : > { %18941 = vpow2.f32 %v8127_v16  ;;  %v8133_v28 = vmul.f32 1.442695, %v8126_v33  ;;  %v8145_v3 = vmul.f32 1.442695, %v8138_v20  ;;  %v7763_v5 = vadd.f32 %v21908_v37, %v23814_v19 }
0x2738   : > { %18943 = vpow2.f32 %v8139_v59  ;;  %v8131_v22 = vmul.f32 1.442695, %v8125_v36  ;;  %v8143_v23 = vmul.f32 1.442695, %v8137_v61  ;;  %v7938_v58 = vadd.f32 %v21910_v11, %v23813_v9  ;;  %v14545_v11 = vld [vmem:[%s23339_s3 + $0x68] sm:$0xff] }
0x2739   : > { %18945 = vpow2.f32 %v8133_v28  ;;  %v7933_v48 = vadd.f32 %v21912_v10, %v23814_v19  ;;  %v14546_v10 = vld [vmem:[%s23339_s3 + $0x70] sm:$0xff] }
0x273a   : > { %18947 = vpow2.f32 %v8145_v3  ;;  %v14547_v3 = vld [vmem:[%s23339_s3 + $0x78] sm:$0xff] }
0x273b   : > { %18949 = vpow2.f32 %v8131_v22 }
0x273c   : > { %18951 = vpow2.f32 %v8143_v23  ;;  %v23815_v23 = vld [vmem:[#allocation38_spill] sm:$0xff] }
0x273f   : > { %v18938_v41 = vpop.eup %18937 }
0x2740   : > { %v18940_v38 = vpop.eup %18939 }
0x2741   : > { %v18942_v12 = vpop.eup %18941  ;;  %v8148_v47 = vadd.f32 %v18940_v38, %v18938_v41 }
0x2742   : > { %v18944_v60 = vpop.eup %18943 }
0x2743   : > { %v18946_v32 = vpop.eup %18945  ;;  %18953 = vrcp.f32 %v8148_v47  ;;  %v8147_v8 = vadd.f32 %v18944_v60, %v18942_v12 }
0x2744   : > { %v18948_v42 = vpop.eup %18947 }
0x2745   : > { %v18950_v56 = vpop.eup %18949  ;;  %18955 = vrcp.f32 %v8147_v8  ;;  %v8150_v2 = vadd.f32 %v18948_v42, %v18946_v32 }
0x2746   : > { %v18952_v26 = vpop.eup %18951 }
0x2747   : > { %18957 = vrcp.f32 %v8150_v2  ;;  %v8149_v43 = vadd.f32 %v18952_v26, %v18950_v56 }
0x2749   : > { %18959 = vrcp.f32 %v8149_v43  ;;  %v23817_v43 = vld [vmem:[#allocation40_spill] sm:$0xff] }
0x274d   : > { %v18954_v17 = vpop.eup %18953 }
0x274e   : > { %v8156_v15 = vmul.f32 %v18954_v17, %v18938_v41  ;;  %v8164_v54 = vmul.f32 %v18954_v17, %v18940_v38 }
0x274f   : > { %v18956_v6 = vpop.eup %18955 }
0x2750   : > { %v8155_v14 = vmul.f32 %v18956_v6, %v18942_v12  ;;  %v8160_v35 = vmul.f32 %v8156_v15, %v7758_v44  ;;  %v8163_v40 = vmul.f32 %v18956_v6, %v18944_v60  ;;  %v8168_v29 = vmul.f32 %v8164_v54, %v7928_v7  ;;  %v23816_v12 = vld [vmem:[#allocation84_spill] sm:$0xff] }
0x2751   : > { %v18958_v46 = vpop.eup %18957 }
0x2752   : > { %v8159_v30 = vmul.f32 %v8155_v14, %v7753_v49  ;;  %v8167_v57 = vmul.f32 %v8163_v40, %v7923_v53  ;;  %v8172_v51 = vadd.f32 %v8168_v29, %v8160_v35  ;;  %v8158_v52 = vmul.f32 %v18958_v46, %v18946_v32  ;;  %v8189_v32 = vpop.permute.xlu0 %8188  ;;  %v14548_v29 = vld [vmem:[%s23340_s4 + $0xc0] sm:$0xff] }
0x2753   : > { %v18960_v24 = vpop.eup %18959  ;;  %v8166_v34 = vmul.f32 %v18958_v46, %v18948_v42 }
0x2754   : > { %v8171_v31 = vadd.f32 %v8167_v57, %v8159_v30  ;;  %v8157_v16 = vmul.f32 %v18960_v24, %v18950_v56  ;;  %v8162_v59 = vmul.f32 %v8158_v52, %v7768_v27  ;;  %v8165_v63 = vmul.f32 %v18960_v24, %v18952_v26 }
0x2755   : > { %v8170_v25 = vmul.f32 %v8166_v34, %v7938_v58 }
0x2756   : > { %v18122_v33 = vpack.c.bf16 %v8172_v51, %v8171_v31  ;;  %v8161_v20 = vmul.f32 %v8157_v16, %v7763_v5  ;;  %v8169_v36 = vmul.f32 %v8165_v63, %v7933_v48  ;;  %v8459_v30 = vpop.permute.xlu0 %8458  ;;  %v23818_v48 = vld [vmem:[#allocation41_spill] sm:$0xff] }
0x2757   : > { %v8174_v61 = vadd.f32 %v8170_v25, %v8162_v59  ;;  %v23819_v59 = vld [vmem:[#allocation44_spill] sm:$0xff] }
0x2758   : > { %18123 = vmatprep.subr.bf16.mxu1 %v18122_v33  ;;  %v8173_v28 = vadd.f32 %v8169_v36, %v8161_v20  ;;  %v23821_v36 = vld [vmem:[#allocation43_spill] sm:$0xff] }
0x2759   : > { %18125 = vmatpush3.bf16.msra.mxu1 %v18122_v33  ;;  %v23820_v33 = vld [vmem:[#allocation42_spill] sm:$0xff] }
0x275a   : > { %v18126_v37 = vpack.c.bf16 %v8174_v61, %v8173_v28  ;;  %v8463_v51 = vpop.permute.xlu0 %8462 }
0x275c   : > { %18127 = vmatprep.subr.bf16.mxu1 %v18126_v37 }
0x275d   : > { %18129 = vmatpush3.bf16.msra.mxu1 %v18126_v37  ;;  %v23822_v37 = vld [vmem:[#allocation46_spill] sm:$0xff] }
0x275e   : > { %18136 = vmatprep.subr.bf16.mxu1 %v23600_v55  ;;  %v8483_v25 = vpop.permute.xlu0 %8482 }
0x2760   : > { %16838 = vmatmul.mubr.msk.f32.vlgmr.msra.gmra.mrb[116].mxu1 %vm716_vm0, %v14545_v11 }
0x2761   : > { %16840 = vmatprep.mubr.msk.f32.mxu1 %vm716_vm0, %v14546_v10 }
0x2764   : > { %16841 = vmatmul.mubr.msk.f32.gmra.mrb[118].mxu1 %vm716_vm0, %v14547_v3 }
0x2765   : > { %16862 = vmatprep.mubr.msk.f32.mxu1 %vm19245_vm1, %v23606_v4 }
0x2833   : > { %v16839_v22 = vpop.f32.mrb[116].mxu1 }
0x2834   : > { %v8275_v41 = vadd.f32 %v16839_v22, %v23815_v23  ;;  %v8269_v38 = vpop.f32.mrb[117].mxu1  ;;  %v14549_v22 = vld [vmem:[%s23340_s4 + $0xc8] sm:$0xff]  ;;  %v14550_v23 = vld [vmem:[%s23340_s4 + $0xd0] sm:$0xff] }
0x2835   : > { %v8270_v47 = vadd.f32 %v8269_v38, %v23816_v12  ;;  %v14552_v38 = vld [vmem:[%s23340_s4 + $0xe0] sm:$0xff]  ;;  %v14553_v12 = vld [vmem:[%s23340_s4 + $0xe8] sm:$0xff] }
0x2836   : > { %v8289_v60 = vadd.f32 %v8275_v41, %v21780_v62  ;;  %v14551_v41 = vld [vmem:[%s23340_s4 + $0xd8] sm:$0xff] }
0x2837   : > { %v8288_v8 = vadd.f32 %v8270_v47, %v21776_v21  ;;  %v16842_v42 = vpop.f32.mrb[118].mxu1  ;;  %v14554_v47 = vld [vmem:[%s23340_s4 + $0xf0] sm:$0xff] }
0x2838   : > { %v8285_v56 = vadd.f32 %v16842_v42, %v8189_v32  ;;  %v8279_v2 = vpop.f32.mrb[119].mxu1  ;;  %v7415_v32 = vld [vmem:[#allocation6 + $0x60] sm:$0xff] }
0x2839   : > { %v18131_v26 = vpack.c.bf16 %v8289_v60, %v8288_v8  ;;  %v8280_v17 = vadd.f32 %v8279_v2, %v23817_v43 }
0x283a   : > { %v8291_v13 = vadd.f32 %v8285_v56, %v21792_v0 }
0x283b   : > { %v8290_v44 = vadd.f32 %v8280_v17, %v21789_v1  ;;  %18132 = vmatpush3.bf16.msra.mxu0 %v18131_v26  ;;  %v23823_v26 = vld [vmem:[#allocation48_spill] sm:$0xff] }
0x283c   : > { %18133 = vmatprep.subr.bf16.mxu0 %v23600_v55 }
0x283d   : > { %v18134_v7 = vpack.c.bf16 %v8291_v13, %v8290_v44 }
0x283f   : > { %18135 = vmatpush3.bf16.msra.mxu0 %v18134_v7  ;;  %v23824_v7 = vld [vmem:[#allocation52_spill] sm:$0xff] }
0x2842   : > { %16852 = vmatmul.mubr.msk.f32.vlgmr.msra.gmra.mrb[140].mxu0 %vm716_vm0, %v23615_v50 }
0x2843   : > { %16873 = vmatprep.mubr.msk.f32.mxu0 %vm716_vm0, %v14548_v29 }
0x2915   : > { %v8358_v62 = vpop.f32.mrb[140].mxu0 }
0x2916   : > { %v8365_v21 = vrot.slane %v8358_v62, %v19872_v18  ;;  %v16853_v15 = vpop.f32.mrb[141].mxu0 }
0x2918   : > { %v8366_v54 = vsub.f32 %v8288_v8, %v8365_v21  ;;  %v8367_v6 = vsub.f32 %v8289_v60, %v8365_v21  ;;  %v8368_v39 = vsub.f32 %v8290_v44, %v8365_v21  ;;  %v8369_v49 = vsub.f32 %v8291_v13, %v8365_v21  ;;  %v14555_v60 = vld [vmem:[%s23340_s4 + $0xf8] sm:$0xff]  ;;  %v8499_v8 = vpop.permute.xlu0 %8498 }
0x291a   : > { %v8370_v53 = vmul.f32 %v8366_v54, %v8366_v54  ;;  %v8371_v0 = vmul.f32 %v8367_v6, %v8367_v6  ;;  %v8372_v1 = vmul.f32 %v8368_v39, %v8368_v39  ;;  %v8373_v35 = vmul.f32 %v8369_v49, %v8369_v49 }
0x291c   : > { %v18137_v14 = vpack.c.bf16 %v8371_v0, %v8370_v53  ;;  %v18140_v40 = vpack.c.bf16 %v8373_v35, %v8372_v1 }
0x291e   : > { %18138 = vmatpush3.bf16.msra.mxu1 %v18137_v14  ;;  %v23826_v14 = vld [vmem:[#allocation56_spill] sm:$0xff] }
0x291f   : > { %18139 = vmatprep.subr.bf16.mxu1 %v23600_v55 }
0x2922   : > { %18141 = vmatpush3.bf16.msra.mxu1 %v18140_v40 }
0x2925   : > { %16863 = vmatmul.mubr.msk.f32.vlgmr.msra.gmra.mrb[120].mxu1 %vm716_vm0, %v23615_v50 }
0x2926   : > { %16901 = vmatprep.mubr.msk.f32.mxu1 %vm1966_vm2, %v7415_v32 }
0x29f8   : > { %v8440_v46 = vpop.f32.mrb[120].mxu1 }
0x29f9   : > { %v8441_v9 = vadd.f32 1e-05, %v8440_v46  ;;  %v16864_v27 = vpop.f32.mrb[121].mxu1 }
0x29fb   : > { %18961 = vrsqrt.f32 %v8441_v9 }
0x2a05   : > { %v18962_v57 = vpop.eup %18961 }
0x2a06   : > { %v8448_v52 = vrot.slane %v18962_v57, %v19872_v18  ;;  %v23827_v57 = vld [vmem:[#allocation57_spill] sm:$0xff] }
0x2a08   : > { %v8449_v24 = vmul.f32 %v8448_v52, %v8366_v54  ;;  %v8450_v19 = vmul.f32 %v8448_v52, %v8367_v6  ;;  %v8451_v5 = vmul.f32 %v8448_v52, %v8368_v39  ;;  %v8452_v58 = vmul.f32 %v8448_v52, %v8369_v49  ;;  %v23825_v54 = vld [vmem:[#allocation51_spill] sm:$0xff]  ;;  %v8512_v39 = vpop.permute.xlu0 %8511 }
0x2a0a   : > { %v8469_v34 = vmul.f32 %v23818_v48, %v8449_v24  ;;  %v8470_v31 = vmul.f32 %v8459_v30, %v8450_v19  ;;  %v8471_v16 = vmul.f32 %v8463_v51, %v8451_v5  ;;  %v8472_v63 = vmul.f32 %v23819_v59, %v8452_v58 }
0x2a0c   : > { %v21969_v20 = vadd.f32 %v23820_v33, %v8469_v34  ;;  %v21972_v61 = vadd.f32 %v23821_v36, %v8470_v31  ;;  %v21974_v28 = vadd.f32 %v8483_v25, %v8471_v16  ;;  %v21977_v11 = vadd.f32 %v23822_v37, %v8472_v63  ;;  %v8522_v30 = vpop.permute.xlu0 %8521  ;;  %v7416_v34 = vld [vmem:[#allocation6 + $0x68] sm:$0xff]  ;;  %v7417_v31 = vld [vmem:[#allocation6 + $0x70] sm:$0xff]  ;;  %v7418_v16 = vld [vmem:[#allocation6 + $0x78] sm:$0xff] }
0x2a0d   : > { %v23828_v25 = vld [vmem:[#allocation58_spill] sm:$0xff] }
0x2a0e   : > { %v18142_v10 = vpack.c.bf16 %v21972_v61, %v21969_v20  ;;  %v18146_v3 = vpack.c.bf16 %v21977_v11, %v21974_v28 }
0x2a10   : > { %18143 = vmatprep.subr.bf16.mxu0 %v18142_v10  ;;  %v8668_v59 = vpop.permute.xlu0 %8667 }
0x2a11   : > { %18145 = vmatpush3.bf16.msra.mxu0 %v18142_v10 }
0x2a12   : > { %18147 = vmatprep.subr.bf16.mxu0 %v18146_v3 }
0x2a15   : > { %18149 = vmatpush3.bf16.msra.mxu0 %v18146_v3  ;;  %v8680_v3 = vpop.permute.xlu0 %8679 }
0x2a16   : > { %18166 = vmatprep.subr.bf16.mxu0 %v23600_v55 }
0x2a18   : > { %16874 = vmatmul.mubr.msk.f32.vlgmr.msra.gmra.mrb[142].mxu0 %vm716_vm0, %v14549_v22 }
0x2a19   : > { %16876 = vmatprep.mubr.msk.f32.mxu0 %vm716_vm0, %v14550_v23 }
0x2a1c   : > { %16877 = vmatmul.mubr.msk.f32.gmra.mrb[144].mxu0 %vm716_vm0, %v14551_v41 }
0x2a1d   : > { %16879 = vmatprep.mubr.msk.f32.mxu0 %vm716_vm0, %v14552_v38 }
0x2a20   : > { %16880 = vmatmul.mubr.msk.f32.gmra.mrb[146].mxu0 %vm716_vm0, %v14553_v12 }
0x2a21   : > { %16882 = vmatprep.mubr.msk.f32.mxu0 %vm716_vm0, %v14554_v47  ;;  %v23829_v47 = vld [vmem:[#allocation59_spill] sm:$0xff] }
0x2a24   : > { %16883 = vmatmul.mubr.msk.f32.gmra.mrb[148].mxu0 %vm716_vm0, %v14555_v60 }
0x2a25   : > { %16915 = vmatprep.mubr.msk.f32.mxu0 %vm19245_vm1, %v23606_v4 }
0x2aeb   : > { %v16875_v42 = vpop.f32.mrb[142].mxu0 }
0x2aec   : > { %v8625_v56 = vadd.f32 %v16875_v42, %v8499_v8  ;;  %v8619_v2 = vpop.f32.mrb[143].mxu0 }
0x2aed   : > { %v8620_v43 = vadd.f32 %v8619_v2, %v23823_v26  ;;  %v22070_v2 = vld [vmem:[%s23338_s2 + $0x190] sm:$0xff]  ;;  %v22075_v26 = vld [vmem:[%s23338_s2 + $0x198] sm:$0xff] }
0x2aee   : > { %v8659_v17 = vmax.f32 %v8625_v56, 0.0  ;;  %v22064_v56 = vld [vmem:[%s19539_s30 + $0x50] sm:$0xff]   ;;  %23833 = vst [vmem:[#allocation45_spill] sm:$0xff] %v22070_v2  ;;  %23834 = vst [vmem:[#allocation18_spill] sm:$0xff] %v22075_v26 }
0x2aef   : > { %v8658_v13 = vmax.f32 %v8620_v43, 0.0  ;;  %v16878_v44 = vpop.f32.mrb[144].mxu0  ;;  %23832 = vst [vmem:[#allocation92_spill] sm:$0xff] %v22064_v56  ;;  %v22081_v43 = vpop.permute.xlu1 %10115 }
0x2af0   : > { %v8635_v62 = vadd.f32 %v16878_v44, %v23824_v7  ;;  %v8629_v21 = vpop.f32.mrb[145].mxu0  ;;  %23835 = vst [vmem:[#allocation94_spill] sm:$0xff] %v22081_v43 }
0x2af1   : > { %v18150_v15 = vpack.c.bf16 %v8659_v17, %v8658_v13  ;;  %v8630_v6 = vadd.f32 %v8629_v21, %v23825_v54 }
0x2af2   : > { %v8661_v49 = vmax.f32 %v8635_v62, 0.0 }
0x2af3   : > { %v8660_v53 = vmax.f32 %v8630_v6, 0.0  ;;  %v16881_v0 = vpop.f32.mrb[146].mxu0  ;;  %18151 = vmatprep.subr.bf16.mxu1 %v18150_v15  ;;  %v22083_v17 = vpop.permute.xlu1 %10123 }
0x2af4   : > { %v8645_v1 = vadd.f32 %v16881_v0, %v23826_v14  ;;  %v8639_v35 = vpop.f32.mrb[147].mxu0  ;;  %18153 = vmatpush3.bf16.msra.mxu1 %v18150_v15  ;;  %23836 = vst [vmem:[#allocation98_spill] sm:$0xff] %v22083_v17 }
0x2af5   : > { %v18154_v40 = vpack.c.bf16 %v8661_v49, %v8660_v53  ;;  %v8640_v29 = vadd.f32 %v8639_v35, %v8512_v39 }
0x2af6   : > { %v8663_v46 = vmax.f32 %v8645_v1, 0.0 }
0x2af7   : > { %v8662_v9 = vmax.f32 %v8640_v29, 0.0  ;;  %v16884_v27 = vpop.f32.mrb[148].mxu0  ;;  %18155 = vmatprep.subr.bf16.mxu1 %v18154_v40  ;;  %v22085_v13 = vpop.permute.xlu1 %10127 }
0x2af8   : > { %v8655_v51 = vadd.f32 %v16884_v27, %v23827_v57  ;;  %v8649_v52 = vpop.f32.mrb[149].mxu0  ;;  %18157 = vmatpush3.bf16.msra.mxu1 %v18154_v40  ;;  %23837 = vst [vmem:[#allocation95_spill] sm:$0xff] %v22085_v13  ;;  %v22117_v27 = vpop.permute.xlu0 %9056  ;;  %v14625_v57 = vld [vmem:[%s23338_s2 + $0x1a8] sm:$0xff] }
0x2af9   : > { %v18158_v24 = vpack.c.bf16 %v8663_v46, %v8662_v9  ;;  %v8650_v19 = vadd.f32 %v8649_v52, %v8522_v30  ;;  %v14624_v9 = vld [vmem:[%s23338_s2 + $0x1a0] sm:$0xff]  ;;  %23841 = vst [vmem:[#allocation96_spill] sm:$0xff] %v22117_v27  ;;  %v14626_v52 = vld [vmem:[%s23338_s2 + $0x1b0] sm:$0xff] }
0x2afa   : > { %v8665_v5 = vmax.f32 %v8655_v51, 0.0 }
0x2afb   : > { %v8664_v58 = vmax.f32 %v8650_v19, 0.0  ;;  %18159 = vmatprep.subr.bf16.mxu1 %v18158_v24  ;;  %v22087_v44 = vpop.permute.xlu1 %10137 }
0x2afc   : > { %18161 = vmatpush3.bf16.msra.mxu1 %v18158_v24  ;;  %v22130_v51 = vpop.permute.xlu0 %9061  ;;  %v22137_v24 = vld [vmem:[%s19539_s30 + $0x58] sm:$0xff]  }
0x2afd   : > { %v18162_v48 = vpack.c.bf16 %v8665_v5, %v8664_v58  ;;  %23843 = vst [vmem:[#allocation97_spill] sm:$0xff] %v22130_v51  ;;  %23844 = vst [vmem:[#allocation101_spill] sm:$0xff] %v22137_v24  ;;  %v14627_v5 = vld [vmem:[%s23338_s2 + $0x1b8] sm:$0xff] }
0x2aff   : > { %18163 = vmatprep.subr.bf16.mxu1 %v18162_v48  ;;  %v22089_v7 = vpop.permute.xlu1 %10147 }
0x2b00   : > { %18165 = vmatpush3.bf16.msra.mxu1 %v18162_v48  ;;  %23838 = vst [vmem:[#allocation99_spill] sm:$0xff] %v22089_v7  ;;  %v22148_v58 = vpop.permute.xlu0 %9175 }
0x2b01   : > { %18172 = vmatprep.subr.bf16.mxu1 %v23600_v55 }
0x2b03   : > { %16902 = vmatmul.mubr.msk.f32.vlgmr.msra.gmra.mrb[122].mxu1 %vm1966_vm2, %v7416_v34  ;;  %v22104_v14 = vpop.permute.xlu1 %10292 }
0x2b04   : > { %16904 = vmatprep.mubr.msk.f32.mxu1 %vm1966_vm2, %v7417_v31  ;;  %23839 = vst [vmem:[#allocation20_spill] sm:$0xff] %v22104_v14  ;;  %v22157_v34 = vpop.permute.xlu0 %9284 }
0x2b07   : > { %16905 = vmatmul.mubr.msk.f32.gmra.mrb[124].mxu1 %vm1966_vm2, %v7418_v16  ;;  %v22111_v46 = vpop.permute.xlu1 %10296 }
0x2b08   : > { %16926 = vmatprep.mubr.msk.f32.mxu1 %vm19245_vm1, %v23606_v4  ;;  %23840 = vst [vmem:[#allocation47_spill] sm:$0xff] %v22111_v46  ;;  %v22164_v16 = vpop.permute.xlu0 %9797 }
0x2b0b   : > { %v22123_v30 = vpop.permute.xlu1 %10566 }
0x2b0c   : > { %23842 = vst [vmem:[#allocation100_spill] sm:$0xff] %v22123_v30 }
0x2b0f   : > { %v22139_v19 = vpop.permute.xlu1 %10586 }
0x2b10   : > { %23845 = vst [vmem:[#allocation102_spill] sm:$0xff] %v22139_v19 }
0x2b13   : > { %v22153_v48 = vpop.permute.xlu1 %10590 }
0x2b14   : > { %23846 = vst [vmem:[#allocation103_spill] sm:$0xff] %v22153_v48 }
0x2b17   : > { %v22159_v31 = vpop.permute.xlu1 %10578 }
0x2b18   : > { %23847 = vst [vmem:[#allocation104_spill] sm:$0xff] %v22159_v31 }
0x2bd6   : > { %v16903_v63 = vpop.f32.mrb[122].mxu1 }
0x2bd7   : > { %v8766_v33 = vadd.f32 %v16903_v63, %v23828_v25  ;;  %v8760_v36 = vpop.f32.mrb[123].mxu1  ;;  %v22168_v63 = vpop.permute.xlu0 %9809 }
0x2bd8   : > { %v8761_v37 = vadd.f32 %v8760_v36, %v8668_v59  ;;  %v22166_v59 = vpop.permute.xlu1 %10598 }
0x2bd9   : > { %v8780_v10 = vadd.f32 %v8766_v33, %v21972_v61  ;;  %v22041_v61 = vld [vmem:[%s19539_s30 + $0x48] sm:$0xff]   ;;  %23848 = vst [vmem:[#allocation105_spill] sm:$0xff] %v22166_v59 }
0x2bda   : > { %v8779_v22 = vadd.f32 %v8761_v37, %v21969_v20  ;;  %v16906_v23 = vpop.f32.mrb[124].mxu1  ;;  %v22036_v20 = vld [vmem:[%s19539_s30 + $0x40] sm:$0xff]  }
0x2bdb   : > { %v8776_v41 = vadd.f32 %v16906_v23, %v8680_v3  ;;  %v8770_v38 = vpop.f32.mrb[125].mxu1  ;;  %v22172_v33 = vpop.permute.xlu0 %10079 }
0x2bdc   : > { %v18167_v12 = vpack.c.bf16 %v8780_v10, %v8779_v22  ;;  %v8771_v60 = vadd.f32 %v8770_v38, %v23829_v47  ;;  %v22170_v25 = vpop.permute.xlu1 %11598 }
0x2bdd   : > { %v8782_v32 = vadd.f32 %v8776_v41, %v21977_v11  ;;  %v22056_v11 = vld [vmem:[%s23338_s2 + $0x188] sm:$0xff]  ;;  %23849 = vst [vmem:[#allocation106_spill] sm:$0xff] %v22170_v25 }
0x2bde   : > { %v8781_v8 = vadd.f32 %v8771_v60, %v21974_v28  ;;  %18168 = vmatpush3.bf16.msra.mxu0 %v18167_v12  ;;  %v22048_v28 = vld [vmem:[%s23338_s2 + $0x180] sm:$0xff]  ;;  %23831 = vst [vmem:[#allocation55_spill] sm:$0xff] %v22056_v11 }
0x2bdf   : > { %18169 = vmatprep.subr.bf16.mxu0 %v23600_v55  ;;  %23830 = vst [vmem:[#allocation54_spill] sm:$0xff] %v22048_v28  ;;  %v22176_v37 = vpop.permute.xlu0 %10083 }
0x2be0   : > { %v18170_v42 = vpack.c.bf16 %v8782_v32, %v8781_v8  ;;  %v22174_v36 = vpop.permute.xlu1 %11714 }
0x2be1   : > { %23850 = vst [vmem:[#allocation19_spill] sm:$0xff] %v22174_v36 }
0x2be2   : > { %18171 = vmatpush3.bf16.msra.mxu0 %v18170_v42 }
0x2be3   : > { %18179 = vmatprep.subr.bf16.mxu0 %v22036_v20  ;;  %v22180_v3 = vpop.permute.xlu0 %10103 }
0x2be5   : > { %16916 = vmatmul.mubr.msk.f32.vlgmr.msra.gmra.mrb[150].mxu0 %vm716_vm0, %v23615_v50 }
0x2be6   : > { %18181 = vmatpush3.bf16.msra.mxu0 %v22036_v20  ;;  %16937 = vmatprep.mubr.msk.f32.mxu0 %vm716_vm0, %v22048_v28  ;;  %v23904_v28 = vld [vmem:[#allocation87_spill] sm:$0xff] }
0x2be7   : > { %18183 = vmatprep.subr.bf16.mxu0 %v22041_v61  ;;  %v22184_v23 = vpop.permute.xlu0 %10119 }
0x2be8   : > { %23853 = vst [vmem:[#allocation62_spill] sm:$0xff] %v22184_v23 }
0x2bea   : > { %18185 = vmatpush3.bf16.msra.mxu0 %v22041_v61 }
0x2beb   : > { %18195 = vmatprep.subr.bf16.mxu0 %v22036_v20  ;;  %v22188_v38 = vpop.permute.xlu0 %10132 }
0x2bec   : > { %23855 = vst [vmem:[#allocation64_spill] sm:$0xff] %v22188_v38 }
0x2bed   : > { %16938 = vmatmul.mubr.msk.f32.vlgmr.msra.gmra.mrb[152].mxu0 %vm716_vm0, %v22056_v11 }
0x2bee   : > { %18197 = vmatpush3.bf16.msra.mxu0 %v22036_v20  ;;  %16940 = vmatprep.mubr.msk.f32.mxu0 %vm716_vm0, %v22070_v2 }
0x2bef   : > { %18199 = vmatprep.subr.bf16.mxu0 %v22041_v61  ;;  %v22192_v47 = vpop.permute.xlu0 %10142 }
0x2bf0   : > { %23857 = vst [vmem:[#allocation108_spill] sm:$0xff] %v22192_v47  ;;  %v23908_v47 = vld [vmem:[#allocation85_spill] sm:$0xff] }
0x2bf1   : > { %16941 = vmatmul.mubr.msk.f32.gmra.mrb[154].mxu0 %vm716_vm0, %v22075_v26  ;;  %v23898_v26 = vld [vmem:[#allocation63_spill] sm:$0xff] }
0x2bf2   : > { %18201 = vmatpush3.bf16.msra.mxu0 %v22041_v61 }
0x2bf3   : > { %18211 = vmatprep.subr.bf16.mxu0 %v22064_v56 }
0x2cb8   : > { %v8849_v62 = vpop.f32.mrb[150].mxu0 }
0x2cb9   : > { %v8856_v21 = vrot.slane %v8849_v62, %v19872_v18  ;;  %v16917_v15 = vpop.f32.mrb[151].mxu0 }
0x2cbb   : > { %v22092_v54 = vsub.f32 %v8779_v22, %v8856_v21  ;;  %v22094_v6 = vsub.f32 %v8780_v10, %v8856_v21  ;;  %v22096_v39 = vsub.f32 %v8781_v8, %v8856_v21  ;;  %v22098_v49 = vsub.f32 %v8782_v32, %v8856_v21  ;;  %v22178_v10 = vpop.permute.xlu1 %11718  ;;  %v22196_v32 = vpop.permute.xlu0 %10288 }
0x2cbc   : > { %23851 = vst [vmem:[#allocation21_spill] sm:$0xff] %v22178_v10  ;;  %23859 = vst [vmem:[#allocation53_spill] sm:$0xff] %v22196_v32 }
0x2cbd   : > { %v8861_v53 = vmul.f32 %v22092_v54, %v22092_v54  ;;  %v8862_v0 = vmul.f32 %v22094_v6, %v22094_v6  ;;  %v8863_v35 = vmul.f32 %v22096_v39, %v22096_v39  ;;  %v8864_v40 = vmul.f32 %v22098_v49, %v22098_v49 }
0x2cbf   : > { %v18173_v1 = vpack.c.bf16 %v8862_v0, %v8861_v53  ;;  %v18176_v29 = vpack.c.bf16 %v8864_v40, %v8863_v35  ;;  %v22182_v22 = vpop.permute.xlu1 %11613  ;;  %v22200_v42 = vpop.permute.xlu0 %10300 }
0x2cc0   : > { %23852 = vst [vmem:[#allocation22_spill] sm:$0xff] %v22182_v22  ;;  %23861 = vst [vmem:[#allocation39_spill] sm:$0xff] %v22200_v42  ;;  %v22206_v15 = vpop.f32.mrb[152].mxu0 }
0x2cc1   : > { %18174 = vmatpush3.bf16.msra.mxu1 %v18173_v1  ;;  %v22208_v53 = vpop.f32.mrb[153].mxu0 }
0x2cc2   : > { %18175 = vmatprep.subr.bf16.mxu1 %v23600_v55 }
0x2cc3   : > { %v22186_v41 = vpop.permute.xlu1 %11726  ;;  %v22204_v21 = vpop.permute.xlu0 %10570 }
0x2cc4   : > { %23854 = vst [vmem:[#allocation23_spill] sm:$0xff] %v22186_v41  ;;  %23863 = vst [vmem:[#allocation26_spill] sm:$0xff] %v22204_v21  ;;  %v22216_v40 = vpop.f32.mrb[154].mxu0 }
0x2cc5   : > { %18177 = vmatpush3.bf16.msra.mxu1 %v18176_v29  ;;  %v22218_v29 = vpop.f32.mrb[155].mxu0 }
0x2cc6   : > { %18187 = vmatprep.subr.bf16.mxu1 %v22036_v20 }
0x2cc7   : > { %v22190_v12 = vpop.permute.xlu1 %11827  ;;  %v22212_v1 = vpop.permute.xlu0 %10574 }
0x2cc8   : > { %16927 = vmatmul.mubr.msk.f32.vlgmr.msra.gmra.mrb[126].mxu1 %vm716_vm0, %v23615_v50  ;;  %23856 = vst [vmem:[#allocation107_spill] sm:$0xff] %v22190_v12  ;;  %23865 = vst [vmem:[#allocation50_spill] sm:$0xff] %v22212_v1 }
0x2cc9   : > { %18189 = vmatpush3.bf16.msra.mxu1 %v22036_v20  ;;  %16951 = vmatprep.mubr.msk.f32.mxu1 %vm716_vm0, %v14624_v9 }
0x2cca   : > { %18191 = vmatprep.subr.bf16.mxu1 %v22041_v61 }
0x2ccb   : > { %v22194_v60 = vpop.permute.xlu1 %11835 }
0x2ccc   : > { %23858 = vst [vmem:[#allocation109_spill] sm:$0xff] %v22194_v60 }
0x2ccd   : > { %18193 = vmatpush3.bf16.msra.mxu1 %v22041_v61 }
0x2cce   : > { %18203 = vmatprep.subr.bf16.mxu1 %v22064_v56 }
0x2ccf   : > { %v22198_v8 = vpop.permute.xlu1 %11839 }
0x2cd0   : > { %16952 = vmatmul.mubr.msk.f32.vlgmr.msra.gmra.mrb[128].mxu1 %vm716_vm0, %v14625_v57  ;;  %23860 = vst [vmem:[#allocation49_spill] sm:$0xff] %v22198_v8 }
0x2cd1   : > { %18205 = vmatpush3.bf16.msra.mxu1 %v22064_v56  ;;  %16954 = vmatprep.mubr.msk.f32.mxu1 %vm716_vm0, %v14626_v52 }
0x2cd2   : > { %18207 = vmatprep.subr.bf16.mxu1 %v22137_v24 }
0x2cd3   : > { %v22202_v62 = vpop.permute.xlu1 %12348 }
0x2cd4   : > { %16955 = vmatmul.mubr.msk.f32.gmra.mrb[130].mxu1 %vm716_vm0, %v14627_v5  ;;  %23862 = vst [vmem:[#allocation66_spill] sm:$0xff] %v22202_v62 }
0x2cd5   : > { %18209 = vmatpush3.bf16.msra.mxu1 %v22137_v24  ;;  %16979 = vmatprep.mubr.msk.f32.mxu1 %vm716_vm0, %v14624_v9  ;;  %v22220_v9 = vpop.permute.xlu0 %10594 }
0x2cd6   : > { %23867 = vst [vmem:[#allocation68_spill] sm:$0xff] %v22220_v9 }
0x2cd7   : > { %v22210_v0 = vpop.permute.xlu1 %12352 }
0x2cd8   : > { %16980 = vmatmul.mubr.msk.f32.vlgmr.msra.gmra.mrb[132].mxu1 %vm716_vm0, %v14625_v57  ;;  %23864 = vst [vmem:[#allocation91_spill] sm:$0xff] %v22210_v0  ;;  %v14628_v57 = vld [vmem:[%s23338_s2 + $0x1c0] sm:$0xff]  ;;  %v14631_v0 = vld [vmem:[%s23338_s2 + $0x1d8] sm:$0xff] }
0x2cd9   : > { %16982 = vmatprep.mubr.msk.f32.mxu1 %vm716_vm0, %v14626_v52  ;;  %16965 = vmatprep.mubr.msk.f32.mxu0 %vm716_vm0, %v14628_v57  ;;  %v14629_v52 = vld [vmem:[%s23338_s2 + $0x1c8] sm:$0xff]  ;;  %v22241_v62 = vpop.permute.xlu0 %11603 }
0x2cda   : > { %16966 = vmatmul.mubr.msk.f32.vlgmr.msra.gmra.mrb[156].mxu0 %vm716_vm0, %v14629_v52  ;;  %23869 = vst [vmem:[#allocation28_spill] sm:$0xff] %v22241_v62 }
0x2cdb   : > { %v22214_v35 = vpop.permute.xlu1 %12622  ;;  %18213 = vmatpush3.bf16.msra.mxu0 %v22064_v56  ;;  %v23905_v56 = vld [vmem:[#allocation86_spill] sm:$0xff] }
0x2cdc   : > { %16983 = vmatmul.mubr.msk.f32.gmra.mrb[134].mxu1 %vm716_vm0, %v14627_v5  ;;  %23866 = vst [vmem:[#allocation70_spill] sm:$0xff] %v22214_v35  ;;  %v14630_v35 = vld [vmem:[%s23338_s2 + $0x1d0] sm:$0xff]  ;;  %18215 = vmatprep.subr.bf16.mxu0 %v22137_v24 }
0x2cdd   : > { %17007 = vmatprep.mubr.msk.f32.mxu1 %vm716_vm0, %v21861_v45  ;;  %16968 = vmatprep.mubr.msk.f32.mxu0 %vm716_vm0, %v14630_v35  ;;  %v22250_v60 = vpop.permute.xlu0 %11608 }
0x2cde   : > { %16969 = vmatmul.mubr.msk.f32.gmra.mrb[158].mxu0 %vm716_vm0, %v14631_v0  ;;  %23871 = vst [vmem:[#allocation72_spill] sm:$0xff] %v22250_v60 }
0x2cdf   : > { %v22229_v5 = vpop.permute.xlu1 %12642  ;;  %18217 = vmatpush3.bf16.msra.mxu0 %v22137_v24  ;;  %16993 = vmatprep.mubr.msk.f32.mxu0 %vm716_vm0, %v14628_v57 }
0x2ce0   : > { %23868 = vst [vmem:[#allocation24_spill] sm:$0xff] %v22229_v5 }
0x2ce1   : > { %v22257_v12 = vpop.permute.xlu0 %11722 }
0x2ce2   : > { %16994 = vmatmul.mubr.msk.f32.vlgmr.msra.gmra.mrb[160].mxu0 %vm716_vm0, %v14629_v52  ;;  %23873 = vst [vmem:[#allocation74_spill] sm:$0xff] %v22257_v12 }
0x2ce3   : > { %v22246_v5 = vpop.permute.xlu1 %12646  ;;  %16996 = vmatprep.mubr.msk.f32.mxu0 %vm716_vm0, %v14630_v35 }
0x2ce4   : > { %23870 = vst [vmem:[#allocation29_spill] sm:$0xff] %v22246_v5 }
0x2ce5   : > { %v22261_v57 = vpop.permute.xlu0 %11831 }
0x2ce6   : > { %16997 = vmatmul.mubr.msk.f32.gmra.mrb[162].mxu0 %vm716_vm0, %v14631_v0  ;;  %23875 = vst [vmem:[#allocation76_spill] sm:$0xff] %v22261_v57 }
0x2ce7   : > { %v22252_v8 = vpop.permute.xlu1 %12634  ;;  %17021 = vmatprep.mubr.msk.f32.mxu0 %vm716_vm0, %v21861_v45 }
0x2ce8   : > { %23872 = vst [vmem:[#allocation25_spill] sm:$0xff] %v22252_v8 }
0x2ce9   : > { %v22265_v52 = vpop.permute.xlu0 %12344 }
0x2cea   : > { %23877 = vst [vmem:[#allocation32_spill] sm:$0xff] %v22265_v52 }
0x2ceb   : > { %v22259_v41 = vpop.permute.xlu1 %12654 }
0x2cec   : > { %23874 = vst [vmem:[#allocation27_spill] sm:$0xff] %v22259_v41 }
0x2ced   : > { %v22269_v60 = vpop.permute.xlu0 %12356 }
0x2cee   : > { %23879 = vst [vmem:[#allocation33_spill] sm:$0xff] %v22269_v60 }
0x2cef   : > { %v22263_v5 = vpop.permute.xlu1 %12662 }
0x2cf0   : > { %23876 = vst [vmem:[#allocation31_spill] sm:$0xff] %v22263_v5 }
0x2cf1   : > { %v22273_v0 = vpop.permute.xlu0 %12626 }
0x2cf2   : > { %23881 = vst [vmem:[#allocation34_spill] sm:$0xff] %v22273_v0 }
0x2cf3   : > { %v22267_v35 = vpop.permute.xlu1 %12670 }
0x2cf4   : > { %23878 = vst [vmem:[#allocation30_spill] sm:$0xff] %v22267_v35 }
0x2cf5   : > { %v22277_v45 = vpop.permute.xlu0 %12630 }
0x2cf6   : > { %23883 = vst [vmem:[#allocation82_spill] sm:$0xff] %v22277_v45 }
0x2cf7   : > { %v22271_v8 = vpop.permute.xlu1 %12674 }
0x2cf8   : > { %23880 = vst [vmem:[#allocation78_spill] sm:$0xff] %v22271_v8 }
0x2cf9   : > { %v22281_v41 = vpop.permute.xlu0 %12650 }
0x2cfa   : > { %23885 = vst [vmem:[#allocation37_spill] sm:$0xff] %v22281_v41 }
0x2cfb   : > { %v22275_v22 = vpop.permute.xlu1 %12684 }
0x2cfc   : > { %23882 = vst [vmem:[#allocation80_spill] sm:$0xff] %v22275_v22 }
0x2cfd   : > { %v22285_v5 = vpop.permute.xlu0 %12666 }
0x2cfe   : > { %23887 = vst [vmem:[#allocation38_spill] sm:$0xff] %v22285_v5 }
0x2cff   : > { %v22279_v12 = vpop.permute.xlu1 %12694 }
0x2d00   : > { %23884 = vst [vmem:[#allocation35_spill] sm:$0xff] %v22279_v12 }
0x2d01   : > { %v22289_v35 = vpop.permute.xlu0 %12679 }
0x2d02   : > { %23889 = vst [vmem:[#allocation40_spill] sm:$0xff] %v22289_v35 }
0x2d03   : > { %v22283_v57 = vpop.permute.xlu1 %12839 }
0x2d04   : > { %23886 = vst [vmem:[#allocation36_spill] sm:$0xff] %v22283_v57 }
0x2d05   : > { %v22293_v8 = vpop.permute.xlu0 %12689 }
0x2d06   : > { %23890 = vst [vmem:[#allocation41_spill] sm:$0xff] %v22293_v8  ;;  %v23895_v8 = vld [vmem:[#allocation93_spill] sm:$0xff] }
0x2d07   : > { %v22287_v52 = vpop.permute.xlu1 %12843  ;;  %v4764_v10 = vadd.f32 1e-05, %v23895_v8  ;;  %v9153_v8 = vadd.f32 %v22206_v15, %v22117_v27  ;;  %v23906_v27 = vld [vmem:[#allocation65_spill] sm:$0xff] }
0x2d08   : > { %23888 = vst [vmem:[#allocation84_spill] sm:$0xff] %v22287_v52 }
0x2d09   : > { %v22297_v22 = vpop.permute.xlu0 %12835  ;;  %18963 = vrsqrt.f32 %v4764_v10  ;;  %v23897_v10 = vld [vmem:[#allocation88_spill] sm:$0xff] }
0x2d0a   : > { %23891 = vst [vmem:[#allocation44_spill] sm:$0xff] %v22297_v22 }
0x2d0b   : > { %v22291_v60 = vpop.permute.xlu1 %4777 }
0x2d0d   : > { %v22301_v12 = vpop.permute.xlu0 %12847 }
0x2d0e   : > { %23892 = vst [vmem:[#allocation42_spill] sm:$0xff] %v22301_v12 }
0x2d0f   : > { %v22295_v0 = vpop.permute.xlu1 %8945 }
0x2d11   : > { %v22305_v57 = vpop.permute.xlu0 %4797 }
0x2d13   : > { %v22299_v45 = vpop.permute.xlu1 %8949  ;;  %v18964_v48 = vpop.eup %18963 }
0x2d14   : > { %v4771_v19 = vrot.slane %v18964_v48, %v19872_v18 }
0x2d15   : > { %v22309_v52 = vpop.permute.xlu0 %8969 }
0x2d16   : > { %v4775_v30 = vmul.f32 %v4771_v19, %v23897_v10  ;;  %v4773_v46 = vmul.f32 %v4771_v19, %v23905_v56  ;;  %v9163_v10 = vadd.f32 %v22216_v40, %v23906_v27  ;;  %v4772_v56 = vmul.f32 %v4771_v19, %v23908_v47 }
0x2d17   : > { %v22303_v41 = vpop.permute.xlu1 %4801 }
0x2d19   : > { %v22313_v36 = vpop.permute.xlu0 %13133 }
0x2d1a   : > { %23894 = vst [vmem:[#allocation46_spill] sm:$0xff] %v22313_v36 }
0x2d1b   : > { %v22307_v5 = vpop.permute.xlu1 %8965 }
0x2d1d   : > { %v4810_v22 = vpop.permute.xlu0 %4809 }
0x2d1f   : > { %v22311_v35 = vpop.permute.xlu1 %13113 }
0x2d20   : > { %23893 = vst [vmem:[#allocation43_spill] sm:$0xff] %v22311_v35 }
0x2d21   : > { %v22316_v59 = vpop.permute.xlu0 %8977 }
0x2d23   : > { %v4786_v25 = vpop.permute.xlu1 %4785 }
0x2d25   : > { %v4782_v21 = vpop.permute.xlu0 %4781 }
0x2d27   : > { %v4790_v62 = vpop.permute.xlu1 %4789 }
0x2d29   : > { %v22327_v24 = vpop.permute.xlu0 %13117 }
0x2d2a   : > { %23900 = vst [vmem:[#allocation51_spill] sm:$0xff] %v22327_v24  ;;  %v9158_v24 = vadd.f32 %v22218_v29, %v22130_v51 }
0x2d2b   : > { %v8958_v9 = vpop.permute.xlu1 %8957 }
0x2d2d   : > { %v8954_v51 = vpop.permute.xlu0 %8953 }
0x2d2f   : > { %v22319_v35 = vpop.permute.xlu1 %13137 }
0x2d30   : > { %23896 = vst [vmem:[#allocation48_spill] sm:$0xff] %v22319_v35  ;;  %v4774_v35 = vmul.f32 %v4771_v19, %v23904_v28 }
0x2d32   : > { %v4794_v27 = vmul.f32 %v4786_v25, %v4774_v35  ;;  %v4792_v25 = vmul.f32 %v22291_v60, %v4772_v56 }
0x2d9b   : > { %v8931_v12 = vpop.f32.mrb[126].mxu1 }
0x2d9c   : > { %v8932_v31 = vadd.f32 1e-05, %v8931_v12  ;;  %v16928_v1 = vpop.f32.mrb[127].mxu1  ;;  %v23901_v12 = vld [vmem:[#allocation60_spill] sm:$0xff] }
0x2d9d   : > { %v23902_v1 = vld [vmem:[#allocation61_spill] sm:$0xff] }
0x2d9e   : > { %18965 = vrsqrt.f32 %v8932_v31  ;;  %v9148_v31 = vadd.f32 %v22208_v53, %v23901_v12  ;;  %v4795_v53 = vmul.f32 %v4790_v62, %v4775_v30  ;;  %v4806_v12 = vpop.permute.xlu1 %4805 }
0x2da0   : > { %v4815_v47 = vadd.f32 %v4810_v22, %v4795_v53 }
0x2da3   : > { %v16953_v36 = vpop.f32.mrb[128].mxu1 }
0x2da4   : > { %v22325_v2 = vadd.f32 %v16953_v36, %v23898_v26  ;;  %v9260_v11 = vpop.f32.mrb[129].mxu1 }
0x2da5   : > { %v22332_v48 = vadd.f32 %v9260_v11, %v23902_v1  ;;  %v23907_v11 = vld [vmem:[#allocation67_spill] sm:$0xff] }
0x2da6   : > { %23899 = vst [vmem:[#allocation52_spill] sm:$0xff] %v22325_v2  ;;  %v9563_v15 = vmul.f32 %v22325_v2, %v9153_v8 }
0x2da7   : > { %23903 = vst [vmem:[#allocation56_spill] sm:$0xff] %v22332_v48  ;;  %v9562_v36 = vmul.f32 %v22332_v48, %v9148_v31  ;;  %v16956_v42 = vpop.f32.mrb[130].mxu1  ;;  %v4793_v48 = vmul.f32 %v4782_v21, %v4773_v46  ;;  %v8974_v46 = vpop.permute.xlu1 %8973 }
0x2da8   : > { %v18966_v32 = vpop.eup %18965  ;;  %v22343_v14 = vadd.f32 %v16956_v42, %v23907_v11  ;;  %v9270_v28 = vpop.f32.mrb[131].mxu1 }
0x2da9   : > { %v22347_v2 = vadd.f32 %v9270_v28, %v22148_v58  ;;  %v18218_v7 = vpack.c.bf16 %v9563_v15, %v9562_v36  ;;  %v8939_v40 = vrot.slane %v18966_v32, %v19872_v18 }
0x2daa   : > { %v9565_v29 = vmul.f32 %v22343_v14, %v9163_v10 }
0x2dab   : > { %v9564_v30 = vmul.f32 %v22347_v2, %v9158_v24  ;;  %v16981_v62 = vpop.f32.mrb[132].mxu1  ;;  %18219 = vmatprep.subr.bf16.mxu1 %v18218_v7  ;;  %v8942_v42 = vmul.f32 %v8939_v40, %v22096_v39  ;;  %v8943_v38 = vmul.f32 %v8939_v40, %v22098_v49  ;;  %v8940_v19 = vmul.f32 %v8939_v40, %v22092_v54 }
0x2dac   : > { %v22356_v15 = vadd.f32 %v16981_v62, %v23898_v26  ;;  %v9458_v32 = vpop.f32.mrb[133].mxu1  ;;  %18221 = vmatpush3.bf16.msra.mxu1 %v18218_v7  ;;  %v8941_v21 = vmul.f32 %v8939_v40, %v22094_v6  ;;  %v4813_v49 = vadd.f32 %v22303_v41, %v4793_v48  ;;  %v4814_v7 = vadd.f32 %v4806_v12, %v4794_v27  ;;  %v22396_v48 = vld [vmem:[#allocation8 + $0x18] sm:$0xff] }
0x2dad   : > { %v8962_v35 = vmul.f32 %v8954_v51, %v8942_v42  ;;  %v22361_v36 = vadd.f32 %v9458_v32, %v23902_v1  ;;  %v18222_v39 = vpack.c.bf16 %v9565_v29, %v9564_v30  ;;  %v8963_v28 = vmul.f32 %v8958_v9, %v8943_v38 }
0x2dae   : > { %v9652_v54 = vmul.f32 %v22356_v15, %v9153_v8  ;;  %v8960_v26 = vmul.f32 %v22295_v0, %v8940_v19  ;;  %v8961_v22 = vmul.f32 %v22299_v45, %v8941_v21  ;;  %v4812_v41 = vadd.f32 %v22305_v57, %v4792_v25  ;;  %v22426_v19 = vld [vmem:[%s23339_s3 + $0x80] sm:$0xff] }
0x2daf   : > { %v9651_v53 = vmul.f32 %v22361_v36, %v9148_v31  ;;  %v8982_v60 = vadd.f32 %v8974_v46, %v8962_v35  ;;  %v16984_v56 = vpop.f32.mrb[134].mxu1  ;;  %18223 = vmatprep.subr.bf16.mxu1 %v18222_v39  ;;  %v8983_v6 = vadd.f32 %v22316_v59, %v8963_v28 }
0x2db0   : > { %v22370_v51 = vadd.f32 %v16984_v56, %v23907_v11  ;;  %v9468_v38 = vpop.f32.mrb[135].mxu1  ;;  %18225 = vmatpush3.bf16.msra.mxu1 %v18222_v39  ;;  %v8980_v9 = vadd.f32 %v22307_v5, %v8960_v26  ;;  %v8981_v0 = vadd.f32 %v22309_v52, %v8961_v22  ;;  %v22388_v5 = vld [vmem:[#allocation8 + $0x8] sm:$0xff] }
0x2db1   : > { %v22375_v45 = vadd.f32 %v8982_v60, %v4814_v7  ;;  %v22378_v27 = vadd.f32 %v9468_v38, %v22148_v58  ;;  %v18226_v8 = vpack.c.bf16 %v9652_v54, %v9651_v53  ;;  %v22380_v12 = vadd.f32 %v8983_v6, %v4815_v47  ;;  %v22392_v58 = vld [vmem:[#allocation8 + $0x10] sm:$0xff] }
0x2db2   : > { %v9654_v59 = vmul.f32 %v22370_v51, %v9163_v10  ;;  %v22383_v31 = vadd.f32 %v8980_v9, %v4812_v41  ;;  %v22385_v1 = vadd.f32 %v8981_v0, %v4813_v49 }
0x2db3   : > { %23909 = vst [vmem:[#allocation57_spill] sm:$0xff] %v22375_v45  ;;  %23910 = vst [vmem:[#allocation58_spill] sm:$0xff] %v22380_v12  ;;  %v9653_v57 = vmul.f32 %v22378_v27, %v9158_v24  ;;  %18227 = vmatprep.subr.bf16.mxu0 %v18226_v8  ;;  %17008 = vmatmul.mubr.msk.f32.vlgmr.msra.gmra.mrb[136].mxu1 %vm716_vm0, %v22388_v5  ;;  %v22409_v24 = vpop.f32.mrb[156].mxu0 }
0x2db4   : > { %23911 = vst [vmem:[#allocation59_spill] sm:$0xff] %v22383_v31  ;;  %23912 = vst [vmem:[#allocation93_spill] sm:$0xff] %v22385_v1  ;;  %18229 = vmatpush3.bf16.msra.mxu0 %v18226_v8  ;;  %17010 = vmatprep.mubr.msk.f32.mxu1 %vm716_vm0, %v22392_v58  ;;  %v22411_v10 = vpop.f32.mrb[157].mxu0 }
0x2db5   : > { %v18230_v52 = vpack.c.bf16 %v9654_v59, %v9653_v57  ;;  %v22413_v11 = vpop.f32.mrb[158].mxu0 }
0x2db6   : > { %v22415_v40 = vpop.f32.mrb[159].mxu0 }
0x2db7   : > { %18231 = vmatprep.subr.bf16.mxu0 %v18230_v52  ;;  %17011 = vmatmul.mubr.msk.f32.gmra.mrb[138].mxu1 %vm716_vm0, %v22396_v48  ;;  %v16995_v29 = vpop.f32.mrb[160].mxu0 }
0x2db8   : > { %18233 = vmatpush3.bf16.msra.mxu0 %v18230_v52  ;;  %v22417_v30 = vpop.f32.mrb[161].mxu0  ;;  %17035 = vmatprep.mubr.msk.f32.mxu1 %vm716_vm0, %v22426_v19 }
0x2db9   : > { %18242 = vmatprep.subr.bf16.mxu0 %v23600_v55  ;;  %v22419_v62 = vpop.f32.mrb[162].mxu0 }
0x2dba   : > { %v22421_v42 = vpop.f32.mrb[163].mxu0 }
0x2dbb   : > { %17022 = vmatmul.mubr.msk.f32.vlgmr.msra.gmra.mrb[164].mxu0 %vm716_vm0, %v22388_v5 }
0x2dbc   : > { %17024 = vmatprep.mubr.msk.f32.mxu0 %vm716_vm0, %v22392_v58 }
0x2dbf   : > { %17025 = vmatmul.mubr.msk.f32.gmra.mrb[166].mxu0 %vm716_vm0, %v22396_v48 }
0x2dc0   : > { %17049 = vmatprep.mubr.msk.f32.mxu0 %vm19245_vm1, %v23606_v4 }
0x2e86   : > { %v17009_v47 = vpop.f32.mrb[136].mxu1 }
0x2e87   : > { %v9632_v32 = vpop.f32.mrb[137].mxu1 }
0x2e8a   : > { %v17012_v46 = vpop.f32.mrb[138].mxu1 }
0x2e8b   : > { %v9642_v25 = vpop.f32.mrb[139].mxu1 }
0x2e8e   : > { %v17023_v21 = vpop.f32.mrb[164].mxu0 }
0x2e8f   : > { %v9741_v35 = vmax.f32 %v17009_v47, %v17023_v21  ;;  %v9721_v39 = vpop.f32.mrb[165].mxu0 }
0x2e90   : > { %v9740_v28 = vmax.f32 %v9632_v32, %v9721_v39 }
0x2e91   : > { %v9745_v49 = vsub.f32 %v17009_v47, %v9741_v35  ;;  %v9757_v54 = vsub.f32 %v17023_v21, %v9741_v35 }
0x2e92   : > { %v9744_v26 = vsub.f32 %v9632_v32, %v9740_v28  ;;  %v9756_v22 = vsub.f32 %v9721_v39, %v9740_v28  ;;  %v17026_v7 = vpop.f32.mrb[166].mxu0 }
0x2e93   : > { %v9750_v53 = vmul.f32 1.442695, %v9745_v49  ;;  %v9762_v60 = vmul.f32 1.442695, %v9757_v54  ;;  %v9743_v56 = vmax.f32 %v17012_v46, %v17026_v7  ;;  %v9731_v6 = vpop.f32.mrb[167].mxu0 }
0x2e94   : > { %v9748_v38 = vmul.f32 1.442695, %v9744_v26  ;;  %v9760_v41 = vmul.f32 1.442695, %v9756_v22  ;;  %v9742_v9 = vmax.f32 %v9642_v25, %v9731_v6 }
0x2e95   : > { %18967 = vpow2.f32 %v9750_v53  ;;  %v9747_v0 = vsub.f32 %v17012_v46, %v9743_v56  ;;  %v9759_v8 = vsub.f32 %v17026_v7, %v9743_v56 }
0x2e96   : > { %18969 = vpow2.f32 %v9762_v60  ;;  %v9746_v59 = vsub.f32 %v9642_v25, %v9742_v9  ;;  %v9758_v57 = vsub.f32 %v9731_v6, %v9742_v9  ;;  %v22432_v6 = vadd.f32 %v22409_v24, %v22157_v34 }
0x2e97   : > { %18971 = vpow2.f32 %v9748_v38  ;;  %v9754_v52 = vmul.f32 1.442695, %v9747_v0  ;;  %v9766_v47 = vmul.f32 1.442695, %v9759_v8  ;;  %v22435_v38 = vadd.f32 %v16995_v29, %v22157_v34  ;;  %v23913_v8 = vld [vmem:[#allocation69_spill] sm:$0xff] }
0x2e98   : > { %18973 = vpow2.f32 %v9760_v41  ;;  %v9752_v32 = vmul.f32 1.442695, %v9746_v59  ;;  %v9764_v21 = vmul.f32 1.442695, %v9758_v57  ;;  %v22439_v59 = vadd.f32 %v22411_v10, %v23913_v8  ;;  %v23914_v34 = vld [vmem:[#allocation73_spill] sm:$0xff] }
0x2e99   : > { %18975 = vpow2.f32 %v9754_v52  ;;  %v22443_v57 = vadd.f32 %v22417_v30, %v23913_v8  ;;  %v22449_v29 = vadd.f32 %v22413_v11, %v23914_v34  ;;  %v23915_v30 = vld [vmem:[#allocation71_spill] sm:$0xff] }
0x2e9a   : > { %18977 = vpow2.f32 %v9766_v47 }
0x2e9b   : > { %18979 = vpow2.f32 %v9752_v32 }
0x2e9c   : > { %18981 = vpow2.f32 %v9764_v21 }
0x2e9f   : > { %v18968_v35 = vpop.eup %18967 }
0x2ea0   : > { %v18970_v39 = vpop.eup %18969 }
0x2ea1   : > { %v18972_v28 = vpop.eup %18971  ;;  %v9769_v49 = vadd.f32 %v18970_v39, %v18968_v35 }
0x2ea2   : > { %v18974_v54 = vpop.eup %18973 }
0x2ea3   : > { %v18976_v46 = vpop.eup %18975  ;;  %18983 = vrcp.f32 %v9769_v49  ;;  %v9768_v26 = vadd.f32 %v18974_v54, %v18972_v28 }
0x2ea4   : > { %v18978_v25 = vpop.eup %18977 }
0x2ea5   : > { %v18980_v22 = vpop.eup %18979  ;;  %18985 = vrcp.f32 %v9768_v26  ;;  %v9771_v7 = vadd.f32 %v18978_v25, %v18976_v46 }
0x2ea6   : > { %v18982_v53 = vpop.eup %18981 }
0x2ea7   : > { %18987 = vrcp.f32 %v9771_v7  ;;  %v9770_v60 = vadd.f32 %v18982_v53, %v18980_v22  ;;  %v22463_v7 = vadd.f32 %v22421_v42, %v23915_v30  ;;  %v22472_v42 = vld [vmem:[%s23339_s3 + $0x88] sm:$0xff] }
0x2ea9   : > { %18989 = vrcp.f32 %v9770_v60 }
0x2ead   : > { %v18984_v56 = vpop.eup %18983 }
0x2eae   : > { %v9777_v41 = vmul.f32 %v18984_v56, %v18968_v35  ;;  %v9785_v9 = vmul.f32 %v18984_v56, %v18970_v39 }
0x2eaf   : > { %v18986_v0 = vpop.eup %18985 }
0x2eb0   : > { %v9776_v52 = vmul.f32 %v18986_v0, %v18972_v28  ;;  %v9781_v47 = vmul.f32 %v9777_v41, %v22432_v6  ;;  %v9784_v32 = vmul.f32 %v18986_v0, %v18974_v54  ;;  %v9789_v24 = vmul.f32 %v9785_v9, %v22435_v38 }
0x2eb1   : > { %v18988_v21 = vpop.eup %18987  ;;  %v22455_v28 = vadd.f32 %v22415_v40, %v23915_v30  ;;  %v22459_v54 = vadd.f32 %v22419_v62, %v23914_v34 }
0x2eb2   : > { %v9780_v35 = vmul.f32 %v9776_v52, %v22439_v59  ;;  %v9788_v10 = vmul.f32 %v9784_v32, %v22443_v57  ;;  %v9793_v39 = vadd.f32 %v9789_v24, %v9781_v47  ;;  %v9779_v49 = vmul.f32 %v18988_v21, %v18976_v46 }
0x2eb3   : > { %v18990_v26 = vpop.eup %18989  ;;  %v9787_v11 = vmul.f32 %v18988_v21, %v18978_v25  ;;  %v22477_v25 = vld [vmem:[%s23339_s3 + $0x90] sm:$0xff]  ;;  %v14894_v24 = vunpack.c.l.bf16 %v22036_v20  ;;  %v23916_v21 = vld [vmem:[#allocation75_spill] sm:$0xff] }
0x2eb4   : > { %v9792_v60 = vadd.f32 %v9788_v10, %v9780_v35  ;;  %v9778_v56 = vmul.f32 %v18990_v26, %v18980_v22  ;;  %v9783_v41 = vmul.f32 %v9779_v49, %v22449_v29  ;;  %v9786_v9 = vmul.f32 %v18990_v26, %v18982_v53  ;;  %v22487_v22 = vld [vmem:[%s23339_s3 + $0x98] sm:$0xff] }
0x2eb5   : > { %v9791_v46 = vmul.f32 %v9787_v11, %v22459_v54  ;;  %v14895_v53 = vunpack.c.h.bf16 %v22036_v20  ;;  %v14899_v49 = vunpack.c.h.bf16 %v22041_v61  ;;  %v14898_v11 = vunpack.c.l.bf16 %v22041_v61 }
0x2eb6   : > { %v18234_v0 = vpack.c.bf16 %v9793_v39, %v9792_v60  ;;  %v9782_v40 = vmul.f32 %v9778_v56, %v22455_v28  ;;  %v9790_v8 = vmul.f32 %v9786_v9, %v22463_v7  ;;  %v23917_v9 = vld [vmem:[#allocation77_spill] sm:$0xff] }
0x2eb7   : > { %v9795_v52 = vadd.f32 %v9791_v46, %v9783_v41 }
0x2eb8   : > { %18235 = vmatprep.subr.bf16.mxu1 %v18234_v0  ;;  %v9794_v62 = vadd.f32 %v9790_v8, %v9782_v40 }
0x2eb9   : > { %18237 = vmatpush3.bf16.msra.mxu1 %v18234_v0 }
0x2eba   : > { %v18238_v47 = vpack.c.bf16 %v9795_v52, %v9794_v62 }
0x2ebc   : > { %18239 = vmatprep.subr.bf16.mxu1 %v18238_v47 }
0x2ebd   : > { %18241 = vmatpush3.bf16.msra.mxu1 %v18238_v47 }
0x2ebe   : > { %18248 = vmatprep.subr.bf16.mxu1 %v23600_v55 }
0x2ec0   : > { %17036 = vmatmul.mubr.msk.f32.vlgmr.msra.gmra.mrb[140].mxu1 %vm716_vm0, %v22472_v42 }
0x2ec1   : > { %17038 = vmatprep.mubr.msk.f32.mxu1 %vm716_vm0, %v22477_v25 }
0x2ec4   : > { %17039 = vmatmul.mubr.msk.f32.gmra.mrb[142].mxu1 %vm716_vm0, %v22487_v22 }
0x2ec5   : > { %17060 = vmatprep.mubr.msk.f32.mxu1 %vm19245_vm1, %v23606_v4 }
0x2f93   : > { %v17037_v32 = vpop.f32.mrb[140].mxu1 }
0x2f94   : > { %v9896_v34 = vadd.f32 %v17037_v32, %v23916_v21  ;;  %v9890_v35 = vpop.f32.mrb[141].mxu1 }
0x2f95   : > { %v9891_v10 = vadd.f32 %v9890_v35, %v22164_v16 }
0x2f96   : > { %v9910_v39 = vadd.f32 %v14895_v53, %v9896_v34 }
0x2f97   : > { %v9909_v26 = vadd.f32 %v14894_v24, %v9891_v10  ;;  %v17040_v30 = vpop.f32.mrb[142].mxu1 }
0x2f98   : > { %v9906_v60 = vadd.f32 %v17040_v30, %v22168_v63  ;;  %v9900_v56 = vpop.f32.mrb[143].mxu1 }
0x2f99   : > { %v18243_v41 = vpack.c.bf16 %v9910_v39, %v9909_v26  ;;  %v9901_v46 = vadd.f32 %v9900_v56, %v23917_v9 }
0x2f9a   : > { %v9912_v0 = vadd.f32 %v14899_v49, %v9906_v60 }
0x2f9b   : > { %v9911_v20 = vadd.f32 %v14898_v11, %v9901_v46  ;;  %18244 = vmatpush3.bf16.msra.mxu0 %v18243_v41 }
0x2f9c   : > { %18245 = vmatprep.subr.bf16.mxu0 %v23600_v55 }
0x2f9d   : > { %v18246_v40 = vpack.c.bf16 %v9912_v0, %v9911_v20 }
0x2f9f   : > { %18247 = vmatpush3.bf16.msra.mxu0 %v18246_v40 }
0x2fa2   : > { %17050 = vmatmul.mubr.msk.f32.vlgmr.msra.gmra.mrb[168].mxu0 %vm716_vm0, %v23615_v50 }
0x3075   : > { %v9979_v8 = vpop.f32.mrb[168].mxu0 }
0x3076   : > { %v9986_v52 = vrot.slane %v9979_v8, %v19872_v18  ;;  %v17051_v61 = vpop.f32.mrb[169].mxu0  ;;  %v23918_v8 = vld [vmem:[#allocation79_spill] sm:$0xff] }
0x3078   : > { %v9987_v62 = vsub.f32 %v9909_v26, %v9986_v52  ;;  %v9988_v47 = vsub.f32 %v9910_v39, %v9986_v52  ;;  %v9989_v53 = vsub.f32 %v9911_v20, %v9986_v52  ;;  %v9990_v32 = vsub.f32 %v9912_v0, %v9986_v52  ;;  %v22511_v26 = vld [vmem:[%s23340_s4 + $0x100] sm:$0xff] }
0x3079   : > { %17071 = vmatprep.mubr.msk.f32.mxu0 %vm716_vm0, %v22511_v26 }
0x307a   : > { %v9991_v24 = vmul.f32 %v9987_v62, %v9987_v62  ;;  %v9992_v34 = vmul.f32 %v9988_v47, %v9988_v47  ;;  %v9993_v10 = vmul.f32 %v9989_v53, %v9989_v53  ;;  %v9994_v49 = vmul.f32 %v9990_v32, %v9990_v32 }
0x307c   : > { %v18249_v35 = vpack.c.bf16 %v9992_v34, %v9991_v24  ;;  %v18252_v30 = vpack.c.bf16 %v9994_v49, %v9993_v10  ;;  %v23919_v34 = vld [vmem:[#allocation89_spill] sm:$0xff] }
0x307d   : > { %v23920_v10 = vld [vmem:[#allocation81_spill] sm:$0xff] }
0x307e   : > { %18250 = vmatpush3.bf16.msra.mxu1 %v18249_v35 }
0x307f   : > { %18251 = vmatprep.subr.bf16.mxu1 %v23600_v55 }
0x3082   : > { %18253 = vmatpush3.bf16.msra.mxu1 %v18252_v30  ;;  %v23921_v30 = vld [vmem:[#allocation83_spill] sm:$0xff] }
0x3085   : > { %17061 = vmatmul.mubr.msk.f32.vlgmr.msra.gmra.mrb[144].mxu1 %vm716_vm0, %v23615_v50 }
0x3158   : > { %v10061_v39 = vpop.f32.mrb[144].mxu1 }
0x3159   : > { %v10062_v11 = vadd.f32 1e-05, %v10061_v39  ;;  %v17062_v60 = vpop.f32.mrb[145].mxu1 }
0x315a   : > { %v22539_v60 = vld [vmem:[%s23340_s4 + $0x108] sm:$0xff] }
0x315b   : > { %18991 = vrsqrt.f32 %v10062_v11  ;;  %23923 = vst [vmem:[#allocation88_spill] sm:$0xff] %v22539_v60 }
0x3165   : > { %v18992_v56 = vpop.eup %18991 }
0x3166   : > { %v10069_v41 = vrot.slane %v18992_v56, %v19872_v18  ;;  %v22544_v56 = vld [vmem:[%s23340_s4 + $0x110] sm:$0xff] }
0x3167   : > { %23924 = vst [vmem:[#allocation63_spill] sm:$0xff] %v22544_v56 }
0x3168   : > { %v10070_v46 = vmul.f32 %v10069_v41, %v9987_v62  ;;  %v10071_v0 = vmul.f32 %v10069_v41, %v9988_v47  ;;  %v10072_v20 = vmul.f32 %v10069_v41, %v9989_v53  ;;  %v10073_v40 = vmul.f32 %v10069_v41, %v9990_v32  ;;  %v23922_v62 = vld [vmem:[#allocation90_spill] sm:$0xff] }
0x3169   : > { %v22554_v41 = vld [vmem:[%s23340_s4 + $0x118] sm:$0xff] }
0x316a   : > { %v10090_v52 = vmul.f32 %v23918_v8, %v10070_v46  ;;  %v10091_v61 = vmul.f32 %v22172_v33, %v10071_v0  ;;  %v10092_v24 = vmul.f32 %v22176_v37, %v10072_v20  ;;  %v10093_v35 = vmul.f32 %v23919_v34, %v10073_v40  ;;  %23925 = vst [vmem:[#allocation61_spill] sm:$0xff] %v22554_v41  ;;  %v22559_v46 = vld [vmem:[%s23340_s4 + $0x120] sm:$0xff]  ;;  %v22568_v0 = vld [vmem:[%s23340_s4 + $0x128] sm:$0xff]  ;;  %v22573_v20 = vld [vmem:[%s23340_s4 + $0x130] sm:$0xff] }
0x316b   : > { %23926 = vst [vmem:[#allocation87_spill] sm:$0xff] %v22559_v46  ;;  %23927 = vst [vmem:[#allocation86_spill] sm:$0xff] %v22568_v0  ;;  %v22582_v40 = vld [vmem:[%s23340_s4 + $0x138] sm:$0xff] }
0x316c   : > { %v22521_v49 = vadd.f32 %v23920_v10, %v10090_v52  ;;  %v22524_v39 = vadd.f32 %v23921_v30, %v10091_v61  ;;  %v22527_v11 = vadd.f32 %v22180_v3, %v10092_v24  ;;  %v22530_v47 = vadd.f32 %v23922_v62, %v10093_v35  ;;  %23928 = vst [vmem:[#allocation67_spill] sm:$0xff] %v22573_v20  ;;  %v22588_v52 = vld [vmem:[#allocation6 + $0x80] sm:$0xff] }
0x316d   : > { %23929 = vst [vmem:[#allocation85_spill] sm:$0xff] %v22582_v40  ;;  %17099 = vmatprep.mubr.msk.f32.mxu1 %vm1966_vm2, %v22588_v52 }
0x316e   : > { %v18254_v53 = vpack.c.bf16 %v22524_v39, %v22521_v49  ;;  %v18258_v32 = vpack.c.bf16 %v22530_v47, %v22527_v11 }
0x3170   : > { %18255 = vmatprep.subr.bf16.mxu0 %v18254_v53 }
0x3171   : > { %18257 = vmatpush3.bf16.msra.mxu0 %v18254_v53 }
0x3172   : > { %18259 = vmatprep.subr.bf16.mxu0 %v18258_v32 }
0x3175   : > { %18261 = vmatpush3.bf16.msra.mxu0 %v18258_v32 }
0x3176   : > { %18278 = vmatprep.subr.bf16.mxu0 %v23600_v55 }
0x3178   : > { %17072 = vmatmul.mubr.msk.f32.vlgmr.msra.gmra.mrb[170].mxu0 %vm716_vm0, %v22539_v60 }
0x3179   : > { %17074 = vmatprep.mubr.msk.f32.mxu0 %vm716_vm0, %v22544_v56 }
0x317c   : > { %17075 = vmatmul.mubr.msk.f32.gmra.mrb[172].mxu0 %vm716_vm0, %v22554_v41 }
0x317d   : > { %17077 = vmatprep.mubr.msk.f32.mxu0 %vm716_vm0, %v22559_v46 }
0x3180   : > { %17078 = vmatmul.mubr.msk.f32.gmra.mrb[174].mxu0 %vm716_vm0, %v22568_v0 }
0x3181   : > { %17080 = vmatprep.mubr.msk.f32.mxu0 %vm716_vm0, %v22573_v20 }
0x3184   : > { %17081 = vmatmul.mubr.msk.f32.gmra.mrb[176].mxu0 %vm716_vm0, %v22582_v40 }
0x3185   : > { %17113 = vmatprep.mubr.msk.f32.mxu0 %vm19245_vm1, %v23606_v4 }
0x324b   : > { %v17073_v61 = vpop.f32.mrb[170].mxu0 }
0x324c   : > { %v10246_v24 = vadd.f32 %v17073_v61, %v22184_v23  ;;  %v10240_v35 = vpop.f32.mrb[171].mxu0  ;;  %v23930_v23 = vld [vmem:[#allocation64_spill] sm:$0xff] }
0x324d   : > { %v10241_v53 = vadd.f32 %v10240_v35, %v22081_v43 }
0x324e   : > { %v10280_v32 = vmax.f32 %v10246_v24, 0.0 }
0x324f   : > { %v10279_v1 = vmax.f32 %v10241_v53, 0.0  ;;  %v17076_v31 = vpop.f32.mrb[172].mxu0 }
0x3250   : > { %v10256_v12 = vadd.f32 %v17076_v31, %v22085_v13  ;;  %v10250_v45 = vpop.f32.mrb[173].mxu0  ;;  %v23931_v31 = vld [vmem:[#allocation99_spill] sm:$0xff] }
0x3251   : > { %v18262_v40 = vpack.c.bf16 %v10280_v32, %v10279_v1  ;;  %v10251_v20 = vadd.f32 %v10250_v45, %v22083_v17 }
0x3252   : > { %v10282_v0 = vmax.f32 %v10256_v12, 0.0  ;;  %v23932_v12 = vld [vmem:[#allocation108_spill] sm:$0xff] }
0x3253   : > { %v10281_v46 = vmax.f32 %v10251_v20, 0.0  ;;  %v17079_v41 = vpop.f32.mrb[174].mxu0  ;;  %18263 = vmatprep.subr.bf16.mxu1 %v18262_v40 }
0x3254   : > { %v10266_v56 = vadd.f32 %v17079_v41, %v22087_v44  ;;  %v10260_v60 = vpop.f32.mrb[175].mxu0  ;;  %18265 = vmatpush3.bf16.msra.mxu1 %v18262_v40  ;;  %v23937_v40 = vld [vmem:[#allocation53_spill] sm:$0xff] }
0x3255   : > { %v18266_v61 = vpack.c.bf16 %v10282_v0, %v10281_v46  ;;  %v10261_v35 = vadd.f32 %v10260_v60, %v23930_v23  ;;  %v22600_v46 = vld [vmem:[#allocation6 + $0x88] sm:$0xff]  ;;  %v22602_v60 = vld [vmem:[#allocation6 + $0x90] sm:$0xff] }
0x3256   : > { %v10284_v24 = vmax.f32 %v10266_v56, 0.0  ;;  %23933 = vst [vmem:[#allocation69_spill] sm:$0xff] %v22600_v46  ;;  %23934 = vst [vmem:[#allocation73_spill] sm:$0xff] %v22602_v60 }
0x3257   : > { %v10283_v53 = vmax.f32 %v10261_v35, 0.0  ;;  %v17082_v43 = vpop.f32.mrb[176].mxu0  ;;  %18267 = vmatprep.subr.bf16.mxu1 %v18266_v61 }
0x3258   : > { %v10276_v13 = vadd.f32 %v17082_v43, %v23931_v31  ;;  %v10270_v1 = vpop.f32.mrb[177].mxu0  ;;  %18269 = vmatpush3.bf16.msra.mxu1 %v18266_v61  ;;  %v22609_v43 = vld [vmem:[#allocation6 + $0x98] sm:$0xff] }
0x3259   : > { %v18270_v45 = vpack.c.bf16 %v10284_v24, %v10283_v53  ;;  %v10271_v20 = vadd.f32 %v10270_v1, %v23932_v12  ;;  %23935 = vst [vmem:[#allocation71_spill] sm:$0xff] %v22609_v43  ;;  %v23938_v1 = vld [vmem:[#allocation39_spill] sm:$0xff] }
0x325a   : > { %v10286_v32 = vmax.f32 %v10276_v13, 0.0  ;;  %v23936_v13 = vld [vmem:[#allocation20_spill] sm:$0xff] }
0x325b   : > { %v10285_v17 = vmax.f32 %v10271_v20, 0.0  ;;  %18271 = vmatprep.subr.bf16.mxu1 %v18270_v45 }
0x325c   : > { %18273 = vmatpush3.bf16.msra.mxu1 %v18270_v45 }
0x325d   : > { %v18274_v41 = vpack.c.bf16 %v10286_v32, %v10285_v17 }
0x325f   : > { %18275 = vmatprep.subr.bf16.mxu1 %v18274_v41 }
0x3260   : > { %18277 = vmatpush3.bf16.msra.mxu1 %v18274_v41  ;;  %v23939_v41 = vld [vmem:[#allocation47_spill] sm:$0xff] }
0x3261   : > { %18284 = vmatprep.subr.bf16.mxu1 %v23600_v55 }
0x3263   : > { %17100 = vmatmul.mubr.msk.f32.vlgmr.msra.gmra.mrb[146].mxu1 %vm1966_vm2, %v22600_v46 }
0x3264   : > { %17102 = vmatprep.mubr.msk.f32.mxu1 %vm1966_vm2, %v22602_v60 }
0x3267   : > { %17103 = vmatmul.mubr.msk.f32.gmra.mrb[148].mxu1 %vm1966_vm2, %v22609_v43 }
0x3268   : > { %17124 = vmatprep.mubr.msk.f32.mxu1 %vm19245_vm1, %v23606_v4 }
0x3336   : > { %v17101_v17 = vpop.f32.mrb[146].mxu1 }
0x3337   : > { %v10387_v56 = vadd.f32 %v17101_v17, %v23936_v13  ;;  %v10381_v0 = vpop.f32.mrb[147].mxu1 }
0x3338   : > { %v10382_v61 = vadd.f32 %v10381_v0, %v23937_v40  ;;  %v23940_v0 = vld [vmem:[#allocation92_spill] sm:$0xff] }
0x3339   : > { %v10401_v35 = vadd.f32 %v10387_v56, %v22524_v39  ;;  %v23942_v39 = vld [vmem:[#allocation101_spill] sm:$0xff] }
0x333a   : > { %v10400_v24 = vadd.f32 %v10382_v61, %v22521_v49  ;;  %v17104_v53 = vpop.f32.mrb[148].mxu1  ;;  %v23941_v49 = vld [vmem:[#allocation54_spill] sm:$0xff] }
0x333b   : > { %v10397_v45 = vadd.f32 %v17104_v53, %v23938_v1  ;;  %v10391_v20 = vpop.f32.mrb[149].mxu1  ;;  %v22638_v56 = vld [vmem:[#allocation8] sm:$0xff] }
0x333c   : > { %v18279_v32 = vpack.c.bf16 %v10401_v35, %v10400_v24  ;;  %v10392_v43 = vadd.f32 %v10391_v20, %v23939_v41 }
0x333d   : > { %v10403_v60 = vadd.f32 %v10397_v45, %v22530_v47  ;;  %v23944_v47 = vld [vmem:[#allocation45_spill] sm:$0xff] }
0x333e   : > { %v10402_v46 = vadd.f32 %v10392_v43, %v22527_v11  ;;  %18280 = vmatpush3.bf16.msra.mxu0 %v18279_v32  ;;  %v23943_v11 = vld [vmem:[#allocation55_spill] sm:$0xff]  ;;  %v23945_v43 = vld [vmem:[#allocation18_spill] sm:$0xff] }
0x333f   : > { %18281 = vmatprep.subr.bf16.mxu0 %v23600_v55 }
0x3340   : > { %v18282_v17 = vpack.c.bf16 %v10403_v60, %v10402_v46 }
0x3342   : > { %18283 = vmatpush3.bf16.msra.mxu0 %v18282_v17 }
0x3343   : > { %18291 = vmatprep.subr.bf16.mxu0 %v23940_v0 }
0x3345   : > { %17114 = vmatmul.mubr.msk.f32.vlgmr.msra.gmra.mrb[178].mxu0 %vm716_vm0, %v23615_v50 }
0x3346   : > { %18293 = vmatpush3.bf16.msra.mxu0 %v23940_v0  ;;  %17135 = vmatprep.mubr.msk.f32.mxu0 %vm716_vm0, %v23941_v49 }
0x3347   : > { %18295 = vmatprep.subr.bf16.mxu0 %v23942_v39 }
0x334a   : > { %18297 = vmatpush3.bf16.msra.mxu0 %v23942_v39 }
0x334d   : > { %17136 = vmatmul.mubr.msk.f32.vlgmr.msra.gmra.mrb[180].mxu0 %vm716_vm0, %v23943_v11 }
0x334e   : > { %17138 = vmatprep.mubr.msk.f32.mxu0 %vm716_vm0, %v23944_v47 }
0x3351   : > { %17139 = vmatmul.mubr.msk.f32.gmra.mrb[182].mxu0 %vm716_vm0, %v23945_v43 }
0x3352   : > { %17163 = vmatprep.mubr.msk.f32.mxu0 %vm716_vm0, %v22638_v56 }
0x3418   : > { %v10470_v61 = vpop.f32.mrb[178].mxu0 }
0x3419   : > { %v10477_v53 = vrot.slane %v10470_v61, %v19872_v18  ;;  %v17115_v45 = vpop.f32.mrb[179].mxu0 }
0x341a   : > { %v23952_v45 = vld [vmem:[#allocation52_spill] sm:$0xff] }
0x341b   : > { %v22643_v20 = vsub.f32 %v10400_v24, %v10477_v53  ;;  %v22645_v32 = vsub.f32 %v10401_v35, %v10477_v53  ;;  %v22647_v17 = vsub.f32 %v10402_v46, %v10477_v53  ;;  %v22649_v0 = vsub.f32 %v10403_v60, %v10477_v53  ;;  %v23950_v35 = vld [vmem:[#allocation96_spill] sm:$0xff] }
0x341c   : > { %v23951_v60 = vld [vmem:[#allocation60_spill] sm:$0xff] }
0x341d   : > { %23946 = vst [vmem:[#allocation75_spill] sm:$0xff] %v22643_v20  ;;  %23947 = vst [vmem:[#allocation77_spill] sm:$0xff] %v22645_v32  ;;  %v10482_v49 = vmul.f32 %v22643_v20, %v22643_v20  ;;  %v10483_v39 = vmul.f32 %v22645_v32, %v22645_v32  ;;  %v10484_v47 = vmul.f32 %v22647_v17, %v22647_v17 }
0x341e   : > { %23948 = vst [vmem:[#allocation79_spill] sm:$0xff] %v22647_v17  ;;  %23949 = vst [vmem:[#allocation89_spill] sm:$0xff] %v22649_v0  ;;  %v10485_v24 = vmul.f32 %v22649_v0, %v22649_v0  ;;  %v23954_v0 = vld [vmem:[#allocation65_spill] sm:$0xff] }
0x341f   : > { %v18285_v11 = vpack.c.bf16 %v10483_v39, %v10482_v49  ;;  %v23953_v39 = vld [vmem:[#allocation56_spill] sm:$0xff] }
0x3420   : > { %v17137_v43 = vpop.f32.mrb[180].mxu0  ;;  %v18288_v49 = vpack.c.bf16 %v10485_v24, %v10484_v47 }
0x3421   : > { %v10677_v61 = vadd.f32 %v17137_v43, %v23950_v35  ;;  %18286 = vmatpush3.bf16.msra.mxu1 %v18285_v11  ;;  %v10671_v46 = vpop.f32.mrb[181].mxu0  ;;  %v23955_v11 = vld [vmem:[#allocation97_spill] sm:$0xff] }
0x3422   : > { %v10672_v53 = vadd.f32 %v10671_v46, %v23951_v60  ;;  %18287 = vmatprep.subr.bf16.mxu1 %v23600_v55 }
0x3423   : > { %v10691_v41 = vmul.f32 %v10677_v61, %v23952_v45  ;;  %v10780_v1 = vmul.f32 %v10677_v61, %v22356_v15 }
0x3424   : > { %v10690_v40 = vmul.f32 %v10672_v53, %v23953_v39  ;;  %v10779_v17 = vmul.f32 %v10672_v53, %v22361_v36  ;;  %v17140_v13 = vpop.f32.mrb[182].mxu0 }
0x3425   : > { %v10687_v32 = vadd.f32 %v17140_v13, %v23954_v0  ;;  %18289 = vmatpush3.bf16.msra.mxu1 %v18288_v49  ;;  %v10681_v43 = vpop.f32.mrb[183].mxu0 }
0x3426   : > { %v10682_v35 = vadd.f32 %v10681_v43, %v23955_v11  ;;  %v18298_v20 = vpack.c.bf16 %v10691_v41, %v10690_v40  ;;  %v18306_v46 = vpack.c.bf16 %v10780_v1, %v10779_v17 }
0x3427   : > { %v10693_v60 = vmul.f32 %v10687_v32, %v22343_v14  ;;  %v10782_v45 = vmul.f32 %v10687_v32, %v22370_v51 }
0x3428   : > { %v10692_v15 = vmul.f32 %v10682_v35, %v22347_v2  ;;  %v10781_v47 = vmul.f32 %v10682_v35, %v22378_v27  ;;  %17125 = vmatmul.mubr.msk.f32.vlgmr.msra.gmra.mrb[150].mxu1 %vm716_vm0, %v23615_v50  ;;  %18299 = vmatprep.subr.bf16.mxu1 %v18298_v20 }
0x3429   : > { %18307 = vmatprep.subr.bf16.mxu0 %v18306_v46  ;;  %18301 = vmatpush3.bf16.msra.mxu1 %v18298_v20 }
0x342a   : > { %18309 = vmatpush3.bf16.msra.mxu0 %v18306_v46  ;;  %v18302_v36 = vpack.c.bf16 %v10693_v60, %v10692_v15  ;;  %v18310_v13 = vpack.c.bf16 %v10782_v45, %v10781_v47  ;;  %17149 = vmatprep.mubr.msk.f32.mxu1 %vm716_vm0, %v22638_v56 }
0x342c   : > { %18303 = vmatprep.subr.bf16.mxu1 %v18302_v36  ;;  %18311 = vmatprep.subr.bf16.mxu0 %v18310_v13 }
0x342d   : > { %18305 = vmatpush3.bf16.msra.mxu1 %v18302_v36 }
0x342e   : > { %18313 = vmatpush3.bf16.msra.mxu0 %v18310_v13 }
0x342f   : > { %18322 = vmatprep.subr.bf16.mxu0 %v23600_v55 }
0x3430   : > { %17150 = vmatmul.mubr.msk.f32.vlgmr.msra.gmra.mrb[152].mxu1 %vm716_vm0, %v22388_v5 }
0x3431   : > { %17164 = vmatmul.mubr.msk.f32.vlgmr.msra.gmra.mrb[184].mxu0 %vm716_vm0, %v22388_v5  ;;  %17152 = vmatprep.mubr.msk.f32.mxu1 %vm716_vm0, %v22392_v58 }
0x3432   : > { %17166 = vmatprep.mubr.msk.f32.mxu0 %vm716_vm0, %v22392_v58 }
0x3434   : > { %17153 = vmatmul.mubr.msk.f32.gmra.mrb[154].mxu1 %vm716_vm0, %v22396_v48 }
0x3435   : > { %17167 = vmatmul.mubr.msk.f32.gmra.mrb[186].mxu0 %vm716_vm0, %v22396_v48  ;;  %17177 = vmatprep.mubr.msk.f32.mxu1 %vm716_vm0, %v22426_v19 }
0x3436   : > { %17191 = vmatprep.mubr.msk.f32.mxu0 %vm19245_vm1, %v23606_v4 }
0x34fb   : > { %v22693_v2 = vpop.f32.mrb[150].mxu1 }
0x34fc   : > { %v17126_v14 = vpop.f32.mrb[151].mxu1 }
0x3503   : > { %v17151_v51 = vpop.f32.mrb[152].mxu1 }
0x3504   : > { %v17165_v27 = vpop.f32.mrb[184].mxu0  ;;  %v10760_v5 = vpop.f32.mrb[153].mxu1 }
0x3505   : > { %v10869_v40 = vmax.f32 %v17151_v51, %v17165_v27  ;;  %v10849_v58 = vpop.f32.mrb[185].mxu0 }
0x3506   : > { %v10868_v1 = vmax.f32 %v10760_v5, %v10849_v58 }
0x3507   : > { %v10873_v41 = vsub.f32 %v17151_v51, %v10869_v40  ;;  %v10885_v20 = vsub.f32 %v17165_v27, %v10869_v40  ;;  %v17154_v32 = vpop.f32.mrb[154].mxu1 }
0x3508   : > { %v10872_v17 = vsub.f32 %v10760_v5, %v10868_v1  ;;  %v10884_v48 = vsub.f32 %v10849_v58, %v10868_v1  ;;  %v17168_v0 = vpop.f32.mrb[186].mxu0  ;;  %v10770_v24 = vpop.f32.mrb[155].mxu1 }
0x3509   : > { %v10878_v19 = vmul.f32 1.442695, %v10873_v41  ;;  %v10890_v61 = vmul.f32 1.442695, %v10885_v20  ;;  %v10871_v53 = vmax.f32 %v17154_v32, %v17168_v0  ;;  %v10859_v49 = vpop.f32.mrb[187].mxu0 }
0x350a   : > { %v10876_v39 = vmul.f32 1.442695, %v10872_v17  ;;  %v10870_v43 = vmax.f32 %v10770_v24, %v10859_v49  ;;  %v10888_v11 = vmul.f32 1.442695, %v10884_v48 }
0x350b   : > { %18993 = vpow2.f32 %v10878_v19  ;;  %v10875_v35 = vsub.f32 %v17154_v32, %v10871_v53  ;;  %v10887_v46 = vsub.f32 %v17168_v0, %v10871_v53 }
0x350c   : > { %v10874_v60 = vsub.f32 %v10770_v24, %v10870_v43  ;;  %18995 = vpow2.f32 %v10890_v61  ;;  %v10886_v45 = vsub.f32 %v10859_v49, %v10870_v43 }
0x350d   : > { %18997 = vpow2.f32 %v10876_v39  ;;  %v10882_v15 = vmul.f32 1.442695, %v10875_v35  ;;  %v10894_v47 = vmul.f32 1.442695, %v10887_v46 }
0x350e   : > { %v10880_v36 = vmul.f32 1.442695, %v10874_v60  ;;  %18999 = vpow2.f32 %v10888_v11  ;;  %v10892_v13 = vmul.f32 1.442695, %v10886_v45 }
0x350f   : > { %19001 = vpow2.f32 %v10882_v15 }
0x3510   : > { %19003 = vpow2.f32 %v10894_v47 }
0x3511   : > { %19005 = vpow2.f32 %v10880_v36 }
0x3512   : > { %19007 = vpow2.f32 %v10892_v13 }
0x3515   : > { %v18994_v14 = vpop.eup %18993 }
0x3516   : > { %v18996_v51 = vpop.eup %18995 }
0x3517   : > { %v18998_v27 = vpop.eup %18997  ;;  %v10897_v5 = vadd.f32 %v18996_v51, %v18994_v14 }
0x3518   : > { %v19000_v40 = vpop.eup %18999 }
0x3519   : > { %v19002_v58 = vpop.eup %19001  ;;  %19009 = vrcp.f32 %v10897_v5  ;;  %v10896_v1 = vadd.f32 %v19000_v40, %v18998_v27 }
0x351a   : > { %v19004_v41 = vpop.eup %19003 }
0x351b   : > { %v19006_v20 = vpop.eup %19005  ;;  %19011 = vrcp.f32 %v10896_v1  ;;  %v10899_v32 = vadd.f32 %v19004_v41, %v19002_v58 }
0x351c   : > { %v19008_v17 = vpop.eup %19007 }
0x351d   : > { %19013 = vrcp.f32 %v10899_v32  ;;  %v10898_v48 = vadd.f32 %v19008_v17, %v19006_v20 }
0x351f   : > { %19015 = vrcp.f32 %v10898_v48 }
0x3523   : > { %v19010_v0 = vpop.eup %19009 }
0x3524   : > { %v10905_v24 = vmul.f32 %v19010_v0, %v18994_v14  ;;  %v10913_v19 = vmul.f32 %v19010_v0, %v18996_v51 }
0x3525   : > { %v19012_v61 = vpop.eup %19011 }
0x3526   : > { %v10904_v53 = vmul.f32 %v19012_v61, %v18998_v27  ;;  %v10909_v49 = vmul.f32 %v10905_v24, %v22432_v6  ;;  %v10912_v39 = vmul.f32 %v19012_v61, %v19000_v40  ;;  %v10917_v43 = vmul.f32 %v10913_v19, %v22435_v38 }
0x3527   : > { %v19014_v11 = vpop.eup %19013 }
0x3528   : > { %v10908_v35 = vmul.f32 %v10904_v53, %v22439_v59  ;;  %v10916_v46 = vmul.f32 %v10912_v39, %v22443_v57  ;;  %v10921_v60 = vadd.f32 %v10917_v43, %v10909_v49  ;;  %v10907_v45 = vmul.f32 %v19014_v11, %v19002_v58 }
0x3529   : > { %v19016_v15 = vpop.eup %19015  ;;  %v10915_v47 = vmul.f32 %v19014_v11, %v19004_v41 }
0x352a   : > { %v10920_v36 = vadd.f32 %v10916_v46, %v10908_v35  ;;  %v10906_v13 = vmul.f32 %v19016_v15, %v19006_v20  ;;  %v10911_v14 = vmul.f32 %v10907_v45, %v22449_v29  ;;  %v10914_v51 = vmul.f32 %v19016_v15, %v19008_v17  ;;  %v19074_v29 = vld [vmem:[%s19539_s30 + $0x50] sm:$0xff]  }
0x352b   : > { %v10919_v27 = vmul.f32 %v10915_v47, %v22459_v54 }
0x352c   : > { %v18314_v6 = vpack.c.bf16 %v10921_v60, %v10920_v36  ;;  %v10910_v38 = vmul.f32 %v10906_v13, %v22455_v28  ;;  %v10918_v5 = vmul.f32 %v10914_v51, %v22463_v7  ;;  %v14903_v28 = vunpack.c.h.bf16 %v19074_v29 }
0x352d   : > { %v10923_v59 = vadd.f32 %v10919_v27, %v10911_v14  ;;  %v14902_v7 = vunpack.c.l.bf16 %v19074_v29 }
0x352e   : > { %18315 = vmatprep.subr.bf16.mxu1 %v18314_v6  ;;  %v10922_v57 = vadd.f32 %v10918_v5, %v10910_v38 }
0x352f   : > { %18317 = vmatpush3.bf16.msra.mxu1 %v18314_v6 }
0x3530   : > { %v18318_v40 = vpack.c.bf16 %v10923_v59, %v10922_v57 }
0x3532   : > { %18319 = vmatprep.subr.bf16.mxu1 %v18318_v40 }
0x3533   : > { %18321 = vmatpush3.bf16.msra.mxu1 %v18318_v40 }
0x3534   : > { %18328 = vmatprep.subr.bf16.mxu1 %v23600_v55 }
0x3536   : > { %17178 = vmatmul.mubr.msk.f32.vlgmr.msra.gmra.mrb[156].mxu1 %vm716_vm0, %v22472_v42  ;;  %v19075_v42 = vld [vmem:[%s19539_s30 + $0x58] sm:$0xff]   ;;  %s24040_s30 = smov %s24039_s25 }
0x3537   : > { %17180 = vmatprep.mubr.msk.f32.mxu1 %vm716_vm0, %v22477_v25  ;;  %v14907_v32 = vunpack.c.h.bf16 %v19075_v42  ;;  %v14906_v48 = vunpack.c.l.bf16 %v19075_v42 }
0x353a   : > { %17181 = vmatmul.mubr.msk.f32.gmra.mrb[158].mxu1 %vm716_vm0, %v22487_v22 }
0x353b   : > { %17202 = vmatprep.mubr.msk.f32.mxu1 %vm19245_vm1, %v23606_v4 }
0x3609   : > { %v17179_v54 = vpop.f32.mrb[156].mxu1 }
0x360a   : > { %v10996_v58 = vadd.f32 %v17179_v54, %v23916_v21  ;;  %v10990_v1 = vpop.f32.mrb[157].mxu1 }
0x360b   : > { %v10991_v41 = vadd.f32 %v10990_v1, %v22164_v16 }
0x360c   : > { %v11010_v20 = vadd.f32 %v14903_v28, %v10996_v58  ;;  %v23962_v58 = vld [vmem:[#allocation85_spill] sm:$0xff] }
0x360d   : > { %v11009_v17 = vadd.f32 %v14902_v7, %v10991_v41  ;;  %v17182_v25 = vpop.f32.mrb[158].mxu1  ;;  %v23963_v41 = vld [vmem:[#allocation62_spill] sm:$0xff] }
0x360e   : > { %v11006_v22 = vadd.f32 %v17182_v25, %v22168_v63  ;;  %v11000_v0 = vpop.f32.mrb[159].mxu1 }
0x360f   : > { %v18323_v24 = vpack.c.bf16 %v11010_v20, %v11009_v17  ;;  %v11001_v19 = vadd.f32 %v11000_v0, %v23917_v9  ;;  %v23965_v0 = vld [vmem:[#allocation95_spill] sm:$0xff] }
0x3610   : > { %v11012_v61 = vadd.f32 %v14907_v32, %v11006_v22  ;;  %v23964_v32 = vld [vmem:[#allocation94_spill] sm:$0xff] }
0x3611   : > { %v11011_v53 = vadd.f32 %v14906_v48, %v11001_v19  ;;  %18324 = vmatpush3.bf16.msra.mxu0 %v18323_v24 }
0x3612   : > { %18325 = vmatprep.subr.bf16.mxu0 %v23600_v55 }
0x3613   : > { %v18326_v21 = vpack.c.bf16 %v11012_v61, %v11011_v53 }
0x3615   : > { %18327 = vmatpush3.bf16.msra.mxu0 %v18326_v21 }
0x3618   : > { %17192 = vmatmul.mubr.msk.f32.vlgmr.msra.gmra.mrb[188].mxu0 %vm716_vm0, %v23615_v50 }
0x3619   : > { %17213 = vmatprep.mubr.msk.f32.mxu0 %vm716_vm0, %v22511_v26 }
0x36eb   : > { %v11079_v16 = vpop.f32.mrb[188].mxu0 }
0x36ec   : > { %v11086_v63 = vrot.slane %v11079_v16, %v19872_v18  ;;  %v17193_v49 = vpop.f32.mrb[189].mxu0 }
0x36ee   : > { %v11087_v39 = vsub.f32 %v11009_v17, %v11086_v63  ;;  %v11088_v43 = vsub.f32 %v11010_v20, %v11086_v63  ;;  %v11089_v9 = vsub.f32 %v11011_v53, %v11086_v63  ;;  %v11090_v11 = vsub.f32 %v11012_v61, %v11086_v63  ;;  %v23966_v53 = vld [vmem:[#allocation98_spill] sm:$0xff] }
0x36f0   : > { %v11091_v35 = vmul.f32 %v11087_v39, %v11087_v39  ;;  %v11092_v46 = vmul.f32 %v11088_v43, %v11088_v43  ;;  %v11093_v45 = vmul.f32 %v11089_v9, %v11089_v9  ;;  %v11094_v15 = vmul.f32 %v11090_v11, %v11090_v11 }
0x36f2   : > { %v18329_v60 = vpack.c.bf16 %v11092_v46, %v11091_v35  ;;  %v18332_v47 = vpack.c.bf16 %v11094_v15, %v11093_v45 }
0x36f4   : > { %18330 = vmatpush3.bf16.msra.mxu1 %v18329_v60 }
0x36f5   : > { %18331 = vmatprep.subr.bf16.mxu1 %v23600_v55 }
0x36f8   : > { %18333 = vmatpush3.bf16.msra.mxu1 %v18332_v47 }
0x36fb   : > { %17203 = vmatmul.mubr.msk.f32.vlgmr.msra.gmra.mrb[160].mxu1 %vm716_vm0, %v23615_v50 }
0x36fc   : > { %17241 = vmatprep.mubr.msk.f32.mxu1 %vm1966_vm2, %v22588_v52 }
0x37ce   : > { %v11161_v26 = vpop.f32.mrb[160].mxu1 }
0x37cf   : > { %v11162_v36 = vadd.f32 1e-05, %v11161_v26  ;;  %v17204_v13 = vpop.f32.mrb[161].mxu1 }
0x37d1   : > { %19017 = vrsqrt.f32 %v11162_v36 }
0x37db   : > { %v19018_v14 = vpop.eup %19017 }
0x37dc   : > { %v11169_v51 = vrot.slane %v19018_v14, %v19872_v18  ;;  %v23968_v14 = vld [vmem:[#allocation73_spill] sm:$0xff] }
0x37de   : > { %v11170_v27 = vmul.f32 %v11169_v51, %v11087_v39  ;;  %v11171_v6 = vmul.f32 %v11169_v51, %v11088_v43  ;;  %v11172_v38 = vmul.f32 %v11169_v51, %v11089_v9  ;;  %v11173_v5 = vmul.f32 %v11169_v51, %v11090_v11 }
0x37e0   : > { %v11174_v59 = vmul.f32 %v11170_v27, %v23918_v8  ;;  %v11175_v57 = vmul.f32 %v11171_v6, %v22172_v33  ;;  %v11176_v40 = vmul.f32 %v11172_v38, %v22176_v37  ;;  %v11177_v29 = vmul.f32 %v11173_v5, %v23919_v34  ;;  %v23956_v37 = vld [vmem:[#allocation88_spill] sm:$0xff]  ;;  %v23958_v34 = vld [vmem:[#allocation61_spill] sm:$0xff]  ;;  %v23970_v6 = vld [vmem:[#allocation75_spill] sm:$0xff] }
0x37e1   : > { %v23971_v5 = vld [vmem:[#allocation77_spill] sm:$0xff] }
0x37e2   : > { %v22735_v52 = vadd.f32 %v11174_v59, %v23920_v10  ;;  %v22738_v28 = vadd.f32 %v11175_v57, %v23921_v30  ;;  %v22741_v54 = vadd.f32 %v11176_v40, %v22180_v3  ;;  %v22744_v7 = vadd.f32 %v11177_v29, %v23922_v62  ;;  %v23957_v3 = vld [vmem:[#allocation63_spill] sm:$0xff]  ;;  %v23960_v30 = vld [vmem:[#allocation86_spill] sm:$0xff]  ;;  %v23972_v40 = vld [vmem:[#allocation20_spill] sm:$0xff] }
0x37e3   : > { %v23959_v10 = vld [vmem:[#allocation87_spill] sm:$0xff] }
0x37e4   : > { %v18334_v8 = vpack.c.bf16 %v22738_v28, %v22735_v52  ;;  %v18338_v33 = vpack.c.bf16 %v22744_v7, %v22741_v54  ;;  %v23961_v62 = vld [vmem:[#allocation67_spill] sm:$0xff] }
0x37e6   : > { %18335 = vmatprep.subr.bf16.mxu0 %v18334_v8 }
0x37e7   : > { %18337 = vmatpush3.bf16.msra.mxu0 %v18334_v8 }
0x37e8   : > { %18339 = vmatprep.subr.bf16.mxu0 %v18338_v33 }
0x37eb   : > { %18341 = vmatpush3.bf16.msra.mxu0 %v18338_v33  ;;  %v23973_v33 = vld [vmem:[#allocation53_spill] sm:$0xff] }
0x37ec   : > { %18358 = vmatprep.subr.bf16.mxu0 %v23600_v55 }
0x37ee   : > { %17214 = vmatmul.mubr.msk.f32.vlgmr.msra.gmra.mrb[190].mxu0 %vm716_vm0, %v23956_v37 }
0x37ef   : > { %17216 = vmatprep.mubr.msk.f32.mxu0 %vm716_vm0, %v23957_v3  ;;  %v23974_v3 = vld [vmem:[#allocation100_spill] sm:$0xff] }
0x37f2   : > { %17217 = vmatmul.mubr.msk.f32.gmra.mrb[192].mxu0 %vm716_vm0, %v23958_v34 }
0x37f3   : > { %17219 = vmatprep.mubr.msk.f32.mxu0 %vm716_vm0, %v23959_v10  ;;  %v23975_v10 = vld [vmem:[#allocation79_spill] sm:$0xff] }
0x37f6   : > { %17220 = vmatmul.mubr.msk.f32.gmra.mrb[194].mxu0 %vm716_vm0, %v23960_v30 }
0x37f7   : > { %17222 = vmatprep.mubr.msk.f32.mxu0 %vm716_vm0, %v23961_v62  ;;  %v23976_v62 = vld [vmem:[#allocation89_spill] sm:$0xff] }
0x37fa   : > { %17223 = vmatmul.mubr.msk.f32.gmra.mrb[196].mxu0 %vm716_vm0, %v23962_v58 }
0x37fb   : > { %17255 = vmatprep.mubr.msk.f32.mxu0 %vm19245_vm1, %v23606_v4 }
0x38c1   : > { %v17215_v1 = vpop.f32.mrb[190].mxu0 }
0x38c2   : > { %v11254_v20 = vadd.f32 %v17215_v1, %v23963_v41  ;;  %v11248_v42 = vpop.f32.mrb[191].mxu0  ;;  %v23977_v1 = vld [vmem:[#allocation26_spill] sm:$0xff] }
0x38c3   : > { %v11249_v17 = vadd.f32 %v11248_v42, %v23964_v32  ;;  %v23978_v32 = vld [vmem:[#allocation39_spill] sm:$0xff] }
0x38c4   : > { %v11288_v25 = vmax.f32 %v11254_v20, 0.0 }
0x38c5   : > { %v11287_v48 = vmax.f32 %v11249_v17, 0.0  ;;  %v17218_v22 = vpop.f32.mrb[192].mxu0 }
0x38c6   : > { %v11264_v24 = vadd.f32 %v17218_v22, %v23965_v0  ;;  %v11258_v19 = vpop.f32.mrb[193].mxu0  ;;  %v23979_v22 = vld [vmem:[#allocation47_spill] sm:$0xff] }
0x38c7   : > { %v18342_v61 = vpack.c.bf16 %v11288_v25, %v11287_v48  ;;  %v11259_v21 = vadd.f32 %v11258_v19, %v23966_v53  ;;  %v23981_v53 = vld [vmem:[#allocation103_spill] sm:$0xff] }
0x38c8   : > { %v11290_v16 = vmax.f32 %v11264_v24, 0.0  ;;  %v23980_v24 = vld [vmem:[#allocation102_spill] sm:$0xff] }
0x38c9   : > { %v11289_v63 = vmax.f32 %v11259_v21, 0.0  ;;  %v17221_v49 = vpop.f32.mrb[194].mxu0  ;;  %18343 = vmatprep.subr.bf16.mxu1 %v18342_v61 }
0x38ca   : > { %v11274_v39 = vadd.f32 %v17221_v49, %v22087_v44  ;;  %v11268_v43 = vpop.f32.mrb[195].mxu0  ;;  %18345 = vmatpush3.bf16.msra.mxu1 %v18342_v61 }
0x38cb   : > { %v18346_v9 = vpack.c.bf16 %v11290_v16, %v11289_v63  ;;  %v11269_v11 = vadd.f32 %v11268_v43, %v23930_v23  ;;  %v23967_v23 = vld [vmem:[#allocation69_spill] sm:$0xff]  ;;  %v23983_v63 = vld [vmem:[#allocation104_spill] sm:$0xff] }
0x38cc   : > { %v11292_v35 = vmax.f32 %v11274_v39, 0.0 }
0x38cd   : > { %v11291_v46 = vmax.f32 %v11269_v11, 0.0  ;;  %v17224_v60 = vpop.f32.mrb[196].mxu0  ;;  %18347 = vmatprep.subr.bf16.mxu1 %v18346_v9 }
0x38ce   : > { %v11284_v45 = vadd.f32 %v17224_v60, %v23931_v31  ;;  %v11278_v15 = vpop.f32.mrb[197].mxu0  ;;  %18349 = vmatpush3.bf16.msra.mxu1 %v18346_v9  ;;  %v23969_v31 = vld [vmem:[#allocation71_spill] sm:$0xff]  ;;  %v23984_v9 = vld [vmem:[#allocation68_spill] sm:$0xff] }
0x38cf   : > { %v18350_v47 = vpack.c.bf16 %v11292_v35, %v11291_v46  ;;  %v11279_v26 = vadd.f32 %v11278_v15, %v23932_v12  ;;  %v10553_v12 = vadd.f32 1e-05, %v22693_v2  ;;  %v14732_v46 = vld [vmem:[%s23338_s2 + $0x1e0] sm:$0xff]  ;;  %v14733_v60 = vld [vmem:[%s23338_s2 + $0x1e8] sm:$0xff] }
0x38d0   : > { %v11294_v36 = vmax.f32 %v11284_v45, 0.0 }
0x38d1   : > { %v11293_v13 = vmax.f32 %v11279_v26, 0.0  ;;  %18351 = vmatprep.subr.bf16.mxu1 %v18350_v47  ;;  %19019 = vrsqrt.f32 %v10553_v12 }
0x38d2   : > { %18353 = vmatpush3.bf16.msra.mxu1 %v18350_v47 }
0x38d3   : > { %v18354_v44 = vpack.c.bf16 %v11294_v36, %v11293_v13 }
0x38d5   : > { %18355 = vmatprep.subr.bf16.mxu1 %v18354_v44 }
0x38d6   : > { %18357 = vmatpush3.bf16.msra.mxu1 %v18354_v44 }
0x38d7   : > { %18364 = vmatprep.subr.bf16.mxu1 %v23600_v55 }
0x38d9   : > { %17242 = vmatmul.mubr.msk.f32.vlgmr.msra.gmra.mrb[162].mxu1 %vm1966_vm2, %v23967_v23 }
0x38da   : > { %17244 = vmatprep.mubr.msk.f32.mxu1 %vm1966_vm2, %v23968_v14 }
0x38db   : > { %v19020_v51 = vpop.eup %19019 }
0x38dc   : > { %v10560_v27 = vrot.slane %v19020_v51, %v19872_v18 }
0x38dd   : > { %17245 = vmatmul.mubr.msk.f32.gmra.mrb[164].mxu1 %vm1966_vm2, %v23969_v31 }
0x38de   : > { %17266 = vmatprep.mubr.msk.f32.mxu1 %vm19245_vm1, %v23606_v4  ;;  %v10561_v38 = vmul.f32 %v10560_v27, %v23970_v6  ;;  %v10562_v59 = vmul.f32 %v10560_v27, %v23971_v5  ;;  %v10563_v30 = vmul.f32 %v10560_v27, %v23975_v10  ;;  %v10564_v2 = vmul.f32 %v10560_v27, %v23976_v62  ;;  %v14736_v6 = vld [vmem:[%s23338_s2 + $0x200] sm:$0xff]  ;;  %v14734_v5 = vld [vmem:[%s23338_s2 + $0x1f0] sm:$0xff] }
0x38e0   : > { %v10581_v34 = vmul.f32 %v23974_v3, %v10561_v38  ;;  %v10582_v41 = vmul.f32 %v23977_v1, %v10562_v59  ;;  %v10584_v49 = vmul.f32 %v23983_v63, %v10564_v2  ;;  %v14737_v38 = vld [vmem:[%s23338_s2 + $0x208] sm:$0xff]  ;;  %v14735_v59 = vld [vmem:[%s23338_s2 + $0x1f8] sm:$0xff] }
0x38e2   : > { %v22799_v19 = vadd.f32 %v23980_v24, %v10581_v34  ;;  %v22803_v21 = vadd.f32 %v23981_v53, %v10582_v41 }
0x38e4   : > { %v18370_v43 = vpack.c.bf16 %v22803_v21, %v22799_v19 }
0x39ac   : > { %v17243_v57 = vpop.f32.mrb[162].mxu1 }
0x39ad   : > { %v11367_v29 = vadd.f32 %v17243_v57, %v23972_v40  ;;  %v11361_v8 = vpop.f32.mrb[163].mxu1  ;;  %v22850_v57 = vld [vmem:[%s23338_s2 + $0x220] sm:$0xff]  ;;  %v14738_v40 = vld [vmem:[%s23338_s2 + $0x210] sm:$0xff] }
0x39ae   : > { %v11362_v37 = vadd.f32 %v11361_v8, %v23973_v33  ;;  %v14739_v8 = vld [vmem:[%s23338_s2 + $0x218] sm:$0xff] }
0x39af   : > { %v11381_v58 = vadd.f32 %v11367_v29, %v22738_v28  ;;  %v23982_v28 = vld [vmem:[#allocation50_spill] sm:$0xff]  ;;  %v22862_v29 = vld [vmem:[%s23338_s2 + $0x228] sm:$0xff] }
0x39b0   : > { %v11380_v20 = vadd.f32 %v11362_v37, %v22735_v52  ;;  %v17246_v42 = vpop.f32.mrb[164].mxu1  ;;  %v10583_v16 = vmul.f32 %v23982_v28, %v10563_v30 }
0x39b1   : > { %v11377_v17 = vadd.f32 %v17246_v42, %v23978_v32  ;;  %v11371_v25 = vpop.f32.mrb[165].mxu1 }
0x39b2   : > { %v18359_v48 = vpack.c.bf16 %v11381_v58, %v11380_v20  ;;  %v11372_v0 = vadd.f32 %v11371_v25, %v23979_v22  ;;  %v22812_v11 = vadd.f32 %v23984_v9, %v10583_v16 }
0x39b3   : > { %v11383_v61 = vadd.f32 %v11377_v17, %v22744_v7  ;;  %v23985_v7 = vld [vmem:[#allocation105_spill] sm:$0xff] }
0x39b4   : > { %v11382_v52 = vadd.f32 %v11372_v0, %v22741_v54  ;;  %18360 = vmatpush3.bf16.msra.mxu0 %v18359_v48  ;;  %v22815_v35 = vadd.f32 %v23985_v7, %v10584_v49 }
0x39b5   : > { %18361 = vmatprep.subr.bf16.mxu0 %v23600_v55 }
0x39b6   : > { %v18362_v39 = vpack.c.bf16 %v11383_v61, %v11382_v52  ;;  %v18374_v54 = vpack.c.bf16 %v22815_v35, %v22812_v11 }
0x39b8   : > { %18363 = vmatpush3.bf16.msra.mxu0 %v18362_v39  ;;  %v23988_v39 = vld [vmem:[#allocation21_spill] sm:$0xff] }
0x39b9   : > { %18371 = vmatprep.subr.bf16.mxu0 %v18370_v43 }
0x39bb   : > { %17256 = vmatmul.mubr.msk.f32.vlgmr.msra.gmra.mrb[198].mxu0 %vm716_vm0, %v23615_v50 }
0x39bc   : > { %18373 = vmatpush3.bf16.msra.mxu0 %v18370_v43  ;;  %17277 = vmatprep.mubr.msk.f32.mxu0 %vm716_vm0, %v14732_v46  ;;  %v23989_v46 = vld [vmem:[#allocation19_spill] sm:$0xff] }
0x39bd   : > { %18375 = vmatprep.subr.bf16.mxu0 %v18374_v54 }
0x39c0   : > { %18377 = vmatpush3.bf16.msra.mxu0 %v18374_v54 }
0x39c1   : > { %18387 = vmatprep.subr.bf16.mxu0 %v18370_v43 }
0x39c3   : > { %17278 = vmatmul.mubr.msk.f32.vlgmr.msra.gmra.mrb[200].mxu0 %vm716_vm0, %v14733_v60 }
0x39c4   : > { %18389 = vmatpush3.bf16.msra.mxu0 %v18370_v43  ;;  %17280 = vmatprep.mubr.msk.f32.mxu0 %vm716_vm0, %v14734_v5  ;;  %v14742_v5 = vld [vmem:[%s23338_s2 + $0x230] sm:$0xff] }
0x39c5   : > { %18391 = vmatprep.subr.bf16.mxu0 %v18374_v54 }
0x39c7   : > { %17281 = vmatmul.mubr.msk.f32.gmra.mrb[202].mxu0 %vm716_vm0, %v14735_v59  ;;  %v14743_v59 = vld [vmem:[%s23338_s2 + $0x238] sm:$0xff] }
0x39c8   : > { %18393 = vmatpush3.bf16.msra.mxu0 %v18374_v54  ;;  %17305 = vmatprep.mubr.msk.f32.mxu0 %vm716_vm0, %v22850_v57 }
0x39cb   : > { %17306 = vmatmul.mubr.msk.f32.vlgmr.msra.gmra.mrb[204].mxu0 %vm716_vm0, %v22862_v29 }
0x39cc   : > { %17308 = vmatprep.mubr.msk.f32.mxu0 %vm716_vm0, %v14742_v5 }
0x39cf   : > { %17309 = vmatmul.mubr.msk.f32.gmra.mrb[206].mxu0 %vm716_vm0, %v14743_v59 }
0x39d0   : > { %17333 = vmatprep.mubr.msk.f32.mxu0 %vm716_vm0, %v22850_v57 }
0x3a8e   : > { %v11450_v45 = vpop.f32.mrb[198].mxu0 }
0x3a8f   : > { %v11457_v15 = vrot.slane %v11450_v45, %v19872_v18  ;;  %v17257_v47 = vpop.f32.mrb[199].mxu0 }
0x3a90   : > { %v23990_v47 = vld [vmem:[#allocation22_spill] sm:$0xff] }
0x3a91   : > { %v11458_v26 = vsub.f32 %v11380_v20, %v11457_v15  ;;  %v11459_v36 = vsub.f32 %v11381_v58, %v11457_v15  ;;  %v11460_v13 = vsub.f32 %v11382_v52, %v11457_v15  ;;  %v11461_v44 = vsub.f32 %v11383_v61, %v11457_v15 }
0x3a93   : > { %v11462_v23 = vmul.f32 %v11458_v26, %v11458_v26  ;;  %v11463_v14 = vmul.f32 %v11459_v36, %v11459_v36  ;;  %v11464_v12 = vmul.f32 %v11460_v13, %v11460_v13  ;;  %v11465_v51 = vmul.f32 %v11461_v44, %v11461_v44 }
0x3a95   : > { %v18365_v31 = vpack.c.bf16 %v11463_v14, %v11462_v23  ;;  %v18368_v27 = vpack.c.bf16 %v11465_v51, %v11464_v12  ;;  %v23992_v23 = vld [vmem:[#allocation23_spill] sm:$0xff]  ;;  %v23993_v12 = vld [vmem:[#allocation74_spill] sm:$0xff] }
0x3a96   : > { %v17279_v33 = vpop.f32.mrb[200].mxu0 }
0x3a97   : > { %18366 = vmatpush3.bf16.msra.mxu1 %v18365_v31  ;;  %v11694_v37 = vpop.f32.mrb[201].mxu0 }
0x3a98   : > { %18367 = vmatprep.subr.bf16.mxu1 %v23600_v55 }
0x3a9b   : > { %18369 = vmatpush3.bf16.msra.mxu1 %v18368_v27 }
0x3a9c   : > { %18379 = vmatprep.subr.bf16.mxu1 %v18370_v43 }
0x3a9e   : > { %17267 = vmatmul.mubr.msk.f32.vlgmr.msra.gmra.mrb[166].mxu1 %vm716_vm0, %v23615_v50 }
0x3a9f   : > { %18381 = vmatpush3.bf16.msra.mxu1 %v18370_v43  ;;  %17291 = vmatprep.mubr.msk.f32.mxu1 %vm716_vm0, %v14736_v6 }
0x3aa0   : > { %18383 = vmatprep.subr.bf16.mxu1 %v18374_v54 }
0x3aa3   : > { %18385 = vmatpush3.bf16.msra.mxu1 %v18374_v54 }
0x3aa6   : > { %17292 = vmatmul.mubr.msk.f32.vlgmr.msra.gmra.mrb[168].mxu1 %vm716_vm0, %v14737_v38 }
0x3aa7   : > { %17294 = vmatprep.mubr.msk.f32.mxu1 %vm716_vm0, %v14738_v40 }
0x3aaa   : > { %17295 = vmatmul.mubr.msk.f32.gmra.mrb[170].mxu1 %vm716_vm0, %v14739_v8 }
0x3aab   : > { %17319 = vmatprep.mubr.msk.f32.mxu1 %vm716_vm0, %v14736_v6 }
0x3b71   : > { %v11532_v34 = vpop.f32.mrb[166].mxu1 }
0x3b72   : > { %v11533_v10 = vadd.f32 1e-05, %v11532_v34  ;;  %v17268_v30 = vpop.f32.mrb[167].mxu1 }
0x3b74   : > { %19021 = vrsqrt.f32 %v11533_v10 }
0x3b7e   : > { %v19022_v62 = vpop.eup %19021 }
0x3b7f   : > { %v11540_v2 = vrot.slane %v19022_v62, %v19872_v18 }
0x3b81   : > { %v11541_v58 = vmul.f32 %v11540_v2, %v11458_v26  ;;  %v11542_v41 = vmul.f32 %v11540_v2, %v11459_v36  ;;  %v11543_v20 = vmul.f32 %v11540_v2, %v11460_v13  ;;  %v11544_v42 = vmul.f32 %v11540_v2, %v11461_v44  ;;  %v23991_v13 = vld [vmem:[#allocation72_spill] sm:$0xff] }
0x3b83   : > { %v11545_v32 = vmul.f32 %v11541_v58, %v23974_v3  ;;  %v11546_v17 = vmul.f32 %v11542_v41, %v23977_v1  ;;  %v11547_v25 = vmul.f32 %v11543_v20, %v23982_v28  ;;  %v11548_v48 = vmul.f32 %v11544_v42, %v23983_v63  ;;  %v23986_v3 = vld [vmem:[#allocation28_spill] sm:$0xff]  ;;  %v17282_v63 = vpop.f32.mrb[202].mxu0 }
0x3b84   : > { %v11700_v1 = vadd.f32 %v17279_v33, %v23986_v3  ;;  %v11710_v26 = vadd.f32 %v17282_v63, %v23990_v47  ;;  %v19078_v33 = vld [vmem:[#allocation8 + $0x18] sm:$0xff] }
0x3b85   : > { %v11549_v22 = vadd.f32 %v11545_v32, %v23980_v24  ;;  %v11550_v0 = vadd.f32 %v11546_v17, %v23981_v53  ;;  %v11551_v61 = vadd.f32 %v11547_v25, %v23984_v9  ;;  %v11552_v16 = vadd.f32 %v11548_v48, %v23985_v7  ;;  %v17293_v24 = vpop.f32.mrb[168].mxu1  ;;  %v23987_v53 = vld [vmem:[#allocation106_spill] sm:$0xff]  ;;  %v11704_v7 = vpop.f32.mrb[203].mxu0 }
0x3b86   : > { %v11695_v28 = vadd.f32 %v11694_v37, %v23987_v53  ;;  %v11813_v43 = vadd.f32 %v17293_v24, %v23988_v39  ;;  %v11807_v9 = vpop.f32.mrb[169].mxu1  ;;  %v11705_v44 = vadd.f32 %v11704_v7, %v23991_v13  ;;  %v22913_v57 = vpop.f32.mrb[204].mxu0  ;;  %v14744_v53 = vld [vmem:[%s23339_s3 + $0xa0] sm:$0xff] }
0x3b87   : > { %v18394_v49 = vpack.c.bf16 %v11550_v0, %v11549_v22  ;;  %v18398_v52 = vpack.c.bf16 %v11552_v16, %v11551_v61  ;;  %v11808_v54 = vadd.f32 %v11807_v9, %v23989_v46  ;;  %v17296_v36 = vpop.f32.mrb[170].mxu1  ;;  %v22915_v37 = vpop.f32.mrb[205].mxu0 }
0x3b88   : > { %v12110_v60 = vmul.f32 %v11813_v43, %v11700_v1  ;;  %v11823_v14 = vadd.f32 %v17296_v36, %v23992_v23  ;;  %v11817_v31 = vpop.f32.mrb[171].mxu1  ;;  %v22927_v48 = vpop.f32.mrb[206].mxu0 }
0x3b89   : > { %18395 = vmatprep.subr.bf16.mxu1 %v18394_v49  ;;  %18403 = vmatprep.subr.bf16.mxu0 %v18394_v49  ;;  %v12109_v45 = vmul.f32 %v11808_v54, %v11695_v28  ;;  %v11818_v51 = vadd.f32 %v11817_v31, %v23993_v12  ;;  %v22929_v22 = vpop.f32.mrb[207].mxu0 }
0x3b8a   : > { %18397 = vmatpush3.bf16.msra.mxu1 %v18394_v49  ;;  %18405 = vmatpush3.bf16.msra.mxu0 %v18394_v49  ;;  %v12112_v27 = vmul.f32 %v11823_v14, %v11710_v26 }
0x3b8b   : > { %18399 = vmatprep.subr.bf16.mxu1 %v18398_v52  ;;  %18407 = vmatprep.subr.bf16.mxu0 %v18398_v52  ;;  %v18410_v15 = vpack.c.bf16 %v12110_v60, %v12109_v45  ;;  %v12111_v6 = vmul.f32 %v11818_v51, %v11705_v44 }
0x3b8e   : > { %18401 = vmatpush3.bf16.msra.mxu1 %v18398_v52  ;;  %18409 = vmatpush3.bf16.msra.mxu0 %v18398_v52 }
0x3b8f   : > { %18411 = vmatprep.subr.bf16.mxu1 %v18410_v15 }
0x3b91   : > { %17320 = vmatmul.mubr.msk.f32.vlgmr.msra.gmra.mrb[172].mxu1 %vm716_vm0, %v14737_v38  ;;  %v18414_v38 = vpack.c.bf16 %v12112_v27, %v12111_v6  ;;  %17334 = vmatmul.mubr.msk.f32.vlgmr.msra.gmra.mrb[208].mxu0 %vm716_vm0, %v22862_v29 }
0x3b92   : > { %17322 = vmatprep.mubr.msk.f32.mxu1 %vm716_vm0, %v14738_v40  ;;  %18413 = vmatpush3.bf16.msra.mxu1 %v18410_v15  ;;  %v19076_v40 = vld [vmem:[#allocation8 + $0x8] sm:$0xff] }
0x3b93   : > { %18415 = vmatprep.subr.bf16.mxu1 %v18414_v38  ;;  %17336 = vmatprep.mubr.msk.f32.mxu0 %vm716_vm0, %v14742_v5 }
0x3b95   : > { %17323 = vmatmul.mubr.msk.f32.gmra.mrb[174].mxu1 %vm716_vm0, %v14739_v8  ;;  %v19077_v8 = vld [vmem:[#allocation8 + $0x10] sm:$0xff]  ;;  %17337 = vmatmul.mubr.msk.f32.gmra.mrb[210].mxu0 %vm716_vm0, %v14743_v59 }
0x3b96   : > { %17347 = vmatprep.mubr.msk.f32.mxu1 %vm716_vm0, %v22638_v56  ;;  %18417 = vmatpush3.bf16.msra.mxu1 %v18414_v38 }
0x3b97   : > { %17361 = vmatprep.mubr.msk.f32.mxu0 %vm716_vm0, %v22638_v56 }
0x3b99   : > { %17348 = vmatmul.mubr.msk.f32.vlgmr.msra.gmra.mrb[176].mxu1 %vm716_vm0, %v19076_v40 }
0x3b9a   : > { %17350 = vmatprep.mubr.msk.f32.mxu1 %vm716_vm0, %v19077_v8 }
0x3b9d   : > { %17351 = vmatmul.mubr.msk.f32.gmra.mrb[178].mxu1 %vm716_vm0, %v19078_v33 }
0x3b9e   : > { %17375 = vmatprep.mubr.msk.f32.mxu1 %vm716_vm0, %v14744_v53 }
0x3c64   : > { %v17321_v34 = vpop.f32.mrb[172].mxu1  ;;  %v17335_v61 = vpop.f32.mrb[208].mxu0 }
0x3c65   : > { %v12011_v29 = vadd.f32 %v17321_v34, %v23988_v39  ;;  %v12005_v10 = vpop.f32.mrb[173].mxu1  ;;  %v12090_v49 = vpop.f32.mrb[209].mxu0 }
0x3c66   : > { %v12006_v30 = vadd.f32 %v12005_v10, %v23989_v46 }
0x3c67   : > { %v12199_v62 = vmul.f32 %v12011_v29, %v11700_v1 }
0x3c68   : > { %v12198_v2 = vmul.f32 %v12006_v30, %v11695_v28  ;;  %v17324_v58 = vpop.f32.mrb[174].mxu1  ;;  %v22931_v52 = vpop.f32.mrb[210].mxu0 }
0x3c69   : > { %v12021_v41 = vadd.f32 %v17324_v58, %v23992_v23  ;;  %v12015_v20 = vpop.f32.mrb[175].mxu1  ;;  %v22933_v3 = vpop.f32.mrb[211].mxu0 }
0x3c6a   : > { %v12016_v42 = vadd.f32 %v12015_v20, %v23993_v12  ;;  %v18418_v32 = vpack.c.bf16 %v12199_v62, %v12198_v2  ;;  %v23994_v20 = vld [vmem:[#allocation76_spill] sm:$0xff] }
0x3c6b   : > { %v12201_v56 = vmul.f32 %v12021_v41, %v11710_v26 }
0x3c6c   : > { %v12200_v17 = vmul.f32 %v12016_v42, %v11705_v44  ;;  %18419 = vmatprep.subr.bf16.mxu0 %v18418_v32  ;;  %v17349_v0 = vpop.f32.mrb[176].mxu1  ;;  %v11926_v42 = vadd.f32 %v22913_v57, %v23994_v20 }
0x3c6d   : > { %18421 = vmatpush3.bf16.msra.mxu0 %v18418_v32  ;;  %v12179_v16 = vpop.f32.mrb[177].mxu1  ;;  %v12096_v32 = vadd.f32 %v17335_v61, %v23994_v20 }
0x3c6e   : > { %v18422_v25 = vpack.c.bf16 %v12201_v56, %v12200_v17 }
0x3c70   : > { %18423 = vmatprep.subr.bf16.mxu0 %v18422_v25  ;;  %v17352_v1 = vpop.f32.mrb[178].mxu1 }
0x3c71   : > { %18425 = vmatpush3.bf16.msra.mxu0 %v18422_v25  ;;  %v12189_v24 = vpop.f32.mrb[179].mxu1 }
0x3c72   : > { %18434 = vmatprep.subr.bf16.mxu0 %v23600_v55 }
0x3c74   : > { %17362 = vmatmul.mubr.msk.f32.vlgmr.msra.gmra.mrb[212].mxu0 %vm716_vm0, %v19076_v40 }
0x3c75   : > { %17364 = vmatprep.mubr.msk.f32.mxu0 %vm716_vm0, %v19077_v8 }
0x3c78   : > { %17365 = vmatmul.mubr.msk.f32.gmra.mrb[214].mxu0 %vm716_vm0, %v19078_v33 }
0x3c79   : > { %17389 = vmatprep.mubr.msk.f32.mxu0 %vm19245_vm1, %v23606_v4 }
0x3d47   : > { %v17363_v28 = vpop.f32.mrb[212].mxu0 }
0x3d48   : > { %v12288_v63 = vmax.f32 %v17349_v0, %v17363_v28  ;;  %v12268_v39 = vpop.f32.mrb[213].mxu0 }
0x3d49   : > { %v12287_v43 = vmax.f32 %v12179_v16, %v12268_v39 }
0x3d4a   : > { %v12292_v9 = vsub.f32 %v17349_v0, %v12288_v63  ;;  %v12304_v7 = vsub.f32 %v17363_v28, %v12288_v63  ;;  %v23995_v0 = vld [vmem:[#allocation107_spill] sm:$0xff] }
0x3d4b   : > { %v12291_v46 = vsub.f32 %v12179_v16, %v12287_v43  ;;  %v12303_v54 = vsub.f32 %v12268_v39, %v12287_v43  ;;  %v17366_v60 = vpop.f32.mrb[214].mxu0  ;;  %v11921_v16 = vadd.f32 %v22915_v37, %v23995_v0  ;;  %v23996_v43 = vld [vmem:[#allocation49_spill] sm:$0xff] }
0x3d4c   : > { %v12297_v45 = vmul.f32 1.442695, %v12292_v9  ;;  %v12309_v15 = vmul.f32 1.442695, %v12304_v7  ;;  %v12290_v47 = vmax.f32 %v17352_v1, %v17366_v60  ;;  %v12278_v26 = vpop.f32.mrb[215].mxu0  ;;  %v11936_v9 = vadd.f32 %v22927_v48, %v23996_v43 }
0x3d4d   : > { %v12295_v36 = vmul.f32 1.442695, %v12291_v46  ;;  %v12307_v13 = vmul.f32 1.442695, %v12303_v54  ;;  %v12289_v44 = vmax.f32 %v12189_v24, %v12278_v26  ;;  %v12106_v37 = vadd.f32 %v22931_v52, %v23996_v43  ;;  %v14745_v52 = vld [vmem:[%s23339_s3 + $0xa8] sm:$0xff] }
0x3d4e   : > { %19023 = vpow2.f32 %v12297_v45  ;;  %v12294_v23 = vsub.f32 %v17352_v1, %v12290_v47  ;;  %v12306_v14 = vsub.f32 %v17366_v60, %v12290_v47  ;;  %v12091_v1 = vadd.f32 %v12090_v49, %v23995_v0  ;;  %v23997_v60 = vld [vmem:[#allocation109_spill] sm:$0xff] }
0x3d4f   : > { %19025 = vpow2.f32 %v12309_v15  ;;  %v12293_v31 = vsub.f32 %v12189_v24, %v12289_v44  ;;  %v12305_v12 = vsub.f32 %v12278_v26, %v12289_v44  ;;  %v11931_v45 = vadd.f32 %v22929_v22, %v23997_v60 }
0x3d50   : > { %19027 = vpow2.f32 %v12295_v36  ;;  %v12301_v51 = vmul.f32 1.442695, %v12294_v23  ;;  %v12313_v27 = vmul.f32 1.442695, %v12306_v14  ;;  %v12101_v49 = vadd.f32 %v22933_v3, %v23997_v60  ;;  %v14746_v3 = vld [vmem:[%s23339_s3 + $0xb0] sm:$0xff] }
0x3d51   : > { %19029 = vpow2.f32 %v12307_v13  ;;  %v12299_v6 = vmul.f32 1.442695, %v12293_v31  ;;  %v12311_v38 = vmul.f32 1.442695, %v12305_v12  ;;  %v24002_v60 = vld [vmem:[#allocation70_spill] sm:$0xff] }
0x3d52   : > { %19031 = vpow2.f32 %v12301_v51  ;;  %v14747_v51 = vld [vmem:[%s23339_s3 + $0xb8] sm:$0xff] }
0x3d53   : > { %19033 = vpow2.f32 %v12313_v27 }
0x3d54   : > { %19035 = vpow2.f32 %v12299_v6  ;;  %v23998_v6 = vld [vmem:[#allocation66_spill] sm:$0xff] }
0x3d55   : > { %19037 = vpow2.f32 %v12311_v38 }
0x3d58   : > { %v19024_v5 = vpop.eup %19023 }
0x3d59   : > { %v19026_v59 = vpop.eup %19025 }
0x3d5a   : > { %v19028_v40 = vpop.eup %19027  ;;  %v12316_v8 = vadd.f32 %v19026_v59, %v19024_v5 }
0x3d5b   : > { %v19030_v33 = vpop.eup %19029 }
0x3d5c   : > { %v19032_v34 = vpop.eup %19031  ;;  %19039 = vrcp.f32 %v12316_v8  ;;  %v12315_v29 = vadd.f32 %v19030_v33, %v19028_v40 }
0x3d5d   : > { %v19034_v10 = vpop.eup %19033 }
0x3d5e   : > { %v19036_v30 = vpop.eup %19035  ;;  %19041 = vrcp.f32 %v12315_v29  ;;  %v12318_v62 = vadd.f32 %v19034_v10, %v19032_v34  ;;  %v24000_v29 = vld [vmem:[#allocation33_spill] sm:$0xff] }
0x3d5f   : > { %v19038_v2 = vpop.eup %19037 }
0x3d60   : > { %19043 = vrcp.f32 %v12318_v62  ;;  %v12317_v58 = vadd.f32 %v19038_v2, %v19036_v30 }
0x3d62   : > { %19045 = vrcp.f32 %v12317_v58 }
0x3d66   : > { %v19040_v41 = vpop.eup %19039 }
0x3d67   : > { %v12324_v56 = vmul.f32 %v19040_v41, %v19024_v5  ;;  %v12332_v17 = vmul.f32 %v19040_v41, %v19026_v59  ;;  %v23999_v59 = vld [vmem:[#allocation32_spill] sm:$0xff] }
0x3d68   : > { %v19042_v25 = vpop.eup %19041 }
0x3d69   : > { %v12323_v24 = vmul.f32 %v19042_v25, %v19028_v40  ;;  %v12328_v53 = vmul.f32 %v12324_v56, %v11926_v42  ;;  %v12331_v28 = vmul.f32 %v19042_v25, %v19030_v33  ;;  %v12336_v63 = vmul.f32 %v12332_v17, %v12096_v32 }
0x3d6a   : > { %v19044_v39 = vpop.eup %19043 }
0x3d6b   : > { %v12327_v7 = vmul.f32 %v12323_v24, %v11921_v16  ;;  %v12335_v57 = vmul.f32 %v12331_v28, %v12091_v1  ;;  %v12340_v46 = vadd.f32 %v12336_v63, %v12328_v53  ;;  %v12326_v61 = vmul.f32 %v19044_v39, %v19032_v34  ;;  %v14748_v28 = vld [vmem:[%s23340_s4 + $0x140] sm:$0xff] }
0x3d6c   : > { %v19046_v54 = vpop.eup %19045  ;;  %v12334_v15 = vmul.f32 %v19044_v39, %v19034_v10 }
0x3d6d   : > { %v12339_v47 = vadd.f32 %v12335_v57, %v12327_v7  ;;  %v12325_v26 = vmul.f32 %v19046_v54, %v19036_v30  ;;  %v12330_v36 = vmul.f32 %v12326_v61, %v11936_v9  ;;  %v12333_v13 = vmul.f32 %v19046_v54, %v19038_v2  ;;  %v24001_v2 = vld [vmem:[#allocation91_spill] sm:$0xff] }
0x3d6e   : > { %v12338_v48 = vmul.f32 %v12334_v15, %v12106_v37  ;;  %v24003_v37 = vld [vmem:[#allocation34_spill] sm:$0xff] }
0x3d6f   : > { %v18426_v44 = vpack.c.bf16 %v12340_v46, %v12339_v47  ;;  %v12329_v23 = vmul.f32 %v12325_v26, %v11931_v45  ;;  %v12337_v14 = vmul.f32 %v12333_v13, %v12101_v49  ;;  %v24004_v15 = vld [vmem:[#allocation82_spill] sm:$0xff]  ;;  %v24005_v26 = vld [vmem:[#allocation25_spill] sm:$0xff]  ;;  %v24006_v13 = vld [vmem:[#allocation24_spill] sm:$0xff] }
0x3d70   : > { %v12342_v31 = vadd.f32 %v12338_v48, %v12330_v36 }
0x3d71   : > { %18427 = vmatprep.subr.bf16.mxu1 %v18426_v44  ;;  %v12341_v12 = vadd.f32 %v12337_v14, %v12329_v23  ;;  %v24008_v14 = vld [vmem:[#allocation37_spill] sm:$0xff] }
0x3d72   : > { %18429 = vmatpush3.bf16.msra.mxu1 %v18426_v44  ;;  %v24007_v44 = vld [vmem:[#allocation29_spill] sm:$0xff] }
0x3d73   : > { %v18430_v22 = vpack.c.bf16 %v12342_v31, %v12341_v12  ;;  %v24009_v12 = vld [vmem:[#allocation27_spill] sm:$0xff] }
0x3d75   : > { %18431 = vmatprep.subr.bf16.mxu1 %v18430_v22 }
0x3d76   : > { %18433 = vmatpush3.bf16.msra.mxu1 %v18430_v22 }
0x3d77   : > { %18440 = vmatprep.subr.bf16.mxu1 %v23600_v55 }
0x3d79   : > { %17376 = vmatmul.mubr.msk.f32.vlgmr.msra.gmra.mrb[180].mxu1 %vm716_vm0, %v14745_v52 }
0x3d7a   : > { %17378 = vmatprep.mubr.msk.f32.mxu1 %vm716_vm0, %v14746_v3 }
0x3d7d   : > { %17379 = vmatmul.mubr.msk.f32.gmra.mrb[182].mxu1 %vm716_vm0, %v14747_v51  ;;  %v14749_v51 = vld [vmem:[%s23340_s4 + $0x148] sm:$0xff] }
0x3d7e   : > { %17400 = vmatprep.mubr.msk.f32.mxu1 %vm19245_vm1, %v23606_v4 }
0x3e4c   : > { %v17377_v27 = vpop.f32.mrb[180].mxu1 }
0x3e4d   : > { %v12443_v38 = vadd.f32 %v17377_v27, %v23998_v6  ;;  %v12437_v5 = vpop.f32.mrb[181].mxu1  ;;  %v14750_v27 = vld [vmem:[%s23340_s4 + $0x150] sm:$0xff]  ;;  %v14751_v6 = vld [vmem:[%s23340_s4 + $0x158] sm:$0xff] }
0x3e4e   : > { %v12438_v40 = vadd.f32 %v12437_v5, %v23999_v59  ;;  %v14753_v5 = vld [vmem:[%s23340_s4 + $0x168] sm:$0xff]  ;;  %v14754_v59 = vld [vmem:[%s23340_s4 + $0x170] sm:$0xff] }
0x3e4f   : > { %v12457_v8 = vadd.f32 %v12443_v38, %v22803_v21  ;;  %v14752_v38 = vld [vmem:[%s23340_s4 + $0x160] sm:$0xff] }
0x3e50   : > { %v12456_v33 = vadd.f32 %v12438_v40, %v22799_v19  ;;  %v17380_v34 = vpop.f32.mrb[182].mxu1  ;;  %v14755_v40 = vld [vmem:[%s23340_s4 + $0x178] sm:$0xff] }
0x3e51   : > { %v12453_v10 = vadd.f32 %v17380_v34, %v24000_v29  ;;  %v12447_v30 = vpop.f32.mrb[183].mxu1  ;;  %v24010_v34 = vld [vmem:[#allocation38_spill] sm:$0xff] }
0x3e52   : > { %v18435_v62 = vpack.c.bf16 %v12457_v8, %v12456_v33  ;;  %v12448_v58 = vadd.f32 %v12447_v30, %v24001_v2  ;;  %v24011_v30 = vld [vmem:[#allocation31_spill] sm:$0xff] }
0x3e53   : > { %v12459_v41 = vadd.f32 %v12453_v10, %v22815_v35 }
0x3e54   : > { %v12458_v20 = vadd.f32 %v12448_v58, %v22812_v11  ;;  %18436 = vmatpush3.bf16.msra.mxu0 %v18435_v62 }
0x3e55   : > { %18437 = vmatprep.subr.bf16.mxu0 %v23600_v55 }
0x3e56   : > { %v18438_v42 = vpack.c.bf16 %v12459_v41, %v12458_v20 }
0x3e58   : > { %18439 = vmatpush3.bf16.msra.mxu0 %v18438_v42 }
0x3e5b   : > { %17390 = vmatmul.mubr.msk.f32.vlgmr.msra.gmra.mrb[216].mxu0 %vm716_vm0, %v23615_v50 }
0x3e5c   : > { %17411 = vmatprep.mubr.msk.f32.mxu0 %vm716_vm0, %v14748_v28 }
0x3f2e   : > { %v12526_v19 = vpop.f32.mrb[216].mxu0 }
0x3f2f   : > { %v12533_v21 = vrot.slane %v12526_v19, %v19872_v18  ;;  %v17391_v32 = vpop.f32.mrb[217].mxu0 }
0x3f30   : > { %v24013_v32 = vld [vmem:[#allocation30_spill] sm:$0xff] }
0x3f31   : > { %v12534_v56 = vsub.f32 %v12456_v33, %v12533_v21  ;;  %v12535_v17 = vsub.f32 %v12457_v8, %v12533_v21  ;;  %v12536_v25 = vsub.f32 %v12458_v20, %v12533_v21  ;;  %v12537_v0 = vsub.f32 %v12459_v41, %v12533_v21  ;;  %v11583_v8 = vld [vmem:[#allocation6 + $0xa0] sm:$0xff] }
0x3f32   : > { %v24012_v20 = vld [vmem:[#allocation78_spill] sm:$0xff] }
0x3f33   : > { %v12538_v16 = vmul.f32 %v12534_v56, %v12534_v56  ;;  %v12539_v35 = vmul.f32 %v12535_v17, %v12535_v17  ;;  %v12540_v11 = vmul.f32 %v12536_v25, %v12536_v25  ;;  %v12541_v24 = vmul.f32 %v12537_v0, %v12537_v0 }
0x3f35   : > { %v18441_v1 = vpack.c.bf16 %v12539_v35, %v12538_v16  ;;  %v18444_v53 = vpack.c.bf16 %v12541_v24, %v12540_v11  ;;  %v24014_v16 = vld [vmem:[#allocation80_spill] sm:$0xff] }
0x3f36   : > { %v24015_v24 = vld [vmem:[#allocation40_spill] sm:$0xff] }
0x3f37   : > { %18442 = vmatpush3.bf16.msra.mxu1 %v18441_v1 }
0x3f38   : > { %18443 = vmatprep.subr.bf16.mxu1 %v23600_v55 }
0x3f3b   : > { %18445 = vmatpush3.bf16.msra.mxu1 %v18444_v53 }
0x3f3e   : > { %17401 = vmatmul.mubr.msk.f32.vlgmr.msra.gmra.mrb[184].mxu1 %vm716_vm0, %v23615_v50 }
0x3f3f   : > { %17439 = vmatprep.mubr.msk.f32.mxu1 %vm1966_vm2, %v11583_v8 }
0x4011   : > { %v12608_v63 = vpop.f32.mrb[184].mxu1 }
0x4012   : > { %v12609_v39 = vadd.f32 1e-05, %v12608_v63  ;;  %v17402_v43 = vpop.f32.mrb[185].mxu1 }
0x4013   : > { %v24016_v43 = vld [vmem:[#allocation35_spill] sm:$0xff] }
0x4014   : > { %19047 = vrsqrt.f32 %v12609_v39 }
0x401e   : > { %v19048_v9 = vpop.eup %19047 }
0x401f   : > { %v12616_v7 = vrot.slane %v19048_v9, %v19872_v18 }
0x4021   : > { %v12617_v57 = vmul.f32 %v12616_v7, %v12534_v56  ;;  %v12618_v46 = vmul.f32 %v12616_v7, %v12535_v17  ;;  %v12619_v61 = vmul.f32 %v12616_v7, %v12536_v25  ;;  %v12620_v54 = vmul.f32 %v12616_v7, %v12537_v0 }
0x4023   : > { %v12637_v45 = vmul.f32 %v24002_v60, %v12617_v57  ;;  %v12638_v49 = vmul.f32 %v24003_v37, %v12618_v46  ;;  %v12639_v47 = vmul.f32 %v24004_v15, %v12619_v61  ;;  %v12640_v36 = vmul.f32 %v24005_v26, %v12620_v54  ;;  %v24017_v46 = vld [vmem:[#allocation41_spill] sm:$0xff]  ;;  %v11584_v37 = vld [vmem:[#allocation6 + $0xa8] sm:$0xff]  ;;  %v24018_v26 = vld [vmem:[#allocation36_spill] sm:$0xff] }
0x4024   : > { %v11586_v15 = vld [vmem:[#allocation6 + $0xb8] sm:$0xff] }
0x4025   : > { %v22993_v48 = vadd.f32 %v24006_v13, %v12637_v45  ;;  %v22996_v23 = vadd.f32 %v24007_v44, %v12638_v49  ;;  %v22999_v31 = vadd.f32 %v24008_v14, %v12639_v47  ;;  %v23002_v22 = vadd.f32 %v24009_v12, %v12640_v36  ;;  %v11585_v49 = vld [vmem:[#allocation6 + $0xb0] sm:$0xff] }
0x4026   : > { %v24019_v44 = vld [vmem:[#allocation44_spill] sm:$0xff] }
0x4027   : > { %v18446_v52 = vpack.c.bf16 %v22996_v23, %v22993_v48  ;;  %v18450_v3 = vpack.c.bf16 %v23002_v22, %v22999_v31 }
0x4029   : > { %18447 = vmatprep.subr.bf16.mxu0 %v18446_v52 }
0x402a   : > { %18449 = vmatpush3.bf16.msra.mxu0 %v18446_v52 }
0x402b   : > { %18451 = vmatprep.subr.bf16.mxu0 %v18450_v3 }
0x402e   : > { %18453 = vmatpush3.bf16.msra.mxu0 %v18450_v3 }
0x402f   : > { %18470 = vmatprep.subr.bf16.mxu0 %v23600_v55 }
0x4031   : > { %17412 = vmatmul.mubr.msk.f32.vlgmr.msra.gmra.mrb[218].mxu0 %vm716_vm0, %v14749_v51  ;;  %v24020_v51 = vld [vmem:[#allocation42_spill] sm:$0xff] }
0x4032   : > { %17414 = vmatprep.mubr.msk.f32.mxu0 %vm716_vm0, %v14750_v27 }
0x4035   : > { %17415 = vmatmul.mubr.msk.f32.gmra.mrb[220].mxu0 %vm716_vm0, %v14751_v6 }
0x4036   : > { %17417 = vmatprep.mubr.msk.f32.mxu0 %vm716_vm0, %v14752_v38 }
0x4039   : > { %17418 = vmatmul.mubr.msk.f32.gmra.mrb[222].mxu0 %vm716_vm0, %v14753_v5  ;;  %v24021_v5 = vld [vmem:[#allocation84_spill] sm:$0xff] }
0x403a   : > { %17420 = vmatprep.mubr.msk.f32.mxu0 %vm716_vm0, %v14754_v59 }
0x403d   : > { %17421 = vmatmul.mubr.msk.f32.gmra.mrb[224].mxu0 %vm716_vm0, %v14755_v40 }
0x403e   : > { %17453 = vmatprep.mubr.msk.f32.mxu0 %vm19245_vm1, %v23606_v4 }
0x4104   : > { %v17413_v33 = vpop.f32.mrb[218].mxu0 }
0x4105   : > { %v12793_v29 = vadd.f32 %v17413_v33, %v24010_v34  ;;  %v12787_v10 = vpop.f32.mrb[219].mxu0 }
0x4106   : > { %v12788_v62 = vadd.f32 %v12787_v10, %v24011_v30 }
0x4107   : > { %v12827_v2 = vmax.f32 %v12793_v29, 0.0 }
0x4108   : > { %v12826_v58 = vmax.f32 %v12788_v62, 0.0  ;;  %v17416_v41 = vpop.f32.mrb[220].mxu0 }
0x4109   : > { %v12803_v42 = vadd.f32 %v17416_v41, %v24012_v20  ;;  %v12797_v19 = vpop.f32.mrb[221].mxu0 }
0x410a   : > { %v18454_v21 = vpack.c.bf16 %v12827_v2, %v12826_v58  ;;  %v12798_v56 = vadd.f32 %v12797_v19, %v24013_v32  ;;  %v13161_v19 = vld [vmem:[%s23344_s8] sm:$0xff]  ;;  %v13163_v32 = vld [vmem:[%s23344_s8 + $0x10] sm:$0xff] }
0x410b   : > { %v12829_v17 = vmax.f32 %v12803_v42, 0.0  ;;  %v13156_v42 = vld [vmem:[%s19542_s16] sm:$0xff]  ;;  %s19169_s16 = scalar_lea.vmem %s19168_s10, 32 }
0x410c   : > { %v12828_v25 = vmax.f32 %v12798_v56, 0.0  ;;  %v17419_v0 = vpop.f32.mrb[222].mxu0  ;;  %18455 = vmatprep.subr.bf16.mxu1 %v18454_v21  ;;  %v13283_v56 = vld [vmem:[%s23345_s9] sm:$0xff]  ;;  %p19171_p1 = scmp.lt.s32.totalorder %s19169_s16, %s19163_s22 }
0x410d   : > { %v12813_v35 = vadd.f32 %v17419_v0, %v24014_v16  ;;  %v12807_v1 = vpop.f32.mrb[223].mxu0  ;;  %18457 = vmatpush3.bf16.msra.mxu1 %v18454_v21  ;;  %v13162_v21 = vld [vmem:[%s23344_s8 + $0x8] sm:$0xff]  ;;  %v24023_v0 = vmov 2   ;;  %v13159_v16 = vld [vmem:[%s24022_s13 + $0x10] sm:$0xff] }
0x410e   : > { %v18458_v11 = vpack.c.bf16 %v12829_v17, %v12828_v25  ;;  %v12808_v53 = vadd.f32 %v12807_v1, %v24015_v24  ;;  %v13158_v17 = vld [vmem:[%s24022_s13 + $0x8] sm:$0xff]  ;;  %v13157_v25 = vld [vmem:[%s24022_s13] sm:$0xff]  ;;  %v13160_v1 = vld [vmem:[%s24022_s13 + $0x18] sm:$0xff]  ;;  %v24026_v24 = vmov 4   ;;  %p19172_p3 = por %p19171_p1, %p19170_p10 }
0x410f   : > { %v12831_v28 = vmax.f32 %v12813_v35, 0.0  ;;  %13172 = vperm.xlu1 %18782, %v13158_v17   ;;  %13167 = vperm.xlu0 %18781, %v13157_v25   ;;  %v24024_v35 = vmov 0  }
0x4110   : > { %v12830_v63 = vmax.f32 %v12808_v53, 0.0  ;;  %v17422_v39 = vpop.f32.mrb[224].mxu0  ;;  %18459 = vmatprep.subr.bf16.mxu1 %v18458_v11  ;;  %v24027_v53 = vmov 5  }
0x4111   : > { %v12823_v9 = vadd.f32 %v17422_v39, %v24016_v43  ;;  %v12817_v7 = vpop.f32.mrb[225].mxu0  ;;  %18461 = vmatpush3.bf16.msra.mxu1 %v18458_v11  ;;  %v24025_v11 = vmov 3   ;;  %v24030_v39 = vmov 1  }
0x4112   : > { %v18462_v57 = vpack.c.bf16 %v12831_v28, %v12830_v63  ;;  %v12818_v61 = vadd.f32 %v12817_v7, %v24017_v46  ;;  %v24028_v28 = vmov 6   ;;  %v24029_v63 = vmov 7  }
0x4113   : > { %v12833_v54 = vmax.f32 %v12823_v9, 0.0  ;;  %18783 = vset.pattern.permute.xlu1 %v24023_v0  ;;  %18784 = vset.pattern.permute.xlu0 %v24023_v0 }
0x4114   : > { %v12832_v60 = vmax.f32 %v12818_v61, 0.0  ;;  %18463 = vmatprep.subr.bf16.mxu1 %v18462_v57  ;;  %13389 = vperm.xlu1 %18783, %v13157_v25  }
0x4115   : > { %18465 = vmatpush3.bf16.msra.mxu1 %v18462_v57  ;;  %13393 = vperm.xlu0 %18784, %v13158_v17   ;;  %v13122_v57 = vpop.permute.xlu1 %13121 }
0x4116   : > { %v18466_v45 = vpack.c.bf16 %v12833_v54, %v12832_v60 }
0x4118   : > { %18467 = vmatprep.subr.bf16.mxu1 %v18466_v45  ;;  %18785 = vset.pattern.permute.xlu1 %v24024_v35 }
0x4119   : > { %18469 = vmatpush3.bf16.msra.mxu1 %v18466_v45  ;;  %13397 = vperm.xlu0 %18784, %v13159_v16   ;;  %v13142_v46 = vpop.permute.xlu1 %13141 }
0x411a   : > { %18476 = vmatprep.subr.bf16.mxu1 %v23600_v55  ;;  %13177 = vperm.xlu1 %18785, %v13159_v16  }
0x411c   : > { %17440 = vmatmul.mubr.msk.f32.vlgmr.msra.gmra.mrb[186].mxu1 %vm1966_vm2, %v11584_v37 }
0x411d   : > { %17442 = vmatprep.mubr.msk.f32.mxu1 %vm1966_vm2, %v11585_v49  ;;  %18787 = vset.pattern.permute.xlu0 %v24025_v11 }
0x411e   : > { %13182 = vperm.xlu1 %18785, %v13160_v1   ;;  %13417 = vperm.xlu0 %18787, %v13157_v25  }
0x4120   : > { %17443 = vmatmul.mubr.msk.f32.gmra.mrb[188].mxu1 %vm1966_vm2, %v11586_v15  ;;  %v13126_v15 = vpop.permute.xlu0 %13125 }
0x4121   : > { %17464 = vmatprep.mubr.msk.f32.mxu1 %vm19245_vm1, %v23606_v4 }
0x4122   : > { %18786 = vset.pattern.permute.xlu1 %v24023_v0  ;;  %13429 = vperm.xlu0 %18787, %v13160_v1  }
0x4123   : > { %13401 = vperm.xlu1 %18786, %v13160_v1  }
0x4126   : > { %18790 = vset.pattern.permute.xlu0 %v24026_v24 }
0x4127   : > { %18788 = vset.pattern.permute.xlu1 %v24025_v11  ;;  %13543 = vperm.xlu0 %18790, %v13158_v17  }
0x4128   : > { %13421 = vperm.xlu1 %18788, %v13158_v17  }
0x412b   : > { %18791 = vset.pattern.permute.xlu0 %v24027_v53 }
0x412c   : > { %13425 = vperm.xlu1 %18788, %v13159_v16   ;;  %13762 = vperm.xlu0 %18791, %v13157_v25  }
0x4130   : > { %18789 = vset.pattern.permute.xlu1 %v24026_v24  ;;  %13774 = vperm.xlu0 %18791, %v13160_v1  }
0x4131   : > { %13539 = vperm.xlu1 %18789, %v13157_v25  }
0x4134   : > { %18794 = vset.pattern.permute.xlu0 %v24028_v28 }
0x4135   : > { %13547 = vperm.xlu1 %18789, %v13159_v16   ;;  %13795 = vperm.xlu0 %18794, %v13158_v17  }
0x4139   : > { %13551 = vperm.xlu1 %18789, %v13160_v1   ;;  %18795 = vset.pattern.permute.xlu0 %v24029_v63 }
0x413a   : > { %13913 = vperm.xlu0 %18795, %v13157_v25  }
0x413d   : > { %18792 = vset.pattern.permute.xlu1 %v24027_v53 }
0x413e   : > { %13766 = vperm.xlu1 %18792, %v13158_v17   ;;  %13925 = vperm.xlu0 %18795, %v13160_v1  }
0x4142   : > { %13770 = vperm.xlu1 %18792, %v13159_v16   ;;  %18798 = vset.pattern.permute.xlu0 %v24030_v39 }
0x4146   : > { %18793 = vset.pattern.permute.xlu1 %v24028_v28 }
0x4147   : > { %13791 = vperm.xlu1 %18793, %v13157_v25  }
0x414b   : > { %13799 = vperm.xlu1 %18793, %v13159_v16  }
0x414f   : > { %13803 = vperm.xlu1 %18793, %v13160_v1  }
0x4153   : > { %18796 = vset.pattern.permute.xlu1 %v24029_v63 }
0x4154   : > { %13917 = vperm.xlu1 %18796, %v13158_v17  }
0x4158   : > { %13921 = vperm.xlu1 %18796, %v13159_v16  }
0x415c   : > { %18797 = vset.pattern.permute.xlu1 %v24030_v39 }
0x415d   : > { %14035 = vperm.xlu1 %18797, %v13157_v25  }
0x41ef   : > { %v17441_v47 = vpop.f32.mrb[186].mxu1 }
0x41f0   : > { %v12934_v36 = vadd.f32 %v17441_v47, %v24018_v26  ;;  %v12928_v13 = vpop.f32.mrb[187].mxu1  ;;  %v13146_v47 = vpop.permute.xlu1 %13145 }
0x41f1   : > { %v12929_v14 = vadd.f32 %v12928_v13, %v24019_v44  ;;  %v24031_v13 = vld [vmem:[#allocation43_spill] sm:$0xff] }
0x41f2   : > { %v12948_v12 = vadd.f32 %v12934_v36, %v22996_v23 }
0x41f3   : > { %v12947_v52 = vadd.f32 %v12929_v14, %v22993_v48  ;;  %v17444_v3 = vpop.f32.mrb[188].mxu1  ;;  %v24032_v14 = vld [vmem:[#allocation51_spill] sm:$0xff] }
0x41f4   : > { %v12944_v27 = vadd.f32 %v17444_v3, %v24020_v51  ;;  %v12938_v6 = vpop.f32.mrb[189].mxu1  ;;  %v24033_v51 = vld [vmem:[#allocation46_spill] sm:$0xff] }
0x41f5   : > { %v18471_v38 = vpack.c.bf16 %v12948_v12, %v12947_v52  ;;  %v12939_v59 = vadd.f32 %v12938_v6, %v24021_v5 }
0x41f6   : > { %v12950_v40 = vadd.f32 %v12944_v27, %v23002_v22  ;;  %v24034_v27 = vld [vmem:[#allocation48_spill] sm:$0xff] }
0x41f7   : > { %v12949_v8 = vadd.f32 %v12939_v59, %v22999_v31  ;;  %18472 = vmatpush3.bf16.msra.mxu0 %v18471_v38  ;;  %v24035_v38 = vld [vmem:[#allocation57_spill] sm:$0xff]  ;;  %v24036_v59 = vld [vmem:[#allocation58_spill] sm:$0xff] }
0x41f8   : > { %18473 = vmatprep.subr.bf16.mxu0 %v23600_v55 }
0x41f9   : > { %v18474_v33 = vpack.c.bf16 %v12950_v40, %v12949_v8 }
0x41fb   : > { %18475 = vmatpush3.bf16.msra.mxu0 %v18474_v33 }
0x41fc   : > { %17467 = vmatprep.subr.mxu0 %v13156_v42 }
0x41fe   : > { %17454 = vmatmul.mubr.msk.f32.vlgmr.msra.gmra.mrb[226].mxu0 %vm716_vm0, %v23615_v50 }
0x41ff   : > { %17468 = vmatpush3.msra.mxu0 %v13156_v42  ;;  %17469 = vmatprep.mubr.msk.f32.mxu0 %vm13185_vm3, %v13161_v19 }
0x4202   : > { %17470 = vmatmul.mubr.msk.f32.vlgmr.msra.gmra.mrb[228].mxu0 %vm13185_vm3, %v13162_v21 }
0x4203   : > { %17472 = vmatprep.mubr.msk.f32.mxu0 %vm13185_vm3, %v13163_v32 }
0x42d1   : > { %v13017_v48 = vpop.f32.mrb[226].mxu0 }
0x42d2   : > { %v13024_v23 = vrot.slane %v13017_v48, %v19872_v18  ;;  %v17455_v34 = vpop.f32.mrb[227].mxu0  ;;  %v24038_v48 = vld [vmem:[#allocation93_spill] sm:$0xff] }
0x42d4   : > { %v23066_v29 = vsub.f32 %v12947_v52, %v13024_v23  ;;  %v23068_v10 = vsub.f32 %v12948_v12, %v13024_v23  ;;  %v23070_v22 = vsub.f32 %v12949_v8, %v13024_v23  ;;  %v23072_v31 = vsub.f32 %v12950_v40, %v13024_v23  ;;  %v24037_v8 = vld [vmem:[#allocation59_spill] sm:$0xff] }
0x42d6   : > { %v13029_v30 = vmul.f32 %v23066_v29, %v23066_v29  ;;  %v13030_v62 = vmul.f32 %v23068_v10, %v23068_v10  ;;  %v13031_v58 = vmul.f32 %v23070_v22, %v23070_v22  ;;  %v13032_v41 = vmul.f32 %v23072_v31, %v23072_v31 }
0x42d8   : > { %v18477_v2 = vpack.c.bf16 %v13030_v62, %v13029_v30  ;;  %v18480_v20 = vpack.c.bf16 %v13032_v41, %v13031_v58  ;;  %v13408_v30 = vld [vmem:[%s24039_s25] sm:$0xff]  ;;  %v13173_v62 = vpop.permute.xlu1 %13172  ;;  %v13168_v41 = vpop.permute.xlu0 %13167  ;;  %s24042_s25 = sld [smem:[#allocation16_spill]] }
0x42da   : > { %18478 = vmatpush3.bf16.msra.mxu1 %v18477_v2 }
0x42db   : > { %18479 = vmatprep.subr.bf16.mxu1 %v23600_v55 }
0x42dc   : > { %v13390_v2 = vpop.permute.xlu1 %13389  ;;  %v13394_v19 = vpop.permute.xlu0 %13393 }
0x42de   : > { %18481 = vmatpush3.bf16.msra.mxu1 %v18480_v20  ;;  %p24044_p7 = scmp.ne.s32.totalorder %s24042_s25, 0 }
0x42e0   : > { %v13178_v58 = vpop.permute.xlu1 %13177  ;;  %v13398_v53 = vpop.permute.xlu0 %13397  ;;  %p19165_p8 = pnand %p19164_p0, %p24044_p7 }
0x42e1   : > { %17465 = vmatmul.mubr.msk.f32.vlgmr.msra.gmra.mrb[190].mxu1 %vm716_vm0, %v23615_v50  ;;  %v13164_v50 = vld [vmem:[%s23344_s8 + $0x18] sm:$0xff] }
0x42e2   : > { %17473 = vmatmul.mubr.msk.f32.gmra.mrb[230].mxu0 %vm13185_vm3, %v13164_v50  ;;  %17497 = vmatprep.mubr.msk.f32.mxu1 %vm716_vm0, %v13408_v30  ;;  %p19166_p9 = pneg %p19165_p8 }
0x42e3   : > { %17483 = vmatprep.mubr.msk.f32.mxu0 %vm716_vm0, %v13283_v56 }
0x42e4   : > { %v13183_v20 = vpop.permute.xlu1 %13182  ;;  %p19173_p2 = pnand %p19172_p3, %p19166_p9 }
0x42e8   : > { %v13402_v1 = vpop.permute.xlu1 %13401 }
0x43b4   : > { %v13099_v43 = vpop.f32.mrb[190].mxu1 }
0x43b5   : > { %v13100_v9 = vadd.f32 1e-05, %v13099_v43  ;;  %v17466_v7 = vpop.f32.mrb[191].mxu1 }
0x43b7   : > { %19049 = vrsqrt.f32 %v13100_v9 }
0x43c1   : > { %v19050_v61 = vpop.eup %19049 }
0x43c2   : > { %v13107_v54 = vrot.slane %v19050_v61, %v19872_v18  ;;  %v13411_v61 = vld [vmem:[%s24040_s30 + $0x18] sm:$0xff] }
0x43c4   : > { %v13110_v60 = vmul.f32 %v13107_v54, %v23070_v22  ;;  %v13111_v45 = vmul.f32 %v13107_v54, %v23072_v31  ;;  %v13108_v37 = vmul.f32 %v13107_v54, %v23066_v29  ;;  %v13109_v49 = vmul.f32 %v13107_v54, %v23068_v10  ;;  %v13284_v10 = vld [vmem:[%s23345_s9 + $0x8] sm:$0xff]  ;;  %v13285_v22 = vld [vmem:[%s23345_s9 + $0x10] sm:$0xff]  ;;  %v13286_v31 = vld [vmem:[%s23345_s9 + $0x18] sm:$0xff] }
0x43c5   : > { %v14824_v54 = vld [vmem:[%s24040_s30 + $0x20] sm:$0xff] }
0x43c6   : > { %v13130_v26 = vmul.f32 %v13122_v57, %v13110_v60  ;;  %v13131_v36 = vmul.f32 %v13126_v15, %v13111_v45  ;;  %v13128_v44 = vmul.f32 %v24031_v13, %v13108_v37  ;;  %v13129_v12 = vmul.f32 %v24032_v14, %v13109_v49  ;;  %v13409_v57 = vld [vmem:[%s24040_s30 + $0x8] sm:$0xff]  ;;  %v13418_v60 = vpop.permute.xlu0 %13417  ;;  %v13422_v45 = vpop.permute.xlu1 %13421 }
0x43c8   : > { %v13150_v52 = vadd.f32 %v13142_v46, %v13130_v26  ;;  %v13151_v3 = vadd.f32 %v13146_v47, %v13131_v36  ;;  %v13148_v18 = vadd.f32 %v24033_v51, %v13128_v44  ;;  %v13149_v6 = vadd.f32 %v24034_v27, %v13129_v12  ;;  %v13410_v46 = vld [vmem:[%s24040_s30 + $0x10] sm:$0xff] }
0x43ca   : > { %v13154_v5 = vadd.f32 %v13150_v52, %v24035_v38  ;;  %v13155_v40 = vadd.f32 %v13151_v3, %v24036_v59  ;;  %v13152_v33 = vadd.f32 %v13148_v18, %v24037_v8  ;;  %v13153_v23 = vadd.f32 %v13149_v6, %v24038_v48  ;;  %v13430_v36 = vpop.permute.xlu0 %13429  ;;  %v13426_v14 = vpop.permute.xlu1 %13425  ;;  %v14825_v38 = vld [vmem:[%s24040_s30 + $0x28] sm:$0xff]  ;;  %v14827_v59 = vld [vmem:[%s24040_s30 + $0x38] sm:$0xff] }
0x43cb   : > { %v14833_v8 = vld [vmem:[%s23345_s9 + $0x28] sm:$0xff]  ;;  %v14835_v48 = vld [vmem:[%s23345_s9 + $0x38] sm:$0xff] }
0x43cc   : > { %v23143_v34 = vpack.c.bf16 %v13155_v40, %v13154_v5  ;;  %v23145_v29 = vpack.c.bf16 %v13153_v23, %v13152_v33  ;;  %v14826_v5 = vld [vmem:[%s24040_s30 + $0x30] sm:$0xff]  ;;  %v14832_v40 = vld [vmem:[%s23345_s9 + $0x20] sm:$0xff] }
0x43cd   : > { %v14834_v33 = vld [vmem:[%s23345_s9 + $0x30] sm:$0xff]  ;;  %v14840_v23 = vld [vmem:[%s24040_s30 + $0x40] sm:$0xff] }
0x43ce   : > { %18483 = vmatprep.subr.bf16.mxu0 %v23145_v29 }
0x43cf   : > { %18485 = vmatpush3.bf16.msra.mxu0 %v23145_v29 }
0x43d0   : > { %18487 = vmatprep.subr.bf16.mxu0 %v23143_v34 }
0x43d3   : > { %18489 = vmatpush3.bf16.msra.mxu0 %v23143_v34 }
0x43d6   : > { %17484 = vmatmul.mubr.msk.f32.vlgmr.msra.gmra.mrb[228].mxu0 %vm716_vm0, %v13284_v10  ;;  %v13544_v10 = vpop.permute.xlu0 %13543 }
0x43d7   : > { %17486 = vmatprep.mubr.msk.f32.mxu0 %vm716_vm0, %v13285_v22 }
0x43da   : > { %17487 = vmatmul.mubr.msk.f32.gmra.mrb[230].mxu0 %vm716_vm0, %v13286_v31 }
0x43db   : > { %17539 = vmatprep.mubr.msk.f32.mxu0 %vm716_vm0, %v14840_v23 }
0x44a9   : > { %v17485_v42 = vpop.f32.mrb[228].mxu0 }
0x44aa   : > { %v18536_v21 = vadd.f32 %v17485_v42, %v13173_v62  ;;  %v13365_v32 = vpop.f32.mrb[229].mxu0 }
0x44ab   : > { %v18537_v50 = vadd.f32 %v13365_v32, %v13168_v41 }
0x44ac   : > { %v23167_v56 = vadd.f32 %v18536_v21, %v13394_v19 }
0x44ad   : > { %v23169_v17 = vadd.f32 %v18537_v50, %v13390_v2  ;;  %v17488_v25 = vpop.f32.mrb[230].mxu0  ;;  %v13763_v2 = vpop.permute.xlu0 %13762 }
0x44ae   : > { %v13413_v0 = vmax.f32 %v23167_v56, 0.0  ;;  %v18538_v16 = vadd.f32 %v17488_v25, %v13183_v20  ;;  %v13375_v35 = vpop.f32.mrb[231].mxu0  ;;  %v18540_v31 = vadd.f32 %v13544_v10, %v23167_v56 }
0x44af   : > { %v13412_v11 = vmax.f32 %v23169_v17, 0.0  ;;  %v18539_v24 = vadd.f32 %v13375_v35, %v13178_v58 }
0x44b0   : > { %v23173_v28 = vadd.f32 %v18538_v16, %v13402_v1 }
0x44b1   : > { %v23175_v63 = vadd.f32 %v18539_v24, %v13398_v53  ;;  %v18490_v39 = vpack.c.bf16 %v13413_v0, %v13412_v11  ;;  %v13775_v35 = vpop.permute.xlu0 %13774 }
0x44b2   : > { %v13415_v43 = vmax.f32 %v23173_v28, 0.0 }
0x44b3   : > { %v13414_v9 = vmax.f32 %v23175_v63, 0.0  ;;  %18491 = vmatprep.subr.bf16.mxu1 %v18490_v39 }
0x44b4   : > { %18493 = vmatpush3.bf16.msra.mxu1 %v18490_v39 }
0x44b5   : > { %v18494_v7 = vpack.c.bf16 %v13415_v43, %v13414_v9  ;;  %v14841_v43 = vld [vmem:[%s24040_s30 + $0x48] sm:$0xff]  ;;  %v14842_v9 = vld [vmem:[%s24040_s30 + $0x50] sm:$0xff] }
0x44b7   : > { %18495 = vmatprep.subr.bf16.mxu1 %v18494_v7 }
0x44b8   : > { %18497 = vmatpush3.bf16.msra.mxu1 %v18494_v7  ;;  %v14843_v7 = vld [vmem:[%s24040_s30 + $0x58] sm:$0xff] }
0x44bb   : > { %17498 = vmatmul.mubr.msk.f32.vlgmr.msra.gmra.mrb[192].mxu1 %vm716_vm0, %v13409_v57  ;;  %v14848_v57 = vld [vmem:[%s24040_s30 + $0x60] sm:$0xff] }
0x44bc   : > { %17500 = vmatprep.mubr.msk.f32.mxu1 %vm716_vm0, %v13410_v46 }
0x44bf   : > { %17501 = vmatmul.mubr.msk.f32.gmra.mrb[194].mxu1 %vm716_vm0, %v13411_v61 }
0x44c0   : > { %17511 = vmatprep.mubr.msk.f32.mxu1 %vm716_vm0, %v14824_v54  ;;  %v13796_v54 = vpop.permute.xlu0 %13795 }
0x458e   : > { %v17499_v37 = vpop.f32.mrb[192].mxu1 }
0x458f   : > { %v13516_v49 = vadd.f32 %v17499_v37, %v13422_v45  ;;  %v13510_v15 = vpop.f32.mrb[193].mxu1 }
0x4590   : > { %v13511_v47 = vadd.f32 %v13510_v15, %v13418_v60 }
0x4591   : > { %v13535_v26 = vmax.f32 %v13516_v49, 0.0 }
0x4592   : > { %v13534_v13 = vmax.f32 %v13511_v47, 0.0  ;;  %v17502_v44 = vpop.f32.mrb[194].mxu1 }
0x4593   : > { %v13526_v12 = vadd.f32 %v17502_v44, %v13430_v36  ;;  %v13520_v52 = vpop.f32.mrb[195].mxu1 }
0x4594   : > { %v18498_v3 = vpack.c.bf16 %v13535_v26, %v13534_v13  ;;  %v13521_v51 = vadd.f32 %v13520_v52, %v13426_v14 }
0x4595   : > { %v13537_v18 = vmax.f32 %v13526_v12, 0.0 }
0x4596   : > { %v13536_v27 = vmax.f32 %v13521_v51, 0.0  ;;  %18499 = vmatprep.subr.bf16.mxu1 %v18498_v3 }
0x4597   : > { %18501 = vmatpush3.bf16.msra.mxu1 %v18498_v3 }
0x4598   : > { %v18502_v6 = vpack.c.bf16 %v13537_v18, %v13536_v27  ;;  %v14849_v18 = vld [vmem:[%s24040_s30 + $0x68] sm:$0xff]  ;;  %v14850_v27 = vld [vmem:[%s24040_s30 + $0x70] sm:$0xff] }
0x459a   : > { %18503 = vmatprep.subr.bf16.mxu1 %v18502_v6 }
0x459b   : > { %18505 = vmatpush3.bf16.msra.mxu1 %v18502_v6  ;;  %v14851_v6 = vld [vmem:[%s24040_s30 + $0x78] sm:$0xff] }
0x459c   : > { %18507 = vmatprep.subr.bf16.mxu1 %v23145_v29 }
0x459e   : > { %17512 = vmatmul.mubr.msk.f32.vlgmr.msra.gmra.mrb[196].mxu1 %vm716_vm0, %v14825_v38  ;;  %v13914_v38 = vpop.permute.xlu0 %13913 }
0x459f   : > { %18509 = vmatpush3.bf16.msra.mxu1 %v23145_v29  ;;  %17514 = vmatprep.mubr.msk.f32.mxu1 %vm716_vm0, %v14826_v5 }
0x45a0   : > { %18511 = vmatprep.subr.bf16.mxu1 %v23143_v34 }
0x45a2   : > { %17515 = vmatmul.mubr.msk.f32.gmra.mrb[198].mxu1 %vm716_vm0, %v14827_v59 }
0x45a3   : > { %18513 = vmatpush3.bf16.msra.mxu1 %v23143_v34  ;;  %17525 = vmatprep.mubr.msk.f32.mxu1 %vm716_vm0, %v14832_v40  ;;  %v13540_v34 = vpop.permute.xlu1 %13539 }
0x45a4   : > { %18530 = vmatprep.subr.bf16.mxu1 %v23600_v55  ;;  %v18542_v62 = vadd.f32 %v13540_v34, %v23169_v17  ;;  %v13926_v34 = vpop.permute.xlu0 %13925 }
0x45a6   : > { %17526 = vmatmul.mubr.msk.f32.vlgmr.msra.gmra.mrb[196].mxu1 %vm716_vm0, %v14833_v8 }
0x45a7   : > { %17528 = vmatprep.mubr.msk.f32.mxu1 %vm716_vm0, %v14834_v33  ;;  %v13548_v29 = vpop.permute.xlu1 %13547 }
0x45a8   : > { %v18546_v50 = vadd.f32 %v13548_v29, %v23175_v63 }
0x45aa   : > { %17529 = vmatmul.mubr.msk.f32.gmra.mrb[198].mxu1 %vm716_vm0, %v14835_v48 }
0x45ab   : > { %17567 = vmatprep.mubr.msk.f32.mxu1 %vm19245_vm1, %v23606_v4  ;;  %v13552_v22 = vpop.permute.xlu1 %13551 }
0x45ac   : > { %v18544_v42 = vadd.f32 %v13552_v22, %v23173_v28 }
0x45af   : > { %v13767_v20 = vpop.permute.xlu1 %13766 }
0x45b3   : > { %v13771_v11 = vpop.permute.xlu1 %13770 }
0x45b7   : > { %v13792_v46 = vpop.permute.xlu1 %13791 }
0x45bb   : > { %v13800_v61 = vpop.permute.xlu1 %13799 }
0x45bf   : > { %v13804_v36 = vpop.permute.xlu1 %13803 }
0x45c3   : > { %v13918_v5 = vpop.permute.xlu1 %13917 }
0x4679   : > { %v17527_v30 = vpop.f32.mrb[196].mxu1 }
0x467a   : > { %v18541_v58 = vadd.f32 %v18540_v31, %v17527_v30  ;;  %v13738_v41 = vpop.f32.mrb[197].mxu1  ;;  %v13922_v31 = vpop.permute.xlu1 %13921 }
0x467b   : > { %v18543_v4 = vadd.f32 %v18542_v62, %v13738_v41 }
0x467c   : > { %v23237_v19 = vadd.f32 %v18541_v58, %v13767_v20 }
0x467d   : > { %v23239_v21 = vadd.f32 %v18543_v4, %v13763_v2  ;;  %v17530_v32 = vpop.f32.mrb[198].mxu1 }
0x467e   : > { %v13787_v25 = vmax.f32 %v23237_v19, 0.0  ;;  %v18545_v56 = vadd.f32 %v18544_v42, %v17530_v32  ;;  %v13748_v0 = vpop.f32.mrb[199].mxu1  ;;  %v14036_v32 = vpop.permute.xlu1 %14035 }
0x467f   : > { %v13786_v17 = vmax.f32 %v23239_v21, 0.0  ;;  %v18547_v16 = vadd.f32 %v18546_v50, %v13748_v0 }
0x4680   : > { %v23244_v1 = vadd.f32 %v18545_v56, %v13775_v35 }
0x4681   : > { %v23246_v24 = vadd.f32 %v18547_v16, %v13771_v11  ;;  %v18514_v53 = vpack.c.bf16 %v13787_v25, %v13786_v17 }
0x4682   : > { %v13789_v28 = vmax.f32 %v23244_v1, 0.0 }
0x4683   : > { %v13788_v39 = vmax.f32 %v23246_v24, 0.0  ;;  %18515 = vmatprep.subr.bf16.mxu0 %v18514_v53 }
0x4684   : > { %18517 = vmatpush3.bf16.msra.mxu0 %v18514_v53 }
0x4685   : > { %v18518_v63 = vpack.c.bf16 %v13789_v28, %v13788_v39 }
0x4687   : > { %18519 = vmatprep.subr.bf16.mxu0 %v18518_v63 }
0x4688   : > { %18521 = vmatpush3.bf16.msra.mxu0 %v18518_v63 }
0x468b   : > { %17540 = vmatmul.mubr.msk.f32.vlgmr.msra.gmra.mrb[232].mxu0 %vm716_vm0, %v14841_v43 }
0x468c   : > { %17542 = vmatprep.mubr.msk.f32.mxu0 %vm716_vm0, %v14842_v9 }
0x468f   : > { %17543 = vmatmul.mubr.msk.f32.gmra.mrb[234].mxu0 %vm716_vm0, %v14843_v7 }
0x4690   : > { %17553 = vmatprep.mubr.msk.f32.mxu0 %vm716_vm0, %v14848_v57 }
0x475e   : > { %v17541_v60 = vpop.f32.mrb[232].mxu0 }
0x475f   : > { %v13890_v45 = vadd.f32 %v17541_v60, %v13796_v54  ;;  %v13884_v37 = vpop.f32.mrb[233].mxu0 }
0x4760   : > { %v13885_v49 = vadd.f32 %v13884_v37, %v13792_v46 }
0x4761   : > { %v13909_v15 = vmax.f32 %v13890_v45, 0.0 }
0x4762   : > { %v13908_v47 = vmax.f32 %v13885_v49, 0.0  ;;  %v17544_v26 = vpop.f32.mrb[234].mxu0 }
0x4763   : > { %v13900_v13 = vadd.f32 %v17544_v26, %v13804_v36  ;;  %v13894_v44 = vpop.f32.mrb[235].mxu0 }
0x4764   : > { %v18522_v14 = vpack.c.bf16 %v13909_v15, %v13908_v47  ;;  %v13895_v12 = vadd.f32 %v13894_v44, %v13800_v61 }
0x4765   : > { %v13911_v52 = vmax.f32 %v13900_v13, 0.0 }
0x4766   : > { %v13910_v3 = vmax.f32 %v13895_v12, 0.0  ;;  %18523 = vmatprep.subr.bf16.mxu0 %v18522_v14 }
0x4767   : > { %18525 = vmatpush3.bf16.msra.mxu0 %v18522_v14 }
0x4768   : > { %v18526_v51 = vpack.c.bf16 %v13911_v52, %v13910_v3 }
0x476a   : > { %18527 = vmatprep.subr.bf16.mxu0 %v18526_v51 }
0x476b   : > { %18529 = vmatpush3.bf16.msra.mxu0 %v18526_v51 }
0x476e   : > { %17554 = vmatmul.mubr.msk.f32.vlgmr.msra.gmra.mrb[236].mxu0 %vm716_vm0, %v14849_v18 }
0x476f   : > { %17556 = vmatprep.mubr.msk.f32.mxu0 %vm716_vm0, %v14850_v27 }
0x4772   : > { %17557 = vmatmul.mubr.msk.f32.gmra.mrb[238].mxu0 %vm716_vm0, %v14851_v6 }
0x4841   : > { %v17555_v59 = vpop.f32.mrb[236].mxu0 }
0x4842   : > { %v14012_v40 = vadd.f32 %v17555_v59, %v13918_v5  ;;  %v14006_v8 = vpop.f32.mrb[237].mxu0 }
0x4843   : > { %v14007_v33 = vadd.f32 %v14006_v8, %v13914_v38 }
0x4844   : > { %v14026_v48 = vadd.f32 %v14012_v40, %v23237_v19 }
0x4845   : > { %v14025_v23 = vadd.f32 %v14007_v33, %v23239_v21  ;;  %v17558_v29 = vpop.f32.mrb[238].mxu0  ;;  %v14029_v21 = vld [vmem:[%s24041_s14] sm:$0x1] }
0x4846   : > { %v14031_v10 = vmax.f32 %v14026_v48, 0.0  ;;  %v14022_v22 = vadd.f32 %v17558_v29, %v13926_v34  ;;  %v14016_v30 = vpop.f32.mrb[239].mxu0 }
0x4847   : > { %v14030_v62 = vmax.f32 %v14025_v23, 0.0  ;;  %v14017_v2 = vadd.f32 %v14016_v30, %v13922_v31 }
0x4848   : > { %v14028_v58 = vadd.f32 %v14022_v22, %v23244_v1 }
0x4849   : > { %v18531_v41 = vpack.c.bf16 %v14031_v10, %v14030_v62  ;;  %v14027_v20 = vadd.f32 %v14017_v2, %v23246_v24 }
0x484a   : > { %v14033_v4 = vmax.f32 %v14028_v58, 0.0 }
0x484b   : > { %v14032_v42 = vmax.f32 %v14027_v20, 0.0  ;;  %18532 = vmatpush3.bf16.msra.mxu1 %v18531_v41 }
0x484c   : > { %18533 = vmatprep.subr.bf16.mxu1 %v23600_v55 }
0x484d   : > { %v18534_v19 = vpack.c.bf16 %v14033_v4, %v14032_v42 }
0x484f   : > { %18535 = vmatpush3.bf16.msra.mxu1 %v18534_v19 }
0x4852   : > { %17568 = vmatmul.mubr.msk.f32.vlgmr.msra.gmra.mrb[200].mxu1 %vm716_vm0, %v14029_v21 }
0x4925   : > { %v14107_v50 = vpop.f32.mrb[200].mxu1 }
0x4926   : > { %v14108_v25 = vadd.f32 %v14107_v50, %v14036_v32  ;;  %v17569_v56 = vpop.f32.mrb[201].mxu1 }
0x4928   : > { %14111 = vst [vmem:[%s636_s15] sm:$0x1] %v14108_v25 }
0x4929   : > { %19176 = shalt.err (!%p19173_p2)
}
0x492a   : > { %s19177_s11 = scalar_lea.hbm %s23292_s18, 16  ;;  %s19181_s23 = scalar_lea.hbm %s24043_s21, 32 }
0x492b   : > { %p19178_p6 = scmp.ne.s32.totalorder %s23292_s18, %s19177_s11  ;;  %p19182_p4 = scmp.lt.u32.totalorder %s23292_s18, %s24043_s21 }
0x492c   : > { %p19183_p5 = scmp.lt.u32.totalorder %s19181_s23, %s19177_s11  ;;  %p19185_p0 = scmp.lt.u32.totalorder %s19177_s11, %s23292_s18 }
0x492d   : > { %p19179_p12 = pnand %p19178_p6, %p24044_p7 }
0x492e   : > { %p19184_p13 = por %p19183_p5, %p19182_p4 }
0x492f   : > { %p19180_p11 = pneg %p19179_p12 }
0x4930   : > { %p19186_p8 = por %p19185_p0, %p19184_p13 }
0x4932   : > { %p19187_p9 = pnand %p19186_p8, %p19180_p11 }
0x4934   : > { %19190 = shalt.err (!%p19187_p9)
}
0x4935   : > { %18568 = dma.vmem_to_hbm [thread:$0]  (%p24044_p7), %s23294_s24, 16, %s23292_s18, %s14113_s19  }
0x4936 PF: > { %s24045_s20 = sld [smem:[#allocation13_spill]]  ;;  %s24046_s22 = sld [smem:[#allocation17_spill]] }
0x4937   : > { %p24048_p1 = scmp.ge.s32.totalorder %s19233_s28, 2 }
0x493c   : > { %s14137_s29 = sand.u32 1, %s24045_s20   ;;  %p24047_p10 = scmp.ne.s32.totalorder %s24046_s22, 0 }
0x493d   : > { %s14138_s10 = scalar_lea.sflag [#allocation5], %s14137_s29 }
0x493e   : > { %p18578_p3 = pnand %p24048_p1, %p24047_p10 }
0x4940   : > { %19216 = dma.done.wait (!%p18578_p3), %s14138_s10, 16  }
0x4941   : > { %19218 = vsyncadd (!%p18578_p3), %s14138_s10, 4294967280  ;;  %s24049_s28 = sld [smem:[#allocation14_spill]]  ;;  %s24050_s16 = sld [smem:[#allocation15_spill]] }
0x4942   : > { %s24051_s25 = smov %s19225_s26  ;;  %s24052_s26 = smov %s19229_s27 }
0x4947   : > { %p27_p2 = scmp.ge.s32.totalorder %s24049_s28, 4   ;;  %s24053_s27 = smov %s24050_s16 }
0x4949   :  { %29 = sbr.rel (!%p27_p2) target bundleno = 11 (0xb), region = 220 }
0x4950   :  { %14142 = vsyncpa [#allocation4], 1 }
0x4951   :  { %14144 = vsyncpa [#allocation4 + $0x1], 1 }
0x4952   :  { %14145 = vsyncpa [#allocation7], 1 }
0x4953   :  { %14146 = vsyncpa [#allocation5], 1 }
0x4954   :  { %14148 = vsyncpa [#allocation5 + $0x1], 1 }

</bundles_post_ra>
